<compile_context>
chip_gen: v6e
topology: v6e:2x2x1
jax: 0.10.0
libtpu: 0.0.40
codegen_flags: <defaults>
</compile_context>

<pallas_src>
import functools

import jax
import jax.numpy as jnp
from jax import lax
from jax.experimental import pallas as pl
from jax.experimental.pallas import tpu as pltpu

EPS = 1e-5
NEG_SLOPE = 0.01   # F.leaky_relu_ default
LANE = 128


def _leaky(x):
    return jnp.where(x >= 0, x, NEG_SLOPE * x)


def _round_up(v, m):
    return (v + m - 1) // m * m


# --------------------------- in-kernel helpers -------------------------------


def _sum_sq(v2d):
    """v2d: (R, C) f32 -> ((1, C) sum, (1, C) sum of squares).  No stacked temp."""
    return (jnp.sum(v2d, axis=0, keepdims=True),
            jnp.sum(v2d * v2d, axis=0, keepdims=True))


def _conv3x3_rows(a, w_ref, r0, th):
    """3x3 'same' conv for output rows [r0, r0+th) of a full-image activation.

    a:      (H, W, Ci) value, already cast to the matmul dtype
    w_ref:  (9*Ci, Co) weight ref, rows ordered (ky, kx, ci)
    r0, th: static Python ints
    returns (th, W, Co) f32
    """
    H, W, Ci = a.shape
    Co = w_ref.shape[-1]
    zrow = jnp.zeros((1, W, Ci), a.dtype)

    lo, hi = max(r0 - 1, 0), min(r0 + th + 1, H)
    rows_pad = a[lo:hi]
    if r0 == 0:
        rows_pad = jnp.concatenate([zrow, rows_pad], axis=0)
    if r0 + th == H:
        rows_pad = jnp.concatenate([rows_pad, zrow], axis=0)     # (th+2, W, Ci)

    col = lax.broadcasted_iota(jnp.int32, (th, W, Ci), 1)
    left_ok = col >= 1           # neighbour w-1 exists
    right_ok = col <= W - 2      # neighbour w+1 exists
    zero = jnp.zeros((th, W, Ci), a.dtype)

    acc = None
    for ky in range(3):          # 3 accumulated matmuls, K = 3*Ci each (f32 acc)
        rows = rows_pad[ky:ky + th]
        left = jnp.where(left_ok, pltpu.roll(rows, shift=1, axis=1), zero)
        right = jnp.where(right_ok, pltpu.roll(rows, shift=W - 1, axis=1), zero)
        patches = jnp.concatenate([left, rows, right], axis=2).reshape(th * W, 3 * Ci)
        part = jnp.dot(patches, w_ref[pl.ds(3 * Ci * ky, 3 * Ci), :],
                       preferred_element_type=jnp.float32)
        acc = part if acc is None else acc + part
    return acc.reshape(th, W, Co)


# --------------------------- kernels ------------------------------------------


def bn_stats_kernel(x_ref, st_ref):
    """Pass 1 of BN1: per-sample (sum, sumsq) over (H, W)."""
    _, H, W, Ci = x_ref.shape
    x = x_ref[0].astype(jnp.float32).reshape(H * W, Ci)
    s, sq = _sum_sq(x)
    st_ref[0] = jnp.concatenate([s, sq], axis=0)


def stage1_kernel(pin_ref, x_ref, w1_ref, h1_ref, st2_ref, *, row_chunk):
    """a1 = leaky(bn1(x)); h1 = conv1(a1); emit per-sample (sum, sumsq) of h1."""
    _, H, W, Ci = x_ref.shape
    Co = h1_ref.shape[-1]
    mm_dtype = w1_ref.dtype

    pin = pin_ref[...]                                  # (2, Ci) = [scale, shift]
    a1 = _leaky(x_ref[0].astype(jnp.float32) * pin[0] + pin[1]).astype(mm_dtype)

    s = jnp.zeros((1, Co), jnp.float32)
    sq = jnp.zeros((1, Co), jnp.float32)
    for r0 in range(0, H, row_chunk):                    # static row chunks
        th = min(row_chunk, H - r0)
        h1c = _conv3x3_rows(a1, w1_ref, r0, th).astype(h1_ref.dtype)
        h1_ref[0, pl.ds(r0, th)] = h1c
        # BN2 stats from the stored (rounded) h1 so normalization is consistent.
        hf = h1c.astype(jnp.float32).reshape(th * W, Co)
        cs, csq = _sum_sq(hf)
        s, sq = s + cs, sq + csq
    st2_ref[0] = jnp.concatenate([s, sq], axis=0)


def stage2_kernel(pout_ref, x_ref, h1_ref, w2_ref, wsc_ref,
                  latent_ref, pooled_ref, *, row_chunk):
    """a2 = leaky(bn2(h1)); latent = shortcut(x) + conv2(a2); pooled = avgpool2."""
    _, H, W, Ci = x_ref.shape
    Co = latent_ref.shape[-1]
    H2, W2 = H // 2, W // 2
    mm_dtype = w2_ref.dtype

    pout = pout_ref[...]                                 # (3, Co) = [scale, shift, bsc]
    a2 = _leaky(h1_ref[0].astype(jnp.float32) * pout[0] + pout[1]).astype(mm_dtype)
    xs = x_ref[0].astype(wsc_ref.dtype)                  # (H, W, Ci)
    wsc = wsc_ref[...]

    for r0 in range(0, H, row_chunk):                    # static row chunks
        th = min(row_chunk, H - r0)
        h2c = _conv3x3_rows(a2, w2_ref, r0, th)          # (th, W, Co) f32
        scc = jnp.dot(xs[r0:r0 + th].reshape(th * W, Ci), wsc,
                      preferred_element_type=jnp.float32).reshape(th, W, Co)
        latent_ref[0, pl.ds(r0, th)] = h2c + scc + pout[2]

    # 2x2 average pool: stride-2 reads of the freshly written latent block on
    # the W axis, leading-dim reshape on the H axis.  No scratch buffers.
    even = latent_ref[:, :, pl.ds(0, W2, 2), :]          # (1, H, W2, Co)
    odd = latent_ref[:, :, pl.ds(1, W2, 2), :]
    ws = (even + odd).reshape(H2, 2, W2, Co)
    pooled_ref[0] = 0.25 * (ws[:, 0] + ws[:, 1])


# --------------------------- wrapper -------------------------------------------


def _bn_scale_shift(stats, gamma, beta, count):
    """stats: (N, 2, C) per-sample [sum, sumsq]; returns packed (2, C) [scale, shift]."""
    tot = jnp.sum(stats, axis=0)                         # (2, C)
    mean = tot[0] / count
    var = jnp.maximum(tot[1] / count - mean * mean, 0.0)  # biased batch variance
    scale = gamma * lax.rsqrt(var + EPS)
    shift = beta - mean * scale
    return jnp.stack([scale, shift], axis=0)


def _vmem_limit_bytes():
    """7/8 of physical VMEM (v5e/v6e ~112 MiB, v7x ~56 MiB), with a safe fallback."""
    try:
        cap = int(getattr(pltpu.get_tpu_info(), "vmem_capacity_bytes", 64 << 20))
    except Exception:
        cap = 64 << 20
    return int(min(max(cap * 7 // 8, 32 << 20), 112 << 20))


@functools.partial(jax.jit, static_argnames=("matmul_dtype", "row_chunk"))
def encoder_block_forward(x_nchw, params, *, matmul_dtype=jnp.bfloat16, row_chunk=32):
    """x_nchw: (N, Cin, H, W) float32 (PyTorch layout). Returns (output, latent) NCHW."""
    N, Cin, H, W = x_nchw.shape
    Cout = params["w1"].shape[0]
    assert H % 2 == 0 and W % 2 == 0, "avg_pool2d(kernel=2) needs even H and W"
    H2, W2 = H // 2, W // 2
    Ci = _round_up(Cin, LANE)      # lane-dense padded channel counts
    Co = _round_up(Cout, LANE)
    f32 = jnp.float32

    # NHWC + zero-pad channels to a lane multiple (lane-dense loads/stores).
    # TODO(synk): when chaining blocks inside the full UNet, keep activations in
    # padded NHWC between blocks and emit the next block's BN1 stats from this
    # block's stage2 to drop the per-block transpose/pad and the x re-read pass.
    x = jnp.transpose(x_nchw, (0, 2, 3, 1)).astype(f32)
    x = jnp.pad(x, ((0, 0), (0, 0), (0, 0), (0, Ci - Cin)))

    def pad1(a, n):
        return jnp.pad(a.astype(f32), (0, n - a.shape[0]))

    # Conv weights: OIHW -> HWIO -> zero-pad channels -> (9*C_in, C_out), rows
    # ordered (ky, kx, ci) to match the in-kernel tap order.
    w1 = jnp.transpose(params["w1"], (2, 3, 1, 0))
    w1 = jnp.pad(w1, ((0, 0), (0, 0), (0, Ci - Cin), (0, Co - Cout)))
    w1 = w1.reshape(9 * Ci, Co).astype(matmul_dtype)
    w2 = jnp.transpose(params["w2"], (2, 3, 1, 0))
    w2 = jnp.pad(w2, ((0, 0), (0, 0), (0, Co - Cout), (0, Co - Cout)))
    w2 = w2.reshape(9 * Co, Co).astype(matmul_dtype)
    wsc = jnp.pad(params["wsc"].reshape(Cout, Cin).T,
                  ((0, Ci - Cin), (0, Co - Cout))).astype(matmul_dtype)

    count = float(N * H * W)
    rc = int(min(row_chunk, H))
    cparams = pltpu.CompilerParams(dimension_semantics=("parallel",),
                                   vmem_limit_bytes=_vmem_limit_bytes())

    # Pass 1: per-sample BN1 partial statistics (sum, sumsq) over (H, W).
    stats1 = pl.pallas_call(
        bn_stats_kernel,
        grid=(N,),
        in_specs=[pl.BlockSpec((1, H, W, Ci), lambda n: (n, 0, 0, 0))],
        out_specs=pl.BlockSpec((1, 2, Ci), lambda n: (n, 0, 0)),
        out_shape=jax.ShapeDtypeStruct((N, 2, Ci), f32),
        compiler_params=cparams,
    )(x)

    # BN1 scale/shift reduced in the wrapper (tiny) and broadcast to the kernel.
    pin = _bn_scale_shift(stats1, pad1(params["g1"], Ci), pad1(params["b1"], Ci), count)

    # Pass 2: BN1 + leaky + conv1 (3 accumulated K=3*Ci matmuls) + BN2 partials.
    h1, stats2 = pl.pallas_call(
        functools.partial(stage1_kernel, row_chunk=rc),
        grid=(N,),
        in_specs=[
            pl.BlockSpec((2, Ci), lambda n: (0, 0)),
            pl.BlockSpec((1, H, W, Ci), lambda n: (n, 0, 0, 0)),
            pl.BlockSpec((9 * Ci, Co), lambda n: (0, 0)),
        ],
        out_specs=(
            pl.BlockSpec((1, H, W, Co), lambda n: (n, 0, 0, 0)),
            pl.BlockSpec((1, 2, Co), lambda n: (n, 0, 0)),
        ),
        out_shape=(jax.ShapeDtypeStruct((N, H, W, Co), matmul_dtype),
                   jax.ShapeDtypeStruct((N, 2, Co), f32)),
        compiler_params=cparams,
    )(pin, x, w1)

    ss2 = _bn_scale_shift(stats2, pad1(params["g2"], Co), pad1(params["b2"], Co), count)
    pout = jnp.concatenate([ss2, pad1(params["bsc"], Co)[None, :]], axis=0)   # (3, Co)

    # Pass 3: BN2 + leaky + conv2 + shortcut + residual + 2x2 average pool.
    latent_p, pooled_p = pl.pallas_call(
        functools.partial(stage2_kernel, row_chunk=rc),
        grid=(N,),
        in_specs=[
            pl.BlockSpec((3, Co), lambda n: (0, 0)),
            pl.BlockSpec((1, H, W, Ci), lambda n: (n, 0, 0, 0)),
            pl.BlockSpec((1, H, W, Co), lambda n: (n, 0, 0, 0)),
            pl.BlockSpec((9 * Co, Co), lambda n: (0, 0)),
            pl.BlockSpec((Ci, Co), lambda n: (0, 0)),
        ],
        out_specs=(
            pl.BlockSpec((1, H, W, Co), lambda n: (n, 0, 0, 0)),
            pl.BlockSpec((1, H2, W2, Co), lambda n: (n, 0, 0, 0)),
        ),
        out_shape=(jax.ShapeDtypeStruct((N, H, W, Co), f32),
                   jax.ShapeDtypeStruct((N, H2, W2, Co), f32)),
        compiler_params=cparams,
    )(pout, x, h1, w2, wsc)

    # Strip channel padding, back to the PyTorch NCHW convention.
    latent = jnp.transpose(latent_p[..., :Cout], (0, 3, 1, 2))
    pooled = jnp.transpose(pooled_p[..., :Cout], (0, 3, 1, 2))
    return pooled, latent
    # TODO(synk): BatchNorm running_mean/running_var buffer updates (training
    # bookkeeping, not part of the returned forward value) are not replicated.


# --------------------------- pure-JAX reference --------------------------------


def reference_forward(x_nchw, params):
    """Pure-JAX reference (NCHW, f32), mirrors the PyTorch forward."""
    x = x_nchw.astype(jnp.float32)

    def bn(y, g, b):
        m = jnp.mean(y, axis=(0, 2, 3), keepdims=True)
        v = jnp.mean((y - m) ** 2, axis=(0, 2, 3), keepdims=True)
        return (y - m) / jnp.sqrt(v + EPS) * g.reshape(1, -1, 1, 1) + b.reshape(1, -1, 1, 1)

    def conv3x3(y, w):
        return lax.conv_general_dilated(y, w, (1, 1), [(1, 1), (1, 1)],
                                        dimension_numbers=("NCHW", "OIHW", "NCHW"))

    a1 = _leaky(bn(x, params["g1"], params["b1"]))
    h1 = conv3x3(a1, params["w1"])
    a2 = _leaky(bn(h1, params["g2"], params["b2"]))
    h2 = conv3x3(a2, params["w2"])
    sc = lax.conv_general_dilated(x, params["wsc"], (1, 1), [(0, 0), (0, 0)],
                                  dimension_numbers=("NCHW", "OIHW", "NCHW"))
    latent = sc + params["bsc"].reshape(1, -1, 1, 1) + h2
    N, C, H, W = latent.shape
    pooled = jnp.mean(latent.reshape(N, C, H // 2, 2, W // 2, 2), axis=(3, 5))
    return pooled, latent


if __name__ == "__main__":
    key = jax.random.PRNGKey(0)
    N, Cin, Cout, H, W = 2, 4, 8, 16, 16
    keys = jax.random.split(key, 8)

    x = jax.random.normal(keys[0], (N, Cin, H, W), jnp.float32)
    params = dict(
        g1=1.0 + 0.1 * jax.random.normal(keys[1], (Cin,), jnp.float32),
        b1=0.1 * jax.random.normal(keys[2], (Cin,), jnp.float32),
        w1=0.1 * jax.random.normal(keys[3], (Cout, Cin, 3, 3), jnp.float32),
        g2=1.0 + 0.1 * jax.random.normal(keys[4], (Cout,), jnp.float32),
        b2=0.1 * jax.random.normal(keys[5], (Cout,), jnp.float32),
        w2=0.1 * jax.random.normal(keys[6], (Cout, Cout, 3, 3), jnp.float32),
        wsc=0.1 * jax.random.normal(keys[7], (Cout, Cin, 1, 1), jnp.float32),
        bsc=0.05 * jnp.arange(Cout, dtype=jnp.float32),
    )

    ref_pooled, ref_latent = reference_forward(x, params)

    # Exact-semantics check: f32 matmul operands, exercising the multi-row-chunk path.
    pooled32, latent32 = jax.block_until_ready(
        encoder_block_forward(x, params, matmul_dtype=jnp.float32, row_chunk=8))
    assert pooled32.shape == (N, Cout, H // 2, W // 2)
    assert latent32.shape == (N, Cout, H, W)
    assert jnp.allclose(latent32, ref_latent, atol=2e-3, rtol=2e-3)
    assert jnp.allclose(pooled32, ref_pooled, atol=2e-3, rtol=2e-3)

    # Perf path (v5e/v6e/v7x): bf16 MXU operands, bf16 h1 staging tensor, f32
    # accumulation and f32 BN statistics.  Tolerance only covers bf16 rounding.
    pooled16, latent16 = jax.block_until_ready(
        encoder_block_forward(x, params, matmul_dtype=jnp.bfloat16))
    assert jnp.allclose(latent16, ref_latent, atol=5e-2, rtol=5e-2)
    assert jnp.allclose(pooled16, ref_pooled, atol=5e-2, rtol=5e-2)

    print("KERNEL_OK")
</pallas_src>

<mosaic_0001>
module attributes {stable_mosaic.version = 11 : i64} {
  func.func @bn_stats_kernel(%arg0: i32, %arg1: memref<1x16x16x128xf32, #tpu.memory_space<vmem>>, %arg2: memref<1x2x128xf32, #tpu.memory_space<vmem>>) attributes {dimension_semantics = [#tpu.dimension_semantics<parallel>], iteration_bounds = array<i64: 2>, scalar_prefetch = 0 : i64, scratch_operands = 0 : i64, tpu.core_type = #tpu.core_type<tc>, window_params = [{transform_indices = @transform_0, window_bounds = array<i64: 1, 16, 16, 128>}, {transform_indices = @transform_1, window_bounds = array<i64: 1, 2, 128>}]} {
    %c0 = arith.constant 0 : index
    %c0_0 = arith.constant 0 : index
    %c0_1 = arith.constant 0 : index
    %c0_2 = arith.constant 0 : index
    %0 = vector.load %arg1[%c0, %c0_0, %c0_1, %c0_2] : memref<1x16x16x128xf32, #tpu.memory_space<vmem>>, vector<1x16x16x128xf32>
    %1 = vector.shape_cast %0 : vector<1x16x16x128xf32> to vector<16x16x128xf32>
    %2 = vector.shape_cast %1 : vector<16x16x128xf32> to vector<256x128xf32>
    %cst = arith.constant dense<0.000000e+00> : vector<128xf32>
    %3 = vector.multi_reduction <add>, %2, %cst [0] : vector<256x128xf32> to vector<128xf32>
    %4 = vector.shape_cast %3 : vector<128xf32> to vector<1x128xf32>
    %5 = arith.mulf %2, %2 : vector<256x128xf32>
    %cst_3 = arith.constant dense<0.000000e+00> : vector<128xf32>
    %6 = vector.multi_reduction <add>, %5, %cst_3 [0] : vector<256x128xf32> to vector<128xf32>
    %7 = vector.shape_cast %6 : vector<128xf32> to vector<1x128xf32>
    %8 = tpu.concatenate %4, %7 in 0 : vector<1x128xf32>, vector<1x128xf32> -> vector<2x128xf32>
    %c0_4 = arith.constant 0 : index
    %c0_5 = arith.constant 0 : index
    %c0_6 = arith.constant 0 : index
    %9 = vector.load %arg2[%c0_4, %c0_5, %c0_6] : memref<1x2x128xf32, #tpu.memory_space<vmem>>, vector<1x2x128xf32>
    %10 = vector.shape_cast %9 : vector<1x2x128xf32> to vector<2x128xf32>
    %11 = vector.shape_cast %8 : vector<2x128xf32> to vector<1x2x128xf32>
    tpu.vector_store %arg2[%c0_4, %c0_5, %c0_6], %11 {strides = array<i32>} : memref<1x2x128xf32, #tpu.memory_space<vmem>>, vector<1x2x128xf32>,
    return
  }
  func.func @transform_0(%arg0: i32) -> (i32, i32, i32, i32) {
    %c0_i32 = arith.constant 0 : i32
    %c0_i32_0 = arith.constant 0 : i32
    %c0_i32_1 = arith.constant 0 : i32
    %c0_i32_2 = arith.constant 0 : i32
    return %arg0, %c0_i32, %c0_i32_0, %c0_i32_1 : i32, i32, i32, i32
  }
  func.func @transform_1(%arg0: i32) -> (i32, i32, i32) {
    %c0_i32 = arith.constant 0 : i32
    %c0_i32_0 = arith.constant 0 : i32
    %c0_i32_1 = arith.constant 0 : i32
    return %arg0, %c0_i32, %c0_i32_0 : i32, i32, i32
  }
}

module attributes {stable_mosaic.version = 11 : i64} {
  func.func @stage1_kernel(%arg0: i32, %arg1: memref<2x128xf32, #tpu.memory_space<vmem>>, %arg2: memref<1x16x16x128xf32, #tpu.memory_space<vmem>>, %arg3: memref<1152x128xf32, #tpu.memory_space<vmem>>, %arg4: memref<1x16x16x128xf32, #tpu.memory_space<vmem>>, %arg5: memref<1x2x128xf32, #tpu.memory_space<vmem>>) attributes {dimension_semantics = [#tpu.dimension_semantics<parallel>], iteration_bounds = array<i64: 2>, scalar_prefetch = 0 : i64, scratch_operands = 0 : i64, tpu.core_type = #tpu.core_type<tc>, window_params = [{pipeline_mode = #tpu.pipeline_mode<synchronous>, transform_indices = @transform_0, window_bounds = array<i64: 2, 128>}, {transform_indices = @transform_1, window_bounds = array<i64: 1, 16, 16, 128>}, {pipeline_mode = #tpu.pipeline_mode<synchronous>, transform_indices = @transform_2, window_bounds = array<i64: 1152, 128>}, {transform_indices = @transform_3, window_bounds = array<i64: 1, 16, 16, 128>}, {transform_indices = @transform_4, window_bounds = array<i64: 1, 2, 128>}]} {
    %c0 = arith.constant 0 : index
    %c0_0 = arith.constant 0 : index
    %0 = vector.load %arg1[%c0, %c0_0] : memref<2x128xf32, #tpu.memory_space<vmem>>, vector<2x128xf32>
    %c0_1 = arith.constant 0 : index
    %c0_2 = arith.constant 0 : index
    %c0_3 = arith.constant 0 : index
    %c0_4 = arith.constant 0 : index
    %1 = vector.load %arg2[%c0_1, %c0_2, %c0_3, %c0_4] : memref<1x16x16x128xf32, #tpu.memory_space<vmem>>, vector<1x16x16x128xf32>
    %2 = vector.shape_cast %1 : vector<1x16x16x128xf32> to vector<16x16x128xf32>
    %3 = vector.extract_strided_slice %0 {offsets = [0, 0], sizes = [1, 128], strides = [1, 1]} : vector<2x128xf32> to vector<1x128xf32>
    %4 = vector.shape_cast %3 : vector<1x128xf32> to vector<128xf32>
    %5 = vector.shape_cast %4 : vector<128xf32> to vector<1x1x128xf32>
    %6 = vector.broadcast %5 : vector<1x1x128xf32> to vector<16x16x128xf32>
    %7 = arith.mulf %2, %6 : vector<16x16x128xf32>
    %8 = vector.extract_strided_slice %0 {offsets = [1, 0], sizes = [1, 128], strides = [1, 1]} : vector<2x128xf32> to vector<1x128xf32>
    %9 = vector.shape_cast %8 : vector<1x128xf32> to vector<128xf32>
    %10 = vector.shape_cast %9 : vector<128xf32> to vector<1x1x128xf32>
    %11 = vector.broadcast %10 : vector<1x1x128xf32> to vector<16x16x128xf32>
    %12 = arith.addf %7, %11 : vector<16x16x128xf32>
    %cst = arith.constant 0.000000e+00 : f32
    %13 = vector.broadcast %cst : f32 to vector<16x16x128xf32>
    %14 = arith.cmpf oge, %12, %13 : vector<16x16x128xf32>
    %cst_5 = arith.constant 0.00999999977 : f32
    %15 = vector.broadcast %cst_5 : f32 to vector<16x16x128xf32>
    %16 = arith.mulf %15, %12 : vector<16x16x128xf32>
    %17 = arith.select %14, %12, %16 : vector<16x16x128xi1>, vector<16x16x128xf32>
    %cst_6 = arith.constant 0.000000e+00 : f32
    %18 = vector.broadcast %cst_6 : f32 to vector<1x128xf32>
    %cst_7 = arith.constant 0.000000e+00 : f32
    %19 = vector.broadcast %cst_7 : f32 to vector<1x128xf32>
    %cst_8 = arith.constant 0.000000e+00 : f32
    %20 = vector.broadcast %cst_8 : f32 to vector<1x16x128xf32>
    %21 = vector.extract_strided_slice %17 {offsets = [0, 0, 0], sizes = [9, 16, 128], strides = [1, 1, 1]} : vector<16x16x128xf32> to vector<9x16x128xf32>
    %22 = tpu.concatenate %20, %21 in 0 : vector<1x16x128xf32>, vector<9x16x128xf32> -> vector<10x16x128xf32>
    %23 = tpu.iota {dimensions = array<i32: 1>} : vector<8x16x128xi32>
    %c1_i32 = arith.constant 1 : i32
    %24 = vector.broadcast %c1_i32 : i32 to vector<8x16x128xi32>
    %25 = arith.cmpi sge, %23, %24 : vector<8x16x128xi32>
    %c14_i32 = arith.constant 14 : i32
    %26 = vector.broadcast %c14_i32 : i32 to vector<8x16x128xi32>
    %27 = arith.cmpi sle, %23, %26 : vector<8x16x128xi32>
    %cst_9 = arith.constant 0.000000e+00 : f32
    %28 = vector.broadcast %cst_9 : f32 to vector<8x16x128xf32>
    %29 = vector.extract_strided_slice %22 {offsets = [0, 0, 0], sizes = [8, 16, 128], strides = [1, 1, 1]} : vector<10x16x128xf32> to vector<8x16x128xf32>
    %c1_i32_10 = arith.constant 1 : i32
    %30 = tpu.dynamic_rotate %29 by %c1_i32_10 dim 1 : vector<8x16x128xf32>, i32 -> vector<8x16x128xf32>
    %31 = arith.select %25, %30, %28 : vector<8x16x128xi1>, vector<8x16x128xf32>
    %c15_i32 = arith.constant 15 : i32
    %32 = tpu.dynamic_rotate %29 by %c15_i32 dim 1 : vector<8x16x128xf32>, i32 -> vector<8x16x128xf32>
    %33 = arith.select %27, %32, %28 : vector<8x16x128xi1>, vector<8x16x128xf32>
    %34 = tpu.concatenate %31, %29, %33 in 2 : vector<8x16x128xf32>, vector<8x16x128xf32>, vector<8x16x128xf32> -> vector<8x16x384xf32>
    %35 = vector.shape_cast %34 : vector<8x16x384xf32> to vector<128x384xf32>
    %c0_11 = arith.constant 0 : index
    %c0_12 = arith.constant 0 : index
    %36 = vector.load %arg3[%c0_11, %c0_12] : memref<1152x128xf32, #tpu.memory_space<vmem>>, vector<384x128xf32>
    %cst_13 = arith.constant dense<0.000000e+00> : vector<128x128xf32>
    %37 = tpu.matmul %35, %36, %cst_13 {dimension_numbers = #tpu.dot_dimension_numbers<[1], [0], [0], [1], [0, 0, 1, 1], [], []>} : vector<128x384xf32>, vector<384x128xf32>, vector<128x128xf32> -> vector<128x128xf32>
    %38 = vector.extract_strided_slice %22 {offsets = [1, 0, 0], sizes = [8, 16, 128], strides = [1, 1, 1]} : vector<10x16x128xf32> to vector<8x16x128xf32>
    %c1_i32_14 = arith.constant 1 : i32
    %39 = tpu.dynamic_rotate %38 by %c1_i32_14 dim 1 : vector<8x16x128xf32>, i32 -> vector<8x16x128xf32>
    %40 = arith.select %25, %39, %28 : vector<8x16x128xi1>, vector<8x16x128xf32>
    %c15_i32_15 = arith.constant 15 : i32
    %41 = tpu.dynamic_rotate %38 by %c15_i32_15 dim 1 : vector<8x16x128xf32>, i32 -> vector<8x16x128xf32>
    %42 = arith.select %27, %41, %28 : vector<8x16x128xi1>, vector<8x16x128xf32>
    %43 = tpu.concatenate %40, %38, %42 in 2 : vector<8x16x128xf32>, vector<8x16x128xf32>, vector<8x16x128xf32> -> vector<8x16x384xf32>
    %44 = vector.shape_cast %43 : vector<8x16x384xf32> to vector<128x384xf32>
    %c384 = arith.constant 384 : index
    %c0_16 = arith.constant 0 : index
    %45 = vector.load %arg3[%c384, %c0_16] : memref<1152x128xf32, #tpu.memory_space<vmem>>, vector<384x128xf32>
    %cst_17 = arith.constant dense<0.000000e+00> : vector<128x128xf32>
    %46 = tpu.matmul %44, %45, %cst_17 {dimension_numbers = #tpu.dot_dimension_numbers<[1], [0], [0], [1], [0, 0, 1, 1], [], []>} : vector<128x384xf32>, vector<384x128xf32>, vector<128x128xf32> -> vector<128x128xf32>
    %47 = arith.addf %37, %46 : vector<128x128xf32>
    %48 = vector.extract_strided_slice %22 {offsets = [2, 0, 0], sizes = [8, 16, 128], strides = [1, 1, 1]} : vector<10x16x128xf32> to vector<8x16x128xf32>
    %c1_i32_18 = arith.constant 1 : i32
    %49 = tpu.dynamic_rotate %48 by %c1_i32_18 dim 1 : vector<8x16x128xf32>, i32 -> vector<8x16x128xf32>
    %50 = arith.select %25, %49, %28 : vector<8x16x128xi1>, vector<8x16x128xf32>
    %c15_i32_19 = arith.constant 15 : i32
    %51 = tpu.dynamic_rotate %48 by %c15_i32_19 dim 1 : vector<8x16x128xf32>, i32 -> vector<8x16x128xf32>
    %52 = arith.select %27, %51, %28 : vector<8x16x128xi1>, vector<8x16x128xf32>
    %53 = tpu.concatenate %50, %48, %52 in 2 : vector<8x16x128xf32>, vector<8x16x128xf32>, vector<8x16x128xf32> -> vector<8x16x384xf32>
    %54 = vector.shape_cast %53 : vector<8x16x384xf32> to vector<128x384xf32>
    %c768 = arith.constant 768 : index
    %c0_20 = arith.constant 0 : index
    %55 = vector.load %arg3[%c768, %c0_20] : memref<1152x128xf32, #tpu.memory_space<vmem>>, vector<384x128xf32>
    %cst_21 = arith.constant dense<0.000000e+00> : vector<128x128xf32>
    %56 = tpu.matmul %54, %55, %cst_21 {dimension_numbers = #tpu.dot_dimension_numbers<[1], [0], [0], [1], [0, 0, 1, 1], [], []>} : vector<128x384xf32>, vector<384x128xf32>, vector<128x128xf32> -> vector<128x128xf32>
    %57 = arith.addf %47, %56 : vector<128x128xf32>
    %58 = vector.shape_cast %57 : vector<128x128xf32> to vector<8x16x128xf32>
    %c0_22 = arith.constant 0 : index
    %c0_23 = arith.constant 0 : index
    %c0_24 = arith.constant 0 : index
    %c0_25 = arith.constant 0 : index
    %59 = vector.load %arg4[%c0_22, %c0_23, %c0_24, %c0_25] : memref<1x16x16x128xf32, #tpu.memory_space<vmem>>, vector<1x8x16x128xf32>
    %60 = vector.shape_cast %59 : vector<1x8x16x128xf32> to vector<8x16x128xf32>
    %61 = vector.shape_cast %58 : vector<8x16x128xf32> to vector<1x8x16x128xf32>
    tpu.vector_store %arg4[%c0_22, %c0_23, %c0_24, %c0_25], %61 {strides = array<i32>} : memref<1x16x16x128xf32, #tpu.memory_space<vmem>>, vector<1x8x16x128xf32>,
    %62 = vector.shape_cast %58 : vector<8x16x128xf32> to vector<128x128xf32>
    %cst_26 = arith.constant dense<0.000000e+00> : vector<128xf32>
    %63 = vector.multi_reduction <add>, %62, %cst_26 [0] : vector<128x128xf32> to vector<128xf32>
    %64 = vector.shape_cast %63 : vector<128xf32> to vector<1x128xf32>
    %65 = arith.mulf %62, %62 : vector<128x128xf32>
    %cst_27 = arith.constant dense<0.000000e+00> : vector<128xf32>
    %66 = vector.multi_reduction <add>, %65, %cst_27 [0] : vector<128x128xf32> to vector<128xf32>
    %67 = vector.shape_cast %66 : vector<128xf32> to vector<1x128xf32>
    %68 = arith.addf %18, %64 : vector<1x128xf32>
    %69 = arith.addf %19, %67 : vector<1x128xf32>
    %cst_28 = arith.constant 0.000000e+00 : f32
    %70 = vector.broadcast %cst_28 : f32 to vector<1x16x128xf32>
    %71 = vector.extract_strided_slice %17 {offsets = [7, 0, 0], sizes = [9, 16, 128], strides = [1, 1, 1]} : vector<16x16x128xf32> to vector<9x16x128xf32>
    %72 = tpu.concatenate %71, %70 in 0 : vector<9x16x128xf32>, vector<1x16x128xf32> -> vector<10x16x128xf32>
    %73 = tpu.iota {dimensions = array<i32: 1>} : vector<8x16x128xi32>
    %c1_i32_29 = arith.constant 1 : i32
    %74 = vector.broadcast %c1_i32_29 : i32 to vector<8x16x128xi32>
    %75 = arith.cmpi sge, %73, %74 : vector<8x16x128xi32>
    %c14_i32_30 = arith.constant 14 : i32
    %76 = vector.broadcast %c14_i32_30 : i32 to vector<8x16x128xi32>
    %77 = arith.cmpi sle, %73, %76 : vector<8x16x128xi32>
    %cst_31 = arith.constant 0.000000e+00 : f32
    %78 = vector.broadcast %cst_31 : f32 to vector<8x16x128xf32>
    %79 = vector.extract_strided_slice %72 {offsets = [0, 0, 0], sizes = [8, 16, 128], strides = [1, 1, 1]} : vector<10x16x128xf32> to vector<8x16x128xf32>
    %c1_i32_32 = arith.constant 1 : i32
    %80 = tpu.dynamic_rotate %79 by %c1_i32_32 dim 1 : vector<8x16x128xf32>, i32 -> vector<8x16x128xf32>
    %81 = arith.select %75, %80, %78 : vector<8x16x128xi1>, vector<8x16x128xf32>
    %c15_i32_33 = arith.constant 15 : i32
    %82 = tpu.dynamic_rotate %79 by %c15_i32_33 dim 1 : vector<8x16x128xf32>, i32 -> vector<8x16x128xf32>
    %83 = arith.select %77, %82, %78 : vector<8x16x128xi1>, vector<8x16x128xf32>
    %84 = tpu.concatenate %81, %79, %83 in 2 : vector<8x16x128xf32>, vector<8x16x128xf32>, vector<8x16x128xf32> -> vector<8x16x384xf32>
    %85 = vector.shape_cast %84 : vector<8x16x384xf32> to vector<128x384xf32>
    %c0_34 = arith.constant 0 : index
    %c0_35 = arith.constant 0 : index
    %86 = vector.load %arg3[%c0_34, %c0_35] : memref<1152x128xf32, #tpu.memory_space<vmem>>, vector<384x128xf32>
    %cst_36 = arith.constant dense<0.000000e+00> : vector<128x128xf32>
    %87 = tpu.matmul %85, %86, %cst_36 {dimension_numbers = #tpu.dot_dimension_numbers<[1], [0], [0], [1], [0, 0, 1, 1], [], []>} : vector<128x384xf32>, vector<384x128xf32>, vector<128x128xf32> -> vector<128x128xf32>
    %88 = vector.extract_strided_slice %72 {offsets = [1, 0, 0], sizes = [8, 16, 128], strides = [1, 1, 1]} : vector<10x16x128xf32> to vector<8x16x128xf32>
    %c1_i32_37 = arith.constant 1 : i32
    %89 = tpu.dynamic_rotate %88 by %c1_i32_37 dim 1 : vector<8x16x128xf32>, i32 -> vector<8x16x128xf32>
    %90 = arith.select %75, %89, %78 : vector<8x16x128xi1>, vector<8x16x128xf32>
    %c15_i32_38 = arith.constant 15 : i32
    %91 = tpu.dynamic_rotate %88 by %c15_i32_38 dim 1 : vector<8x16x128xf32>, i32 -> vector<8x16x128xf32>
    %92 = arith.select %77, %91, %78 : vector<8x16x128xi1>, vector<8x16x128xf32>
    %93 = tpu.concatenate %90, %88, %92 in 2 : vector<8x16x128xf32>, vector<8x16x128xf32>, vector<8x16x128xf32> -> vector<8x16x384xf32>
    %94 = vector.shape_cast %93 : vector<8x16x384xf32> to vector<128x384xf32>
    %c384_39 = arith.constant 384 : index
    %c0_40 = arith.constant 0 : index
    %95 = vector.load %arg3[%c384_39, %c0_40] : memref<1152x128xf32, #tpu.memory_space<vmem>>, vector<384x128xf32>
    %cst_41 = arith.constant dense<0.000000e+00> : vector<128x128xf32>
    %96 = tpu.matmul %94, %95, %cst_41 {dimension_numbers = #tpu.dot_dimension_numbers<[1], [0], [0], [1], [0, 0, 1, 1], [], []>} : vector<128x384xf32>, vector<384x128xf32>, vector<128x128xf32> -> vector<128x128xf32>
    %97 = arith.addf %87, %96 : vector<128x128xf32>
    %98 = vector.extract_strided_slice %72 {offsets = [2, 0, 0], sizes = [8, 16, 128], strides = [1, 1, 1]} : vector<10x16x128xf32> to vector<8x16x128xf32>
    %c1_i32_42 = arith.constant 1 : i32
    %99 = tpu.dynamic_rotate %98 by %c1_i32_42 dim 1 : vector<8x16x128xf32>, i32 -> vector<8x16x128xf32>
    %100 = arith.select %75, %99, %78 : vector<8x16x128xi1>, vector<8x16x128xf32>
    %c15_i32_43 = arith.constant 15 : i32
    %101 = tpu.dynamic_rotate %98 by %c15_i32_43 dim 1 : vector<8x16x128xf32>, i32 -> vector<8x16x128xf32>
    %102 = arith.select %77, %101, %78 : vector<8x16x128xi1>, vector<8x16x128xf32>
    %103 = tpu.concatenate %100, %98, %102 in 2 : vector<8x16x128xf32>, vector<8x16x128xf32>, vector<8x16x128xf32> -> vector<8x16x384xf32>
    %104 = vector.shape_cast %103 : vector<8x16x384xf32> to vector<128x384xf32>
    %c768_44 = arith.constant 768 : index
    %c0_45 = arith.constant 0 : index
    %105 = vector.load %arg3[%c768_44, %c0_45] : memref<1152x128xf32, #tpu.memory_space<vmem>>, vector<384x128xf32>
    %cst_46 = arith.constant dense<0.000000e+00> : vector<128x128xf32>
    %106 = tpu.matmul %104, %105, %cst_46 {dimension_numbers = #tpu.dot_dimension_numbers<[1], [0], [0], [1], [0, 0, 1, 1], [], []>} : vector<128x384xf32>, vector<384x128xf32>, vector<128x128xf32> -> vector<128x128xf32>
    %107 = arith.addf %97, %106 : vector<128x128xf32>
    %108 = vector.shape_cast %107 : vector<128x128xf32> to vector<8x16x128xf32>
    %c0_47 = arith.constant 0 : index
    %c8 = arith.constant 8 : index
    %c0_48 = arith.constant 0 : index
    %c0_49 = arith.constant 0 : index
    %109 = vector.load %arg4[%c0_47, %c8, %c0_48, %c0_49] : memref<1x16x16x128xf32, #tpu.memory_space<vmem>>, vector<1x8x16x128xf32>
    %110 = vector.shape_cast %109 : vector<1x8x16x128xf32> to vector<8x16x128xf32>
    %111 = vector.shape_cast %108 : vector<8x16x128xf32> to vector<1x8x16x128xf32>
    tpu.vector_store %arg4[%c0_47, %c8, %c0_48, %c0_49], %111 {strides = array<i32>} : memref<1x16x16x128xf32, #tpu.memory_space<vmem>>, vector<1x8x16x128xf32>,
    %112 = vector.shape_cast %108 : vector<8x16x128xf32> to vector<128x128xf32>
    %cst_50 = arith.constant dense<0.000000e+00> : vector<128xf32>
    %113 = vector.multi_reduction <add>, %112, %cst_50 [0] : vector<128x128xf32> to vector<128xf32>
    %114 = vector.shape_cast %113 : vector<128xf32> to vector<1x128xf32>
    %115 = arith.mulf %112, %112 : vector<128x128xf32>
    %cst_51 = arith.constant dense<0.000000e+00> : vector<128xf32>
    %116 = vector.multi_reduction <add>, %115, %cst_51 [0] : vector<128x128xf32> to vector<128xf32>
    %117 = vector.shape_cast %116 : vector<128xf32> to vector<1x128xf32>
    %118 = arith.addf %68, %114 : vector<1x128xf32>
    %119 = arith.addf %69, %117 : vector<1x128xf32>
    %120 = tpu.concatenate %118, %119 in 0 : vector<1x128xf32>, vector<1x128xf32> -> vector<2x128xf32>
    %c0_52 = arith.constant 0 : index
    %c0_53 = arith.constant 0 : index
    %c0_54 = arith.constant 0 : index
    %121 = vector.load %arg5[%c0_52, %c0_53, %c0_54] : memref<1x2x128xf32, #tpu.memory_space<vmem>>, vector<1x2x128xf32>
    %122 = vector.shape_cast %121 : vector<1x2x128xf32> to vector<2x128xf32>
    %123 = vector.shape_cast %120 : vector<2x128xf32> to vector<1x2x128xf32>
    tpu.vector_store %arg5[%c0_52, %c0_53, %c0_54], %123 {strides = array<i32>} : memref<1x2x128xf32, #tpu.memory_space<vmem>>, vector<1x2x128xf32>,
    return
  }
  func.func @transform_0(%arg0: i32) -> (i32, i32) {
    %c0_i32 = arith.constant 0 : i32
    %c0_i32_0 = arith.constant 0 : i32
    %c0_i32_1 = arith.constant 0 : i32
    return %c0_i32, %c0_i32_0 : i32, i32
  }
  func.func @transform_1(%arg0: i32) -> (i32, i32, i32, i32) {
    %c0_i32 = arith.constant 0 : i32
    %c0_i32_0 = arith.constant 0 : i32
    %c0_i32_1 = arith.constant 0 : i32
    %c0_i32_2 = arith.constant 0 : i32
    return %arg0, %c0_i32, %c0_i32_0, %c0_i32_1 : i32, i32, i32, i32
  }
  func.func @transform_2(%arg0: i32) -> (i32, i32) {
    %c0_i32 = arith.constant 0 : i32
    %c0_i32_0 = arith.constant 0 : i32
    %c0_i32_1 = arith.constant 0 : i32
    return %c0_i32, %c0_i32_0 : i32, i32
  }
  func.func @transform_3(%arg0: i32) -> (i32, i32, i32, i32) {
    %c0_i32 = arith.constant 0 : i32
    %c0_i32_0 = arith.constant 0 : i32
    %c0_i32_1 = arith.constant 0 : i32
    %c0_i32_2 = arith.constant 0 : i32
    return %arg0, %c0_i32, %c0_i32_0, %c0_i32_1 : i32, i32, i32, i32
  }
  func.func @transform_4(%arg0: i32) -> (i32, i32, i32) {
    %c0_i32 = arith.constant 0 : i32
    %c0_i32_0 = arith.constant 0 : i32
    %c0_i32_1 = arith.constant 0 : i32
    return %arg0, %c0_i32, %c0_i32_0 : i32, i32, i32
  }
}

module attributes {stable_mosaic.version = 11 : i64} {
  func.func @stage2_kernel(%arg0: i32, %arg1: memref<3x128xf32, #tpu.memory_space<vmem>>, %arg2: memref<1x16x16x128xf32, #tpu.memory_space<vmem>>, %arg3: memref<1x16x16x128xf32, #tpu.memory_space<vmem>>, %arg4: memref<1152x128xf32, #tpu.memory_space<vmem>>, %arg5: memref<128x128xf32, #tpu.memory_space<vmem>>, %arg6: memref<1x16x16x128xf32, #tpu.memory_space<vmem>>, %arg7: memref<1x8x8x128xf32, #tpu.memory_space<vmem>>) attributes {dimension_semantics = [#tpu.dimension_semantics<parallel>], iteration_bounds = array<i64: 2>, scalar_prefetch = 0 : i64, scratch_operands = 0 : i64, tpu.core_type = #tpu.core_type<tc>, window_params = [{pipeline_mode = #tpu.pipeline_mode<synchronous>, transform_indices = @transform_0, window_bounds = array<i64: 3, 128>}, {transform_indices = @transform_1, window_bounds = array<i64: 1, 16, 16, 128>}, {transform_indices = @transform_2, window_bounds = array<i64: 1, 16, 16, 128>}, {pipeline_mode = #tpu.pipeline_mode<synchronous>, transform_indices = @transform_3, window_bounds = array<i64: 1152, 128>}, {pipeline_mode = #tpu.pipeline_mode<synchronous>, transform_indices = @transform_4, window_bounds = array<i64: 128, 128>}, {transform_indices = @transform_5, window_bounds = array<i64: 1, 16, 16, 128>}, {transform_indices = @transform_6, window_bounds = array<i64: 1, 8, 8, 128>}]} {
    %c0 = arith.constant 0 : index
    %c0_0 = arith.constant 0 : index
    %0 = vector.load %arg1[%c0, %c0_0] : memref<3x128xf32, #tpu.memory_space<vmem>>, vector<3x128xf32>
    %c0_1 = arith.constant 0 : index
    %c0_2 = arith.constant 0 : index
    %c0_3 = arith.constant 0 : index
    %c0_4 = arith.constant 0 : index
    %1 = vector.load %arg3[%c0_1, %c0_2, %c0_3, %c0_4] : memref<1x16x16x128xf32, #tpu.memory_space<vmem>>, vector<1x16x16x128xf32>
    %2 = vector.shape_cast %1 : vector<1x16x16x128xf32> to vector<16x16x128xf32>
    %3 = vector.extract_strided_slice %0 {offsets = [0, 0], sizes = [1, 128], strides = [1, 1]} : vector<3x128xf32> to vector<1x128xf32>
    %4 = vector.shape_cast %3 : vector<1x128xf32> to vector<128xf32>
    %5 = vector.shape_cast %4 : vector<128xf32> to vector<1x1x128xf32>
    %6 = vector.broadcast %5 : vector<1x1x128xf32> to vector<16x16x128xf32>
    %7 = arith.mulf %2, %6 : vector<16x16x128xf32>
    %8 = vector.extract_strided_slice %0 {offsets = [1, 0], sizes = [1, 128], strides = [1, 1]} : vector<3x128xf32> to vector<1x128xf32>
    %9 = vector.shape_cast %8 : vector<1x128xf32> to vector<128xf32>
    %10 = vector.shape_cast %9 : vector<128xf32> to vector<1x1x128xf32>
    %11 = vector.broadcast %10 : vector<1x1x128xf32> to vector<16x16x128xf32>
    %12 = arith.addf %7, %11 : vector<16x16x128xf32>
    %cst = arith.constant 0.000000e+00 : f32
    %13 = vector.broadcast %cst : f32 to vector<16x16x128xf32>
    %14 = arith.cmpf oge, %12, %13 : vector<16x16x128xf32>
    %cst_5 = arith.constant 0.00999999977 : f32
    %15 = vector.broadcast %cst_5 : f32 to vector<16x16x128xf32>
    %16 = arith.mulf %15, %12 : vector<16x16x128xf32>
    %17 = arith.select %14, %12, %16 : vector<16x16x128xi1>, vector<16x16x128xf32>
    %c0_6 = arith.constant 0 : index
    %c0_7 = arith.constant 0 : index
    %c0_8 = arith.constant 0 : index
    %c0_9 = arith.constant 0 : index
    %18 = vector.load %arg2[%c0_6, %c0_7, %c0_8, %c0_9] : memref<1x16x16x128xf32, #tpu.memory_space<vmem>>, vector<1x16x16x128xf32>
    %19 = vector.shape_cast %18 : vector<1x16x16x128xf32> to vector<16x16x128xf32>
    %c0_10 = arith.constant 0 : index
    %c0_11 = arith.constant 0 : index
    %20 = vector.load %arg5[%c0_10, %c0_11] : memref<128x128xf32, #tpu.memory_space<vmem>>, vector<128x128xf32>
    %cst_12 = arith.constant 0.000000e+00 : f32
    %21 = vector.broadcast %cst_12 : f32 to vector<1x16x128xf32>
    %22 = vector.extract_strided_slice %17 {offsets = [0, 0, 0], sizes = [9, 16, 128], strides = [1, 1, 1]} : vector<16x16x128xf32> to vector<9x16x128xf32>
    %23 = tpu.concatenate %21, %22 in 0 : vector<1x16x128xf32>, vector<9x16x128xf32> -> vector<10x16x128xf32>
    %24 = tpu.iota {dimensions = array<i32: 1>} : vector<8x16x128xi32>
    %c1_i32 = arith.constant 1 : i32
    %25 = vector.broadcast %c1_i32 : i32 to vector<8x16x128xi32>
    %26 = arith.cmpi sge, %24, %25 : vector<8x16x128xi32>
    %c14_i32 = arith.constant 14 : i32
    %27 = vector.broadcast %c14_i32 : i32 to vector<8x16x128xi32>
    %28 = arith.cmpi sle, %24, %27 : vector<8x16x128xi32>
    %cst_13 = arith.constant 0.000000e+00 : f32
    %29 = vector.broadcast %cst_13 : f32 to vector<8x16x128xf32>
    %30 = vector.extract_strided_slice %23 {offsets = [0, 0, 0], sizes = [8, 16, 128], strides = [1, 1, 1]} : vector<10x16x128xf32> to vector<8x16x128xf32>
    %c1_i32_14 = arith.constant 1 : i32
    %31 = tpu.dynamic_rotate %30 by %c1_i32_14 dim 1 : vector<8x16x128xf32>, i32 -> vector<8x16x128xf32>
    %32 = arith.select %26, %31, %29 : vector<8x16x128xi1>, vector<8x16x128xf32>
    %c15_i32 = arith.constant 15 : i32
    %33 = tpu.dynamic_rotate %30 by %c15_i32 dim 1 : vector<8x16x128xf32>, i32 -> vector<8x16x128xf32>
    %34 = arith.select %28, %33, %29 : vector<8x16x128xi1>, vector<8x16x128xf32>
    %35 = tpu.concatenate %32, %30, %34 in 2 : vector<8x16x128xf32>, vector<8x16x128xf32>, vector<8x16x128xf32> -> vector<8x16x384xf32>
    %36 = vector.shape_cast %35 : vector<8x16x384xf32> to vector<128x384xf32>
    %c0_15 = arith.constant 0 : index
    %c0_16 = arith.constant 0 : index
    %37 = vector.load %arg4[%c0_15, %c0_16] : memref<1152x128xf32, #tpu.memory_space<vmem>>, vector<384x128xf32>
    %cst_17 = arith.constant dense<0.000000e+00> : vector<128x128xf32>
    %38 = tpu.matmul %36, %37, %cst_17 {dimension_numbers = #tpu.dot_dimension_numbers<[1], [0], [0], [1], [0, 0, 1, 1], [], []>} : vector<128x384xf32>, vector<384x128xf32>, vector<128x128xf32> -> vector<128x128xf32>
    %39 = vector.extract_strided_slice %23 {offsets = [1, 0, 0], sizes = [8, 16, 128], strides = [1, 1, 1]} : vector<10x16x128xf32> to vector<8x16x128xf32>
    %c1_i32_18 = arith.constant 1 : i32
    %40 = tpu.dynamic_rotate %39 by %c1_i32_18 dim 1 : vector<8x16x128xf32>, i32 -> vector<8x16x128xf32>
    %41 = arith.select %26, %40, %29 : vector<8x16x128xi1>, vector<8x16x128xf32>
    %c15_i32_19 = arith.constant 15 : i32
    %42 = tpu.dynamic_rotate %39 by %c15_i32_19 dim 1 : vector<8x16x128xf32>, i32 -> vector<8x16x128xf32>
    %43 = arith.select %28, %42, %29 : vector<8x16x128xi1>, vector<8x16x128xf32>
    %44 = tpu.concatenate %41, %39, %43 in 2 : vector<8x16x128xf32>, vector<8x16x128xf32>, vector<8x16x128xf32> -> vector<8x16x384xf32>
    %45 = vector.shape_cast %44 : vector<8x16x384xf32> to vector<128x384xf32>
    %c384 = arith.constant 384 : index
    %c0_20 = arith.constant 0 : index
    %46 = vector.load %arg4[%c384, %c0_20] : memref<1152x128xf32, #tpu.memory_space<vmem>>, vector<384x128xf32>
    %cst_21 = arith.constant dense<0.000000e+00> : vector<128x128xf32>
    %47 = tpu.matmul %45, %46, %cst_21 {dimension_numbers = #tpu.dot_dimension_numbers<[1], [0], [0], [1], [0, 0, 1, 1], [], []>} : vector<128x384xf32>, vector<384x128xf32>, vector<128x128xf32> -> vector<128x128xf32>
    %48 = arith.addf %38, %47 : vector<128x128xf32>
    %49 = vector.extract_strided_slice %23 {offsets = [2, 0, 0], sizes = [8, 16, 128], strides = [1, 1, 1]} : vector<10x16x128xf32> to vector<8x16x128xf32>
    %c1_i32_22 = arith.constant 1 : i32
    %50 = tpu.dynamic_rotate %49 by %c1_i32_22 dim 1 : vector<8x16x128xf32>, i32 -> vector<8x16x128xf32>
    %51 = arith.select %26, %50, %29 : vector<8x16x128xi1>, vector<8x16x128xf32>
    %c15_i32_23 = arith.constant 15 : i32
    %52 = tpu.dynamic_rotate %49 by %c15_i32_23 dim 1 : vector<8x16x128xf32>, i32 -> vector<8x16x128xf32>
    %53 = arith.select %28, %52, %29 : vector<8x16x128xi1>, vector<8x16x128xf32>
    %54 = tpu.concatenate %51, %49, %53 in 2 : vector<8x16x128xf32>, vector<8x16x128xf32>, vector<8x16x128xf32> -> vector<8x16x384xf32>
    %55 = vector.shape_cast %54 : vector<8x16x384xf32> to vector<128x384xf32>
    %c768 = arith.constant 768 : index
    %c0_24 = arith.constant 0 : index
    %56 = vector.load %arg4[%c768, %c0_24] : memref<1152x128xf32, #tpu.memory_space<vmem>>, vector<384x128xf32>
    %cst_25 = arith.constant dense<0.000000e+00> : vector<128x128xf32>
    %57 = tpu.matmul %55, %56, %cst_25 {dimension_numbers = #tpu.dot_dimension_numbers<[1], [0], [0], [1], [0, 0, 1, 1], [], []>} : vector<128x384xf32>, vector<384x128xf32>, vector<128x128xf32> -> vector<128x128xf32>
    %58 = arith.addf %48, %57 : vector<128x128xf32>
    %59 = vector.shape_cast %58 : vector<128x128xf32> to vector<8x16x128xf32>
    %60 = vector.extract_strided_slice %19 {offsets = [0, 0, 0], sizes = [8, 16, 128], strides = [1, 1, 1]} : vector<16x16x128xf32> to vector<8x16x128xf32>
    %61 = vector.shape_cast %60 : vector<8x16x128xf32> to vector<128x128xf32>
    %cst_26 = arith.constant dense<0.000000e+00> : vector<128x128xf32>
    %62 = tpu.matmul %61, %20, %cst_26 {dimension_numbers = #tpu.dot_dimension_numbers<[1], [0], [0], [1], [0, 0, 1, 1], [], []>} : vector<128x128xf32>, vector<128x128xf32>, vector<128x128xf32> -> vector<128x128xf32>
    %63 = vector.shape_cast %62 : vector<128x128xf32> to vector<8x16x128xf32>
    %64 = arith.addf %59, %63 : vector<8x16x128xf32>
    %65 = vector.extract_strided_slice %0 {offsets = [2, 0], sizes = [1, 128], strides = [1, 1]} : vector<3x128xf32> to vector<1x128xf32>
    %66 = vector.shape_cast %65 : vector<1x128xf32> to vector<128xf32>
    %67 = vector.shape_cast %66 : vector<128xf32> to vector<1x1x128xf32>
    %68 = vector.broadcast %67 : vector<1x1x128xf32> to vector<8x16x128xf32>
    %69 = arith.addf %64, %68 : vector<8x16x128xf32>
    %c0_27 = arith.constant 0 : index
    %c0_28 = arith.constant 0 : index
    %c0_29 = arith.constant 0 : index
    %c0_30 = arith.constant 0 : index
    %70 = vector.load %arg6[%c0_27, %c0_28, %c0_29, %c0_30] : memref<1x16x16x128xf32, #tpu.memory_space<vmem>>, vector<1x8x16x128xf32>
    %71 = vector.shape_cast %70 : vector<1x8x16x128xf32> to vector<8x16x128xf32>
    %72 = vector.shape_cast %69 : vector<8x16x128xf32> to vector<1x8x16x128xf32>
    tpu.vector_store %arg6[%c0_27, %c0_28, %c0_29, %c0_30], %72 {strides = array<i32>} : memref<1x16x16x128xf32, #tpu.memory_space<vmem>>, vector<1x8x16x128xf32>,
    %cst_31 = arith.constant 0.000000e+00 : f32
    %73 = vector.broadcast %cst_31 : f32 to vector<1x16x128xf32>
    %74 = vector.extract_strided_slice %17 {offsets = [7, 0, 0], sizes = [9, 16, 128], strides = [1, 1, 1]} : vector<16x16x128xf32> to vector<9x16x128xf32>
    %75 = tpu.concatenate %74, %73 in 0 : vector<9x16x128xf32>, vector<1x16x128xf32> -> vector<10x16x128xf32>
    %76 = tpu.iota {dimensions = array<i32: 1>} : vector<8x16x128xi32>
    %c1_i32_32 = arith.constant 1 : i32
    %77 = vector.broadcast %c1_i32_32 : i32 to vector<8x16x128xi32>
    %78 = arith.cmpi sge, %76, %77 : vector<8x16x128xi32>
    %c14_i32_33 = arith.constant 14 : i32
    %79 = vector.broadcast %c14_i32_33 : i32 to vector<8x16x128xi32>
    %80 = arith.cmpi sle, %76, %79 : vector<8x16x128xi32>
    %cst_34 = arith.constant 0.000000e+00 : f32
    %81 = vector.broadcast %cst_34 : f32 to vector<8x16x128xf32>
    %82 = vector.extract_strided_slice %75 {offsets = [0, 0, 0], sizes = [8, 16, 128], strides = [1, 1, 1]} : vector<10x16x128xf32> to vector<8x16x128xf32>
    %c1_i32_35 = arith.constant 1 : i32
    %83 = tpu.dynamic_rotate %82 by %c1_i32_35 dim 1 : vector<8x16x128xf32>, i32 -> vector<8x16x128xf32>
    %84 = arith.select %78, %83, %81 : vector<8x16x128xi1>, vector<8x16x128xf32>
    %c15_i32_36 = arith.constant 15 : i32
    %85 = tpu.dynamic_rotate %82 by %c15_i32_36 dim 1 : vector<8x16x128xf32>, i32 -> vector<8x16x128xf32>
    %86 = arith.select %80, %85, %81 : vector<8x16x128xi1>, vector<8x16x128xf32>
    %87 = tpu.concatenate %84, %82, %86 in 2 : vector<8x16x128xf32>, vector<8x16x128xf32>, vector<8x16x128xf32> -> vector<8x16x384xf32>
    %88 = vector.shape_cast %87 : vector<8x16x384xf32> to vector<128x384xf32>
    %c0_37 = arith.constant 0 : index
    %c0_38 = arith.constant 0 : index
    %89 = vector.load %arg4[%c0_37, %c0_38] : memref<1152x128xf32, #tpu.memory_space<vmem>>, vector<384x128xf32>
    %cst_39 = arith.constant dense<0.000000e+00> : vector<128x128xf32>
    %90 = tpu.matmul %88, %89, %cst_39 {dimension_numbers = #tpu.dot_dimension_numbers<[1], [0], [0], [1], [0, 0, 1, 1], [], []>} : vector<128x384xf32>, vector<384x128xf32>, vector<128x128xf32> -> vector<128x128xf32>
    %91 = vector.extract_strided_slice %75 {offsets = [1, 0, 0], sizes = [8, 16, 128], strides = [1, 1, 1]} : vector<10x16x128xf32> to vector<8x16x128xf32>
    %c1_i32_40 = arith.constant 1 : i32
    %92 = tpu.dynamic_rotate %91 by %c1_i32_40 dim 1 : vector<8x16x128xf32>, i32 -> vector<8x16x128xf32>
    %93 = arith.select %78, %92, %81 : vector<8x16x128xi1>, vector<8x16x128xf32>
    %c15_i32_41 = arith.constant 15 : i32
    %94 = tpu.dynamic_rotate %91 by %c15_i32_41 dim 1 : vector<8x16x128xf32>, i32 -> vector<8x16x128xf32>
    %95 = arith.select %80, %94, %81 : vector<8x16x128xi1>, vector<8x16x128xf32>
    %96 = tpu.concatenate %93, %91, %95 in 2 : vector<8x16x128xf32>, vector<8x16x128xf32>, vector<8x16x128xf32> -> vector<8x16x384xf32>
    %97 = vector.shape_cast %96 : vector<8x16x384xf32> to vector<128x384xf32>
    %c384_42 = arith.constant 384 : index
    %c0_43 = arith.constant 0 : index
    %98 = vector.load %arg4[%c384_42, %c0_43] : memref<1152x128xf32, #tpu.memory_space<vmem>>, vector<384x128xf32>
    %cst_44 = arith.constant dense<0.000000e+00> : vector<128x128xf32>
    %99 = tpu.matmul %97, %98, %cst_44 {dimension_numbers = #tpu.dot_dimension_numbers<[1], [0], [0], [1], [0, 0, 1, 1], [], []>} : vector<128x384xf32>, vector<384x128xf32>, vector<128x128xf32> -> vector<128x128xf32>
    %100 = arith.addf %90, %99 : vector<128x128xf32>
    %101 = vector.extract_strided_slice %75 {offsets = [2, 0, 0], sizes = [8, 16, 128], strides = [1, 1, 1]} : vector<10x16x128xf32> to vector<8x16x128xf32>
    %c1_i32_45 = arith.constant 1 : i32
    %102 = tpu.dynamic_rotate %101 by %c1_i32_45 dim 1 : vector<8x16x128xf32>, i32 -> vector<8x16x128xf32>
    %103 = arith.select %78, %102, %81 : vector<8x16x128xi1>, vector<8x16x128xf32>
    %c15_i32_46 = arith.constant 15 : i32
    %104 = tpu.dynamic_rotate %101 by %c15_i32_46 dim 1 : vector<8x16x128xf32>, i32 -> vector<8x16x128xf32>
    %105 = arith.select %80, %104, %81 : vector<8x16x128xi1>, vector<8x16x128xf32>
    %106 = tpu.concatenate %103, %101, %105 in 2 : vector<8x16x128xf32>, vector<8x16x128xf32>, vector<8x16x128xf32> -> vector<8x16x384xf32>
    %107 = vector.shape_cast %106 : vector<8x16x384xf32> to vector<128x384xf32>
    %c768_47 = arith.constant 768 : index
    %c0_48 = arith.constant 0 : index
    %108 = vector.load %arg4[%c768_47, %c0_48] : memref<1152x128xf32, #tpu.memory_space<vmem>>, vector<384x128xf32>
    %cst_49 = arith.constant dense<0.000000e+00> : vector<128x128xf32>
    %109 = tpu.matmul %107, %108, %cst_49 {dimension_numbers = #tpu.dot_dimension_numbers<[1], [0], [0], [1], [0, 0, 1, 1], [], []>} : vector<128x384xf32>, vector<384x128xf32>, vector<128x128xf32> -> vector<128x128xf32>
    %110 = arith.addf %100, %109 : vector<128x128xf32>
    %111 = vector.shape_cast %110 : vector<128x128xf32> to vector<8x16x128xf32>
    %112 = vector.extract_strided_slice %19 {offsets = [8, 0, 0], sizes = [8, 16, 128], strides = [1, 1, 1]} : vector<16x16x128xf32> to vector<8x16x128xf32>
    %113 = vector.shape_cast %112 : vector<8x16x128xf32> to vector<128x128xf32>
    %cst_50 = arith.constant dense<0.000000e+00> : vector<128x128xf32>
    %114 = tpu.matmul %113, %20, %cst_50 {dimension_numbers = #tpu.dot_dimension_numbers<[1], [0], [0], [1], [0, 0, 1, 1], [], []>} : vector<128x128xf32>, vector<128x128xf32>, vector<128x128xf32> -> vector<128x128xf32>
    %115 = vector.shape_cast %114 : vector<128x128xf32> to vector<8x16x128xf32>
    %116 = arith.addf %111, %115 : vector<8x16x128xf32>
    %117 = vector.extract_strided_slice %0 {offsets = [2, 0], sizes = [1, 128], strides = [1, 1]} : vector<3x128xf32> to vector<1x128xf32>
    %118 = vector.shape_cast %117 : vector<1x128xf32> to vector<128xf32>
    %119 = vector.shape_cast %118 : vector<128xf32> to vector<1x1x128xf32>
    %120 = vector.broadcast %119 : vector<1x1x128xf32> to vector<8x16x128xf32>
    %121 = arith.addf %116, %120 : vector<8x16x128xf32>
    %c0_51 = arith.constant 0 : index
    %c8 = arith.constant 8 : index
    %c0_52 = arith.constant 0 : index
    %c0_53 = arith.constant 0 : index
    %122 = vector.load %arg6[%c0_51, %c8, %c0_52, %c0_53] : memref<1x16x16x128xf32, #tpu.memory_space<vmem>>, vector<1x8x16x128xf32>
    %123 = vector.shape_cast %122 : vector<1x8x16x128xf32> to vector<8x16x128xf32>
    %124 = vector.shape_cast %121 : vector<8x16x128xf32> to vector<1x8x16x128xf32>
    tpu.vector_store %arg6[%c0_51, %c8, %c0_52, %c0_53], %124 {strides = array<i32>} : memref<1x16x16x128xf32, #tpu.memory_space<vmem>>, vector<1x8x16x128xf32>,
    %c0_54 = arith.constant 0 : index
    %c0_55 = arith.constant 0 : index
    %c0_56 = arith.constant 0 : index
    %c0_57 = arith.constant 0 : index
    %125 = tpu.strided_load %arg6[%c0_54, %c0_55, %c0_56, %c0_57] {strides = array<i32: 1, 1, 2, 1>} : memref<1x16x16x128xf32, #tpu.memory_space<vmem>>, vector<1x16x8x128xf32>
    %c0_58 = arith.constant 0 : index
    %c0_59 = arith.constant 0 : index
    %c1 = arith.constant 1 : index
    %c0_60 = arith.constant 0 : index
    %126 = tpu.strided_load %arg6[%c0_58, %c0_59, %c1, %c0_60] {strides = array<i32: 1, 1, 2, 1>} : memref<1x16x16x128xf32, #tpu.memory_space<vmem>>, vector<1x16x8x128xf32>
    %127 = arith.addf %125, %126 : vector<1x16x8x128xf32>
    %128 = vector.shape_cast %127 : vector<1x16x8x128xf32> to vector<8x2x8x128xf32>
    %129 = vector.extract_strided_slice %128 {offsets = [0, 0, 0, 0], sizes = [8, 1, 8, 128], strides = [1, 1, 1, 1]} : vector<8x2x8x128xf32> to vector<8x1x8x128xf32>
    %130 = vector.shape_cast %129 : vector<8x1x8x128xf32> to vector<8x8x128xf32>
    %131 = vector.extract_strided_slice %128 {offsets = [0, 1, 0, 0], sizes = [8, 1, 8, 128], strides = [1, 1, 1, 1]} : vector<8x2x8x128xf32> to vector<8x1x8x128xf32>
    %132 = vector.shape_cast %131 : vector<8x1x8x128xf32> to vector<8x8x128xf32>
    %133 = arith.addf %130, %132 : vector<8x8x128xf32>
    %cst_61 = arith.constant 2.500000e-01 : f32
    %134 = vector.broadcast %cst_61 : f32 to vector<8x8x128xf32>
    %135 = arith.mulf %134, %133 : vector<8x8x128xf32>
    %c0_62 = arith.constant 0 : index
    %c0_63 = arith.constant 0 : index
    %c0_64 = arith.constant 0 : index
    %c0_65 = arith.constant 0 : index
    %136 = vector.load %arg7[%c0_62, %c0_63, %c0_64, %c0_65] : memref<1x8x8x128xf32, #tpu.memory_space<vmem>>, vector<1x8x8x128xf32>
    %137 = vector.shape_cast %136 : vector<1x8x8x128xf32> to vector<8x8x128xf32>
    %138 = vector.shape_cast %135 : vector<8x8x128xf32> to vector<1x8x8x128xf32>
    tpu.vector_store %arg7[%c0_62, %c0_63, %c0_64, %c0_65], %138 {strides = array<i32>} : memref<1x8x8x128xf32, #tpu.memory_space<vmem>>, vector<1x8x8x128xf32>,
    return
  }
  func.func @transform_0(%arg0: i32) -> (i32, i32) {
    %c0_i32 = arith.constant 0 : i32
    %c0_i32_0 = arith.constant 0 : i32
    %c0_i32_1 = arith.constant 0 : i32
    return %c0_i32, %c0_i32_0 : i32, i32
  }
  func.func @transform_1(%arg0: i32) -> (i32, i32, i32, i32) {
    %c0_i32 = arith.constant 0 : i32
    %c0_i32_0 = arith.constant 0 : i32
    %c0_i32_1 = arith.constant 0 : i32
    %c0_i32_2 = arith.constant 0 : i32
    return %arg0, %c0_i32, %c0_i32_0, %c0_i32_1 : i32, i32, i32, i32
  }
  func.func @transform_2(%arg0: i32) -> (i32, i32, i32, i32) {
    %c0_i32 = arith.constant 0 : i32
    %c0_i32_0 = arith.constant 0 : i32
    %c0_i32_1 = arith.constant 0 : i32
    %c0_i32_2 = arith.constant 0 : i32
    return %arg0, %c0_i32, %c0_i32_0, %c0_i32_1 : i32, i32, i32, i32
  }
  func.func @transform_3(%arg0: i32) -> (i32, i32) {
    %c0_i32 = arith.constant 0 : i32
    %c0_i32_0 = arith.constant 0 : i32
    %c0_i32_1 = arith.constant 0 : i32
    return %c0_i32, %c0_i32_0 : i32, i32
  }
  func.func @transform_4(%arg0: i32) -> (i32, i32) {
    %c0_i32 = arith.constant 0 : i32
    %c0_i32_0 = arith.constant 0 : i32
    %c0_i32_1 = arith.constant 0 : i32
    return %c0_i32, %c0_i32_0 : i32, i32
  }
  func.func @transform_5(%arg0: i32) -> (i32, i32, i32, i32) {
    %c0_i32 = arith.constant 0 : i32
    %c0_i32_0 = arith.constant 0 : i32
    %c0_i32_1 = arith.constant 0 : i32
    %c0_i32_2 = arith.constant 0 : i32
    return %arg0, %c0_i32, %c0_i32_0, %c0_i32_1 : i32, i32, i32, i32
  }
  func.func @transform_6(%arg0: i32) -> (i32, i32, i32, i32) {
    %c0_i32 = arith.constant 0 : i32
    %c0_i32_0 = arith.constant 0 : i32
    %c0_i32_1 = arith.constant 0 : i32
    %c0_i32_2 = arith.constant 0 : i32
    return %arg0, %c0_i32, %c0_i32_0, %c0_i32_1 : i32, i32, i32, i32
  }
}

</mosaic_0001>

<bundles_post_ra>
// kernel: encoder_block_forward.3
= control target key start
LH: loop header
LB: loop body
LE: loop exit
PB: predicated region body
PF: predicated region fallthrough
CT: control target
= control target key end

     0   :  { %s346_s6 = smov 0   ;;  %s401_s0 = inlined_call_operand.vmem [shape: f32[2,16,16,128], index: 0, kind: input, shape index: {}]   ;;  %s402_s1 = inlined_call_operand.vmem [shape: f32[2,2,128], index: 1, kind: output, shape index: {}]  }
   0x1 LB: > { %s309_s7 = sadd.s32 4294967295, %s334_s6   ;;  %p313_p0 = scmp.ge.s32.totalorder %s334_s6, 1  ;;  %s334_s6 = sphi %s346_s6, %s11_s6  }
   0x2   : > { %p87_p1 = scmp.lt.s32.totalorder %s334_s6, 3 }
   0x4   : > { %p88_p2 = pnand %p313_p0, %p87_p1 }
   0x5   : > { %p106_p3 = scmp.lt.s32.totalorder (!%p88_p2), %s309_s7, 1 }
   0x6   : > { %91 = sbr.rel (%p88_p2) target bundleno = 93 (0x5d), region = 24 }
   0xb   : > { %s404_s7 = smov (!%p106_p3, %s309_s7), 1  ;;  %vm253_vm0 = vcmask 1040384  }
   0xc   : > { %s319_s8 = sshll.u32 %s404_s7, 8  ;;  %s316_s12 = sshll.u32 %s404_s7, 1 }
   0xd   : > { %s360_s11 = scalar_lea.vmem %s401_s0, %s319_s8  ;;  %s114_s15 = scalar_lea.vmem %s402_s1, %s316_s12 }
   0xe   : > { %v115_v0 = vld [vmem:[%s360_s11] sm:$0xff]  ;;  %v116_v1 = vld [vmem:[%s360_s11 + $0x8] sm:$0xff]  ;;  %v117_v2 = vld [vmem:[%s360_s11 + $0x10] sm:$0xff] }
   0xf   : > { %v118_v3 = vld [vmem:[%s360_s11 + $0x18] sm:$0xff]  ;;  %v147_v4 = vadd.f32 %v116_v1, %v115_v0  ;;  %v184_v5 = vmul.f32 %v115_v0, %v115_v0  ;;  %v185_v6 = vmul.f32 %v116_v1, %v116_v1  ;;  %v186_v7 = vmul.f32 %v117_v2, %v117_v2  ;;  %v119_v8 = vld [vmem:[%s360_s11 + $0x20] sm:$0xff]  ;;  %v120_v12 = vld [vmem:[%s360_s11 + $0x28] sm:$0xff] }
  0x10   : > { %v187_v10 = vmul.f32 %v118_v3, %v118_v3  ;;  %v188_v14 = vmul.f32 %v119_v8, %v119_v8  ;;  %v121_v16 = vld [vmem:[%s360_s11 + $0x30] sm:$0xff]  ;;  %v189_v18 = vmul.f32 %v120_v12, %v120_v12  ;;  %v122_v20 = vld [vmem:[%s360_s11 + $0x38] sm:$0xff]  ;;  %v123_v24 = vld [vmem:[%s360_s11 + $0x40] sm:$0xff] }
  0x11   : > { %v148_v9 = vadd.f32 %v147_v4, %v117_v2  ;;  %v216_v11 = vadd.f32 %v185_v6, %v184_v5  ;;  %v190_v22 = vmul.f32 %v121_v16, %v121_v16  ;;  %v191_v26 = vmul.f32 %v122_v20, %v122_v20  ;;  %v124_v28 = vld [vmem:[%s360_s11 + $0x48] sm:$0xff]  ;;  %v125_v32 = vld [vmem:[%s360_s11 + $0x50] sm:$0xff]  ;;  %v126_v36 = vld [vmem:[%s360_s11 + $0x58] sm:$0xff] }
  0x12   : > { %v192_v30 = vmul.f32 %v123_v24, %v123_v24  ;;  %v193_v34 = vmul.f32 %v124_v28, %v124_v28  ;;  %v194_v38 = vmul.f32 %v125_v32, %v125_v32  ;;  %v127_v40 = vld [vmem:[%s360_s11 + $0x60] sm:$0xff]  ;;  %v195_v42 = vmul.f32 %v126_v36, %v126_v36  ;;  %v128_v44 = vld [vmem:[%s360_s11 + $0x68] sm:$0xff]  ;;  %v129_v48 = vld [vmem:[%s360_s11 + $0x70] sm:$0xff] }
  0x13   : > { %v149_v13 = vadd.f32 %v148_v9, %v118_v3  ;;  %v217_v15 = vadd.f32 %v216_v11, %v186_v7  ;;  %v196_v46 = vmul.f32 %v127_v40, %v127_v40  ;;  %v197_v50 = vmul.f32 %v128_v44, %v128_v44  ;;  %v130_v52 = vld [vmem:[%s360_s11 + $0x78] sm:$0xff]  ;;  %v131_v56 = vld [vmem:[%s360_s11 + $0x80] sm:$0xff]  ;;  %v132_v60 = vld [vmem:[%s360_s11 + $0x88] sm:$0xff] }
  0x14   : > { %v198_v54 = vmul.f32 %v129_v48, %v129_v48  ;;  %v199_v58 = vmul.f32 %v130_v52, %v130_v52  ;;  %v200_v62 = vmul.f32 %v131_v56, %v131_v56  ;;  %v133_v0 = vld [vmem:[%s360_s11 + $0x90] sm:$0xff]  ;;  %v201_v2 = vmul.f32 %v132_v60, %v132_v60  ;;  %v134_v4 = vld [vmem:[%s360_s11 + $0x98] sm:$0xff] }
  0x15   : > { %v150_v17 = vadd.f32 %v149_v13, %v119_v8  ;;  %v218_v19 = vadd.f32 %v217_v15, %v187_v10  ;;  %v202_v6 = vmul.f32 %v133_v0, %v133_v0  ;;  %v135_v8 = vld [vmem:[%s360_s11 + $0xa0] sm:$0xff]  ;;  %v203_v10 = vmul.f32 %v134_v4, %v134_v4 }
  0x17   : > { %v151_v21 = vadd.f32 %v150_v17, %v120_v12  ;;  %v219_v23 = vadd.f32 %v218_v19, %v188_v14  ;;  %v136_v12 = vld [vmem:[%s360_s11 + $0xa8] sm:$0xff]  ;;  %v204_v14 = vmul.f32 %v135_v8, %v135_v8 }
  0x19   : > { %v152_v25 = vadd.f32 %v151_v21, %v121_v16  ;;  %v220_v27 = vadd.f32 %v219_v23, %v189_v18  ;;  %v137_v16 = vld [vmem:[%s360_s11 + $0xb0] sm:$0xff]  ;;  %v205_v18 = vmul.f32 %v136_v12, %v136_v12 }
  0x1b   : > { %v153_v29 = vadd.f32 %v152_v25, %v122_v20  ;;  %v221_v31 = vadd.f32 %v220_v27, %v190_v22  ;;  %v138_v20 = vld [vmem:[%s360_s11 + $0xb8] sm:$0xff]  ;;  %v206_v22 = vmul.f32 %v137_v16, %v137_v16 }
  0x1d   : > { %v154_v33 = vadd.f32 %v153_v29, %v123_v24  ;;  %v222_v35 = vadd.f32 %v221_v31, %v191_v26  ;;  %v139_v24 = vld [vmem:[%s360_s11 + $0xc0] sm:$0xff]  ;;  %v207_v26 = vmul.f32 %v138_v20, %v138_v20 }
  0x1f   : > { %v155_v37 = vadd.f32 %v154_v33, %v124_v28  ;;  %v223_v39 = vadd.f32 %v222_v35, %v192_v30  ;;  %v140_v28 = vld [vmem:[%s360_s11 + $0xc8] sm:$0xff]  ;;  %v208_v30 = vmul.f32 %v139_v24, %v139_v24 }
  0x21   : > { %v156_v41 = vadd.f32 %v155_v37, %v125_v32  ;;  %v224_v43 = vadd.f32 %v223_v39, %v193_v34  ;;  %v141_v32 = vld [vmem:[%s360_s11 + $0xd0] sm:$0xff]  ;;  %v209_v34 = vmul.f32 %v140_v28, %v140_v28 }
  0x23   : > { %v157_v45 = vadd.f32 %v156_v41, %v126_v36  ;;  %v225_v47 = vadd.f32 %v224_v43, %v194_v38  ;;  %v142_v36 = vld [vmem:[%s360_s11 + $0xd8] sm:$0xff]  ;;  %v210_v38 = vmul.f32 %v141_v32, %v141_v32 }
  0x25   : > { %v158_v49 = vadd.f32 %v157_v45, %v127_v40  ;;  %v226_v51 = vadd.f32 %v225_v47, %v195_v42  ;;  %v143_v40 = vld [vmem:[%s360_s11 + $0xe0] sm:$0xff]  ;;  %v211_v42 = vmul.f32 %v142_v36, %v142_v36 }
  0x27   : > { %v159_v53 = vadd.f32 %v158_v49, %v128_v44  ;;  %v227_v55 = vadd.f32 %v226_v51, %v196_v46  ;;  %v144_v44 = vld [vmem:[%s360_s11 + $0xe8] sm:$0xff]  ;;  %v212_v46 = vmul.f32 %v143_v40, %v143_v40 }
  0x29   : > { %v160_v57 = vadd.f32 %v159_v53, %v129_v48  ;;  %v228_v59 = vadd.f32 %v227_v55, %v197_v50  ;;  %v145_v48 = vld [vmem:[%s360_s11 + $0xf0] sm:$0xff]  ;;  %v213_v50 = vmul.f32 %v144_v44, %v144_v44 }
  0x2b   : > { %v161_v61 = vadd.f32 %v160_v57, %v130_v52  ;;  %v229_v63 = vadd.f32 %v228_v59, %v198_v54  ;;  %v146_v52 = vld [vmem:[%s360_s11 + $0xf8] sm:$0xff]  ;;  %v214_v54 = vmul.f32 %v145_v48, %v145_v48 }
  0x2c   : > { %v215_v57 = vmul.f32 %v146_v52, %v146_v52 }
  0x2d   : > { %v162_v1 = vadd.f32 %v161_v61, %v131_v56  ;;  %v230_v3 = vadd.f32 %v229_v63, %v199_v58 }
  0x2f   : > { %v163_v5 = vadd.f32 %v162_v1, %v132_v60  ;;  %v231_v7 = vadd.f32 %v230_v3, %v200_v62 }
  0x31   : > { %v164_v9 = vadd.f32 %v163_v5, %v133_v0  ;;  %v232_v11 = vadd.f32 %v231_v7, %v201_v2 }
  0x33   : > { %v165_v13 = vadd.f32 %v164_v9, %v134_v4  ;;  %v233_v15 = vadd.f32 %v232_v11, %v202_v6 }
  0x35   : > { %v166_v17 = vadd.f32 %v165_v13, %v135_v8  ;;  %v234_v19 = vadd.f32 %v233_v15, %v203_v10 }
  0x37   : > { %v167_v21 = vadd.f32 %v166_v17, %v136_v12  ;;  %v235_v23 = vadd.f32 %v234_v19, %v204_v14 }
  0x39   : > { %v168_v25 = vadd.f32 %v167_v21, %v137_v16  ;;  %v236_v27 = vadd.f32 %v235_v23, %v205_v18 }
  0x3b   : > { %v169_v29 = vadd.f32 %v168_v25, %v138_v20  ;;  %v237_v31 = vadd.f32 %v236_v27, %v206_v22 }
  0x3d   : > { %v170_v33 = vadd.f32 %v169_v29, %v139_v24  ;;  %v238_v35 = vadd.f32 %v237_v31, %v207_v26 }
  0x3f   : > { %v171_v37 = vadd.f32 %v170_v33, %v140_v28  ;;  %v239_v39 = vadd.f32 %v238_v35, %v208_v30 }
  0x41   : > { %v172_v41 = vadd.f32 %v171_v37, %v141_v32  ;;  %v240_v43 = vadd.f32 %v239_v39, %v209_v34 }
  0x43   : > { %v173_v45 = vadd.f32 %v172_v41, %v142_v36  ;;  %v241_v47 = vadd.f32 %v240_v43, %v210_v38 }
  0x45   : > { %v174_v49 = vadd.f32 %v173_v45, %v143_v40  ;;  %v242_v51 = vadd.f32 %v241_v47, %v211_v42 }
  0x47   : > { %v175_v53 = vadd.f32 %v174_v49, %v144_v44  ;;  %v243_v55 = vadd.f32 %v242_v51, %v212_v46 }
  0x49   : > { %v176_v56 = vadd.f32 %v175_v53, %v145_v48  ;;  %v244_v58 = vadd.f32 %v243_v55, %v213_v50 }
  0x4b   : > { %v177_v59 = vadd.f32 %v176_v56, %v146_v52  ;;  %v245_v60 = vadd.f32 %v244_v58, %v214_v54 }
  0x4d   : > { %v178_v61 = vrot.slane %v177_v59, 4  ;;  %v246_v62 = vadd.f32 %v245_v60, %v215_v57 }
  0x4f   : > { %v179_v63 = vadd.f32 %v178_v61, %v177_v59  ;;  %v247_v0 = vrot.slane %v246_v62, 4 }
  0x51   : > { %v180_v1 = vrot.slane %v179_v63, 2  ;;  %v248_v2 = vadd.f32 %v247_v0, %v246_v62 }
  0x53   : > { %v181_v3 = vadd.f32 %v180_v1, %v179_v63  ;;  %v249_v4 = vrot.slane %v248_v2, 2 }
  0x55   : > { %v182_v5 = vrot.slane %v181_v3, 1  ;;  %v250_v6 = vadd.f32 %v249_v4, %v248_v2 }
  0x57   : > { %v183_v7 = vadd.f32 %v182_v5, %v181_v3  ;;  %v251_v8 = vrot.slane %v250_v6, 1 }
  0x59   : > { %v252_v9 = vadd.f32 %v251_v8, %v250_v6 }
  0x5b   : > { %v254_v10 = vsel %vm253_vm0, %v183_v7, %v252_v9 }
  0x5c   : > { %255 = vst [vmem:[%s114_s15] sm:$0x3] %v254_v10 }
  0x5d PF: > { %s11_s6 = sadd.s32 1, %s334_s6  }
  0x5e   : > { %p8_p4 = scmp.ge.s32.totalorder %s11_s6, 4  }
  0x60   :  { %10 = sbr.rel (!%p8_p4) target bundleno = 1 (0x1), region = 54 }

// kernel: encoder_block_forward.4
= control target key start
LH: loop header
LB: loop body
LE: loop exit
PB: predicated region body
PF: predicated region fallthrough
CT: control target
= control target key end

     0   :  { %s4094_s15 = smov 0   ;;  %s6346_s0 = inlined_call_operand.vmem [shape: f32[2,128], index: 0, kind: input, shape index: {}]   ;;  %s6347_s1 = inlined_call_operand.vmem [shape: f32[2,16,16,128], index: 1, kind: input, shape index: {}]   ;;  %s6348_s2 = inlined_call_operand.vmem [shape: f32[1152,128], index: 2, kind: input, shape index: {}]   ;;  %s6349_s3 = inlined_call_operand.vmem [shape: f32[2,16,16,128], index: 3, kind: output, shape index: {0}]   ;;  %s6350_s4 = inlined_call_operand.vmem [shape: f32[2,2,128], index: 4, kind: output, shape index: {1}]  }
   0x1 LB: > { %s2917_s16 = sadd.s32 4294967295, %s4066_s15   ;;  %p2921_p0 = scmp.ge.s32.totalorder %s4066_s15, 1  ;;  %s4066_s15 = sphi %s4094_s15, %s15_s15  }
   0x2   : > { %p165_p1 = scmp.lt.s32.totalorder %s4066_s15, 3 }
   0x4   : > { %p166_p2 = pnand %p2921_p0, %p165_p1 }
   0x6   : > { %169 = sbr.rel (%p166_p2) target bundleno = 592 (0x250), region = 32 }
   0xb   : > { %v598_v0 = vld [vmem:[%s6348_s2 + $0x278] sm:$0xff]  ;;  %v597_v3 = vld [vmem:[%s6348_s2 + $0x270] sm:$0xff]  ;;  %v596_v6 = vld [vmem:[%s6348_s2 + $0x268] sm:$0xff]  ;;  %p4128_p3 = scmp.lt.s32.totalorder %s2917_s16, 1  ;;  %v242_v12 = vlaneseq }
   0xc   : > { %v614_v1 = vld [vmem:[%s6348_s2 + $0x2f8] sm:$0xff]  ;;  %3039 = vmatprep.subr.mxu0 %v598_v0  ;;  %v613_v4 = vld [vmem:[%s6348_s2 + $0x2f0] sm:$0xff]  ;;  %v612_v7 = vld [vmem:[%s6348_s2 + $0x2e8] sm:$0xff] }
   0xd   : > { %v582_v2 = vld [vmem:[%s6348_s2 + $0x1f8] sm:$0xff]  ;;  %3711 = vmatprep.subr.mxu1 %v614_v1  ;;  %v581_v5 = vld [vmem:[%s6348_s2 + $0x1f0] sm:$0xff]  ;;  %v580_v8 = vld [vmem:[%s6348_s2 + $0x1e8] sm:$0xff]  ;;  %s6430_s16 = smov (!%p4128_p3, %s2917_s16), 1  ;;  %v4168_v19 = vshrl.u32 %v242_v12, 7 }
   0xe   : > { %3040 = vmatpush3.msra.mxu0 %v582_v2  ;;  %3712 = vmatpush3.msra.mxu1 %v614_v1  ;;  %v595_v9 = vld [vmem:[%s6348_s2 + $0x260] sm:$0xff]  ;;  %v594_v13 = vld [vmem:[%s6348_s2 + $0x258] sm:$0xff]  ;;  %v593_v16 = vld [vmem:[%s6348_s2 + $0x250] sm:$0xff]  ;;  %s3037_s8 = sshll.u32 %s6430_s16, 8 }
   0xf   : > { %3041 = vmatprep.subr.mxu0 %v597_v3  ;;  %3713 = vmatprep.subr.mxu1 %v613_v4  ;;  %v611_v10 = vld [vmem:[%s6348_s2 + $0x2e0] sm:$0xff]  ;;  %v610_v14 = vld [vmem:[%s6348_s2 + $0x2d8] sm:$0xff]  ;;  %v609_v17 = vld [vmem:[%s6348_s2 + $0x2d0] sm:$0xff]  ;;  %s4194_s21 = scalar_lea.vmem %s6347_s1, %s3037_s8  ;;  %v244_v26 = vsub.s32 0, %v4168_v19  ;;  %v280_v27 = vsub.s32 1, %v4168_v19  ;;  %vm476_vm4 = vcmp.lt.s32.totalorder %v4168_v19, 7  ;;  %s6119_s18 = scalar_lea.vmem %s6349_s3, %s3037_s8 }
  0x10   : > { %3042 = vmatpush3.msra.mxu0 %v581_v5  ;;  %3714 = vmatpush3.msra.mxu1 %v613_v4  ;;  %v579_v11 = vld [vmem:[%s6348_s2 + $0x1e0] sm:$0xff]  ;;  %v578_v15 = vld [vmem:[%s6348_s2 + $0x1d8] sm:$0xff]  ;;  %v577_v18 = vld [vmem:[%s6348_s2 + $0x1d0] sm:$0xff]  ;;  %vm431_vm5 = vcmp.lt.s32.totalorder %v4168_v19, 1  ;;  %vm413_vm8 = vcmp.ge.s32.totalorder %v4168_v19, 1  ;;  %s2926_s8 = sshll.u32 %s6430_s16, 1 }
  0x11   : > { %3043 = vmatprep.subr.mxu0 %v596_v6  ;;  %3715 = vmatprep.subr.mxu1 %v612_v7  ;;  %v592_v20 = vld [vmem:[%s6348_s2 + $0x248] sm:$0xff]  ;;  %v591_v23 = vld [vmem:[%s6348_s2 + $0x240] sm:$0xff]  ;;  %v590_v28 = vld [vmem:[%s6348_s2 + $0x238] sm:$0xff] }
  0x12   : > { %3044 = vmatpush3.msra.mxu0 %v580_v8  ;;  %3716 = vmatpush3.msra.mxu1 %v612_v7  ;;  %v608_v21 = vld [vmem:[%s6348_s2 + $0x2c8] sm:$0xff]  ;;  %v607_v24 = vld [vmem:[%s6348_s2 + $0x2c0] sm:$0xff]  ;;  %v606_v29 = vld [vmem:[%s6348_s2 + $0x2b8] sm:$0xff] }
  0x13   : > { %3045 = vmatprep.subr.mxu0 %v595_v9  ;;  %3717 = vmatprep.subr.mxu1 %v611_v10  ;;  %v576_v22 = vld [vmem:[%s6348_s2 + $0x1c8] sm:$0xff]  ;;  %v575_v25 = vld [vmem:[%s6348_s2 + $0x1c0] sm:$0xff]  ;;  %v574_v30 = vld [vmem:[%s6348_s2 + $0x1b8] sm:$0xff] }
  0x14   : > { %3046 = vmatpush3.msra.mxu0 %v579_v11  ;;  %3718 = vmatpush3.msra.mxu1 %v611_v10  ;;  %v589_v31 = vld [vmem:[%s6348_s2 + $0x230] sm:$0xff]  ;;  %v209_v33 = vld [vmem:[%s6346_s0] sm:$0x3]  ;;  %v211_v35 = vld [vmem:[%s4194_s21 + $0x8] sm:$0xff] }
  0x15   : > { %3047 = vmatprep.subr.mxu0 %v594_v13  ;;  %3719 = vmatprep.subr.mxu1 %v610_v14  ;;  %v605_v32 = vld [vmem:[%s6348_s2 + $0x2b0] sm:$0xff]  ;;  %v210_v34 = vld [vmem:[%s4194_s21] sm:$0xff]  ;;  %v588_v37 = vld [vmem:[%s6348_s2 + $0x228] sm:$0xff]  ;;  %v4224_v38 = vrot.slane %v209_v33, %v244_v26  ;;  %v4226_v39 = vrot.slane %v209_v33, %v280_v27  ;;  %v4291_v13 = vadd.s32 8, %v4168_v19 }
  0x16   : > { %3048 = vmatpush3.msra.mxu0 %v578_v15  ;;  %3720 = vmatpush3.msra.mxu1 %v610_v14  ;;  %v573_v36 = vld [vmem:[%s6348_s2 + $0x1b0] sm:$0xff]  ;;  %v604_v40 = vld [vmem:[%s6348_s2 + $0x2a8] sm:$0xff]  ;;  %v213_v42 = vld [vmem:[%s4194_s21 + $0x18] sm:$0xff] }
  0x17   : > { %3049 = vmatprep.subr.mxu0 %v593_v16  ;;  %3721 = vmatprep.subr.mxu1 %v609_v17  ;;  %v212_v41 = vld [vmem:[%s4194_s21 + $0x10] sm:$0xff]  ;;  %v572_v43 = vld [vmem:[%s6348_s2 + $0x1a8] sm:$0xff]  ;;  %v587_v44 = vld [vmem:[%s6348_s2 + $0x220] sm:$0xff]  ;;  %v246_v45 = vmul.f32 %v4224_v38, %v210_v34  ;;  %v247_v46 = vmul.f32 %v4224_v38, %v211_v35  ;;  %v249_v50 = vmul.f32 %v4224_v38, %v213_v42  ;;  %vm416_vm9 = vcmp.le.s32.totalorder %v4291_v13, 14 }
  0x18   : > { %3050 = vmatpush3.msra.mxu0 %v577_v18  ;;  %3722 = vmatpush3.msra.mxu1 %v609_v17  ;;  %v248_v47 = vmul.f32 %v4224_v38, %v212_v41  ;;  %v603_v48 = vld [vmem:[%s6348_s2 + $0x2a0] sm:$0xff]  ;;  %v586_v52 = vld [vmem:[%s6348_s2 + $0x218] sm:$0xff]  ;;  %v215_v57 = vld [vmem:[%s4194_s21 + $0x28] sm:$0xff] }
  0x19   : > { %3051 = vmatprep.subr.mxu0 %v592_v20  ;;  %3723 = vmatprep.subr.mxu1 %v608_v21  ;;  %v571_v49 = vld [vmem:[%s6348_s2 + $0x1a0] sm:$0xff]  ;;  %v602_v53 = vld [vmem:[%s6348_s2 + $0x298] sm:$0xff]  ;;  %v282_v54 = vadd.f32 %v4226_v39, %v246_v45  ;;  %v283_v55 = vadd.f32 %v4226_v39, %v247_v46  ;;  %v585_v59 = vld [vmem:[%s6348_s2 + $0x210] sm:$0xff]  ;;  %v285_v61 = vadd.f32 %v4226_v39, %v249_v50 }
  0x1a   : > { %3052 = vmatpush3.msra.mxu0 %v576_v22  ;;  %3724 = vmatpush3.msra.mxu1 %v608_v21  ;;  %v214_v51 = vld [vmem:[%s4194_s21 + $0x20] sm:$0xff]  ;;  %v284_v56 = vadd.f32 %v4226_v39, %v248_v47  ;;  %v570_v58 = vld [vmem:[%s6348_s2 + $0x198] sm:$0xff]  ;;  %v601_v60 = vld [vmem:[%s6348_s2 + $0x290] sm:$0xff]  ;;  %v251_v63 = vmul.f32 %v4224_v38, %v215_v57 }
  0x1b   : > { %3053 = vmatprep.subr.mxu0 %v591_v23  ;;  %3725 = vmatprep.subr.mxu1 %v607_v24  ;;  %v250_v62 = vmul.f32 %v4224_v38, %v214_v51  ;;  %vm314_vm0 = vcmp.ge.f32.partialorder %v282_v54, 0.0  ;;  %v346_v0 = vmul.f32 0.01, %v282_v54  ;;  %vm315_vm1 = vcmp.ge.f32.partialorder %v283_v55, 0.0  ;;  %v569_v4 = vld [vmem:[%s6348_s2 + $0x190] sm:$0xff]  ;;  %v584_v8 = vld [vmem:[%s6348_s2 + $0x208] sm:$0xff] }
  0x1c   : > { %3054 = vmatpush3.msra.mxu0 %v575_v25  ;;  %3726 = vmatpush3.msra.mxu1 %v607_v24  ;;  %v347_v1 = vmul.f32 0.01, %v283_v55  ;;  %vm316_vm2 = vcmp.ge.f32.partialorder %v284_v56, 0.0  ;;  %vm317_vm3 = vcmp.ge.f32.partialorder %v285_v61, 0.0  ;;  %v348_v2 = vmul.f32 0.01, %v284_v56 }
  0x1d   : > { %3055 = vmatprep.subr.mxu0 %v590_v28  ;;  %3727 = vmatprep.subr.mxu1 %v606_v29  ;;  %v349_v3 = vmul.f32 0.01, %v285_v61  ;;  %v4275_v5 = vsel %vm314_vm0, %v282_v54, %v346_v0  ;;  %v286_v7 = vadd.f32 %v4226_v39, %v250_v62  ;;  %v600_v9 = vld [vmem:[%s6348_s2 + $0x288] sm:$0xff]  ;;  %v287_v18 = vadd.f32 %v4226_v39, %v251_v63  ;;  %v216_v20 = vld [vmem:[%s4194_s21 + $0x30] sm:$0xff]  ;;  %v583_v21 = vld [vmem:[%s6348_s2 + $0x200] sm:$0xff] }
  0x1e   : > { %3056 = vmatpush3.msra.mxu0 %v574_v30  ;;  %3728 = vmatpush3.msra.mxu1 %v606_v29  ;;  %v4277_v6 = vsel %vm315_vm1, %v283_v55, %v347_v1  ;;  %v417_v10 = vrot.slane %v4275_v5, 7  ;;  %v462_v11 = vrot.slane %v4275_v5, 1  ;;  %v568_v14 = vld [vmem:[%s6348_s2 + $0x188] sm:$0xff]  ;;  %v4298_v16 = vsel %vm316_vm2, %v284_v56, %v348_v2  ;;  %v599_v22 = vld [vmem:[%s6348_s2 + $0x280] sm:$0xff]  ;;  %v217_v27 = vld [vmem:[%s4194_s21 + $0x38] sm:$0xff] }
  0x1f   : > { %3057 = vmatprep.subr.mxu0 %v589_v31  ;;  %3729 = vmatprep.subr.mxu1 %v605_v32  ;;  %v469_v12 = vrot.slane %v4277_v6, 1  ;;  %v424_v15 = vrot.slane %v4277_v6, 7  ;;  %v4301_v17 = vsel %vm317_vm3, %v285_v61, %v349_v3  ;;  %v567_v23 = vld [vmem:[%s6348_s2 + $0x180] sm:$0xff]  ;;  %vm318_vm6 = vcmp.ge.f32.partialorder %v286_v7, 0.0  ;;  %v219_v35 = vld [vmem:[%s4194_s21 + $0x48] sm:$0xff]  ;;  %v521_v54 = vld [vmem:[%s6348_s2 + $0x70] sm:$0xff] }
  0x20   : > { %3058 = vmatpush3.msra.mxu0 %v573_v36  ;;  %3730 = vmatpush3.msra.mxu1 %v605_v32  ;;  %v463_v24 = vrot.slane %v4298_v16, 1  ;;  %v470_v25 = vrot.slane %v4301_v17, 1  ;;  %vm319_vm7 = vcmp.ge.f32.partialorder %v287_v18, 0.0  ;;  %v350_v26 = vmul.f32 0.01, %v286_v7  ;;  %v218_v31 = vld [vmem:[%s4194_s21 + $0x40] sm:$0xff] }
  0x21   : > { %3059 = vmatprep.subr.mxu0 %v588_v37  ;;  %3731 = vmatprep.subr.mxu1 %v604_v40  ;;  %v4320_v28 = vsel %vm476_vm4, %v462_v11, %v469_v12  ;;  %v351_v29 = vmul.f32 0.01, %v287_v18  ;;  %v252_v30 = vmul.f32 %v4224_v38, %v216_v20  ;;  %v4327_v32 = vsel %vm431_vm5, %v424_v15, %v417_v10  ;;  %v538_v36 = vld [vmem:[%s6348_s2 + $0xf8] sm:$0xff]  ;;  %v536_v62 = vld [vmem:[%s6348_s2 + $0xe8] sm:$0xff]  ;;  %v553_v63 = vld [vmem:[%s6348_s2 + $0x170] sm:$0xff] }
  0x22   : > { %3060 = vmatpush3.msra.mxu0 %v572_v43  ;;  %3732 = vmatpush3.msra.mxu1 %v604_v40  ;;  %v4332_v33 = vsel %vm476_vm4, %v469_v12, %v462_v11  ;;  %v4336_v34 = vsel %vm431_vm5, %v417_v10, %v424_v15  ;;  %v554_v37 = vld [vmem:[%s6348_s2 + $0x178] sm:$0xff]  ;;  %v4347_v40 = vsel %vm318_vm6, %v286_v7, %v350_v26  ;;  %v418_v45 = vrot.slane %v4298_v16, 7  ;;  %v520_v2 = vld [vmem:[%s6348_s2 + $0x68] sm:$0xff]  ;;  %v222_v7 = vld [vmem:[%s4194_s21 + $0x60] sm:$0xff] }
  0x23   : > { %3061 = vmatprep.subr.mxu0 %v587_v44  ;;  %3733 = vmatprep.subr.mxu1 %v603_v48  ;;  %v4350_v41 = vsel %vm319_vm7, %v287_v18, %v351_v29  ;;  %v253_v42 = vmul.f32 %v4224_v38, %v217_v27  ;;  %v522_v43 = vld [vmem:[%s6348_s2 + $0x78] sm:$0xff]  ;;  %v4359_v44 = vsel %vm476_vm4, %v463_v24, %v470_v25  ;;  %v425_v50 = vrot.slane %v4301_v17, 7  ;;  %v552_v26 = vld [vmem:[%s6348_s2 + $0x168] sm:$0xff] }
  0x24   : > { %3062 = vmatpush3.msra.mxu0 %v571_v49  ;;  %3734 = vmatpush3.msra.mxu1 %v603_v48  ;;  %v288_v46 = vadd.f32 %v4226_v39, %v252_v30  ;;  %v254_v47 = vmul.f32 %v4224_v38, %v218_v31  ;;  %v537_v48 = vld [vmem:[%s6348_s2 + $0xf0] sm:$0xff]  ;;  %v4375_v49 = vsel %vm476_vm4, %v470_v25, %v463_v24  ;;  %v464_v55 = vrot.slane %v4347_v40, 1  ;;  %v221_v61 = vld [vmem:[%s4194_s21 + $0x58] sm:$0xff] }
  0x25   : > { %3063 = vmatprep.subr.mxu0 %v586_v52  ;;  %3735 = vmatprep.subr.mxu1 %v602_v53  ;;  %v289_v51 = vadd.f32 %v4226_v39, %v253_v42  ;;  %v255_v52 = vmul.f32 %v4224_v38, %v219_v35  ;;  %v471_v56 = vrot.slane %v4350_v41, 1  ;;  %v4407_v3 = vsel %vm431_vm5, %v425_v50, %v418_v45  ;;  %v534_v25 = vld [vmem:[%s6348_s2 + $0xd8] sm:$0xff]  ;;  %v533_v31 = vld [vmem:[%s6348_s2 + $0xd0] sm:$0xff] }
  0x26   : > { %3064 = vmatpush3.msra.mxu0 %v570_v58  ;;  %3736 = vmatpush3.msra.mxu1 %v602_v53  ;;  %v220_v53 = vld [vmem:[%s4194_s21 + $0x50] sm:$0xff]  ;;  %vm320_vm10 = vcmp.ge.f32.partialorder %v288_v46, 0.0  ;;  %v352_v57 = vmul.f32 0.01, %v288_v46  ;;  %v257_v11 = vmul.f32 %v4224_v38, %v221_v61  ;;  %v258_v24 = vmul.f32 %v4224_v38, %v222_v7  ;;  %v518_v30 = vld [vmem:[%s6348_s2 + $0x58] sm:$0xff] }
  0x27   : > { %3065 = vmatprep.subr.mxu0 %v585_v59  ;;  %3737 = vmatprep.subr.mxu1 %v601_v60  ;;  %vm321_vm11 = vcmp.ge.f32.partialorder %v289_v51, 0.0  ;;  %v353_v58 = vmul.f32 0.01, %v289_v51  ;;  %v290_v59 = vadd.f32 %v4226_v39, %v254_v47  ;;  %v256_v1 = vmul.f32 %v4224_v38, %v220_v53  ;;  %v225_v47 = vld [vmem:[%s4194_s21 + $0x78] sm:$0xff] }
  0x28   : > { %3066 = vmatpush3.msra.mxu0 %v569_v4  ;;  %3738 = vmatpush3.msra.mxu1 %v601_v60  ;;  %v291_v60 = vadd.f32 %v4226_v39, %v255_v52  ;;  %v4396_v0 = vsel %vm320_vm10, %v288_v46, %v352_v57  ;;  %v4422_v12 = vsel %vm476_vm4, %v464_v55, %v471_v56  ;;  %v419_v57 = vrot.slane %v4347_v40, 7 }
  0x29   : > { %3067 = vmatprep.subr.mxu0 %v584_v8  ;;  %3739 = vmatprep.subr.mxu1 %v600_v9  ;;  %v4409_v4 = vsel %vm321_vm11, %v289_v51, %v353_v58  ;;  %vm322_vm12 = vcmp.ge.f32.partialorder %v290_v59, 0.0  ;;  %v535_v8 = vld [vmem:[%s6348_s2 + $0xe0] sm:$0xff]  ;;  %v465_v15 = vrot.slane %v4396_v0, 1  ;;  %v292_v20 = vadd.f32 %v4226_v39, %v256_v1 }
  0x2a   : > { %3068 = vmatpush3.msra.mxu0 %v568_v14  ;;  %3740 = vmatpush3.msra.mxu1 %v600_v9  ;;  %vm323_vm13 = vcmp.ge.f32.partialorder %v291_v60, 0.0  ;;  %v354_v9 = vmul.f32 0.01, %v290_v59  ;;  %v355_v10 = vmul.f32 0.01, %v291_v60  ;;  %v519_v14 = vld [vmem:[%s6348_s2 + $0x60] sm:$0xff]  ;;  %v293_v29 = vadd.f32 %v4226_v39, %v257_v11 }
  0x2b   : > { %3069 = vmatprep.subr.mxu0 %v583_v21  ;;  %3741 = vmatprep.subr.mxu1 %v599_v22  ;;  %v472_v18 = vrot.slane %v4409_v4, 1  ;;  %v223_v21 = vld [vmem:[%s4194_s21 + $0x68] sm:$0xff]  ;;  %v4461_v35 = vsel %vm431_vm5, %v418_v45, %v425_v50  ;;  %v356_v46 = vmul.f32 0.01, %v292_v20  ;;  %vm324_vm14 = vcmp.ge.f32.partialorder %v292_v20, 0.0 }
  0x2c   : > { %3070 = vmatpush3.msra.mxu0 %v567_v23  ;;  %679 = vmatprep.mubr.f32.mxu0 %v4275_v5  ;;  %v4436_v23 = vsel %vm322_vm12, %v290_v59, %v354_v9  ;;  %v4447_v27 = vsel %vm323_vm13, %v291_v60, %v355_v10  ;;  %v357_v45 = vmul.f32 0.01, %v293_v29  ;;  %vm325_vm15 = vcmp.ge.f32.partialorder %v293_v29, 0.0  ;;  %v516_v60 = vld [vmem:[%s6348_s2 + $0x48] sm:$0xff] }
  0x2d   : > { %3742 = vmatpush3.msra.mxu1 %v599_v22  ;;  %3743 = vmatprep.mubr.f32.mxu1 %v4320_v28  ;;  %v4433_v22 = vsel %vm476_vm4, %v471_v56, %v464_v55  ;;  %v4473_v42 = vsel %vm476_vm4, %v465_v15, %v472_v18  ;;  %v473_v50 = vrot.slane %v4447_v27, 1  ;;  %v294_v51 = vadd.f32 %v4226_v39, %v258_v24  ;;  %v532_v55 = vld [vmem:[%s6348_s2 + $0xc8] sm:$0xff]  ;;  %v551_v56 = vld [vmem:[%s6348_s2 + $0x160] sm:$0xff]  ;;  %v514_v24 = vld [vmem:[%s6348_s2 + $0x38] sm:$0xff] }
  0x2e   : > { %2927 = vmatmul.mubr.msk.f32.vlgmr.msra.gmra.mxu0 %vm413_vm8, %v4327_v32  ;;  %3744 = vmatmul.mubr.msk.f32.vlgmr.msra.gmra.mxu1 %vm416_vm9, %v4332_v33  ;;  %v4484_v52 = vsel %vm476_vm4, %v472_v18, %v465_v15  ;;  %v426_v58 = vrot.slane %v4350_v41, 7  ;;  %v261_v59 = vmul.f32 %v4224_v38, %v225_v47  ;;  %v4503_v61 = vsel %vm324_vm14, %v292_v20, %v356_v46  ;;  %v530_v20 = vld [vmem:[%s6348_s2 + $0xb8] sm:$0xff] }
  0x2f   : > { %3151 = vmatprep.subr.mxu1 %v538_v36  ;;  %3767 = vmatprep.subr.mxu0 %v554_v37  ;;  %v259_v36 = vmul.f32 %v4224_v38, %v223_v21  ;;  %vm326_vm0 = vcmp.ge.f32.partialorder %v294_v51, 0.0  ;;  %v467_v15 = vrot.slane %v4503_v61, 1  ;;  %v550_v21 = vld [vmem:[%s6348_s2 + $0x158] sm:$0xff] }
  0x30   : > { %3152 = vmatpush3.msra.mxu1 %v522_v43  ;;  %3768 = vmatpush3.msra.mxu0 %v554_v37  ;;  %v224_v37 = vld [vmem:[%s4194_s21 + $0x70] sm:$0xff]  ;;  %v466_v43 = vrot.slane %v4436_v23, 1  ;;  %v297_v10 = vadd.f32 %v4226_v39, %v261_v59  ;;  %v4526_v11 = vsel %vm431_vm5, %v426_v58, %v419_v57  ;;  %v511_v59 = vld [vmem:[%s6348_s2 + $0x20] sm:$0xff] }
  0x31   : > { %3153 = vmatprep.subr.mxu1 %v537_v48  ;;  %684 = vmatprep.mubr.f32.mxu0 %v4277_v6  ;;  %v517_v48 = vld [vmem:[%s6348_s2 + $0x50] sm:$0xff]  ;;  %v295_v53 = vadd.f32 %v4226_v39, %v259_v36 }
  0x32   : > { %3746 = vmatprep.mubr.f32.mxu1 %v4359_v44  ;;  %3154 = vmatpush3.msra.mxu1 %v521_v54  ;;  %v260_v54 = vmul.f32 %v4224_v38, %v224_v37  ;;  %v4517_v1 = vsel %vm476_vm4, %v466_v43, %v473_v50  ;;  %v513_v37 = vld [vmem:[%s6348_s2 + $0x30] sm:$0xff]  ;;  %vm329_vm3 = vcmp.ge.f32.partialorder %v297_v10, 0.0 }
  0x33   : > { %685 = vmatmul.mubr.f32.gmra.mxu0 %v4336_v34  ;;  %3747 = vmatmul.mubr.msk.f32.gmra.mxu1 %vm416_vm9, %v4375_v49  ;;  %v359_v7 = vmul.f32 0.01, %v295_v53  ;;  %vm327_vm1 = vcmp.ge.f32.partialorder %v295_v53, 0.0 }
  0x34   : > { %3155 = vmatprep.subr.mxu1 %v536_v62  ;;  %3769 = vmatprep.subr.mxu0 %v553_v63  ;;  %v4506_v62 = vsel %vm325_vm15, %v293_v29, %v357_v45  ;;  %v296_v9 = vadd.f32 %v4226_v39, %v260_v54  ;;  %v529_v29 = vld [vmem:[%s6348_s2 + $0xb0] sm:$0xff]  ;;  %v512_v54 = vld [vmem:[%s6348_s2 + $0x28] sm:$0xff] }
  0x35   : > { %3156 = vmatpush3.msra.mxu1 %v520_v2  ;;  %3770 = vmatpush3.msra.mxu0 %v553_v63  ;;  %v531_v63 = vld [vmem:[%s6348_s2 + $0xc0] sm:$0xff]  ;;  %v358_v2 = vmul.f32 0.01, %v294_v51  ;;  %v474_v18 = vrot.slane %v4506_v62, 1 }
  0x36   : > { %3157 = vmatprep.subr.mxu1 %v535_v8  ;;  %689 = vmatprep.mubr.f32.mxu0 %v4298_v16  ;;  %v515_v8 = vld [vmem:[%s6348_s2 + $0x40] sm:$0xff]  ;;  %vm328_vm2 = vcmp.ge.f32.partialorder %v296_v9, 0.0 }
  0x37   : > { %3749 = vmatprep.mubr.f32.mxu1 %v4422_v12  ;;  %3158 = vmatpush3.msra.mxu1 %v519_v14  ;;  %v4530_v14 = vsel %vm476_vm4, %v473_v50, %v466_v43  ;;  %v4562_v36 = vsel %vm476_vm4, %v467_v15, %v474_v18  ;;  %v4569_v43 = vsel %vm431_vm5, %v419_v57, %v426_v58  ;;  %v549_v50 = vld [vmem:[%s6348_s2 + $0x150] sm:$0xff]  ;;  %v527_v57 = vld [vmem:[%s6348_s2 + $0xa0] sm:$0xff] }
  0x38   : > { %2928 = vmatmul.mubr.msk.f32.gmra.mxu0 %vm413_vm8, %v4407_v3  ;;  %3750 = vmatmul.mubr.msk.f32.gmra.mxu1 %vm416_vm9, %v4433_v22  ;;  %v4573_v46 = vsel %vm476_vm4, %v474_v18, %v467_v15  ;;  %v525_v15 = vld [vmem:[%s6348_s2 + $0x90] sm:$0xff] }
  0x39   : > { %3159 = vmatprep.subr.mxu1 %v534_v25  ;;  %3771 = vmatprep.subr.mxu0 %v552_v26  ;;  %v4546_v25 = vsel %vm326_vm0, %v294_v51, %v358_v2  ;;  %v420_v51 = vrot.slane %v4396_v0, 7 }
  0x3a   : > { %3160 = vmatpush3.msra.mxu1 %v518_v30  ;;  %3772 = vmatpush3.msra.mxu0 %v552_v26  ;;  %v4549_v26 = vsel %vm327_vm1, %v295_v53, %v359_v7  ;;  %v360_v30 = vmul.f32 0.01, %v296_v9  ;;  %v468_v45 = vrot.slane %v4546_v25, 1  ;;  %v427_v53 = vrot.slane %v4409_v4, 7 }
  0x3b   : > { %3161 = vmatprep.subr.mxu1 %v533_v31  ;;  %694 = vmatprep.mubr.f32.mxu0 %v4301_v17  ;;  %v361_v31 = vmul.f32 0.01, %v297_v10  ;;  %v475_v47 = vrot.slane %v4549_v26, 1 }
  0x3c   : > { %3752 = vmatprep.mubr.f32.mxu1 %v4473_v42  ;;  %3162 = vmatpush3.msra.mxu1 %v517_v48  ;;  %v528_v48 = vld [vmem:[%s6348_s2 + $0xa8] sm:$0xff] }
  0x3d   : > { %695 = vmatmul.mubr.f32.gmra.mxu0 %v4461_v35  ;;  %3753 = vmatmul.mubr.msk.f32.gmra.mxu1 %vm416_vm9, %v4484_v52  ;;  %v4605_v58 = vsel %vm476_vm4, %v468_v45, %v475_v47 }
  0x3e   : > { %3163 = vmatprep.subr.mxu1 %v532_v55  ;;  %3773 = vmatprep.subr.mxu0 %v551_v56  ;;  %v4591_v55 = vsel %vm328_vm2, %v296_v9, %v360_v30  ;;  %v548_v9 = vld [vmem:[%s6348_s2 + $0x148] sm:$0xff]  ;;  %v547_v30 = vld [vmem:[%s6348_s2 + $0x140] sm:$0xff] }
  0x3f   : > { %3164 = vmatpush3.msra.mxu1 %v516_v60  ;;  %3774 = vmatpush3.msra.mxu0 %v551_v56  ;;  %v4594_v56 = vsel %vm329_vm3, %v297_v10, %v361_v31  ;;  %v4612_v60 = vsel %vm431_vm5, %v427_v53, %v420_v51  ;;  %v561_v2 = vrot.slane %v4591_v55, 1  ;;  %v510_v10 = vld [vmem:[%s6348_s2 + $0x18] sm:$0xff]  ;;  %v421_v31 = vrot.slane %v4436_v23, 7 }
  0x40   : > { %3165 = vmatprep.subr.mxu1 %v531_v63  ;;  %699 = vmatprep.mubr.f32.mxu0 %v4347_v40  ;;  %v4616_v63 = vsel %vm476_vm4, %v475_v47, %v468_v45  ;;  %v562_v7 = vrot.slane %v4594_v56, 1  ;;  %v508_v45 = vld [vmem:[%s6348_s2 + $0x8] sm:$0xff]  ;;  %v523_v47 = vld [vmem:[%s6348_s2 + $0x80] sm:$0xff] }
  0x41   : > { %3755 = vmatprep.mubr.f32.mxu1 %v4517_v1  ;;  %3166 = vmatpush3.msra.mxu1 %v515_v8  ;;  %v526_v8 = vld [vmem:[%s6348_s2 + $0x98] sm:$0xff] }
  0x42   : > { %2929 = vmatmul.mubr.msk.f32.gmra.mxu0 %vm413_vm8, %v4526_v11  ;;  %3756 = vmatmul.mubr.msk.f32.gmra.mxu1 %vm416_vm9, %v4530_v14  ;;  %v4642_v18 = vsel %vm476_vm4, %v561_v2, %v562_v7 }
  0x43   : > { %3167 = vmatprep.subr.mxu1 %v530_v20  ;;  %3775 = vmatprep.subr.mxu0 %v550_v21  ;;  %v509_v20 = vld [vmem:[%s6348_s2 + $0x10] sm:$0xff] }
  0x44   : > { %3168 = vmatpush3.msra.mxu1 %v514_v24  ;;  %3776 = vmatpush3.msra.mxu0 %v550_v21  ;;  %v4649_v21 = vsel %vm431_vm5, %v420_v51, %v427_v53  ;;  %v4653_v24 = vsel %vm476_vm4, %v562_v7, %v561_v2  ;;  %v546_v51 = vld [vmem:[%s6348_s2 + $0x138] sm:$0xff]  ;;  %v429_v2 = vrot.slane %v4506_v62, 7  ;;  %v545_v7 = vld [vmem:[%s6348_s2 + $0x130] sm:$0xff] }
  0x45   : > { %3169 = vmatprep.subr.mxu1 %v529_v29  ;;  %704 = vmatprep.mubr.f32.mxu0 %v4350_v41  ;;  %v524_v29 = vld [vmem:[%s6348_s2 + $0x88] sm:$0xff]  ;;  %v1254_v53 = vld [vmem:[%s6348_s2 + $0x478] sm:$0xff] }
  0x46   : > { %3758 = vmatprep.mubr.f32.mxu1 %v4562_v36  ;;  %3170 = vmatpush3.msra.mxu1 %v513_v37  ;;  %v428_v37 = vrot.slane %v4447_v27, 7 }
  0x47   : > { %705 = vmatmul.mubr.f32.gmra.mxu0 %v4569_v43  ;;  %3759 = vmatmul.mubr.msk.f32.gmra.mxu1 %vm416_vm9, %v4573_v46 }
  0x48   : > { %3171 = vmatprep.subr.mxu1 %v528_v48  ;;  %3777 = vmatprep.subr.mxu0 %v549_v50  ;;  %v507_v48 = vld [vmem:[%s6348_s2] sm:$0xff] }
  0x49   : > { %3172 = vmatpush3.msra.mxu1 %v512_v54  ;;  %3778 = vmatpush3.msra.mxu0 %v549_v50  ;;  %v4680_v50 = vsel %vm431_vm5, %v428_v37, %v421_v31  ;;  %v6351_v54 = vmov 0.0  }
  0x4a   : > { %3173 = vmatprep.subr.mxu1 %v527_v57  ;;  %709 = vmatprep.mubr.f32.mxu0 %v4396_v0  ;;  %v4696_v57 = vsel %vm431_vm5, %v421_v31, %v428_v37  ;;  %v542_v37 = vld [vmem:[%s6348_s2 + $0x118] sm:$0xff] }
  0x4b   : > { %3761 = vmatprep.mubr.f32.mxu1 %v4605_v58  ;;  %3174 = vmatpush3.msra.mxu1 %v511_v59  ;;  %v422_v59 = vrot.slane %v4503_v61, 7 }
  0x4c   : > { %2930 = vmatmul.mubr.msk.f32.gmra.mxu0 %vm413_vm8, %v4612_v60  ;;  %3762 = vmatmul.mubr.msk.f32.gmra.mxu1 %vm416_vm9, %v4616_v63 }
  0x4d   : > { %3175 = vmatprep.subr.mxu1 %v526_v8  ;;  %3779 = vmatprep.subr.mxu0 %v548_v9  ;;  %v1253_v8 = vld [vmem:[%s6348_s2 + $0x470] sm:$0xff] }
  0x4e   : > { %3176 = vmatpush3.msra.mxu1 %v510_v10  ;;  %3780 = vmatpush3.msra.mxu0 %v548_v9  ;;  %v4712_v9 = vsel %vm431_vm5, %v429_v2, %v422_v59  ;;  %v544_v10 = vld [vmem:[%s6348_s2 + $0x128] sm:$0xff] }
  0x4f   : > { %3177 = vmatprep.subr.mxu1 %v525_v15  ;;  %714 = vmatprep.mubr.f32.mxu0 %v4409_v4  ;;  %v1252_v15 = vld [vmem:[%s6348_s2 + $0x468] sm:$0xff] }
  0x50   : > { %3764 = vmatprep.mubr.f32.mxu1 %v4642_v18  ;;  %3178 = vmatpush3.msra.mxu1 %v509_v20  ;;  %v4730_v20 = vsel %vm431_vm5, %v422_v59, %v429_v2  ;;  %v540_v59 = vld [vmem:[%s6348_s2 + $0x108] sm:$0xff] }
  0x51   : > { %715 = vmatmul.mubr.f32.gmra.mxu0 %v4649_v21  ;;  %3765 = vmatmul.mubr.msk.f32.gmra.mxu1 %vm416_vm9, %v4653_v24  ;;  %v1248_v2 = vld [vmem:[%s6348_s2 + $0x448] sm:$0xff] }
  0x52   : > { %3179 = vmatprep.subr.mxu1 %v524_v29  ;;  %3781 = vmatprep.subr.mxu0 %v547_v30  ;;  %v423_v29 = vrot.slane %v4546_v25, 7 }
  0x53   : > { %3180 = vmatpush3.msra.mxu1 %v508_v45  ;;  %3782 = vmatpush3.msra.mxu0 %v547_v30  ;;  %v430_v30 = vrot.slane %v4549_v26, 7  ;;  %v555_v45 = vrot.slane %v4591_v55, 7 }
  0x54   : > { %3181 = vmatprep.subr.mxu1 %v523_v47  ;;  %719 = vmatprep.mubr.f32.mxu0 %v4436_v23  ;;  %v556_v47 = vrot.slane %v4594_v56, 7 }
  0x55   : > { %3182 = vmatpush3.msra.mxu1 %v507_v48  ;;  %969 = vmatprep.mubr.f32.mxu1 %v6351_v54  ;;  %v4746_v31 = vsel %vm431_vm5, %v430_v30, %v423_v29  ;;  %v541_v48 = vld [vmem:[%s6348_s2 + $0x110] sm:$0xff] }
  0x56   : > { %2931 = vmatmul.mubr.msk.f32.gmra.mxu0 %vm413_vm8, %v4680_v50  ;;  %970 = vmatmul.mubr.f32.vlgmr.msra.gmra.mxu1 %v6351_v54 }
  0x57   : > { %3783 = vmatprep.subr.mxu0 %v546_v51  ;;  %3823 = vmatprep.subr.mxu1 %v1254_v53 }
  0x58   : > { %3784 = vmatpush3.msra.mxu0 %v546_v51  ;;  %3824 = vmatpush3.msra.mxu1 %v1254_v53  ;;  %v1249_v51 = vld [vmem:[%s6348_s2 + $0x450] sm:$0xff]  ;;  %v4780_v53 = vsel %vm431_vm5, %v556_v47, %v555_v45 }
  0x59   : > { %724 = vmatprep.mubr.f32.mxu0 %v4447_v27  ;;  %974 = vmatprep.mubr.f32.mxu1 %v6351_v54 }
  0x5a   : > { %725 = vmatmul.mubr.f32.gmra.mxu0 %v4696_v57  ;;  %975 = vmatmul.mubr.f32.gmra.mxu1 %v6351_v54 }
  0x5b   : > { %3785 = vmatprep.subr.mxu0 %v545_v7  ;;  %3825 = vmatprep.subr.mxu1 %v1253_v8 }
  0x5c   : > { %3786 = vmatpush3.msra.mxu0 %v545_v7  ;;  %3826 = vmatpush3.msra.mxu1 %v1253_v8  ;;  %v4798_v7 = vsel %vm431_vm5, %v555_v45, %v556_v47  ;;  %v539_v8 = vld [vmem:[%s6348_s2 + $0x100] sm:$0xff]  ;;  %v1220_v45 = vld [vmem:[%s6348_s2 + $0x368] sm:$0xff] }
  0x5d   : > { %729 = vmatprep.mubr.f32.mxu0 %v4503_v61  ;;  %979 = vmatprep.mubr.f32.mxu1 %v4275_v5  ;;  %v543_v5 = vld [vmem:[%s6348_s2 + $0x120] sm:$0xff] }
  0x5e   : > { %2932 = vmatmul.mubr.msk.f32.gmra.mxu0 %vm413_vm8, %v4712_v9  ;;  %2943 = vmatmul.mubr.msk.f32.gmra.mxu1 %vm413_vm8, %v4327_v32  ;;  %v1251_v32 = vld [vmem:[%s6348_s2 + $0x460] sm:$0xff] }
  0x5f   : > { %3787 = vmatprep.subr.mxu0 %v544_v10  ;;  %3827 = vmatprep.subr.mxu1 %v1252_v15  ;;  %v1235_v47 = vld [vmem:[%s6348_s2 + $0x3e0] sm:$0xff] }
  0x60   : > { %3788 = vmatpush3.msra.mxu0 %v544_v10  ;;  %3828 = vmatpush3.msra.mxu1 %v1252_v15  ;;  %v1247_v10 = vld [vmem:[%s6348_s2 + $0x440] sm:$0xff]  ;;  %v1238_v15 = vld [vmem:[%s6348_s2 + $0x3f8] sm:$0xff] }
  0x61   : > { %734 = vmatprep.mubr.f32.mxu0 %v4506_v62  ;;  %984 = vmatprep.mubr.f32.mxu1 %v4277_v6  ;;  %v1250_v6 = vld [vmem:[%s6348_s2 + $0x458] sm:$0xff] }
  0x62   : > { %735 = vmatmul.mubr.f32.gmra.mxu0 %v4730_v20  ;;  %985 = vmatmul.mubr.f32.gmra.mxu1 %v4336_v34  ;;  %v4764_v34 = vsel %vm431_vm5, %v423_v29, %v430_v30  ;;  %v1246_v29 = vld [vmem:[%s6348_s2 + $0x438] sm:$0xff] }
  0x63   : > { %3789 = vmatprep.subr.mxu0 %v543_v5  ;;  %3829 = vmatprep.subr.mxu1 %v1251_v32  ;;  %v1222_v30 = vld [vmem:[%s6348_s2 + $0x378] sm:$0xff] }
  0x64   : > { %3790 = vmatpush3.msra.mxu0 %v543_v5  ;;  %3830 = vmatpush3.msra.mxu1 %v1251_v32  ;;  %v1237_v5 = vld [vmem:[%s6348_s2 + $0x3f0] sm:$0xff] }
  0x65   : > { %739 = vmatprep.mubr.f32.mxu0 %v4546_v25  ;;  %989 = vmatprep.mubr.f32.mxu1 %v4298_v16  ;;  %v1221_v32 = vld [vmem:[%s6348_s2 + $0x370] sm:$0xff] }
  0x66   : > { %2933 = vmatmul.mubr.msk.f32.gmra.mxu0 %vm413_vm8, %v4746_v31  ;;  %2944 = vmatmul.mubr.msk.f32.gmra.mxu1 %vm413_vm8, %v4407_v3 }
  0x67   : > { %3791 = vmatprep.subr.mxu0 %v542_v37  ;;  %3831 = vmatprep.subr.mxu1 %v1250_v6 }
  0x68   : > { %3792 = vmatpush3.msra.mxu0 %v542_v37  ;;  %3832 = vmatpush3.msra.mxu1 %v1250_v6  ;;  %v1236_v37 = vld [vmem:[%s6348_s2 + $0x3e8] sm:$0xff]  ;;  %v1245_v6 = vld [vmem:[%s6348_s2 + $0x430] sm:$0xff] }
  0x69   : > { %744 = vmatprep.mubr.f32.mxu0 %v4549_v26  ;;  %994 = vmatprep.mubr.f32.mxu1 %v4301_v17 }
  0x6a   : > { %745 = vmatmul.mubr.f32.gmra.mxu0 %v4764_v34  ;;  %995 = vmatmul.mubr.f32.gmra.mxu1 %v4461_v35 }
  0x6b   : > { %3793 = vmatprep.subr.mxu0 %v541_v48  ;;  %3833 = vmatprep.subr.mxu1 %v1249_v51 }
  0x6c   : > { %3794 = vmatpush3.msra.mxu0 %v541_v48  ;;  %3834 = vmatpush3.msra.mxu1 %v1249_v51  ;;  %v1234_v48 = vld [vmem:[%s6348_s2 + $0x3d8] sm:$0xff] }
  0x6d   : > { %749 = vmatprep.mubr.f32.mxu0 %v4591_v55  ;;  %999 = vmatprep.mubr.f32.mxu1 %v4347_v40  ;;  %v1218_v51 = vld [vmem:[%s6348_s2 + $0x358] sm:$0xff] }
  0x6e   : > { %2934 = vmatmul.mubr.msk.f32.gmra.mxu0 %vm413_vm8, %v4780_v53  ;;  %2945 = vmatmul.mubr.msk.f32.gmra.mxu1 %vm413_vm8, %v4526_v11 }
  0x6f   : > { %3795 = vmatprep.subr.mxu0 %v540_v59  ;;  %3835 = vmatprep.subr.mxu1 %v1248_v2 }
  0x70   : > { %3796 = vmatpush3.msra.mxu0 %v540_v59  ;;  %3836 = vmatpush3.msra.mxu1 %v1248_v2  ;;  %v1233_v59 = vld [vmem:[%s6348_s2 + $0x3d0] sm:$0xff] }
  0x71   : > { %754 = vmatprep.mubr.f32.mxu0 %v4594_v56  ;;  %1004 = vmatprep.mubr.f32.mxu1 %v4350_v41  ;;  %v1217_v2 = vld [vmem:[%s6348_s2 + $0x350] sm:$0xff] }
  0x72   : > { %755 = vmatmul.mubr.f32.gmra.mxu0 %v4798_v7  ;;  %1005 = vmatmul.mubr.f32.gmra.mxu1 %v4569_v43 }
  0x73   : > { %3797 = vmatprep.subr.mxu0 %v539_v8  ;;  %3837 = vmatprep.subr.mxu1 %v1247_v10 }
  0x74   : > { %3798 = vmatpush3.msra.mxu0 %v539_v8  ;;  %3838 = vmatpush3.msra.mxu1 %v1247_v10  ;;  %v1232_v8 = vld [vmem:[%s6348_s2 + $0x3c8] sm:$0xff]  ;;  %v1243_v10 = vld [vmem:[%s6348_s2 + $0x420] sm:$0xff] }
  0x75   : > { %1009 = vmatprep.mubr.f32.mxu1 %v4396_v0  ;;  %3799 = vmatprep.mubr.f32.mxu0 %v6351_v54 }
  0x76   : > { %2946 = vmatmul.mubr.msk.f32.gmra.mxu1 %vm413_vm8, %v4612_v60  ;;  %3800 = vmatmul.mubr.f32.vlgmr.msra.gmra.mxu0 %v6351_v54 }
  0x77   : > { %3263 = vmatprep.subr.mxu0 %v1238_v15  ;;  %3839 = vmatprep.subr.mxu1 %v1246_v29  ;;  %v1216_v15 = vld [vmem:[%s6348_s2 + $0x348] sm:$0xff] }
  0x78   : > { %3264 = vmatpush3.msra.mxu0 %v1222_v30  ;;  %3840 = vmatpush3.msra.mxu1 %v1246_v29  ;;  %v1231_v29 = vld [vmem:[%s6348_s2 + $0x3c0] sm:$0xff] }
  0x79   : > { %3265 = vmatprep.subr.mxu0 %v1237_v5  ;;  %1014 = vmatprep.mubr.f32.mxu1 %v4409_v4  ;;  %v1215_v30 = vld [vmem:[%s6348_s2 + $0x340] sm:$0xff]  ;;  %v1230_v5 = vld [vmem:[%s6348_s2 + $0x3b8] sm:$0xff] }
  0x7a   : > { %3802 = vmatprep.mubr.f32.mxu0 %v4320_v28  ;;  %3266 = vmatpush3.msra.mxu0 %v1221_v32  ;;  %v1219_v28 = vld [vmem:[%s6348_s2 + $0x360] sm:$0xff]  ;;  %v1242_v32 = vld [vmem:[%s6348_s2 + $0x418] sm:$0xff] }
  0x7b   : > { %1015 = vmatmul.mubr.f32.gmra.mxu1 %v4649_v21  ;;  %3803 = vmatmul.mubr.msk.f32.gmra.mxu0 %vm416_vm9, %v4332_v33  ;;  %v1244_v33 = vld [vmem:[%s6348_s2 + $0x428] sm:$0xff] }
  0x7c   : > { %3267 = vmatprep.subr.mxu0 %v1236_v37  ;;  %3841 = vmatprep.subr.mxu1 %v1245_v6  ;;  %v1214_v37 = vld [vmem:[%s6348_s2 + $0x338] sm:$0xff] }
  0x7d   : > { %3268 = vmatpush3.msra.mxu0 %v1220_v45  ;;  %3842 = vmatpush3.msra.mxu1 %v1245_v6  ;;  %v1229_v6 = vld [vmem:[%s6348_s2 + $0x3b0] sm:$0xff] }
  0x7e   : > { %3269 = vmatprep.subr.mxu0 %v1235_v47  ;;  %1019 = vmatprep.mubr.f32.mxu1 %v4436_v23  ;;  %v1213_v45 = vld [vmem:[%s6348_s2 + $0x330] sm:$0xff]  ;;  %v1228_v47 = vld [vmem:[%s6348_s2 + $0x3a8] sm:$0xff] }
  0x7f   : > { %3805 = vmatprep.mubr.f32.mxu0 %v4359_v44  ;;  %3270 = vmatpush3.msra.mxu0 %v1219_v28  ;;  %v1241_v28 = vld [vmem:[%s6348_s2 + $0x410] sm:$0xff] }
  0x80   : > { %2947 = vmatmul.mubr.msk.f32.gmra.mxu1 %vm413_vm8, %v4680_v50  ;;  %3806 = vmatmul.mubr.msk.f32.gmra.mxu0 %vm416_vm9, %v4375_v49 }
  0x81   : > { %3271 = vmatprep.subr.mxu0 %v1234_v48  ;;  %3843 = vmatprep.subr.mxu1 %v1244_v33  ;;  %v1212_v48 = vld [vmem:[%s6348_s2 + $0x328] sm:$0xff] }
  0x82   : > { %3272 = vmatpush3.msra.mxu0 %v1218_v51  ;;  %3844 = vmatpush3.msra.mxu1 %v1244_v33  ;;  %v1227_v33 = vld [vmem:[%s6348_s2 + $0x3a0] sm:$0xff] }
  0x83   : > { %3273 = vmatprep.subr.mxu0 %v1233_v59  ;;  %1024 = vmatprep.mubr.f32.mxu1 %v4447_v27  ;;  %v1211_v51 = vld [vmem:[%s6348_s2 + $0x320] sm:$0xff]  ;;  %v1226_v59 = vld [vmem:[%s6348_s2 + $0x398] sm:$0xff] }
  0x84   : > { %3808 = vmatprep.mubr.f32.mxu0 %v4422_v12  ;;  %3274 = vmatpush3.msra.mxu0 %v1217_v2  ;;  %v1240_v2 = vld [vmem:[%s6348_s2 + $0x408] sm:$0xff] }
  0x85   : > { %1025 = vmatmul.mubr.f32.gmra.mxu1 %v4696_v57  ;;  %3809 = vmatmul.mubr.msk.f32.gmra.mxu0 %vm416_vm9, %v4433_v22 }
  0x86   : > { %3275 = vmatprep.subr.mxu0 %v1232_v8  ;;  %3845 = vmatprep.subr.mxu1 %v1243_v10  ;;  %v1210_v8 = vld [vmem:[%s6348_s2 + $0x318] sm:$0xff] }
  0x87   : > { %3276 = vmatpush3.msra.mxu0 %v1216_v15  ;;  %3846 = vmatpush3.msra.mxu1 %v1243_v10  ;;  %v1225_v10 = vld [vmem:[%s6348_s2 + $0x390] sm:$0xff] }
  0x88   : > { %3277 = vmatprep.subr.mxu0 %v1231_v29  ;;  %1029 = vmatprep.mubr.f32.mxu1 %v4503_v61  ;;  %v1209_v15 = vld [vmem:[%s6348_s2 + $0x310] sm:$0xff]  ;;  %v1224_v29 = vld [vmem:[%s6348_s2 + $0x388] sm:$0xff] }
  0x89   : > { %3811 = vmatprep.mubr.f32.mxu0 %v4473_v42  ;;  %3278 = vmatpush3.msra.mxu0 %v1215_v30  ;;  %v1239_v30 = vld [vmem:[%s6348_s2 + $0x400] sm:$0xff] }
  0x8a   : > { %2948 = vmatmul.mubr.msk.f32.gmra.mxu1 %vm413_vm8, %v4712_v9  ;;  %3812 = vmatmul.mubr.msk.f32.gmra.mxu0 %vm416_vm9, %v4484_v52 }
  0x8b   : > { %3279 = vmatprep.subr.mxu0 %v1230_v5  ;;  %3847 = vmatprep.subr.mxu1 %v1242_v32  ;;  %v1208_v5 = vld [vmem:[%s6348_s2 + $0x308] sm:$0xff] }
  0x8c   : > { %3280 = vmatpush3.msra.mxu0 %v1214_v37  ;;  %3848 = vmatpush3.msra.mxu1 %v1242_v32  ;;  %v1223_v32 = vld [vmem:[%s6348_s2 + $0x380] sm:$0xff] }
  0x8d   : > { %3281 = vmatprep.subr.mxu0 %v1229_v6  ;;  %1034 = vmatprep.mubr.f32.mxu1 %v4506_v62  ;;  %v1207_v37 = vld [vmem:[%s6348_s2 + $0x300] sm:$0xff]  ;;  %v1800_v6 = vld [vmem:[%s6348_s2 + $0x278] sm:$0xff] }
  0x8e   : > { %3814 = vmatprep.mubr.f32.mxu0 %v4517_v1  ;;  %3282 = vmatpush3.msra.mxu0 %v1213_v45  ;;  %v1816_v45 = vld [vmem:[%s6348_s2 + $0x2f8] sm:$0xff] }
  0x8f   : > { %1035 = vmatmul.mubr.f32.gmra.mxu1 %v4730_v20  ;;  %3815 = vmatmul.mubr.msk.f32.gmra.mxu0 %vm416_vm9, %v4530_v14 }
  0x90   : > { %3283 = vmatprep.subr.mxu0 %v1228_v47  ;;  %3849 = vmatprep.subr.mxu1 %v1241_v28  ;;  %v1784_v47 = vld [vmem:[%s6348_s2 + $0x1f8] sm:$0xff] }
  0x91   : > { %3284 = vmatpush3.msra.mxu0 %v1212_v48  ;;  %3850 = vmatpush3.msra.mxu1 %v1241_v28  ;;  %v1782_v28 = vld [vmem:[%s6348_s2 + $0x1e8] sm:$0xff]  ;;  %v1780_v48 = vld [vmem:[%s6348_s2 + $0x1d8] sm:$0xff] }
  0x92   : > { %3285 = vmatprep.subr.mxu0 %v1227_v33  ;;  %1039 = vmatprep.mubr.f32.mxu1 %v4546_v25  ;;  %v226_v33 = vld [vmem:[%s4194_s21 + $0x80] sm:$0xff] }
  0x93   : > { %3817 = vmatprep.mubr.f32.mxu0 %v4562_v36  ;;  %3286 = vmatpush3.msra.mxu0 %v1211_v51  ;;  %v227_v51 = vld [vmem:[%s4194_s21 + $0x88] sm:$0xff] }
  0x94   : > { %2949 = vmatmul.mubr.msk.f32.gmra.mxu1 %vm413_vm8, %v4746_v31  ;;  %3818 = vmatmul.mubr.msk.f32.gmra.mxu0 %vm416_vm9, %v4573_v46 }
  0x95   : > { %3287 = vmatprep.subr.mxu0 %v1226_v59  ;;  %3851 = vmatprep.subr.mxu1 %v1240_v2  ;;  %v262_v59 = vmul.f32 %v4224_v38, %v226_v33 }
  0x96   : > { %3288 = vmatpush3.msra.mxu0 %v1210_v8  ;;  %3852 = vmatpush3.msra.mxu1 %v1240_v2  ;;  %v1813_v2 = vld [vmem:[%s6348_s2 + $0x2e0] sm:$0xff]  ;;  %v1778_v8 = vld [vmem:[%s6348_s2 + $0x1c8] sm:$0xff] }
  0x97   : > { %3289 = vmatprep.subr.mxu0 %v1225_v10  ;;  %1044 = vmatprep.mubr.f32.mxu1 %v4549_v26  ;;  %v298_v10 = vadd.f32 %v4226_v39, %v262_v59 }
  0x98   : > { %3820 = vmatprep.mubr.f32.mxu0 %v4605_v58  ;;  %3290 = vmatpush3.msra.mxu0 %v1209_v15 }
  0x99   : > { %1045 = vmatmul.mubr.f32.gmra.mxu1 %v4764_v34  ;;  %3821 = vmatmul.mubr.msk.f32.gmra.mxu0 %vm416_vm9, %v4616_v63  ;;  %vm330_vm6 = vcmp.ge.f32.partialorder %v298_v10, 0.0 }
  0x9a   : > { %3291 = vmatprep.subr.mxu0 %v1224_v29  ;;  %3853 = vmatprep.subr.mxu1 %v1239_v30  ;;  %v1776_v29 = vld [vmem:[%s6348_s2 + $0x1b8] sm:$0xff] }
  0x9b   : > { %3292 = vmatpush3.msra.mxu0 %v1208_v5  ;;  %3854 = vmatpush3.msra.mxu1 %v1239_v30  ;;  %v1775_v5 = vld [vmem:[%s6348_s2 + $0x1b0] sm:$0xff] }
  0x9c   : > { %3293 = vmatprep.subr.mxu0 %v1223_v32  ;;  %1319 = vmatprep.mubr.f32.mxu0 %v4298_v16  ;;  %v1799_v16 = vld [vmem:[%s6348_s2 + $0x270] sm:$0xff] }
  0x9d   : > { %3294 = vmatpush3.msra.mxu0 %v1207_v37  ;;  %3855 = vmatprep.mubr.f32.mxu1 %v4359_v44  ;;  %v1783_v44 = vld [vmem:[%s6348_s2 + $0x1f0] sm:$0xff]  ;;  %v229_v37 = vld [vmem:[%s4194_s21 + $0x98] sm:$0xff] }
  0x9e   : > { %2957 = vmatmul.mubr.msk.f32.vlgmr.msra.gmra.mxu0 %vm413_vm8, %v4407_v3  ;;  %3856 = vmatmul.mubr.msk.f32.vlgmr.msra.gmra.mxu1 %vm416_vm9, %v4375_v49  ;;  %v1798_v3 = vld [vmem:[%s6348_s2 + $0x268] sm:$0xff]  ;;  %v1815_v49 = vld [vmem:[%s6348_s2 + $0x2f0] sm:$0xff] }
  0x9f   : > { %3375 = vmatprep.subr.mxu1 %v1800_v6  ;;  %3879 = vmatprep.subr.mxu0 %v1816_v45  ;;  %v228_v32 = vld [vmem:[%s4194_s21 + $0x90] sm:$0xff]  ;;  %v1774_v6 = vld [vmem:[%s6348_s2 + $0x1a8] sm:$0xff] }
  0xa0   : > { %3376 = vmatpush3.msra.mxu1 %v1784_v47  ;;  %3880 = vmatpush3.msra.mxu0 %v1816_v45 }
  0xa1   : > { %3377 = vmatprep.subr.mxu1 %v1799_v16  ;;  %1324 = vmatprep.mubr.f32.mxu0 %v4301_v17  ;;  %v1797_v17 = vld [vmem:[%s6348_s2 + $0x260] sm:$0xff]  ;;  %v264_v16 = vmul.f32 %v4224_v38, %v228_v32  ;;  %v1755_v32 = vld [vmem:[%s6348_s2 + $0x170] sm:$0xff] }
  0xa2   : > { %3858 = vmatprep.mubr.f32.mxu1 %v4422_v12  ;;  %3378 = vmatpush3.msra.mxu1 %v1783_v44  ;;  %v1781_v12 = vld [vmem:[%s6348_s2 + $0x1e0] sm:$0xff]  ;;  %v265_v44 = vmul.f32 %v4224_v38, %v229_v37 }
  0xa3   : > { %1325 = vmatmul.mubr.f32.gmra.mxu0 %v4461_v35  ;;  %3859 = vmatmul.mubr.msk.f32.gmra.mxu1 %vm416_vm9, %v4433_v22  ;;  %v1796_v35 = vld [vmem:[%s6348_s2 + $0x258] sm:$0xff]  ;;  %v1814_v22 = vld [vmem:[%s6348_s2 + $0x2e8] sm:$0xff] }
  0xa4   : > { %3379 = vmatprep.subr.mxu1 %v1798_v3  ;;  %3881 = vmatprep.subr.mxu0 %v1815_v49  ;;  %v1788_v3 = vld [vmem:[%s6348_s2 + $0x218] sm:$0xff] }
  0xa5   : > { %3380 = vmatpush3.msra.mxu1 %v1782_v28  ;;  %3882 = vmatpush3.msra.mxu0 %v1815_v49  ;;  %v1810_v49 = vld [vmem:[%s6348_s2 + $0x2c8] sm:$0xff]  ;;  %v1772_v28 = vld [vmem:[%s6348_s2 + $0x198] sm:$0xff] }
  0xa6   : > { %3381 = vmatprep.subr.mxu1 %v1797_v17  ;;  %1329 = vmatprep.mubr.f32.mxu0 %v4347_v40  ;;  %v1795_v40 = vld [vmem:[%s6348_s2 + $0x250] sm:$0xff]  ;;  %v300_v17 = vadd.f32 %v4226_v39, %v264_v16 }
  0xa7   : > { %3861 = vmatprep.mubr.f32.mxu1 %v4473_v42  ;;  %3382 = vmatpush3.msra.mxu1 %v1781_v12  ;;  %v1779_v42 = vld [vmem:[%s6348_s2 + $0x1d0] sm:$0xff]  ;;  %v301_v12 = vadd.f32 %v4226_v39, %v265_v44  ;;  %v234_v44 = vld [vmem:[%s4194_s21 + $0xc0] sm:$0xff] }
  0xa8   : > { %2958 = vmatmul.mubr.msk.f32.gmra.mxu0 %vm413_vm8, %v4526_v11  ;;  %3862 = vmatmul.mubr.msk.f32.gmra.mxu1 %vm416_vm9, %v4484_v52  ;;  %v263_v11 = vmul.f32 %v4224_v38, %v227_v51  ;;  %v1794_v52 = vld [vmem:[%s6348_s2 + $0x248] sm:$0xff]  ;;  %vm332_vm10 = vcmp.ge.f32.partialorder %v300_v17, 0.0 }
  0xa9   : > { %3383 = vmatprep.subr.mxu1 %v1796_v35  ;;  %3883 = vmatprep.subr.mxu0 %v1814_v22  ;;  %v230_v35 = vld [vmem:[%s4194_s21 + $0xa0] sm:$0xff]  ;;  %v1786_v51 = vld [vmem:[%s6348_s2 + $0x208] sm:$0xff]  ;;  %vm333_vm11 = vcmp.ge.f32.partialorder %v301_v12, 0.0 }
  0xaa   : > { %3384 = vmatpush3.msra.mxu1 %v1780_v48  ;;  %3884 = vmatpush3.msra.mxu0 %v1814_v22  ;;  %v299_v15 = vadd.f32 %v4226_v39, %v263_v11  ;;  %v231_v48 = vld [vmem:[%s4194_s21 + $0xa8] sm:$0xff]  ;;  %v266_v11 = vmul.f32 %v4224_v38, %v230_v35  ;;  %v1753_v35 = vld [vmem:[%s6348_s2 + $0x160] sm:$0xff] }
  0xab   : > { %3385 = vmatprep.subr.mxu1 %v1795_v40  ;;  %1334 = vmatprep.mubr.f32.mxu0 %v4350_v41  ;;  %v1793_v41 = vld [vmem:[%s6348_s2 + $0x240] sm:$0xff] }
  0xac   : > { %3864 = vmatprep.mubr.f32.mxu1 %v4517_v1  ;;  %3386 = vmatpush3.msra.mxu1 %v1779_v42  ;;  %v1777_v1 = vld [vmem:[%s6348_s2 + $0x1c0] sm:$0xff]  ;;  %v363_v30 = vmul.f32 0.01, %v299_v15  ;;  %vm331_vm7 = vcmp.ge.f32.partialorder %v299_v15, 0.0 }
  0xad   : > { %1335 = vmatmul.mubr.f32.gmra.mxu0 %v4569_v43  ;;  %3865 = vmatmul.mubr.msk.f32.gmra.mxu1 %vm416_vm9, %v4530_v14  ;;  %v1792_v14 = vld [vmem:[%s6348_s2 + $0x238] sm:$0xff]  ;;  %v1809_v40 = vld [vmem:[%s6348_s2 + $0x2c0] sm:$0xff] }
  0xae   : > { %3387 = vmatprep.subr.mxu1 %v1794_v52  ;;  %3885 = vmatprep.subr.mxu0 %v1813_v2  ;;  %v1812_v43 = vld [vmem:[%s6348_s2 + $0x2d8] sm:$0xff]  ;;  %v5116_v47 = vsel %vm331_vm7, %v299_v15, %v363_v30  ;;  %v364_v52 = vmul.f32 0.01, %v300_v17 }
  0xaf   : > { %3388 = vmatpush3.msra.mxu1 %v1778_v8  ;;  %3886 = vmatpush3.msra.mxu0 %v1813_v2  ;;  %v1196_v59 = vrot.slane %v5116_v47, 7  ;;  %v365_v2 = vmul.f32 0.01, %v301_v12  ;;  %v267_v8 = vmul.f32 %v4224_v38, %v231_v48  ;;  %v1808_v15 = vld [vmem:[%s6348_s2 + $0x2b8] sm:$0xff] }
  0xb0   : > { %3389 = vmatprep.subr.mxu1 %v1793_v41  ;;  %1339 = vmatprep.mubr.f32.mxu0 %v4396_v0  ;;  %v1791_v0 = vld [vmem:[%s6348_s2 + $0x230] sm:$0xff]  ;;  %v1785_v41 = vld [vmem:[%s6348_s2 + $0x200] sm:$0xff]  ;;  %v233_v30 = vld [vmem:[%s4194_s21 + $0xb8] sm:$0xff] }
  0xb1   : > { %3867 = vmatprep.mubr.f32.mxu1 %v4562_v36  ;;  %3390 = vmatpush3.msra.mxu1 %v1777_v1  ;;  %v362_v36 = vmul.f32 0.01, %v298_v10  ;;  %v1769_v1 = vld [vmem:[%s6348_s2 + $0x180] sm:$0xff] }
  0xb2   : > { %2959 = vmatmul.mubr.msk.f32.gmra.mxu0 %vm413_vm8, %v4612_v60  ;;  %3868 = vmatmul.mubr.msk.f32.gmra.mxu1 %vm416_vm9, %v4573_v46  ;;  %v1790_v46 = vld [vmem:[%s6348_s2 + $0x228] sm:$0xff]  ;;  %v1811_v60 = vld [vmem:[%s6348_s2 + $0x2d0] sm:$0xff] }
  0xb3   : > { %3391 = vmatprep.subr.mxu1 %v1792_v14  ;;  %3887 = vmatprep.subr.mxu0 %v1812_v43  ;;  %v5114_v45 = vsel %vm330_vm6, %v298_v10, %v362_v36  ;;  %v302_v10 = vadd.f32 %v4226_v39, %v266_v11  ;;  %v1756_v14 = vld [vmem:[%s6348_s2 + $0x178] sm:$0xff]  ;;  %v232_v36 = vld [vmem:[%s4194_s21 + $0xb0] sm:$0xff] }
  0xb4   : > { %3392 = vmatpush3.msra.mxu1 %v1776_v29  ;;  %3888 = vmatpush3.msra.mxu0 %v1812_v43  ;;  %v1195_v42 = vrot.slane %v5114_v45, 7  ;;  %v5204_v43 = vsel %vm332_vm10, %v300_v17, %v364_v52  ;;  %v5206_v29 = vsel %vm333_vm11, %v301_v12, %v365_v2 }
  0xb5   : > { %3393 = vmatprep.subr.mxu1 %v1791_v0  ;;  %1344 = vmatprep.mubr.f32.mxu0 %v4409_v4  ;;  %v1789_v4 = vld [vmem:[%s6348_s2 + $0x220] sm:$0xff]  ;;  %v303_v0 = vadd.f32 %v4226_v39, %v267_v8  ;;  %v366_v37 = vmul.f32 0.01, %v302_v10  ;;  %vm334_vm12 = vcmp.ge.f32.partialorder %v302_v10, 0.0 }
  0xb6   : > { %3870 = vmatprep.mubr.f32.mxu1 %v4605_v58  ;;  %3394 = vmatpush3.msra.mxu1 %v1775_v5  ;;  %v1773_v58 = vld [vmem:[%s6348_s2 + $0x1a0] sm:$0xff]  ;;  %v1637_v5 = vrot.slane %v5204_v43, 7 }
  0xb7   : > { %1345 = vmatmul.mubr.f32.gmra.mxu0 %v4649_v21  ;;  %3871 = vmatmul.mubr.msk.f32.gmra.mxu1 %vm416_vm9, %v4616_v63  ;;  %v1201_v21 = vrot.slane %v5114_v45, 1  ;;  %v1202_v63 = vrot.slane %v5116_v47, 1  ;;  %vm335_vm13 = vcmp.ge.f32.partialorder %v303_v0, 0.0 }
  0xb8   : > { %3395 = vmatprep.subr.mxu1 %v1790_v46  ;;  %3889 = vmatprep.subr.mxu0 %v1811_v60  ;;  %v1643_v46 = vrot.slane %v5206_v29, 7 }
  0xb9   : > { %3396 = vmatpush3.msra.mxu1 %v1774_v6  ;;  %3890 = vmatpush3.msra.mxu0 %v1811_v60  ;;  %v5157_v22 = vsel %vm476_vm4, %v1201_v21, %v1202_v63  ;;  %v5165_v33 = vsel %vm476_vm4, %v1202_v63, %v1201_v21  ;;  %v268_v60 = vmul.f32 %v4224_v38, %v232_v36  ;;  %v367_v6 = vmul.f32 0.01, %v303_v0 }
  0xba   : > { %3397 = vmatprep.subr.mxu1 %v1789_v4  ;;  %1349 = vmatprep.mubr.f32.mxu0 %v4436_v23  ;;  %v1787_v23 = vld [vmem:[%s6348_s2 + $0x210] sm:$0xff]  ;;  %v269_v4 = vmul.f32 %v4224_v38, %v233_v30  ;;  %v5248_v21 = vsel %vm334_vm12, %v302_v10, %v366_v37  ;;  %v237_v10 = vld [vmem:[%s4194_s21 + $0xd8] sm:$0xff] }
  0xbb   : > { %3873 = vmatprep.mubr.f32.mxu1 %v4642_v18  ;;  %3398 = vmatpush3.msra.mxu1 %v1773_v58  ;;  %v5238_v58 = vsel %vm431_vm5, %v1643_v46, %v1637_v5  ;;  %v304_v16 = vadd.f32 %v4226_v39, %v268_v60  ;;  %v5250_v63 = vsel %vm335_vm13, %v303_v0, %v367_v6  ;;  %v1802_v60 = vld [vmem:[%s6348_s2 + $0x288] sm:$0xff] }
  0xbc   : > { %2960 = vmatmul.mubr.msk.f32.gmra.mxu0 %vm413_vm8, %v4680_v50  ;;  %3874 = vmatmul.mubr.msk.f32.gmra.mxu1 %vm416_vm9, %v4653_v24  ;;  %v1771_v50 = vld [vmem:[%s6348_s2 + $0x190] sm:$0xff]  ;;  %v1644_v17 = vrot.slane %v5250_v63, 7  ;;  %v273_v36 = vmul.f32 %v4224_v38, %v237_v10 }
  0xbd   : > { %3399 = vmatprep.subr.mxu1 %v1788_v3  ;;  %3891 = vmatprep.subr.mxu0 %v1810_v49  ;;  %v305_v3 = vadd.f32 %v4226_v39, %v269_v4  ;;  %vm336_vm14 = vcmp.ge.f32.partialorder %v304_v16, 0.0  ;;  %v4056_v4 = vld [vmem:[%s6348_s2 + $0x148] sm:$0xff] }
  0xbe   : > { %3400 = vmatpush3.msra.mxu1 %v1772_v28  ;;  %3892 = vmatpush3.msra.mxu0 %v1810_v49  ;;  %v235_v49 = vld [vmem:[%s4194_s21 + $0xc8] sm:$0xff]  ;;  %v270_v28 = vmul.f32 %v4224_v38, %v234_v44  ;;  %v309_v6 = vadd.f32 %v4226_v39, %v273_v36  ;;  %v1801_v44 = vld [vmem:[%s6348_s2 + $0x280] sm:$0xff] }
  0xbf   : > { %3401 = vmatprep.subr.mxu1 %v1787_v23  ;;  %1354 = vmatprep.mubr.f32.mxu0 %v4447_v27  ;;  %v1770_v27 = vld [vmem:[%s6348_s2 + $0x188] sm:$0xff]  ;;  %v5265_v23 = vsel %vm431_vm5, %v1637_v5, %v1643_v46  ;;  %v271_v12 = vmul.f32 %v4224_v38, %v235_v49  ;;  %v369_v48 = vmul.f32 0.01, %v305_v3  ;;  %vm337_vm15 = vcmp.ge.f32.partialorder %v305_v3, 0.0 }
  0xc0   : > { %3876 = vmatprep.mubr.f32.mxu1 %v5157_v22  ;;  %3402 = vmatpush3.msra.mxu1 %v1771_v50  ;;  %v368_v50 = vmul.f32 0.01, %v304_v16  ;;  %vm341_vm3 = vcmp.ge.f32.partialorder %v309_v6, 0.0 }
  0xc1   : > { %1355 = vmatmul.mubr.f32.gmra.mxu0 %v4696_v57  ;;  %3877 = vmatmul.mubr.msk.f32.gmra.mxu1 %vm416_vm9, %v5165_v33  ;;  %v5194_v57 = vsel %vm431_vm5, %v1196_v59, %v1195_v42  ;;  %v5294_v11 = vsel %vm337_vm15, %v305_v3, %v369_v48  ;;  %v1673_v3 = vrot.slane %v5204_v43, 1  ;;  %v1724_v48 = vld [vmem:[%s6348_s2 + $0x78] sm:$0xff] }
  0xc2   : > { %3403 = vmatprep.subr.mxu1 %v1786_v51  ;;  %3893 = vmatprep.subr.mxu0 %v1809_v40  ;;  %v306_v51 = vadd.f32 %v4226_v39, %v270_v28  ;;  %v1645_v8 = vrot.slane %v5294_v11, 7  ;;  %v1679_v28 = vrot.slane %v5206_v29, 1 }
  0xc3   : > { %3404 = vmatpush3.msra.mxu1 %v1770_v27  ;;  %3894 = vmatpush3.msra.mxu0 %v1809_v40 }
  0xc4   : > { %3405 = vmatprep.subr.mxu1 %v1785_v41  ;;  %1359 = vmatprep.mubr.f32.mxu0 %v4503_v61  ;;  %v5220_v61 = vsel %vm431_vm5, %v1195_v42, %v1196_v59  ;;  %v307_v42 = vadd.f32 %v4226_v39, %v271_v12  ;;  %v5292_v59 = vsel %vm336_vm14, %v304_v16, %v368_v50  ;;  %v370_v27 = vmul.f32 0.01, %v306_v51  ;;  %v4057_v12 = vld [vmem:[%s6348_s2 + $0x140] sm:$0xff]  ;;  %v1740_v50 = vld [vmem:[%s6348_s2 + $0xf8] sm:$0xff] }
  0xc5   : > { %3406 = vmatpush3.msra.mxu1 %v1769_v1  ;;  %1881 = vmatprep.mubr.f32.mxu1 %v5114_v45  ;;  %v1639_v2 = vrot.slane %v5292_v59, 7  ;;  %v236_v1 = vld [vmem:[%s4194_s21 + $0xd0] sm:$0xff]  ;;  %vm338_vm0 = vcmp.ge.f32.partialorder %v306_v51, 0.0 }
  0xc6   : > { %2961 = vmatmul.mubr.msk.f32.gmra.mxu0 %vm413_vm8, %v4712_v9  ;;  %2973 = vmatmul.mubr.msk.f32.vlgmr.msra.gmra.mxu1 %vm413_vm8, %v5194_v57  ;;  %v1807_v9 = vld [vmem:[%s6348_s2 + $0x2b0] sm:$0xff]  ;;  %v371_v41 = vmul.f32 0.01, %v307_v42  ;;  %vm339_vm1 = vcmp.ge.f32.partialorder %v307_v42, 0.0  ;;  %v272_v0 = vmul.f32 %v4224_v38, %v236_v1  ;;  %v5328_v5 = vsel %vm338_vm0, %v306_v51, %v370_v27  ;;  %v4058_v27 = vld [vmem:[%s6348_s2 + $0x138] sm:$0xff] }
  0xc7   : > { %3895 = vmatprep.subr.mxu0 %v1808_v15  ;;  %3935 = vmatprep.subr.mxu1 %v1756_v14  ;;  %v5326_v30 = vsel %vm431_vm5, %v1645_v8, %v1639_v2  ;;  %6384 = vst [vmem:[#allocation2_spill] sm:$0xff] %v5328_v5  ;;  %v5352_v16 = vsel %vm431_vm5, %v1639_v2, %v1645_v8  ;;  %v1739_v51 = vld [vmem:[%s6348_s2 + $0xf0] sm:$0xff]  ;;  %v1674_v8 = vrot.slane %v5248_v21, 1 }
  0xc8   : > { %3896 = vmatpush3.msra.mxu0 %v1808_v15  ;;  %3936 = vmatpush3.msra.mxu1 %v1756_v14  ;;  %v1803_v15 = vld [vmem:[%s6348_s2 + $0x290] sm:$0xff]  ;;  %v5330_v46 = vsel %vm339_vm1, %v307_v42, %v371_v41  ;;  %v308_v37 = vadd.f32 %v4226_v39, %v272_v0  ;;  %v5393_v42 = vsel %vm476_vm4, %v1673_v3, %v1679_v28  ;;  %v1680_v41 = vrot.slane %v5250_v63, 1  ;;  %v1738_v0 = vld [vmem:[%s6348_s2 + $0xe8] sm:$0xff] }
  0xc9   : > { %1364 = vmatprep.mubr.f32.mxu0 %v4506_v62  ;;  %1886 = vmatprep.mubr.f32.mxu1 %v5116_v47  ;;  %v1806_v62 = vld [vmem:[%s6348_s2 + $0x2a8] sm:$0xff]  ;;  %v1751_v14 = vld [vmem:[%s6348_s2 + $0x150] sm:$0xff]  ;;  %6385 = vst [vmem:[#allocation3_spill] sm:$0xff] %v5330_v46 }
  0xca   : > { %1365 = vmatmul.mubr.f32.gmra.mxu0 %v4730_v20  ;;  %1887 = vmatmul.mubr.f32.gmra.mxu1 %v5220_v61  ;;  %v1754_v20 = vld [vmem:[%s6348_s2 + $0x168] sm:$0xff]  ;;  %vm340_vm2 = vcmp.ge.f32.partialorder %v308_v37, 0.0  ;;  %v1723_v2 = vld [vmem:[%s6348_s2 + $0x70] sm:$0xff] }
  0xcb   : > { %3897 = vmatprep.subr.mxu0 %v1807_v9  ;;  %3937 = vmatprep.subr.mxu1 %v1755_v32 }
  0xcc   : > { %3898 = vmatpush3.msra.mxu0 %v1807_v9  ;;  %3938 = vmatpush3.msra.mxu1 %v1755_v32  ;;  %v1640_v9 = vrot.slane %v5328_v5, 7  ;;  %v1646_v32 = vrot.slane %v5330_v46, 7 }
  0xcd   : > { %1369 = vmatprep.mubr.f32.mxu0 %v4546_v25  ;;  %1891 = vmatprep.mubr.f32.mxu1 %v5204_v43  ;;  %v1638_v25 = vrot.slane %v5248_v21, 7 }
  0xce   : > { %2962 = vmatmul.mubr.msk.f32.gmra.mxu0 %vm413_vm8, %v4746_v31  ;;  %2974 = vmatmul.mubr.msk.f32.gmra.mxu1 %vm413_vm8, %v5238_v58  ;;  %v1805_v31 = vld [vmem:[%s6348_s2 + $0x2a0] sm:$0xff]  ;;  %v5366_v49 = vsel %vm431_vm5, %v1646_v32, %v1640_v9 }
  0xcf   : > { %3899 = vmatprep.subr.mxu0 %v1806_v62  ;;  %3939 = vmatprep.subr.mxu1 %v1754_v20  ;;  %v5283_v40 = vsel %vm431_vm5, %v1644_v17, %v1638_v25  ;;  %v5306_v52 = vsel %vm431_vm5, %v1638_v25, %v1644_v17  ;;  %6386 = vst [vmem:[#allocation4_spill] sm:$0xff] %v5366_v49  ;;  %v372_v25 = vmul.f32 0.01, %v308_v37  ;;  %v373_v17 = vmul.f32 0.01, %v309_v6 }
  0xd0   : > { %3900 = vmatpush3.msra.mxu0 %v1806_v62  ;;  %3940 = vmatpush3.msra.mxu1 %v1754_v20  ;;  %v238_v62 = vld [vmem:[%s4194_s21 + $0xe0] sm:$0xff]  ;;  %v239_v20 = vld [vmem:[%s4194_s21 + $0xe8] sm:$0xff] }
  0xd1   : > { %1374 = vmatprep.mubr.f32.mxu0 %v4549_v26  ;;  %1896 = vmatprep.mubr.f32.mxu1 %v5206_v29  ;;  %v1804_v26 = vld [vmem:[%s6348_s2 + $0x298] sm:$0xff] }
  0xd2   : > { %1375 = vmatmul.mubr.f32.gmra.mxu0 %v4764_v34  ;;  %1897 = vmatmul.mubr.f32.gmra.mxu1 %v5265_v23  ;;  %v1752_v34 = vld [vmem:[%s6348_s2 + $0x158] sm:$0xff] }
  0xd3   : > { %3901 = vmatprep.subr.mxu0 %v1805_v31  ;;  %3941 = vmatprep.subr.mxu1 %v1753_v35 }
  0xd4   : > { %3902 = vmatpush3.msra.mxu0 %v1805_v31  ;;  %3942 = vmatpush3.msra.mxu1 %v1753_v35  ;;  %v274_v31 = vmul.f32 %v4224_v38, %v238_v62  ;;  %v275_v35 = vmul.f32 %v4224_v38, %v239_v20  ;;  %v241_v62 = vld [vmem:[%s4194_s21 + $0xf8] sm:$0xff]  ;;  %v4059_v20 = vld [vmem:[%s6348_s2 + $0x130] sm:$0xff] }
  0xd5   : > { %1379 = vmatprep.mubr.f32.mxu0 %v4591_v55  ;;  %1901 = vmatprep.mubr.f32.mxu1 %v5248_v21 }
  0xd6   : > { %2963 = vmatmul.mubr.msk.f32.gmra.mxu0 %vm413_vm8, %v4780_v53  ;;  %2975 = vmatmul.mubr.msk.f32.gmra.mxu1 %vm413_vm8, %v5283_v40  ;;  %v310_v1 = vadd.f32 %v4226_v39, %v274_v31  ;;  %v311_v10 = vadd.f32 %v4226_v39, %v275_v35  ;;  %v1736_v31 = vld [vmem:[%s6348_s2 + $0xd8] sm:$0xff]  ;;  %v1746_v35 = vld [vmem:[%s6348_s2 + $0x128] sm:$0xff] }
  0xd7   : > { %3903 = vmatprep.subr.mxu0 %v1804_v26  ;;  %3943 = vmatprep.subr.mxu1 %v1752_v34 }
  0xd8   : > { %3904 = vmatpush3.msra.mxu0 %v1804_v26  ;;  %3944 = vmatpush3.msra.mxu1 %v1752_v34  ;;  %v5395_v26 = vsel %vm340_vm2, %v308_v37, %v372_v25  ;;  %v5397_v34 = vsel %vm341_vm3, %v309_v6, %v373_v17  ;;  %v5436_v37 = vsel %vm476_vm4, %v1674_v8, %v1680_v41  ;;  %v374_v6 = vmul.f32 0.01, %v310_v1 }
  0xd9   : > { %1384 = vmatprep.mubr.f32.mxu0 %v4594_v56  ;;  %1906 = vmatprep.mubr.f32.mxu1 %v5250_v63  ;;  %6387 = vst [vmem:[#allocation5_spill] sm:$0xff] %v5395_v26  ;;  %6388 = vst [vmem:[#allocation6_spill] sm:$0xff] %v5397_v34  ;;  %v1641_v36 = vrot.slane %v5395_v26, 7  ;;  %v1681_v25 = vrot.slane %v5294_v11, 1  ;;  %vm342_vm6 = vcmp.ge.f32.partialorder %v310_v1, 0.0  ;;  %vm343_vm7 = vcmp.ge.f32.partialorder %v311_v10, 0.0 }
  0xda   : > { %1385 = vmatmul.mubr.f32.gmra.mxu0 %v4798_v7  ;;  %1907 = vmatmul.mubr.f32.gmra.mxu1 %v5306_v52 }
  0xdb   : > { %3905 = vmatprep.subr.mxu0 %v1803_v15  ;;  %3945 = vmatprep.subr.mxu1 %v1751_v14 }
  0xdc   : > { %3906 = vmatpush3.msra.mxu0 %v1803_v15  ;;  %3946 = vmatpush3.msra.mxu1 %v1751_v14  ;;  %v5411_v15 = vsel %vm431_vm5, %v1640_v9, %v1646_v32  ;;  %v5415_v14 = vsel %vm476_vm4, %v1679_v28, %v1673_v3  ;;  %v1722_v9 = vld [vmem:[%s6348_s2 + $0x68] sm:$0xff]  ;;  %v1737_v32 = vld [vmem:[%s6348_s2 + $0xe0] sm:$0xff]  ;;  %v1675_v28 = vrot.slane %v5292_v59, 1 }
  0xdd   : > { %1389 = vmatprep.mubr.f32.mxu0 %v5114_v45  ;;  %1911 = vmatprep.mubr.f32.mxu1 %v5292_v59  ;;  %6389 = vst [vmem:[#allocation7_spill] sm:$0xff] %v5411_v15  ;;  %v1721_v3 = vld [vmem:[%s6348_s2 + $0x60] sm:$0xff] }
  0xde   : > { %2964 = vmatmul.mubr.msk.f32.gmra.mxu0 %vm413_vm8, %v5194_v57  ;;  %2976 = vmatmul.mubr.msk.f32.gmra.mxu1 %vm413_vm8, %v5326_v30 }
  0xdf   : > { %3907 = vmatprep.subr.mxu0 %v1802_v60  ;;  %3947 = vmatprep.subr.mxu1 %v4056_v4 }
  0xe0   : > { %3908 = vmatpush3.msra.mxu0 %v1802_v60  ;;  %3948 = vmatpush3.msra.mxu1 %v4056_v4  ;;  %v1647_v60 = vrot.slane %v5397_v34, 7  ;;  %v375_v4 = vmul.f32 0.01, %v311_v10 }
  0xe1   : > { %1394 = vmatprep.mubr.f32.mxu0 %v5116_v47  ;;  %1916 = vmatprep.mubr.f32.mxu1 %v5294_v11 }
  0xe2   : > { %1395 = vmatmul.mubr.f32.gmra.mxu0 %v5220_v61  ;;  %1917 = vmatmul.mubr.f32.gmra.mxu1 %v5352_v16  ;;  %v5450_v17 = vsel %vm431_vm5, %v1647_v60, %v1641_v36 }
  0xe3   : > { %3909 = vmatprep.subr.mxu0 %v1801_v44  ;;  %3949 = vmatprep.subr.mxu1 %v4057_v12  ;;  %6390 = vst [vmem:[#allocation8_spill] sm:$0xff] %v5450_v17 }
  0xe4   : > { %3910 = vmatpush3.msra.mxu0 %v1801_v44  ;;  %3950 = vmatpush3.msra.mxu1 %v4057_v12  ;;  %v240_v44 = vld [vmem:[%s4194_s21 + $0xf0] sm:$0xff]  ;;  %v5454_v12 = vsel %vm476_vm4, %v1680_v41, %v1674_v8  ;;  %v5472_v8 = vsel %vm342_vm6, %v310_v1, %v374_v6  ;;  %v5475_v41 = vsel %vm343_vm7, %v311_v10, %v375_v4  ;;  %v1676_v4 = vrot.slane %v5328_v5, 1  ;;  %s208_s21 = scalar_lea.vmem %s6350_s4, %s2926_s8 }
  0xe5   : > { %1921 = vmatprep.mubr.f32.mxu1 %v5328_v5  ;;  %3911 = vmatprep.mubr.f32.mxu0 %v5157_v22  ;;  %6392 = vst [vmem:[#allocation10_spill] sm:$0xff] %v5472_v8  ;;  %6393 = vst [vmem:[#allocation11_spill] sm:$0xff] %v5475_v41  ;;  %v5503_v6 = vsel %vm476_vm4, %v1681_v25, %v1675_v28 }
  0xe6   : > { %2977 = vmatmul.mubr.msk.f32.gmra.mxu1 %vm413_vm8, %v5366_v49  ;;  %3912 = vmatmul.mubr.msk.f32.vlgmr.msra.gmra.mxu0 %vm416_vm9, %v5165_v33 }
  0xe7   : > { %3487 = vmatprep.subr.mxu0 %v1740_v50  ;;  %3951 = vmatprep.subr.mxu1 %v4058_v27  ;;  %v276_v50 = vmul.f32 %v4224_v38, %v240_v44  ;;  %v1682_v44 = vrot.slane %v5330_v46, 1 }
  0xe8   : > { %3488 = vmatpush3.msra.mxu0 %v1724_v48  ;;  %3952 = vmatpush3.msra.mxu1 %v4058_v27  ;;  %v277_v48 = vmul.f32 %v4224_v38, %v241_v62  ;;  %v1735_v38 = vld [vmem:[%s6348_s2 + $0xd0] sm:$0xff]  ;;  %v1642_v62 = vrot.slane %v5472_v8, 7 }
  0xe9   : > { %3489 = vmatprep.subr.mxu0 %v1739_v51  ;;  %1926 = vmatprep.mubr.f32.mxu1 %v5330_v46 }
  0xea   : > { %3914 = vmatprep.mubr.f32.mxu0 %v5393_v42  ;;  %3490 = vmatpush3.msra.mxu0 %v1723_v2  ;;  %v1720_v2 = vld [vmem:[%s6348_s2 + $0x58] sm:$0xff] }
  0xeb   : > { %1927 = vmatmul.mubr.f32.gmra.mxu1 %v5411_v15  ;;  %3915 = vmatmul.mubr.msk.f32.gmra.mxu0 %vm416_vm9, %v5415_v14 }
  0xec   : > { %3491 = vmatprep.subr.mxu0 %v1738_v0  ;;  %3953 = vmatprep.subr.mxu1 %v4059_v20  ;;  %v5488_v0 = vsel %vm476_vm4, %v1675_v28, %v1681_v25 }
  0xed   : > { %3492 = vmatpush3.msra.mxu0 %v1722_v9  ;;  %3954 = vmatpush3.msra.mxu1 %v4059_v20  ;;  %v1719_v9 = vld [vmem:[%s6348_s2 + $0x50] sm:$0xff]  ;;  %v1648_v20 = vrot.slane %v5475_v41, 7 }
  0xee   : > { %3493 = vmatprep.subr.mxu0 %v1737_v32  ;;  %1931 = vmatprep.mubr.f32.mxu1 %v5395_v26  ;;  %v5465_v51 = vpop.f32.mrf.mxu0  ;;  %v3745_v27 = vpop.f32.mrf.mxu1  ;;  %v5499_v32 = vsel %vm431_vm5, %v1641_v36, %v1647_v60  ;;  %v1734_v36 = vld [vmem:[%s6348_s2 + $0xc8] sm:$0xff]  ;;  %v1745_v60 = vld [vmem:[%s6348_s2 + $0x120] sm:$0xff] }
  0xef   : > { %6391 = vst [vmem:[#allocation9_spill] sm:$0xff] %v5465_v51  ;;  %3917 = vmatprep.mubr.f32.mxu0 %v5436_v37  ;;  %3494 = vmatpush3.msra.mxu0 %v1721_v3  ;;  %6396 = vst [vmem:[#allocation14_spill] sm:$0xff] %v5499_v32  ;;  %v312_v3 = vadd.f32 %v4226_v39, %v276_v50  ;;  %v5533_v50 = vsel %vm476_vm4, %v1676_v4, %v1682_v44 }
  0xf0   : > { %2978 = vmatmul.mubr.msk.f32.gmra.mxu1 %vm413_vm8, %v5450_v17  ;;  %3918 = vmatmul.mubr.msk.f32.gmra.mxu0 %vm416_vm9, %v5454_v12  ;;  %v5490_v1 = vpop.f32.mrf.mxu0  ;;  %v5492_v10 = vpop.f32.mrf.mxu1  ;;  %v5546_v54 = vsel %vm431_vm5, %v1648_v20, %v1642_v62 }
  0xf1   : > { %6394 = vst [vmem:[#allocation12_spill] sm:$0xff] %v5490_v1  ;;  %6395 = vst [vmem:[#allocation13_spill] sm:$0xff] %v5492_v10  ;;  %3495 = vmatprep.subr.mxu0 %v1736_v31  ;;  %3955 = vmatprep.subr.mxu1 %v1746_v35  ;;  %v313_v31 = vadd.f32 %v4226_v39, %v277_v48  ;;  %v1718_v39 = vld [vmem:[%s6348_s2 + $0x48] sm:$0xff]  ;;  %v5537_v48 = vsel %vm476_vm4, %v1682_v44, %v1676_v4  ;;  %v376_v10 = vmul.f32 0.01, %v312_v3 }
  0xf2   : > { %3496 = vmatpush3.msra.mxu0 %v1720_v2  ;;  %3956 = vmatpush3.msra.mxu1 %v1746_v35  ;;  %v1733_v35 = vld [vmem:[%s6348_s2 + $0xc0] sm:$0xff]  ;;  %6397 = vst [vmem:[#allocation15_spill] sm:$0xff] %v5546_v54  ;;  %v1677_v4 = vrot.slane %v5395_v26, 1  ;;  %v1683_v44 = vrot.slane %v5397_v34, 1  ;;  %vm344_vm10 = vcmp.ge.f32.partialorder %v312_v3, 0.0 }
  0xf3   : > { %3497 = vmatprep.subr.mxu0 %v1735_v38  ;;  %1936 = vmatprep.mubr.f32.mxu1 %v5397_v34  ;;  %v3074_v28 = vpop.f32.mrf.mxu0  ;;  %v5518_v25 = vpop.f32.mrf.mxu1  ;;  %v377_v1 = vmul.f32 0.01, %v313_v31  ;;  %vm345_vm11 = vcmp.ge.f32.partialorder %v313_v31, 0.0  ;;  %v1715_v34 = vld [vmem:[%s6348_s2 + $0x30] sm:$0xff] }
  0xf4   : > { %3920 = vmatprep.mubr.f32.mxu0 %v5488_v0  ;;  %3498 = vmatpush3.msra.mxu0 %v1719_v9  ;;  %v1717_v9 = vld [vmem:[%s6348_s2 + $0x40] sm:$0xff] }
  0xf5   : > { %1937 = vmatmul.mubr.f32.gmra.mxu1 %v5499_v32  ;;  %3921 = vmatmul.mubr.msk.f32.gmra.mxu0 %vm416_vm9, %v5503_v6  ;;  %v3075_v2 = vpop.f32.mrf.mxu0  ;;  %v5539_v38 = vpop.f32.mrf.mxu1  ;;  %v1744_v32 = vld [vmem:[%s6348_s2 + $0x118] sm:$0xff] }
  0xf6   : > { %3499 = vmatprep.subr.mxu0 %v1734_v36  ;;  %3957 = vmatprep.subr.mxu1 %v1745_v60  ;;  %v3076_v51 = vadd.f32 %v3075_v2, %v3074_v28  ;;  %v1732_v36 = vld [vmem:[%s6348_s2 + $0xb8] sm:$0xff]  ;;  %v5578_v2 = vsel %vm345_vm11, %v313_v31, %v377_v1  ;;  %v5593_v1 = vsel %vm431_vm5, %v1642_v62, %v1648_v20  ;;  %v1684_v31 = vrot.slane %v5475_v41, 1 }
  0xf7   : > { %3500 = vmatpush3.msra.mxu0 %v1718_v39  ;;  %3958 = vmatpush3.msra.mxu1 %v1745_v60  ;;  %6400 = vst [vmem:[#allocation18_spill] sm:$0xff] %v5578_v2  ;;  %6401 = vst [vmem:[#allocation19_spill] sm:$0xff] %v5593_v1  ;;  %v1758_v20 = vrot.slane %v5578_v2, 7  ;;  %v1764_v46 = vrot.slane %v5578_v2, 1 }
  0xf8   : > { %3501 = vmatprep.subr.mxu0 %v1733_v35  ;;  %1941 = vmatprep.mubr.f32.mxu1 %v5472_v8  ;;  %v5557_v28 = vadd.f32 %v3745_v27, %v3076_v51  ;;  %v5559_v60 = vpop.f32.mrf.mxu0  ;;  %v5561_v39 = vpop.f32.mrf.mxu1  ;;  %v1716_v35 = vld [vmem:[%s6348_s2 + $0x38] sm:$0xff]  ;;  %v1731_v51 = vld [vmem:[%s6348_s2 + $0xb0] sm:$0xff]  ;;  %v5576_v27 = vsel %vm344_vm10, %v312_v3, %v376_v10  ;;  %v5597_v10 = vsel %vm476_vm4, %v1683_v44, %v1677_v4  ;;  %v1678_v3 = vrot.slane %v5472_v8, 1 }
  0xf9   : > { %3923 = vmatprep.mubr.f32.mxu0 %v5533_v50  ;;  %3502 = vmatpush3.msra.mxu0 %v1717_v9  ;;  %6399 = vst [vmem:[#allocation17_spill] sm:$0xff] %v5576_v27  ;;  %v1757_v62 = vrot.slane %v5576_v27, 7 }
  0xfa   : > { %6398 = vst [vmem:[#allocation16_spill] sm:$0xff] %v5557_v28  ;;  %2979 = vmatmul.mubr.msk.f32.gmra.mxu1 %vm413_vm8, %v5546_v54  ;;  %3924 = vmatmul.mubr.msk.f32.gmra.mxu0 %vm416_vm9, %v5537_v48  ;;  %v5580_v9 = vpop.f32.mrf.mxu0  ;;  %v5582_v28 = vpop.f32.mrf.mxu1  ;;  %v5586_v54 = vsel %vm476_vm4, %v1677_v4, %v1683_v44  ;;  %v5638_v15 = vsel %vm476_vm4, %v1684_v31, %v1678_v3 }
  0xfb   : > { %3503 = vmatprep.subr.mxu0 %v1732_v36  ;;  %3959 = vmatprep.subr.mxu1 %v1744_v32  ;;  %v1730_v36 = vld [vmem:[%s6348_s2 + $0xa8] sm:$0xff]  ;;  %v5634_v26 = vsel %vm431_vm5, %v1758_v20, %v1757_v62 }
  0xfc   : > { %3504 = vmatpush3.msra.mxu0 %v1716_v35  ;;  %3960 = vmatpush3.msra.mxu1 %v1744_v32  ;;  %v1743_v32 = vld [vmem:[%s6348_s2 + $0x110] sm:$0xff]  ;;  %v1714_v35 = vld [vmem:[%s6348_s2 + $0x28] sm:$0xff]  ;;  %6402 = vst [vmem:[#allocation20_spill] sm:$0xff] %v5634_v26 }
  0xfd   : > { %3505 = vmatprep.subr.mxu0 %v1731_v51  ;;  %1946 = vmatprep.mubr.f32.mxu1 %v5475_v41  ;;  %v3080_v4 = vpop.f32.mrf.mxu0  ;;  %v5610_v44 = vpop.f32.mrf.mxu1  ;;  %v1729_v51 = vld [vmem:[%s6348_s2 + $0xa0] sm:$0xff] }
  0xfe   : > { %3926 = vmatprep.mubr.f32.mxu0 %v5586_v54  ;;  %3506 = vmatpush3.msra.mxu0 %v1715_v34  ;;  %v5627_v34 = vsel %vm476_vm4, %v1678_v3, %v1684_v31 }
  0xff   : > { %1947 = vmatmul.mubr.f32.gmra.mxu1 %v5593_v1  ;;  %3927 = vmatmul.mubr.msk.f32.gmra.mxu0 %vm416_vm9, %v5597_v10  ;;  %v3081_v41 = vpop.f32.mrf.mxu0  ;;  %v5623_v8 = vpop.f32.mrf.mxu1  ;;  %v1713_v1 = vld [vmem:[%s6348_s2 + $0x20] sm:$0xff] }
 0x100   : > { %3507 = vmatprep.subr.mxu0 %v1730_v36  ;;  %3961 = vmatprep.subr.mxu1 %v1743_v32  ;;  %v3082_v17 = vadd.f32 %v3081_v41, %v3080_v4  ;;  %v1763_v36 = vrot.slane %v5576_v27, 1  ;;  %v1728_v41 = vld [vmem:[%s6348_s2 + $0x98] sm:$0xff] }
 0x101   : > { %3508 = vmatpush3.msra.mxu0 %v1714_v35  ;;  %3962 = vmatpush3.msra.mxu1 %v1743_v32  ;;  %v1742_v32 = vld [vmem:[%s6348_s2 + $0x108] sm:$0xff]  ;;  %v1712_v35 = vld [vmem:[%s6348_s2 + $0x18] sm:$0xff] }
 0x102   : > { %3509 = vmatprep.subr.mxu0 %v1729_v51  ;;  %1951 = vmatprep.mubr.f32.mxu1 %v5576_v27  ;;  %v5650_v4 = vadd.f32 %v5518_v25, %v3082_v17  ;;  %v5652_v3 = vpop.f32.mrf.mxu0  ;;  %v5654_v31 = vpop.f32.mrf.mxu1  ;;  %v1727_v17 = vld [vmem:[%s6348_s2 + $0x90] sm:$0xff]  ;;  %v5682_v27 = vsel %vm431_vm5, %v1757_v62, %v1758_v20  ;;  %v5686_v49 = vsel %vm476_vm4, %v1764_v46, %v1763_v36  ;;  %v1725_v62 = vld [vmem:[%s6348_s2 + $0x80] sm:$0xff] }
 0x103   : > { %3929 = vmatprep.mubr.f32.mxu0 %v5627_v34  ;;  %3510 = vmatpush3.msra.mxu0 %v1713_v1  ;;  %v5675_v1 = vsel %vm476_vm4, %v1763_v36, %v1764_v46  ;;  %6404 = vst [vmem:[#allocation22_spill] sm:$0xff] %v5682_v27  ;;  %6405 = vst [vmem:[#allocation23_spill] sm:$0xff] %v5686_v49  ;;  %v1710_v46 = vld [vmem:[%s6348_s2 + $0x8] sm:$0xff]  ;;  %vm2828_vm4 = vcmask 1040384  }
 0x104   : > { %2980 = vmatmul.mubr.msk.f32.gmra.mxu1 %vm413_vm8, %v5634_v26  ;;  %3930 = vmatmul.mubr.msk.f32.gmra.mxu0 %vm416_vm9, %v5638_v15  ;;  %v5669_v25 = vpop.f32.mrf.mxu0  ;;  %v5671_v51 = vpop.f32.mrf.mxu1  ;;  %6403 = vst [vmem:[#allocation21_spill] sm:$0xff] %v5675_v1  ;;  %v1711_v26 = vld [vmem:[%s6348_s2 + $0x10] sm:$0xff] }
 0x105   : > { %3511 = vmatprep.subr.mxu0 %v1728_v41  ;;  %3963 = vmatprep.subr.mxu1 %v1742_v32  ;;  %v1726_v41 = vld [vmem:[%s6348_s2 + $0x88] sm:$0xff] }
 0x106   : > { %3512 = vmatpush3.msra.mxu0 %v1712_v35  ;;  %3964 = vmatpush3.msra.mxu1 %v1742_v32  ;;  %v1741_v35 = vld [vmem:[%s6348_s2 + $0x100] sm:$0xff] }
 0x107   : > { %3513 = vmatprep.subr.mxu0 %v1727_v17  ;;  %1956 = vmatprep.mubr.f32.mxu1 %v5578_v2  ;;  %v3086_v32 = vpop.f32.mrf.mxu0  ;;  %v5695_v5 = vpop.f32.mrf.mxu1 }
 0x108   : > { %3932 = vmatprep.mubr.f32.mxu0 %v5675_v1  ;;  %3514 = vmatpush3.msra.mxu0 %v1711_v26  ;;  %v1709_v26 = vld [vmem:[%s6348_s2] sm:$0xff]  ;;  %v2444_v1 = vld [vmem:[%s6348_s2 + $0x478] sm:$0xff] }
 0x109   : > { %1957 = vmatmul.mubr.f32.gmra.mxu1 %v5682_v27  ;;  %3933 = vmatmul.mubr.msk.f32.gmra.mxu0 %vm416_vm9, %v5686_v49  ;;  %v3087_v20 = vpop.f32.mrf.mxu0  ;;  %v5708_v36 = vpop.f32.mrf.mxu1  ;;  %v2428_v49 = vld [vmem:[%s6348_s2 + $0x3f8] sm:$0xff] }
 0x10a   : > { %3515 = vmatprep.subr.mxu0 %v1726_v41  ;;  %3965 = vmatprep.subr.mxu1 %v1741_v35  ;;  %v3088_v17 = vadd.f32 %v3087_v20, %v3086_v32 }
 0x10b   : > { %3516 = vmatpush3.msra.mxu0 %v1710_v46  ;;  %3966 = vmatpush3.msra.mxu1 %v1741_v35 }
 0x10c   : > { %3517 = vmatprep.subr.mxu0 %v1725_v62  ;;  %2171 = vmatprep.mubr.f32.mxu0 %v4591_v55  ;;  %v5721_v41 = vadd.f32 %v5561_v39, %v3088_v17  ;;  %v3089_v27 = vpop.f32.mrf.mxu0  ;;  %v5723_v2 = vpop.f32.mrf.mxu1  ;;  %v2412_v55 = vld [vmem:[%s6348_s2 + $0x378] sm:$0xff]  ;;  %v2427_v39 = vld [vmem:[%s6348_s2 + $0x3f0] sm:$0xff] }
 0x10d   : > { %3518 = vmatpush3.msra.mxu0 %v1709_v26  ;;  %3967 = vmatprep.mubr.f32.mxu1 %v4642_v18  ;;  %v2411_v18 = vld [vmem:[%s6348_s2 + $0x370] sm:$0xff] }
 0x10e   : > { %2989 = vmatmul.mubr.msk.f32.vlgmr.msra.gmra.mxu0 %vm413_vm8, %v4780_v53  ;;  %3968 = vmatmul.mubr.msk.f32.vlgmr.msra.gmra.mxu1 %vm416_vm9, %v4653_v24  ;;  %v3090_v35 = vpop.f32.mrf.mxu0  ;;  %v5738_v32 = vpop.f32.mrf.mxu1  ;;  %v2426_v24 = vld [vmem:[%s6348_s2 + $0x3e8] sm:$0xff]  ;;  %v2443_v53 = vld [vmem:[%s6348_s2 + $0x470] sm:$0xff] }
 0x10f   : > { %3599 = vmatprep.subr.mxu1 %v2428_v49  ;;  %3991 = vmatprep.subr.mxu0 %v2444_v1  ;;  %v3091_v46 = vadd.f32 %v3090_v35, %v3089_v27 }
 0x110   : > { %3600 = vmatpush3.msra.mxu1 %v2412_v55  ;;  %3992 = vmatpush3.msra.mxu0 %v2444_v1 }
 0x111   : > { %3601 = vmatprep.subr.mxu1 %v2427_v39  ;;  %2176 = vmatprep.mubr.f32.mxu0 %v4594_v56  ;;  %v5751_v49 = vadd.f32 %v3091_v46, %v5623_v8  ;;  %v3092_v62 = vpop.f32.mrf.mxu0  ;;  %v5753_v20 = vpop.f32.mrf.mxu1  ;;  %v2410_v56 = vld [vmem:[%s6348_s2 + $0x368] sm:$0xff]  ;;  %v2425_v8 = vld [vmem:[%s6348_s2 + $0x3e0] sm:$0xff]  ;;  %v2407_v46 = vld [vmem:[%s6348_s2 + $0x350] sm:$0xff] }
 0x112   : > { %3970 = vmatprep.mubr.f32.mxu1 %v5157_v22  ;;  %3602 = vmatpush3.msra.mxu1 %v2411_v18  ;;  %v2409_v22 = vld [vmem:[%s6348_s2 + $0x360] sm:$0xff] }
 0x113   : > { %2177 = vmatmul.mubr.f32.gmra.mxu0 %v4798_v7  ;;  %3971 = vmatmul.mubr.msk.f32.gmra.mxu1 %vm416_vm9, %v5165_v33  ;;  %v3093_v27 = vpop.f32.mrf.mxu0  ;;  %v5766_v1 = vpop.f32.mrf.mxu1  ;;  %v2424_v7 = vld [vmem:[%s6348_s2 + $0x3d8] sm:$0xff]  ;;  %v2442_v33 = vld [vmem:[%s6348_s2 + $0x468] sm:$0xff] }
 0x114   : > { %3603 = vmatprep.subr.mxu1 %v2426_v24  ;;  %3993 = vmatprep.subr.mxu0 %v2443_v53  ;;  %v3094_v26 = vadd.f32 %v3093_v27, %v3092_v62  ;;  %v2422_v62 = vld [vmem:[%s6348_s2 + $0x3c8] sm:$0xff] }
 0x115   : > { %3604 = vmatpush3.msra.mxu1 %v2410_v56  ;;  %3994 = vmatpush3.msra.mxu0 %v2443_v53  ;;  %v2441_v56 = vld [vmem:[%s6348_s2 + $0x460] sm:$0xff]  ;;  %v2406_v27 = vld [vmem:[%s6348_s2 + $0x348] sm:$0xff] }
 0x116   : > { %3605 = vmatprep.subr.mxu1 %v2425_v8  ;;  %2181 = vmatprep.mubr.f32.mxu0 %v5114_v45  ;;  %v5779_v17 = vadd.f32 %v5610_v44, %v3094_v26  ;;  %v3095_v55 = vpop.f32.mrf.mxu0  ;;  %v5781_v39 = vpop.f32.mrf.mxu1  ;;  %v2408_v45 = vld [vmem:[%s6348_s2 + $0x358] sm:$0xff]  ;;  %v2423_v44 = vld [vmem:[%s6348_s2 + $0x3d0] sm:$0xff]  ;;  %v3079_v26 = vadd.f32 %v5580_v9, %v5559_v60 }
 0x117   : > { %3973 = vmatprep.mubr.f32.mxu1 %v5393_v42  ;;  %3606 = vmatpush3.msra.mxu1 %v2409_v22  ;;  %v2420_v60 = vld [vmem:[%s6348_s2 + $0x3b8] sm:$0xff] }
 0x118   : > { %2990 = vmatmul.mubr.msk.f32.gmra.mxu0 %vm413_vm8, %v5194_v57  ;;  %3974 = vmatmul.mubr.msk.f32.gmra.mxu1 %vm416_vm9, %v5415_v14  ;;  %v3096_v35 = vpop.f32.mrf.mxu0  ;;  %v5796_v18 = vpop.f32.mrf.mxu1  ;;  %v2440_v9 = vld [vmem:[%s6348_s2 + $0x458] sm:$0xff] }
 0x119   : > { %3607 = vmatprep.subr.mxu1 %v2424_v7  ;;  %3995 = vmatprep.subr.mxu0 %v2442_v33  ;;  %v3097_v24 = vadd.f32 %v3096_v35, %v3095_v55 }
 0x11a   : > { %3608 = vmatpush3.msra.mxu1 %v2408_v45  ;;  %3996 = vmatpush3.msra.mxu0 %v2442_v33  ;;  %v3098_v57 = vpop.f32.mrf.mxu0  ;;  %v5801_v53 = vpop.f32.mrf.mxu1  ;;  %v2405_v33 = vld [vmem:[%s6348_s2 + $0x340] sm:$0xff] }
 0x11b   : > { %3609 = vmatprep.subr.mxu1 %v2423_v44  ;;  %2186 = vmatprep.mubr.f32.mxu0 %v5116_v47  ;;  %v5811_v8 = vadd.f32 %v3097_v24, %v5671_v51  ;;  %v2421_v51 = vld [vmem:[%s6348_s2 + $0x3c0] sm:$0xff] }
 0x11c   : > { %3976 = vmatprep.mubr.f32.mxu1 %v5436_v37  ;;  %3610 = vmatpush3.msra.mxu1 %v2407_v46  ;;  %v3099_v22 = vpop.f32.mrf.mxu0  ;;  %v5817_v47 = vpop.f32.mrf.mxu1  ;;  %v837_v46 = vadd.f32 %v3079_v26, %v5539_v38  ;;  %v2419_v38 = vld [vmem:[%s6348_s2 + $0x3b0] sm:$0xff] }
 0x11d   : > { %2187 = vmatmul.mubr.f32.gmra.mxu0 %v5220_v61  ;;  %3977 = vmatmul.mubr.msk.f32.gmra.mxu1 %vm416_vm9, %v5454_v12  ;;  %v3100_v7 = vadd.f32 %v3099_v22, %v3098_v57 }
 0x11e   : > { %3611 = vmatprep.subr.mxu1 %v2422_v62  ;;  %3997 = vmatprep.subr.mxu0 %v2441_v56  ;;  %v3101_v55 = vpop.f32.mrf.mxu0  ;;  %v3189_v45 = vpop.f32.mrf.mxu1 }
 0x11f   : > { %3612 = vmatpush3.msra.mxu1 %v2406_v27  ;;  %3998 = vmatpush3.msra.mxu0 %v2441_v56  ;;  %v5832_v61 = vadd.f32 %v5654_v31, %v3100_v7  ;;  %v2404_v31 = vld [vmem:[%s6348_s2 + $0x338] sm:$0xff]  ;;  %v2403_v27 = vld [vmem:[%s6348_s2 + $0x330] sm:$0xff] }
 0x120   : > { %3613 = vmatprep.subr.mxu1 %v2421_v51  ;;  %2191 = vmatprep.mubr.f32.mxu0 %v5204_v43  ;;  %v3102_v44 = vpop.f32.mrf.mxu0  ;;  %v3190_v35 = vpop.f32.mrf.mxu1 }
 0x121   : > { %3979 = vmatprep.mubr.f32.mxu1 %v5488_v0  ;;  %3614 = vmatpush3.msra.mxu1 %v2405_v33  ;;  %v3103_v24 = vadd.f32 %v3102_v44, %v3101_v55  ;;  %v3191_v57 = vadd.f32 %v3190_v35, %v3189_v45  ;;  %v3085_v33 = vadd.f32 %v5669_v25, %v5652_v3  ;;  %v2418_v55 = vld [vmem:[%s6348_s2 + $0x3a8] sm:$0xff]  ;;  %v2417_v44 = vld [vmem:[%s6348_s2 + $0x3a0] sm:$0xff] }
 0x122   : > { %2991 = vmatmul.mubr.msk.f32.gmra.mxu0 %vm413_vm8, %v5238_v58  ;;  %3980 = vmatmul.mubr.msk.f32.gmra.mxu1 %vm416_vm9, %v5503_v6  ;;  %v3104_v62 = vpop.f32.mrf.mxu0  ;;  %v3192_v56 = vpop.f32.mrf.mxu1  ;;  %v2402_v3 = vld [vmem:[%s6348_s2 + $0x328] sm:$0xff] }
 0x123   : > { %3615 = vmatprep.subr.mxu1 %v2420_v60  ;;  %3999 = vmatprep.subr.mxu0 %v2440_v9  ;;  %v5859_v22 = vadd.f32 %v3103_v24, %v5708_v36  ;;  %v5861_v26 = vadd.f32 %v3191_v57, %v837_v46  ;;  %v2439_v36 = vld [vmem:[%s6348_s2 + $0x450] sm:$0xff] }
 0x124   : > { %3616 = vmatpush3.msra.mxu1 %v2404_v31  ;;  %4000 = vmatpush3.msra.mxu0 %v2440_v9  ;;  %v3105_v51 = vpop.f32.mrf.mxu0  ;;  %v3193_v7 = vpop.f32.mrf.mxu1  ;;  %v2401_v31 = vld [vmem:[%s6348_s2 + $0x320] sm:$0xff] }
 0x125   : > { %3617 = vmatprep.subr.mxu1 %v2419_v38  ;;  %2196 = vmatprep.mubr.f32.mxu0 %v5206_v29  ;;  %v3106_v45 = vadd.f32 %v3105_v51, %v3104_v62  ;;  %v3194_v60 = vadd.f32 %v3193_v7, %v3192_v56  ;;  %v847_v38 = vadd.f32 %v3085_v33, %v5582_v28  ;;  %v2400_v28 = vld [vmem:[%s6348_s2 + $0x318] sm:$0xff] }
 0x126   : > { %3982 = vmatprep.mubr.f32.mxu1 %v5533_v50  ;;  %3618 = vmatpush3.msra.mxu1 %v2403_v27  ;;  %v3107_v25 = vpop.f32.mrf.mxu0  ;;  %v3195_v9 = vpop.f32.mrf.mxu1 }
 0x127   : > { %2197 = vmatmul.mubr.f32.gmra.mxu0 %v5265_v23  ;;  %3983 = vmatmul.mubr.msk.f32.gmra.mxu1 %vm416_vm9, %v5537_v48  ;;  %v5884_v35 = vadd.f32 %v5695_v5, %v3106_v45  ;;  %v5887_v46 = vadd.f32 %v3194_v60, %v5650_v4  ;;  %v2416_v5 = vld [vmem:[%s6348_s2 + $0x398] sm:$0xff]  ;;  %v2438_v4 = vld [vmem:[%s6348_s2 + $0x448] sm:$0xff] }
 0x128   : > { %3619 = vmatprep.subr.mxu1 %v2418_v55  ;;  %4001 = vmatprep.subr.mxu0 %v2439_v36  ;;  %v3108_v24 = vpop.f32.mrf.mxu0  ;;  %v3196_v57 = vpop.f32.mrf.mxu1  ;;  %v2415_v55 = vld [vmem:[%s6348_s2 + $0x390] sm:$0xff] }
 0x129   : > { %3620 = vmatpush3.msra.mxu1 %v2402_v3  ;;  %4002 = vmatpush3.msra.mxu0 %v2439_v36  ;;  %v3109_v62 = vadd.f32 %v3108_v24, %v3107_v25  ;;  %v3197_v56 = vadd.f32 %v3196_v57, %v3195_v9 }
 0x12a   : > { %3621 = vmatprep.subr.mxu1 %v2417_v44  ;;  %2201 = vmatprep.mubr.f32.mxu0 %v5248_v21  ;;  %v3110_v27 = vpop.f32.mrf.mxu0  ;;  %v3198_v51 = vpop.f32.mrf.mxu1  ;;  %v2414_v44 = vld [vmem:[%s6348_s2 + $0x388] sm:$0xff] }
 0x12b   : > { %3985 = vmatprep.mubr.f32.mxu1 %v5586_v54  ;;  %3622 = vmatpush3.msra.mxu1 %v2401_v31  ;;  %v5905_v7 = vadd.f32 %v3109_v62, %v5738_v32  ;;  %v5907_v33 = vadd.f32 %v3197_v56, %v847_v38  ;;  %v2399_v32 = vld [vmem:[%s6348_s2 + $0x310] sm:$0xff]  ;;  %v2437_v31 = vld [vmem:[%s6348_s2 + $0x440] sm:$0xff]  ;;  %v2398_v38 = vld [vmem:[%s6348_s2 + $0x308] sm:$0xff] }
 0x12c   : > { %2992 = vmatmul.mubr.msk.f32.gmra.mxu0 %vm413_vm8, %v5283_v40  ;;  %3986 = vmatmul.mubr.msk.f32.gmra.mxu1 %vm416_vm9, %v5597_v10  ;;  %v3111_v36 = vpop.f32.mrf.mxu0  ;;  %v3199_v45 = vpop.f32.mrf.mxu1 }
 0x12d   : > { %3623 = vmatprep.subr.mxu1 %v2416_v5  ;;  %4003 = vmatprep.subr.mxu0 %v2438_v4  ;;  %v3112_v60 = vadd.f32 %v3111_v36, %v3110_v27  ;;  %v3200_v3 = vadd.f32 %v3199_v45, %v3198_v51  ;;  %v2436_v36 = vld [vmem:[%s6348_s2 + $0x438] sm:$0xff] }
 0x12e   : > { %3624 = vmatpush3.msra.mxu1 %v2400_v28  ;;  %4004 = vmatpush3.msra.mxu0 %v2438_v4  ;;  %v3113_v25 = vpop.f32.mrf.mxu0  ;;  %v3201_v9 = vpop.f32.mrf.mxu1  ;;  %v2397_v4 = vld [vmem:[%s6348_s2 + $0x300] sm:$0xff] }
 0x12f   : > { %3625 = vmatprep.subr.mxu1 %v2415_v55  ;;  %2206 = vmatprep.mubr.f32.mxu0 %v5250_v63  ;;  %v5929_v24 = vadd.f32 %v5723_v2, %v3112_v60  ;;  %v5932_v57 = vadd.f32 %v3200_v3, %v5721_v41  ;;  %v2413_v2 = vld [vmem:[%s6348_s2 + $0x380] sm:$0xff] }
 0x130   : > { %3988 = vmatprep.mubr.f32.mxu1 %v5627_v34  ;;  %3626 = vmatpush3.msra.mxu1 %v2399_v32  ;;  %v3114_v62 = vpop.f32.mrf.mxu0  ;;  %v3202_v56 = vpop.f32.mrf.mxu1 }
 0x131   : > { %2207 = vmatmul.mubr.f32.gmra.mxu0 %v5306_v52  ;;  %3989 = vmatmul.mubr.msk.f32.gmra.mxu1 %vm416_vm9, %v5638_v15  ;;  %v3115_v41 = vadd.f32 %v3114_v62, %v3113_v25  ;;  %v3203_v5 = vadd.f32 %v3202_v56, %v3201_v9  ;;  %v2433_v56 = vld [vmem:[%s6348_s2 + $0x420] sm:$0xff] }
 0x132   : > { %3627 = vmatprep.subr.mxu1 %v2414_v44  ;;  %4005 = vmatprep.subr.mxu0 %v2437_v31  ;;  %v3116_v27 = vpop.f32.mrf.mxu0  ;;  %v3204_v51 = vpop.f32.mrf.mxu1 }
 0x133   : > { %3628 = vmatpush3.msra.mxu1 %v2398_v38  ;;  %4006 = vmatpush3.msra.mxu0 %v2437_v31  ;;  %v5949_v28 = vadd.f32 %v3115_v41, %v5766_v1  ;;  %v5952_v55 = vadd.f32 %v3203_v5, %v5751_v49  ;;  %v2435_v49 = vld [vmem:[%s6348_s2 + $0x430] sm:$0xff]  ;;  %v2434_v31 = vld [vmem:[%s6348_s2 + $0x428] sm:$0xff] }
 0x134   : > { %3629 = vmatprep.subr.mxu1 %v2413_v2  ;;  %2211 = vmatprep.mubr.f32.mxu0 %v5292_v59  ;;  %v3117_v45 = vpop.f32.mrf.mxu0  ;;  %v3205_v32 = vpop.f32.mrf.mxu1  ;;  %v6408_v5 = vld [vmem:[#allocation3_spill] sm:$0xff] }
 0x135   : > { %3630 = vmatpush3.msra.mxu1 %v2397_v4  ;;  %2509 = vmatprep.mubr.f32.mxu1 %v5204_v43  ;;  %v3118_v60 = vadd.f32 %v3117_v45, %v3116_v27  ;;  %v3206_v3 = vadd.f32 %v3205_v32, %v3204_v51  ;;  %v2432_v51 = vld [vmem:[%s6348_s2 + $0x418] sm:$0xff] }
 0x136   : > { %2993 = vmatmul.mubr.msk.f32.gmra.mxu0 %vm413_vm8, %v5326_v30  ;;  %3005 = vmatmul.mubr.msk.f32.vlgmr.msra.gmra.mxu1 %vm413_vm8, %v5238_v58  ;;  %v3207_v1 = vpop.f32.mrf.mxu1  ;;  %v5968_v25 = vpop.f32.mrf.mxu0  ;;  %v6410_v32 = vld [vmem:[#allocation5_spill] sm:$0xff] }
 0x137   : > { %4007 = vmatprep.subr.mxu0 %v2436_v36  ;;  %2216 = vmatprep.mubr.f32.mxu0 %v5294_v11  ;;  %v5972_v43 = vadd.f32 %v5753_v20, %v3118_v60  ;;  %v5975_v9 = vadd.f32 %v3206_v3, %v5779_v17  ;;  %v6406_v20 = vld [vmem:[#allocation2_spill] sm:$0xff] }
 0x138   : > { %4008 = vmatpush3.msra.mxu0 %v2436_v36  ;;  %2514 = vmatprep.mubr.f32.mxu1 %v5206_v29  ;;  %v3208_v58 = vpop.f32.mrf.mxu1  ;;  %v5978_v44 = vpop.f32.mrf.mxu0  ;;  %v6409_v36 = vld [vmem:[#allocation7_spill] sm:$0xff] }
 0x139   : > { %4009 = vmatprep.subr.mxu0 %v2435_v49  ;;  %v3209_v38 = vadd.f32 %v3208_v58, %v3207_v1 }
 0x13a   : > { %2217 = vmatmul.mubr.f32.gmra.mxu0 %v5352_v16  ;;  %2515 = vmatmul.mubr.f32.gmra.mxu1 %v5265_v23  ;;  %v6407_v23 = vld [vmem:[#allocation4_spill] sm:$0xff] }
 0x13b   : > { %4010 = vmatpush3.msra.mxu0 %v2435_v49  ;;  %2221 = vmatprep.mubr.f32.mxu0 %v6406_v20  ;;  %v3210_v17 = vpop.f32.mrf.mxu1  ;;  %v5986_v62 = vpop.f32.mrf.mxu0  ;;  %v5989_v29 = vadd.f32 %v3209_v38, %v5811_v8  ;;  %v6413_v38 = vld [vmem:[#allocation14_spill] sm:$0xff] }
 0x13c   : > { %2519 = vmatprep.mubr.f32.mxu1 %v5248_v21  ;;  %4011 = vmatprep.subr.mxu0 %v2434_v31 }
 0x13d   : > { %4012 = vmatpush3.msra.mxu0 %v2434_v31  ;;  %v3211_v2 = vpop.f32.mrf.mxu1  ;;  %v5995_v41 = vpop.f32.mrf.mxu0 }
 0x13e   : > { %2994 = vmatmul.mubr.msk.f32.gmra.mxu0 %vm413_vm8, %v6407_v23  ;;  %3006 = vmatmul.mubr.msk.f32.gmra.mxu1 %vm413_vm8, %v5283_v40  ;;  %v3212_v8 = vadd.f32 %v3211_v2, %v3210_v17  ;;  %v6414_v2 = vld [vmem:[#allocation10_spill] sm:$0xff] }
 0x13f   : > { %2226 = vmatprep.mubr.f32.mxu0 %v6408_v5  ;;  %2524 = vmatprep.mubr.f32.mxu1 %v5250_v63 }
 0x140   : > { %4013 = vmatprep.subr.mxu0 %v2433_v56  ;;  %v3213_v21 = vpop.f32.mrf.mxu1  ;;  %v6005_v4 = vpop.f32.mrf.mxu0  ;;  %v1017_v27 = vadd.f32 %v3212_v8, %v5832_v61  ;;  %v2431_v61 = vld [vmem:[%s6348_s2 + $0x410] sm:$0xff] }
 0x141   : > { %4014 = vmatpush3.msra.mxu0 %v2433_v56 }
 0x142   : > { %2227 = vmatmul.mubr.f32.gmra.mxu0 %v6409_v36  ;;  %2525 = vmatmul.mubr.f32.gmra.mxu1 %v5306_v52  ;;  %v3214_v40 = vpop.f32.mrf.mxu1  ;;  %v6013_v45 = vpop.f32.mrf.mxu0  ;;  %v6411_v52 = vld [vmem:[#allocation8_spill] sm:$0xff] }
 0x143   : > { %2231 = vmatprep.mubr.f32.mxu0 %v6410_v32  ;;  %2529 = vmatprep.mubr.f32.mxu1 %v5292_v59  ;;  %v3215_v63 = vadd.f32 %v3214_v40, %v3213_v21  ;;  %v6412_v59 = vld [vmem:[#allocation6_spill] sm:$0xff]  ;;  %v6415_v40 = vld [vmem:[#allocation15_spill] sm:$0xff] }
 0x144   : > { %4015 = vmatprep.subr.mxu0 %v2432_v51 }
 0x145   : > { %4016 = vmatpush3.msra.mxu0 %v2432_v51  ;;  %v3216_v60 = vpop.f32.mrf.mxu1  ;;  %v6020_v3 = vpop.f32.mrf.mxu0  ;;  %v6023_v49 = vadd.f32 %v3215_v63, %v5859_v22  ;;  %v2430_v22 = vld [vmem:[%s6348_s2 + $0x408] sm:$0xff]  ;;  %v2429_v51 = vld [vmem:[%s6348_s2 + $0x400] sm:$0xff] }
 0x146   : > { %2995 = vmatmul.mubr.msk.f32.gmra.mxu0 %vm413_vm8, %v6411_v52  ;;  %3007 = vmatmul.mubr.msk.f32.gmra.mxu1 %vm413_vm8, %v5326_v30 }
 0x147   : > { %2236 = vmatprep.mubr.f32.mxu0 %v6412_v59  ;;  %2534 = vmatprep.mubr.f32.mxu1 %v5294_v11  ;;  %v3217_v1 = vpop.f32.mrf.mxu1  ;;  %v6033_v58 = vpop.f32.mrf.mxu0 }
 0x148   : > { %4017 = vmatprep.subr.mxu0 %v2431_v61  ;;  %v3218_v31 = vadd.f32 %v3217_v1, %v3216_v60 }
 0x149   : > { %4018 = vmatpush3.msra.mxu0 %v2431_v61 }
 0x14a   : > { %2237 = vmatmul.mubr.f32.gmra.mxu0 %v6413_v38  ;;  %2535 = vmatmul.mubr.f32.gmra.mxu1 %v5352_v16  ;;  %v3219_v17 = vpop.f32.mrf.mxu1  ;;  %v3813_v30 = vpop.f32.mrf.mxu0  ;;  %v1027_v56 = vadd.f32 %v3218_v31, %v5884_v35  ;;  %v6416_v35 = vld [vmem:[#allocation11_spill] sm:$0xff] }
 0x14b   : > { %2241 = vmatprep.mubr.f32.mxu0 %v6414_v2  ;;  %2539 = vmatprep.mubr.f32.mxu1 %v6406_v20  ;;  %v6043_v11 = vadd.f32 %v3813_v30, %v1017_v27  ;;  %v6417_v31 = vld [vmem:[#allocation19_spill] sm:$0xff] }
 0x14c   : > { %4019 = vmatprep.subr.mxu0 %v2430_v22  ;;  %v3220_v8 = vpop.f32.mrf.mxu1  ;;  %v6045_v21 = vpop.f32.mrf.mxu0 }
 0x14d   : > { %4020 = vmatpush3.msra.mxu0 %v2430_v22  ;;  %v3221_v16 = vadd.f32 %v3220_v8, %v3219_v17 }
 0x14e   : > { %2996 = vmatmul.mubr.msk.f32.gmra.mxu0 %vm413_vm8, %v6415_v40  ;;  %3008 = vmatmul.mubr.msk.f32.gmra.mxu1 %vm413_vm8, %v6407_v23 }
 0x14f   : > { %2246 = vmatprep.mubr.f32.mxu0 %v6416_v35  ;;  %2544 = vmatprep.mubr.f32.mxu1 %v6408_v5  ;;  %v3222_v20 = vpop.f32.mrf.mxu1  ;;  %v3816_v27 = vpop.f32.mrf.mxu0  ;;  %v1032_v63 = vadd.f32 %v3221_v16, %v5905_v7 }
 0x150   : > { %4021 = vmatprep.subr.mxu0 %v2429_v51  ;;  %v6059_v61 = vadd.f32 %v3816_v27, %v1027_v56 }
 0x151   : > { %4022 = vmatpush3.msra.mxu0 %v2429_v51  ;;  %v3223_v60 = vpop.f32.mrf.mxu1  ;;  %v6061_v1 = vpop.f32.mrf.mxu0 }
 0x152   : > { %2247 = vmatmul.mubr.f32.gmra.mxu0 %v6417_v31  ;;  %2545 = vmatmul.mubr.f32.gmra.mxu1 %v6409_v36  ;;  %v3224_v23 = vadd.f32 %v3223_v60, %v3222_v20 }
 0x153   : > { %2549 = vmatprep.mubr.f32.mxu1 %v6410_v32  ;;  %4023 = vmatprep.mubr.f32.mxu0 %v5393_v42 }
 0x154   : > { %v3225_v5 = vpop.f32.mrf.mxu1  ;;  %v1037_v22 = vadd.f32 %v3224_v23, %v5929_v24  ;;  %v3819_v7 = vpop.f32.mrf.mxu0 }
 0x156   : > { %3009 = vmatmul.mubr.msk.f32.gmra.mxu1 %vm413_vm8, %v6411_v52  ;;  %4024 = vmatmul.mubr.msk.f32.vlgmr.msra.gmra.mxu0 %vm416_vm9, %v5415_v14  ;;  %v6074_v17 = vadd.f32 %v3819_v7, %v1037_v22  ;;  %v3226_v36 = vpop.f32.mrf.mxu1  ;;  %v1176_v30 = vpop.f32.mrf.mxu0  ;;  %v6418_v14 = vld [vmem:[#allocation9_spill] sm:$0xff]  ;;  %v6419_v52 = vld [vmem:[#allocation12_spill] sm:$0xff]  ;;  %v6424_v7 = vld [vmem:[#allocation18_spill] sm:$0xff] }
 0x157   : > { %2554 = vmatprep.mubr.f32.mxu1 %v6412_v59  ;;  %4026 = vmatprep.mubr.f32.mxu0 %v5436_v37  ;;  %v3227_v42 = vadd.f32 %v3226_v36, %v3225_v5  ;;  %v6078_v32 = vadd.f32 %v1176_v30, %v1032_v63  ;;  %v3073_v51 = vadd.f32 %v6419_v52, %v6418_v14  ;;  %v6426_v14 = vmov 0.0   ;;  %v6427_v52 = vld [vmem:[#allocation21_spill] sm:$0xff] }
 0x159   : > { %v3228_v24 = vpop.f32.mrf.mxu1  ;;  %v3822_v56 = vpop.f32.mrf.mxu0  ;;  %v1042_v8 = vadd.f32 %v3227_v42, %v5949_v28  ;;  %v3185_v28 = vadd.f32 %v5796_v18, %v5781_v39 }
 0x15a   : > { %2555 = vmatmul.mubr.f32.gmra.mxu1 %v6413_v38  ;;  %4027 = vmatmul.mubr.msk.f32.gmra.mxu0 %vm416_vm9, %v5454_v12 }
 0x15b   : > { %2559 = vmatprep.mubr.f32.mxu1 %v6414_v2  ;;  %4029 = vmatprep.mubr.f32.mxu0 %v5488_v0  ;;  %v3229_v37 = vpop.f32.mrf.mxu1  ;;  %v1186_v59 = vpop.f32.mrf.mxu0  ;;  %v6420_v2 = vld [vmem:[#allocation13_spill] sm:$0xff] }
 0x15c   : > { %v3230_v16 = vadd.f32 %v3229_v37, %v3228_v24  ;;  %v6089_v20 = vadd.f32 %v1186_v59, %v1042_v8  ;;  %v827_v27 = vadd.f32 %v3073_v51, %v6420_v2  ;;  %v1127_v59 = vadd.f32 %v5995_v41, %v5861_v26 }
 0x15e   : > { %3010 = vmatmul.mubr.msk.f32.gmra.mxu1 %vm413_vm8, %v6415_v40  ;;  %4030 = vmatmul.mubr.msk.f32.gmra.mxu0 %vm416_vm9, %v5503_v6  ;;  %v1047_v12 = vadd.f32 %v3230_v16, %v5972_v43  ;;  %v3295_v38 = vpop.f32.mrf.mxu0  ;;  %v3857_v0 = vpop.f32.mrf.mxu1  ;;  %v972_v40 = vadd.f32 %v3185_v28, %v827_v27  ;;  %v3188_v6 = vadd.f32 %v5817_v47, %v5801_v53 }
 0x15f   : > { %2564 = vmatprep.mubr.f32.mxu1 %v6416_v35  ;;  %4032 = vmatprep.mubr.f32.mxu0 %v5533_v50  ;;  %v6421_v35 = vld [vmem:[#allocation17_spill] sm:$0xff] }
 0x160   : > { %v6103_v39 = vadd.f32 %v3822_v56, %v1047_v12  ;;  %v3296_v18 = vpop.f32.mrf.mxu0  ;;  %v1466_v63 = vpop.f32.mrf.mxu1  ;;  %v1117_v43 = vadd.f32 %v5978_v44, %v972_v40  ;;  %v6423_v44 = vld [vmem:[#allocation20_spill] sm:$0xff]  ;;  %v6425_v56 = vld [vmem:[#allocation22_spill] sm:$0xff] }
 0x161   : > { %v3297_v60 = vadd.f32 %v3296_v18, %v3295_v38 }
 0x162   : > { %2565 = vmatmul.mubr.f32.gmra.mxu1 %v6417_v31  ;;  %4033 = vmatmul.mubr.msk.f32.gmra.mxu0 %vm416_vm9, %v5537_v48  ;;  %v6422_v48 = vld [vmem:[#allocation16_spill] sm:$0xff] }
 0x163   : > { %2569 = vmatprep.mubr.f32.mxu1 %v6421_v35  ;;  %4035 = vmatprep.mubr.f32.mxu0 %v5586_v54  ;;  %v1467_v50 = vadd.f32 %v3297_v60, %v1466_v63  ;;  %v3298_v23 = vpop.f32.mrf.mxu0  ;;  %v3860_v5 = vpop.f32.mrf.mxu1  ;;  %v977_v22 = vadd.f32 %v3188_v6, %v6422_v48  ;;  %v1132_v63 = vadd.f32 %v5986_v62, %v5887_v46 }
 0x164   : > { %v1137_v46 = vadd.f32 %v6013_v45, %v5907_v33 }
 0x165   : > { %v1545_v53 = vadd.f32 %v1467_v50, %v1117_v43  ;;  %v3299_v47 = vpop.f32.mrf.mxu0  ;;  %v1476_v31 = vpop.f32.mrf.mxu1  ;;  %v1122_v36 = vadd.f32 %v5968_v25, %v977_v22 }
 0x166   : > { %3011 = vmatmul.mubr.msk.f32.gmra.mxu1 %vm413_vm8, %v6423_v44  ;;  %4036 = vmatmul.mubr.msk.f32.gmra.mxu0 %vm416_vm9, %v5597_v10  ;;  %v3300_v54 = vadd.f32 %v3299_v47, %v3298_v23 }
 0x167   : > { %2574 = vmatprep.mubr.f32.mxu1 %v6424_v7  ;;  %4038 = vmatprep.mubr.f32.mxu0 %v5627_v34  ;;  %1561 = vst [vmem:[%s6119_s18] sm:$0xff] %v1545_v53  ;;  %v1598_v51 = vmul.f32 %v1545_v53, %v1545_v53 }
 0x168   : > { %v1472_v30 = vadd.f32 %v3857_v0, %v3300_v54  ;;  %v3301_v42 = vpop.f32.mrf.mxu0  ;;  %v3863_v24 = vpop.f32.mrf.mxu1 }
 0x16a   : > { %2575 = vmatmul.mubr.f32.gmra.mxu1 %v6425_v56  ;;  %4039 = vmatmul.mubr.msk.f32.gmra.mxu0 %vm416_vm9, %v5638_v15  ;;  %v1546_v19 = vadd.f32 %v1472_v30, %v1122_v36  ;;  %v3302_v10 = vpop.f32.mrf.mxu0  ;;  %v1486_v8 = vpop.f32.mrf.mxu1  ;;  %v6428_v15 = vld [vmem:[#allocation23_spill] sm:$0xff] }
 0x16b   : > { %2579 = vmatprep.mubr.f32.mxu1 %v6426_v14  ;;  %4041 = vmatprep.mubr.f32.mxu0 %v6427_v52  ;;  %v3303_v34 = vadd.f32 %v3302_v10, %v3301_v42  ;;  %v1142_v42 = vadd.f32 %v6005_v4, %v5932_v57 }
 0x16c   : > { %1562 = vst [vmem:[%s6119_s18 + $0x8] sm:$0xff] %v1546_v19  ;;  %v1577_v25 = vadd.f32 %v1546_v19, %v1545_v53  ;;  %v1599_v37 = vmul.f32 %v1546_v19, %v1546_v19 }
 0x16d   : > { %v1477_v16 = vadd.f32 %v3303_v34, %v1476_v31  ;;  %v3304_v28 = vpop.f32.mrf.mxu0  ;;  %v6141_v12 = vpop.f32.mrf.mxu1 }
 0x16e   : > { %2580 = vmatmul.mubr.f32.gmra.mxu1 %v6426_v14  ;;  %4042 = vmatmul.mubr.msk.f32.gmra.mxu0 %vm416_vm9, %v6428_v15  ;;  %v1614_v38 = vadd.f32 %v1599_v37, %v1598_v51 }
 0x16f   : > { %2584 = vmatprep.mubr.f32.mxu1 %v6426_v14  ;;  %4044 = vmatprep.mubr.f32.mxu0 %v6426_v14  ;;  %v1547_v0 = vadd.f32 %v1477_v16, %v1127_v59  ;;  %v3305_v2 = vpop.f32.mrf.mxu0  ;;  %v1496_v27 = vpop.f32.mrf.mxu1 }
 0x170   : > { %v3306_v26 = vadd.f32 %v3305_v2, %v3304_v28  ;;  %v1152_v2 = vadd.f32 %v6020_v3, %v5975_v9  ;;  %v1157_v9 = vadd.f32 %v6045_v21, %v5989_v29 }
 0x171   : > { %1563 = vst [vmem:[%s6119_s18 + $0x10] sm:$0xff] %v1547_v0  ;;  %v1578_v41 = vadd.f32 %v1577_v25, %v1547_v0  ;;  %v1600_v18 = vmul.f32 %v1547_v0, %v1547_v0  ;;  %v1147_v25 = vadd.f32 %v6033_v58, %v5952_v55 }
 0x172   : > { %2585 = vmatmul.mubr.f32.gmra.mxu1 %v6426_v14  ;;  %4045 = vmatmul.mubr.f32.gmra.mxu0 %v6426_v14  ;;  %v1482_v13 = vadd.f32 %v3860_v5, %v3306_v26  ;;  %v3307_v40 = vpop.f32.mrf.mxu0  ;;  %v6154_v60 = vpop.f32.mrf.mxu1 }
 0x173   : > { %v1615_v6 = vadd.f32 %v1614_v38, %v1600_v18 }
 0x174   : > { %v1548_v43 = vadd.f32 %v1482_v13, %v1132_v63  ;;  %v3308_v35 = vpop.f32.mrf.mxu0  ;;  %v1506_v50 = vpop.f32.mrf.mxu1 }
 0x175   : > { %v3309_v23 = vadd.f32 %v3308_v35, %v3307_v40 }
 0x176   : > { %1564 = vst [vmem:[%s6119_s18 + $0x18] sm:$0xff] %v1548_v43  ;;  %v1579_v53 = vadd.f32 %v1578_v41, %v1548_v43  ;;  %v1601_v47 = vmul.f32 %v1548_v43, %v1548_v43 }
 0x177   : > { %v1487_v62 = vadd.f32 %v3309_v23, %v1486_v8  ;;  %v3310_v31 = vpop.f32.mrf.mxu0  ;;  %v6159_v48 = vpop.f32.mrf.mxu1 }
 0x178   : > { %v1616_v5 = vadd.f32 %v1615_v6, %v1601_v47 }
 0x179   : > { %v1549_v22 = vadd.f32 %v1487_v62, %v1137_v46  ;;  %v3311_v44 = vpop.f32.mrf.mxu0  ;;  %v6161_v54 = vpop.f32.mrf.mxu1 }
 0x17a   : > { %v3312_v7 = vadd.f32 %v3311_v44, %v3310_v31 }
 0x17b   : > { %1565 = vst [vmem:[%s6119_s18 + $0x20] sm:$0xff] %v1549_v22  ;;  %v1580_v36 = vadd.f32 %v1579_v53, %v1549_v22  ;;  %v1602_v30 = vmul.f32 %v1549_v22, %v1549_v22 }
 0x17c   : > { %v1492_v56 = vadd.f32 %v3863_v24, %v3312_v7  ;;  %v3313_v19 = vpop.f32.mrf.mxu0  ;;  %v6166_v33 = vpop.f32.mrf.mxu1 }
 0x17d   : > { %v1617_v45 = vadd.f32 %v1616_v5, %v1602_v30 }
 0x17e   : > { %v1550_v10 = vadd.f32 %v1492_v56, %v1142_v42  ;;  %v3314_v8 = vpop.f32.mrf.mxu0  ;;  %v6168_v14 = vpop.f32.mrf.mxu1 }
 0x17f   : > { %v3315_v52 = vadd.f32 %v3314_v8, %v3313_v19 }
 0x180   : > { %1566 = vst [vmem:[%s6119_s18 + $0x28] sm:$0xff] %v1550_v10  ;;  %v1581_v34 = vadd.f32 %v1580_v36, %v1550_v10  ;;  %v1603_v51 = vmul.f32 %v1550_v10, %v1550_v10  ;;  %v1167_v10 = vadd.f32 %v6061_v1, %v6023_v49 }
 0x181   : > { %v1497_v37 = vadd.f32 %v3315_v52, %v1496_v27  ;;  %v3316_v59 = vpop.f32.mrf.mxu0  ;;  %v6173_v57 = vpop.f32.mrf.mxu1 }
 0x182   : > { %v1618_v4 = vadd.f32 %v1617_v45, %v1603_v51 }
 0x183   : > { %v1551_v24 = vadd.f32 %v1497_v37, %v1147_v25  ;;  %v3317_v16 = vpop.f32.mrf.mxu0  ;;  %v6175_v28 = vpop.f32.mrf.mxu1 }
 0x184   : > { %v3318_v15 = vadd.f32 %v3317_v16, %v3316_v59 }
 0x185   : > { %1567 = vst [vmem:[%s6119_s18 + $0x30] sm:$0xff] %v1551_v24  ;;  %v1582_v38 = vadd.f32 %v1581_v34, %v1551_v24  ;;  %v1604_v0 = vmul.f32 %v1551_v24, %v1551_v24 }
 0x186   : > { %v1502_v26 = vadd.f32 %v6141_v12, %v3318_v15  ;;  %v3319_v55 = vpop.f32.mrf.mxu0  ;;  %v3407_v58 = vpop.f32.mrf.mxu1 }
 0x187   : > { %v1619_v27 = vadd.f32 %v1618_v4, %v1604_v0 }
 0x188   : > { %v1552_v41 = vadd.f32 %v1502_v26, %v1152_v2  ;;  %v3320_v18 = vpop.f32.mrf.mxu0  ;;  %v3408_v63 = vpop.f32.mrf.mxu1 }
 0x189   : > { %v3321_v13 = vadd.f32 %v3320_v18, %v3319_v55  ;;  %v6181_v40 = vadd.f32 %v3408_v63, %v3407_v58 }
 0x18a   : > { %1568 = vst [vmem:[%s6119_s18 + $0x38] sm:$0xff] %v1552_v41  ;;  %v1583_v6 = vadd.f32 %v1582_v38, %v1552_v41  ;;  %v1605_v43 = vmul.f32 %v1552_v41, %v1552_v41  ;;  %v3322_v35 = vpop.f32.mrf.mxu0  ;;  %v3410_v23 = vpop.f32.mrf.mxu1 }
 0x18b   : > { %v1507_v3 = vadd.f32 %v3321_v13, %v1506_v50 }
 0x18c   : > { %v1620_v12 = vadd.f32 %v1619_v27, %v1605_v43  ;;  %v3323_v53 = vpop.f32.mrf.mxu0  ;;  %v3411_v47 = vpop.f32.mrf.mxu1 }
 0x18d   : > { %v1553_v46 = vadd.f32 %v1507_v3, %v1157_v9  ;;  %v3324_v62 = vadd.f32 %v3323_v53, %v3322_v35  ;;  %v6186_v31 = vadd.f32 %v3411_v47, %v3410_v23 }
 0x18e   : > { %v3325_v5 = vpop.f32.mrf.mxu0  ;;  %v3413_v22 = vpop.f32.mrf.mxu1 }
 0x18f   : > { %1569 = vst [vmem:[%s6119_s18 + $0x40] sm:$0xff] %v1553_v46  ;;  %v1584_v44 = vadd.f32 %v1583_v6, %v1553_v46  ;;  %v1606_v7 = vmul.f32 %v1553_v46, %v1553_v46  ;;  %v1512_v36 = vadd.f32 %v6154_v60, %v3324_v62 }
 0x190   : > { %v3326_v30 = vpop.f32.mrf.mxu0  ;;  %v3414_v42 = vpop.f32.mrf.mxu1 }
 0x191   : > { %v1621_v56 = vadd.f32 %v1620_v12, %v1606_v7  ;;  %v1554_v29 = vadd.f32 %v1512_v36, %v6043_v11  ;;  %v3327_v21 = vadd.f32 %v3326_v30, %v3325_v5  ;;  %v6191_v50 = vadd.f32 %v3414_v42, %v3413_v22 }
 0x192   : > { %v3328_v19 = vpop.f32.mrf.mxu0  ;;  %v3416_v45 = vpop.f32.mrf.mxu1 }
 0x193   : > { %1570 = vst [vmem:[%s6119_s18 + $0x48] sm:$0xff] %v1554_v29  ;;  %v1585_v8 = vadd.f32 %v1584_v44, %v1554_v29  ;;  %v1607_v52 = vmul.f32 %v1554_v29, %v1554_v29  ;;  %v1517_v34 = vadd.f32 %v3327_v21, %v6161_v54 }
 0x194   : > { %v3329_v60 = vpop.f32.mrf.mxu0  ;;  %v3417_v51 = vpop.f32.mrf.mxu1 }
 0x195   : > { %v1622_v25 = vadd.f32 %v1621_v56, %v1607_v52  ;;  %v1555_v37 = vadd.f32 %v1517_v34, %v1167_v10  ;;  %v3330_v59 = vadd.f32 %v3329_v60, %v3328_v19  ;;  %v6197_v11 = vadd.f32 %v3417_v51, %v3416_v45 }
 0x196   : > { %v3331_v4 = vpop.f32.mrf.mxu0  ;;  %v3419_v24 = vpop.f32.mrf.mxu1 }
 0x197   : > { %1571 = vst [vmem:[%s6119_s18 + $0x50] sm:$0xff] %v1555_v37  ;;  %v1586_v16 = vadd.f32 %v1585_v8, %v1555_v37  ;;  %v1608_v15 = vmul.f32 %v1555_v37, %v1555_v37  ;;  %v1522_v49 = vadd.f32 %v6159_v48, %v3330_v59 }
 0x198   : > { %v3332_v1 = vpop.f32.mrf.mxu0  ;;  %v3420_v38 = vpop.f32.mrf.mxu1 }
 0x199   : > { %v1623_v0 = vadd.f32 %v1622_v25, %v1608_v15  ;;  %v1556_v54 = vadd.f32 %v1522_v49, %v6059_v61  ;;  %v3333_v2 = vadd.f32 %v3332_v1, %v3331_v4  ;;  %v6202_v26 = vadd.f32 %v3420_v38, %v3419_v24 }
 0x19a   : > { %v3334_v55 = vpop.f32.mrf.mxu0  ;;  %v3422_v58 = vpop.f32.mrf.mxu1 }
 0x19b   : > { %1572 = vst [vmem:[%s6119_s18 + $0x58] sm:$0xff] %v1556_v54  ;;  %v1587_v27 = vadd.f32 %v1586_v16, %v1556_v54  ;;  %v1609_v41 = vmul.f32 %v1556_v54, %v1556_v54  ;;  %v1527_v18 = vadd.f32 %v3333_v2, %v6168_v14 }
 0x19c   : > { %v3335_v63 = vpop.f32.mrf.mxu0  ;;  %v3423_v13 = vpop.f32.mrf.mxu1 }
 0x19d   : > { %v1624_v6 = vadd.f32 %v1623_v0, %v1609_v41  ;;  %v1557_v48 = vadd.f32 %v1527_v18, %v6078_v32  ;;  %v3336_v43 = vadd.f32 %v3335_v63, %v3334_v55  ;;  %v3424_v35 = vadd.f32 %v3423_v13, %v3422_v58 }
 0x19e   : > { %v3337_v61 = vpop.f32.mrf.mxu0  ;;  %v3425_v23 = vpop.f32.mrf.mxu1 }
 0x19f   : > { %1573 = vst [vmem:[%s6119_s18 + $0x60] sm:$0xff] %v1557_v48  ;;  %v1588_v9 = vadd.f32 %v1587_v27, %v1557_v48  ;;  %v1610_v3 = vmul.f32 %v1557_v48, %v1557_v48  ;;  %v1532_v12 = vadd.f32 %v6166_v33, %v3336_v43 }
 0x1a0   : > { %v3338_v53 = vpop.f32.mrf.mxu0  ;;  %v3426_v47 = vpop.f32.mrf.mxu1 }
 0x1a1   : > { %v1625_v46 = vadd.f32 %v1624_v6, %v1610_v3  ;;  %v1558_v14 = vadd.f32 %v1532_v12, %v6074_v17  ;;  %v3339_v62 = vadd.f32 %v3338_v53, %v3337_v61  ;;  %v3427_v5 = vadd.f32 %v3426_v47, %v3425_v23 }
 0x1a2   : > { %v3340_v22 = vpop.f32.mrf.mxu0  ;;  %v3428_v32 = vpop.f32.mrf.mxu1 }
 0x1a3   : > { %1574 = vst [vmem:[%s6119_s18 + $0x68] sm:$0xff] %v1558_v14  ;;  %v1589_v44 = vadd.f32 %v1588_v9, %v1558_v14  ;;  %v1611_v7 = vmul.f32 %v1558_v14, %v1558_v14  ;;  %v1537_v36 = vadd.f32 %v3339_v62, %v6175_v28 }
 0x1a4   : > { %v3341_v30 = vpop.f32.mrf.mxu0  ;;  %v3429_v42 = vpop.f32.mrf.mxu1 }
 0x1a5   : > { %v1626_v56 = vadd.f32 %v1625_v46, %v1611_v7  ;;  %v1559_v33 = vadd.f32 %v1537_v36, %v6089_v20  ;;  %v3342_v29 = vadd.f32 %v3341_v30, %v3340_v22  ;;  %v3430_v21 = vadd.f32 %v3429_v42, %v3428_v32 }
 0x1a6   : > { %v3431_v19 = vpop.f32.mrf.mxu1  ;;  %v3913_v17 = vpop.f32.mrf.mxu0 }
 0x1a7   : > { %1575 = vst [vmem:[%s6119_s18 + $0x70] sm:$0xff] %v1559_v33  ;;  %v1590_v45 = vadd.f32 %v1589_v44, %v1559_v33  ;;  %v1612_v10 = vmul.f32 %v1559_v33, %v1559_v33  ;;  %v1542_v8 = vadd.f32 %v6173_v57, %v3342_v29  ;;  %v6216_v52 = vadd.f32 %v3913_v17, %v6186_v31 }
 0x1a8   : > { %v3432_v34 = vpop.f32.mrf.mxu1  ;;  %v2028_v28 = vpop.f32.mrf.mxu0 }
 0x1a9   : > { %v1627_v60 = vadd.f32 %v1626_v56, %v1612_v10  ;;  %v1560_v51 = vadd.f32 %v1542_v8, %v6103_v39  ;;  %v3433_v25 = vadd.f32 %v3432_v34, %v3431_v19  ;;  %v2029_v20 = vadd.f32 %v6181_v40, %v2028_v28 }
 0x1ab   : > { %1576 = vst [vmem:[%s6119_s18 + $0x78] sm:$0xff] %v1560_v51  ;;  %v6221_v37 = vadd.f32 %v1590_v45, %v1560_v51  ;;  %v1613_v59 = vmul.f32 %v1560_v51, %v1560_v51  ;;  %v3434_v4 = vpop.f32.mrf.mxu1  ;;  %v3916_v24 = vpop.f32.mrf.mxu0 }
 0x1ac   : > { %v6224_v16 = vadd.f32 %v3916_v24, %v6197_v11 }
 0x1ad   : > { %v6226_v57 = vadd.f32 %v1627_v60, %v1613_v59  ;;  %v3435_v31 = vpop.f32.mrf.mxu1  ;;  %v2038_v15 = vpop.f32.mrf.mxu0 }
 0x1ae   : > { %v3436_v49 = vadd.f32 %v3435_v31, %v3434_v4  ;;  %v2039_v1 = vadd.f32 %v6191_v50, %v2038_v15 }
 0x1b0   : > { %v3437_v39 = vpop.f32.mrf.mxu1  ;;  %v3919_v38 = vpop.f32.mrf.mxu0 }
 0x1b1   : > { %v6229_v0 = vadd.f32 %v3919_v38, %v3424_v35 }
 0x1b2   : > { %v3438_v40 = vpop.f32.mrf.mxu1  ;;  %v2048_v54 = vpop.f32.mrf.mxu0 }
 0x1b3   : > { %v3439_v2 = vadd.f32 %v3438_v40, %v3437_v39  ;;  %v6232_v55 = vadd.f32 %v6202_v26, %v2048_v54 }
 0x1b5   : > { %v3440_v58 = vpop.f32.mrf.mxu1  ;;  %v3922_v11 = vpop.f32.mrf.mxu0 }
 0x1b6   : > { %v6234_v27 = vadd.f32 %v3922_v11, %v3430_v21 }
 0x1b7   : > { %v3441_v41 = vpop.f32.mrf.mxu1  ;;  %v2058_v18 = vpop.f32.mrf.mxu0 }
 0x1b8   : > { %v3442_v63 = vadd.f32 %v3441_v41, %v3440_v58  ;;  %v6236_v13 = vadd.f32 %v3427_v5, %v2058_v18 }
 0x1ba   : > { %v3443_v50 = vpop.f32.mrf.mxu1  ;;  %v3925_v6 = vpop.f32.mrf.mxu0 }
 0x1bb   : > { %v6238_v48 = vadd.f32 %v3925_v6, %v3436_v49 }
 0x1bc   : > { %v3444_v43 = vpop.f32.mrf.mxu1  ;;  %v2068_v35 = vpop.f32.mrf.mxu0 }
 0x1bd   : > { %v3445_v61 = vadd.f32 %v3444_v43, %v3443_v50  ;;  %v6240_v23 = vadd.f32 %v3433_v25, %v2068_v35 }
 0x1bf   : > { %v3446_v26 = vpop.f32.mrf.mxu1  ;;  %v3928_v9 = vpop.f32.mrf.mxu0 }
 0x1c0   : > { %v6242_v3 = vadd.f32 %v3928_v9, %v3442_v63 }
 0x1c1   : > { %v3447_v12 = vpop.f32.mrf.mxu1  ;;  %v2078_v53 = vpop.f32.mrf.mxu0 }
 0x1c2   : > { %v3448_v47 = vadd.f32 %v3447_v12, %v3446_v26  ;;  %v6244_v46 = vadd.f32 %v3439_v2, %v2078_v53 }
 0x1c4   : > { %v3449_v14 = vpop.f32.mrf.mxu1  ;;  %v3931_v62 = vpop.f32.mrf.mxu0 }
 0x1c5   : > { %v6246_v5 = vadd.f32 %v3931_v62, %v3448_v47 }
 0x1c6   : > { %v3450_v22 = vpop.f32.mrf.mxu1  ;;  %v2088_v32 = vpop.f32.mrf.mxu0 }
 0x1c7   : > { %v3451_v44 = vadd.f32 %v3450_v22, %v3449_v14  ;;  %v6248_v7 = vadd.f32 %v3445_v61, %v2088_v32 }
 0x1c9   : > { %v3452_v36 = vpop.f32.mrf.mxu1  ;;  %v3934_v30 = vpop.f32.mrf.mxu0 }
 0x1cb   : > { %v3453_v42 = vpop.f32.mrf.mxu1  ;;  %v2098_v56 = vpop.f32.mrf.mxu0 }
 0x1cc   : > { %v3454_v33 = vadd.f32 %v3453_v42, %v3452_v36  ;;  %v6250_v29 = vadd.f32 %v3451_v44, %v2098_v56 }
 0x1ce   : > { %v6252_v21 = vadd.f32 %v3934_v30, %v3454_v33  ;;  %v3519_v19 = vpop.f32.mrf.mxu0  ;;  %v3969_v17 = vpop.f32.mrf.mxu1 }
 0x1d0   : > { %v3520_v45 = vpop.f32.mrf.mxu0  ;;  %v2318_v10 = vpop.f32.mrf.mxu1 }
 0x1d1   : > { %v3521_v8 = vadd.f32 %v3520_v45, %v3519_v19 }
 0x1d3   : > { %v2174_v34 = vadd.f32 %v3521_v8, %v2029_v20  ;;  %v3522_v28 = vpop.f32.mrf.mxu0  ;;  %v3972_v60 = vpop.f32.mrf.mxu1 }
 0x1d5   : > { %v6254_v51 = vadd.f32 %v2318_v10, %v2174_v34  ;;  %v3523_v25 = vpop.f32.mrf.mxu0  ;;  %v2328_v59 = vpop.f32.mrf.mxu1 }
 0x1d6   : > { %v3524_v4 = vadd.f32 %v3523_v25, %v3522_v28 }
 0x1d8   : > { %v2179_v24 = vadd.f32 %v3524_v4, %v6216_v52  ;;  %v3525_v31 = vpop.f32.mrf.mxu0  ;;  %v3975_v15 = vpop.f32.mrf.mxu1 }
 0x1da   : > { %v3526_v49 = vpop.f32.mrf.mxu0  ;;  %v2338_v39 = vpop.f32.mrf.mxu1  ;;  %v6257_v38 = vadd.f32 %v3969_v17, %v2179_v24 }
 0x1db   : > { %v3527_v40 = vadd.f32 %v3526_v49, %v3525_v31 }
 0x1dd   : > { %v2184_v54 = vadd.f32 %v3527_v40, %v2039_v1  ;;  %v3528_v2 = vpop.f32.mrf.mxu0  ;;  %v3978_v58 = vpop.f32.mrf.mxu1 }
 0x1df   : > { %v3529_v20 = vpop.f32.mrf.mxu0  ;;  %v2348_v11 = vpop.f32.mrf.mxu1  ;;  %v6259_v41 = vadd.f32 %v2328_v59, %v2184_v54 }
 0x1e0   : > { %v3530_v18 = vadd.f32 %v3529_v20, %v3528_v2 }
 0x1e2   : > { %v2189_v63 = vadd.f32 %v3530_v18, %v6224_v16  ;;  %v3531_v50 = vpop.f32.mrf.mxu0  ;;  %v3981_v6 = vpop.f32.mrf.mxu1 }
 0x1e4   : > { %v3532_v52 = vpop.f32.mrf.mxu0  ;;  %v2358_v43 = vpop.f32.mrf.mxu1  ;;  %v6262_v35 = vadd.f32 %v3972_v60, %v2189_v63 }
 0x1e5   : > { %v3533_v61 = vadd.f32 %v3532_v52, %v3531_v50 }
 0x1e7   : > { %v2194_v26 = vadd.f32 %v3533_v61, %v6232_v55  ;;  %v3534_v9 = vpop.f32.mrf.mxu0  ;;  %v3984_v1 = vpop.f32.mrf.mxu1 }
 0x1e9   : > { %v3535_v12 = vpop.f32.mrf.mxu0  ;;  %v2368_v53 = vpop.f32.mrf.mxu1  ;;  %v6265_v47 = vadd.f32 %v2338_v39, %v2194_v26 }
 0x1ea   : > { %v3536_v14 = vadd.f32 %v3535_v12, %v3534_v9 }
 0x1ec   : > { %v2199_v62 = vadd.f32 %v3536_v14, %v6229_v0  ;;  %v3537_v22 = vpop.f32.mrf.mxu0  ;;  %v3987_v16 = vpop.f32.mrf.mxu1 }
 0x1ee   : > { %v3538_v32 = vpop.f32.mrf.mxu0  ;;  %v2378_v44 = vpop.f32.mrf.mxu1  ;;  %v6268_v36 = vadd.f32 %v3975_v15, %v2199_v62 }
 0x1ef   : > { %v3539_v30 = vadd.f32 %v3538_v32, %v3537_v22 }
 0x1f1   : > { %v2204_v42 = vadd.f32 %v3539_v30, %v6236_v13  ;;  %v3540_v56 = vpop.f32.mrf.mxu0  ;;  %v6271_v55 = vpop.f32.mrf.mxu1 }
 0x1f3   : > { %v3541_v33 = vpop.f32.mrf.mxu0  ;;  %v2388_v19 = vpop.f32.mrf.mxu1  ;;  %v6273_v17 = vadd.f32 %v2348_v11, %v2204_v42 }
 0x1f4   : > { %v3542_v45 = vadd.f32 %v3541_v33, %v3540_v56 }
 0x1f6   : > { %v2209_v10 = vadd.f32 %v3542_v45, %v6234_v27  ;;  %v3543_v0 = vpop.f32.mrf.mxu0  ;;  %v3631_v8 = vpop.f32.mrf.mxu1 }
 0x1f8   : > { %v3544_v34 = vpop.f32.mrf.mxu0  ;;  %v3632_v28 = vpop.f32.mrf.mxu1  ;;  %v6276_v60 = vadd.f32 %v3978_v58, %v2209_v10 }
 0x1f9   : > { %v3545_v25 = vadd.f32 %v3544_v34, %v3543_v0 }
 0x1fa   : > { %v3546_v59 = vpop.f32.mrf.mxu0  ;;  %v3634_v4 = vpop.f32.mrf.mxu1 }
 0x1fb   : > { %v2214_v13 = vadd.f32 %v3545_v25, %v6240_v23 }
 0x1fc   : > { %v3547_v24 = vpop.f32.mrf.mxu0  ;;  %v3635_v31 = vpop.f32.mrf.mxu1 }
 0x1fd   : > { %v3548_v15 = vadd.f32 %v3547_v24, %v3546_v59  ;;  %v6279_v49 = vadd.f32 %v2358_v43, %v2214_v13  ;;  %v3636_v24 = vadd.f32 %v3635_v31, %v3634_v4 }
 0x1fe   : > { %v3549_v39 = vpop.f32.mrf.mxu0  ;;  %v3637_v40 = vpop.f32.mrf.mxu1 }
 0x1ff   : > { %v2219_v27 = vadd.f32 %v3548_v15, %v6238_v48 }
 0x200   : > { %v3550_v54 = vpop.f32.mrf.mxu0  ;;  %v3638_v2 = vpop.f32.mrf.mxu1 }
 0x201   : > { %v3551_v20 = vadd.f32 %v3550_v54, %v3549_v39  ;;  %v6282_v11 = vadd.f32 %v3981_v6, %v2219_v27  ;;  %v3633_v54 = vadd.f32 %v3632_v28, %v3631_v8  ;;  %v3639_v28 = vadd.f32 %v3638_v2, %v3637_v40 }
 0x202   : > { %v3552_v58 = vpop.f32.mrf.mxu0  ;;  %v3640_v18 = vpop.f32.mrf.mxu1 }
 0x203   : > { %v2224_v63 = vadd.f32 %v3551_v20, %v6244_v46 }
 0x204   : > { %v3553_v50 = vpop.f32.mrf.mxu0  ;;  %v3641_v23 = vpop.f32.mrf.mxu1 }
 0x205   : > { %v3554_v52 = vadd.f32 %v3553_v50, %v3552_v58  ;;  %v6285_v61 = vadd.f32 %v2368_v53, %v2224_v63  ;;  %v3642_v63 = vadd.f32 %v3641_v23, %v3640_v18 }
 0x206   : > { %v3555_v43 = vpop.f32.mrf.mxu0  ;;  %v3643_v26 = vpop.f32.mrf.mxu1 }
 0x207   : > { %v2229_v9 = vadd.f32 %v3554_v52, %v6242_v3 }
 0x208   : > { %v3556_v12 = vpop.f32.mrf.mxu0  ;;  %v3644_v48 = vpop.f32.mrf.mxu1 }
 0x209   : > { %v3557_v14 = vadd.f32 %v3556_v12, %v3555_v43  ;;  %v6288_v62 = vadd.f32 %v3984_v1, %v2229_v9 }
 0x20a   : > { %v3558_v6 = vpop.f32.mrf.mxu0  ;;  %v3646_v22 = vpop.f32.mrf.mxu1 }
 0x20b   : > { %v2234_v32 = vadd.f32 %v3557_v14, %v6248_v7 }
 0x20c   : > { %v3559_v30 = vpop.f32.mrf.mxu0  ;;  %v3647_v46 = vpop.f32.mrf.mxu1 }
 0x20d   : > { %v3560_v42 = vadd.f32 %v3559_v30, %v3558_v6  ;;  %v6291_v56 = vadd.f32 %v2378_v44, %v2234_v32  ;;  %v3645_v32 = vadd.f32 %v3644_v48, %v3643_v26 }
 0x20e   : > { %v3561_v53 = vpop.f32.mrf.mxu0  ;;  %v3649_v33 = vpop.f32.mrf.mxu1 }
 0x20f   : > { %v2239_v45 = vadd.f32 %v3560_v42, %v6246_v5 }
 0x210   : > { %v3562_v10 = vpop.f32.mrf.mxu0  ;;  %v3650_v3 = vpop.f32.mrf.mxu1 }
 0x211   : > { %v3563_v0 = vadd.f32 %v3562_v10, %v3561_v53  ;;  %v6294_v34 = vadd.f32 %v3987_v16, %v2239_v45 }
 0x212   : > { %v3564_v1 = vpop.f32.mrf.mxu0  ;;  %v3652_v25 = vpop.f32.mrf.mxu1 }
 0x213   : > { %v2244_v59 = vadd.f32 %v3563_v0, %v6250_v29 }
 0x214   : > { %v3565_v13 = vpop.f32.mrf.mxu0  ;;  %v3653_v7 = vpop.f32.mrf.mxu1 }
 0x215   : > { %v3566_v15 = vadd.f32 %v3565_v13, %v3564_v1  ;;  %v6297_v44 = vadd.f32 %v2388_v19, %v2244_v59  ;;  %v3651_v1 = vadd.f32 %v3650_v3, %v3649_v33 }
 0x216   : > { %v3655_v39 = vpop.f32.mrf.mxu1  ;;  %v4025_v27 = vpop.f32.mrf.mxu0 }
 0x217   : > { %v2249_v5 = vadd.f32 %v3566_v15, %v6252_v21  ;;  %v2662_v20 = vadd.f32 %v4025_v27, %v3636_v24  ;;  %v3648_v21 = vadd.f32 %v3647_v46, %v3646_v22  ;;  %v3654_v46 = vadd.f32 %v3653_v7, %v3652_v25 }
 0x218   : > { %v3656_v58 = vpop.f32.mrf.mxu1  ;;  %v2656_v16 = vpop.f32.mrf.mxu0 }
 0x219   : > { %v6301_v50 = vadd.f32 %v6271_v55, %v2249_v5  ;;  %v2736_v29 = vadd.f32 %v2662_v20, %v6257_v38  ;;  %v2657_v4 = vadd.f32 %v3633_v54, %v2656_v16  ;;  %v3657_v20 = vadd.f32 %v3656_v58, %v3655_v39 }
 0x21a   : > { %v3658_v31 = vpop.f32.mrf.mxu1  ;;  %v4028_v52 = vpop.f32.mrf.mxu0 }
 0x21b   : > { %3020 = vst [vmem:[%s6119_s18 + $0x88] sm:$0xff] %v2736_v29  ;;  %v2735_v19 = vadd.f32 %v2657_v4, %v6254_v51  ;;  %v2672_v8 = vadd.f32 %v4028_v52, %v3642_v63  ;;  %v2790_v12 = vmul.f32 %v2736_v29, %v2736_v29 }
 0x21c   : > { %v3659_v43 = vpop.f32.mrf.mxu1  ;;  %v2666_v9 = vpop.f32.mrf.mxu0 }
 0x21d   : > { %3019 = vst [vmem:[%s6119_s18 + $0x80] sm:$0xff] %v2735_v19  ;;  %v2768_v18 = vadd.f32 %v2736_v29, %v2735_v19  ;;  %v2789_v55 = vmul.f32 %v2735_v19, %v2735_v19  ;;  %v2738_v23 = vadd.f32 %v2672_v8, %v6262_v35  ;;  %v2667_v38 = vadd.f32 %v3639_v28, %v2666_v9 }
 0x21e   : > { %v3661_v14 = vpop.f32.mrf.mxu1  ;;  %v4031_v6 = vpop.f32.mrf.mxu0  ;;  %v3660_v7 = vadd.f32 %v3659_v43, %v3658_v31 }
 0x21f   : > { %v2805_v30 = vadd.f32 %v2790_v12, %v2789_v55  ;;  %3022 = vst [vmem:[%s6119_s18 + $0x98] sm:$0xff] %v2738_v23  ;;  %v2682_v51 = vadd.f32 %v4031_v6, %v3648_v21  ;;  %v2737_v40 = vadd.f32 %v2667_v38, %v6259_v41  ;;  %v2792_v59 = vmul.f32 %v2738_v23, %v2738_v23 }
 0x220   : > { %v3662_v2 = vpop.f32.mrf.mxu1  ;;  %v2676_v22 = vpop.f32.mrf.mxu0 }
 0x221   : > { %v2740_v42 = vadd.f32 %v2682_v51, %v6268_v36  ;;  %v2677_v53 = vadd.f32 %v3645_v32, %v2676_v22  ;;  %3021 = vst [vmem:[%s6119_s18 + $0x90] sm:$0xff] %v2737_v40  ;;  %v2769_v45 = vadd.f32 %v2768_v18, %v2737_v40  ;;  %v2791_v35 = vmul.f32 %v2737_v40, %v2737_v40 }
 0x222   : > { %v3664_v10 = vpop.f32.mrf.mxu1  ;;  %v4034_v0 = vpop.f32.mrf.mxu0  ;;  %v3663_v9 = vadd.f32 %v3662_v2, %v3661_v14 }
 0x223   : > { %3024 = vst [vmem:[%s6119_s18 + $0xa8] sm:$0xff] %v2740_v42  ;;  %v2739_v26 = vadd.f32 %v2677_v53, %v6265_v47  ;;  %v2692_v48 = vadd.f32 %v4034_v0, %v3654_v46  ;;  %v2806_v41 = vadd.f32 %v2805_v30, %v2791_v35  ;;  %v2770_v13 = vadd.f32 %v2769_v45, %v2738_v23 }
 0x224   : > { %v3665_v24 = vpop.f32.mrf.mxu1  ;;  %v2686_v25 = vpop.f32.mrf.mxu0  ;;  %v2794_v63 = vmul.f32 %v2740_v42, %v2740_v42 }
 0x225   : > { %3023 = vst [vmem:[%s6119_s18 + $0xa0] sm:$0xff] %v2739_v26  ;;  %v2793_v36 = vmul.f32 %v2739_v26, %v2739_v26  ;;  %v2742_v15 = vadd.f32 %v2692_v48, %v6276_v60  ;;  %v2687_v27 = vadd.f32 %v3651_v1, %v2686_v25  ;;  %v2771_v54 = vadd.f32 %v2770_v13, %v2739_v26 }
 0x226   : > { %v2807_v5 = vadd.f32 %v2806_v41, %v2792_v59  ;;  %v3667_v33 = vpop.f32.mrf.mxu1  ;;  %v4037_v3 = vpop.f32.mrf.mxu0  ;;  %v3666_v19 = vadd.f32 %v3665_v24, %v3664_v10  ;;  %v1592_v25 = vrot.slane %v6221_v37, 4 }
 0x227   : > { %3026 = vst [vmem:[%s6119_s18 + $0xb8] sm:$0xff] %v2742_v15  ;;  %v2741_v47 = vadd.f32 %v2687_v27, %v6273_v17  ;;  %v2702_v16 = vadd.f32 %v4037_v3, %v3660_v7  ;;  %v2772_v4 = vadd.f32 %v2771_v54, %v2740_v42  ;;  %v2796_v18 = vmul.f32 %v2742_v15, %v2742_v15 }
 0x228   : > { %v2808_v29 = vadd.f32 %v2807_v5, %v2793_v36  ;;  %v3668_v31 = vpop.f32.mrf.mxu1  ;;  %v2696_v52 = vpop.f32.mrf.mxu0  ;;  %v1629_v3 = vrot.slane %v6226_v57, 4 }
 0x229   : > { %3025 = vst [vmem:[%s6119_s18 + $0xb0] sm:$0xff] %v2741_v47  ;;  %v2795_v60 = vmul.f32 %v2741_v47, %v2741_v47  ;;  %v2744_v8 = vadd.f32 %v2702_v16, %v6282_v11  ;;  %v2697_v28 = vadd.f32 %v3657_v20, %v2696_v52  ;;  %v2773_v21 = vadd.f32 %v2772_v4, %v2741_v47 }
 0x22a   : > { %v2809_v43 = vadd.f32 %v2808_v29, %v2794_v63  ;;  %v3670_v39 = vpop.f32.mrf.mxu1  ;;  %v4040_v58 = vpop.f32.mrf.mxu0  ;;  %v3669_v46 = vadd.f32 %v3668_v31, %v3667_v33  ;;  %v1593_v63 = vadd.f32 %v1592_v25, %v6221_v37 }
 0x22b   : > { %3028 = vst [vmem:[%s6119_s18 + $0xc8] sm:$0xff] %v2744_v8  ;;  %v2743_v17 = vadd.f32 %v2697_v28, %v6279_v49  ;;  %v2712_v12 = vadd.f32 %v4040_v58, %v3666_v19  ;;  %v2774_v23 = vadd.f32 %v2773_v21, %v2742_v15  ;;  %v2798_v53 = vmul.f32 %v2744_v8, %v2744_v8 }
 0x22c   : > { %v2810_v55 = vadd.f32 %v2809_v43, %v2795_v60  ;;  %v3671_v38 = vpop.f32.mrf.mxu1  ;;  %v2706_v6 = vpop.f32.mrf.mxu0  ;;  %v1630_v60 = vadd.f32 %v1629_v3, %v6226_v57  ;;  %v1594_v43 = vrot.slane %v1593_v63, 2 }
 0x22d   : > { %3027 = vst [vmem:[%s6119_s18 + $0xc0] sm:$0xff] %v2743_v17  ;;  %v2797_v32 = vmul.f32 %v2743_v17, %v2743_v17  ;;  %v2746_v11 = vadd.f32 %v2712_v12, %v6288_v62  ;;  %v3672_v30 = vadd.f32 %v3671_v38, %v3670_v39  ;;  %v2707_v51 = vadd.f32 %v3663_v9, %v2706_v6 }
 0x22e   : > { %v2775_v40 = vadd.f32 %v2774_v23, %v2743_v17  ;;  %v2811_v22 = vadd.f32 %v2810_v55, %v2796_v18  ;;  %v3673_v14 = vpop.f32.mrf.mxu1  ;;  %v4043_v2 = vpop.f32.mrf.mxu0  ;;  %v1631_v9 = vrot.slane %v1630_v60, 2  ;;  %v1595_v37 = vadd.f32 %v1594_v43, %v1593_v63 }
 0x22f   : > { %3030 = vst [vmem:[%s6119_s18 + $0xd8] sm:$0xff] %v2746_v11  ;;  %v2745_v49 = vadd.f32 %v2707_v51, %v6285_v61  ;;  %v2722_v42 = vadd.f32 %v4043_v2, %v3672_v30  ;;  %v2800_v7 = vmul.f32 %v2746_v11, %v2746_v11 }
 0x230   : > { %v2812_v45 = vadd.f32 %v2811_v22, %v2797_v32  ;;  %v2776_v35 = vadd.f32 %v2775_v40, %v2744_v8  ;;  %v3674_v10 = vpop.f32.mrf.mxu1  ;;  %v2716_v0 = vpop.f32.mrf.mxu0  ;;  %v1632_v55 = vadd.f32 %v1631_v9, %v1630_v60  ;;  %v1596_v38 = vrot.slane %v1595_v37, 1 }
 0x231   : > { %3029 = vst [vmem:[%s6119_s18 + $0xd0] sm:$0xff] %v2745_v49  ;;  %v2799_v62 = vmul.f32 %v2745_v49, %v2745_v49  ;;  %v2748_v1 = vadd.f32 %v2722_v42, %v6294_v34  ;;  %v2717_v26 = vadd.f32 %v3669_v46, %v2716_v0  ;;  %v3675_v24 = vadd.f32 %v3674_v10, %v3673_v14 }
 0x232   : > { %v2777_v48 = vadd.f32 %v2776_v35, %v2745_v49  ;;  %v2813_v59 = vadd.f32 %v2812_v45, %v2798_v53  ;;  %v3676_v41 = vpop.f32.mrf.mxu1  ;;  %v4046_v13 = vpop.f32.mrf.mxu0  ;;  %v1633_v32 = vrot.slane %v1632_v55, 1  ;;  %v1597_v51 = vadd.f32 %v1596_v38, %v1595_v37 }
 0x233   : > { %3032 = vst [vmem:[%s6119_s18 + $0xe8] sm:$0xff] %v2748_v1  ;;  %v2747_v61 = vadd.f32 %v2717_v26, %v6291_v56  ;;  %v2802_v29 = vmul.f32 %v2748_v1, %v2748_v1 }
 0x234   : > { %v2814_v36 = vadd.f32 %v2813_v59, %v2799_v62  ;;  %v2778_v15 = vadd.f32 %v2777_v48, %v2746_v11  ;;  %v3677_v27 = vpop.f32.mrf.mxu1  ;;  %v2726_v54 = vpop.f32.mrf.mxu0  ;;  %v1634_v14 = vadd.f32 %v1633_v32, %v1632_v55 }
 0x235   : > { %3031 = vst [vmem:[%s6119_s18 + $0xe0] sm:$0xff] %v2747_v61  ;;  %v2801_v5 = vmul.f32 %v2747_v61, %v2747_v61  ;;  %v3678_v34 = vadd.f32 %v3677_v27, %v3676_v41  ;;  %v2727_v33 = vadd.f32 %v3675_v24, %v2726_v54 }
 0x236   : > { %v2779_v20 = vadd.f32 %v2778_v15, %v2747_v61  ;;  %v2815_v47 = vadd.f32 %v2814_v36, %v2800_v7 }
 0x237   : > { %v2732_v16 = vadd.f32 %v4046_v13, %v3678_v34  ;;  %v2749_v56 = vadd.f32 %v2727_v33, %v6297_v44 }
 0x238   : > { %v2816_v4 = vadd.f32 %v2815_v47, %v2801_v5  ;;  %v2780_v31 = vadd.f32 %v2779_v20, %v2748_v1 }
 0x239   : > { %v2750_v52 = vadd.f32 %v2732_v16, %v6301_v50  ;;  %3033 = vst [vmem:[%s6119_s18 + $0xf0] sm:$0xff] %v2749_v56  ;;  %v2803_v19 = vmul.f32 %v2749_v56, %v2749_v56 }
 0x23a   : > { %v2781_v8 = vadd.f32 %v2780_v31, %v2749_v56  ;;  %v2817_v28 = vadd.f32 %v2816_v4, %v2802_v29 }
 0x23b   : > { %3034 = vst [vmem:[%s6119_s18 + $0xf8] sm:$0xff] %v2750_v52  ;;  %v2804_v21 = vmul.f32 %v2750_v52, %v2750_v52 }
 0x23c   : > { %v2782_v39 = vadd.f32 %v2781_v8, %v2750_v52  ;;  %v2818_v58 = vadd.f32 %v2817_v28, %v2803_v19 }
 0x23e   : > { %v2783_v44 = vrot.slane %v2782_v39, 4  ;;  %v2819_v17 = vadd.f32 %v2818_v58, %v2804_v21 }
 0x240   : > { %v2784_v12 = vadd.f32 %v2783_v44, %v2782_v39  ;;  %v2820_v18 = vrot.slane %v2819_v17, 4 }
 0x242   : > { %v2785_v50 = vrot.slane %v2784_v12, 2  ;;  %v2821_v23 = vadd.f32 %v2820_v18, %v2819_v17 }
 0x244   : > { %v2786_v6 = vadd.f32 %v2785_v50, %v2784_v12  ;;  %v2822_v57 = vrot.slane %v2821_v23, 2 }
 0x246   : > { %v2787_v11 = vrot.slane %v2786_v6, 1  ;;  %v2823_v30 = vadd.f32 %v2822_v57, %v2821_v23 }
 0x248   : > { %v2788_v40 = vadd.f32 %v2787_v11, %v2786_v6  ;;  %v2824_v22 = vrot.slane %v2823_v30, 1 }
 0x24a   : > { %v2825_v2 = vadd.f32 %v2824_v22, %v2823_v30  ;;  %v2826_v46 = vadd.f32 %v2788_v40, %v1597_v51 }
 0x24c   : > { %v2827_v49 = vadd.f32 %v2825_v2, %v1634_v14 }
 0x24e   : > { %v2829_v42 = vsel %vm2828_vm4, %v2826_v46, %v2827_v49 }
 0x24f   : > { %2830 = vst [vmem:[%s208_s21] sm:$0x3] %v2829_v42 }
 0x250 PF: > { %s15_s15 = sadd.s32 1, %s4066_s15  }
 0x251   : > { %p12_p4 = scmp.ge.s32.totalorder %s15_s15, 4  }
 0x253   :  { %14 = sbr.rel (!%p12_p4) target bundleno = 1 (0x1), region = 75 }

// kernel: encoder_block_forward.5
= control target key start
LH: loop header
LB: loop body
LE: loop exit
PB: predicated region body
PF: predicated region fallthrough
CT: control target
= control target key end

     0   :  { %s4805_s21 = smov 0   ;;  %s7393_s0 = inlined_call_operand.vmem [shape: f32[3,128], index: 0, kind: input, shape index: {}]   ;;  %s7394_s1 = inlined_call_operand.vmem [shape: f32[2,16,16,128], index: 1, kind: input, shape index: {}]   ;;  %s7395_s2 = inlined_call_operand.vmem [shape: f32[2,16,16,128], index: 2, kind: input, shape index: {}]   ;;  %s7396_s3 = inlined_call_operand.vmem [shape: f32[1152,128], index: 3, kind: input, shape index: {}]   ;;  %s7397_s4 = inlined_call_operand.vmem [shape: f32[128,128], index: 4, kind: input, shape index: {}]   ;;  %s7398_s5 = inlined_call_operand.vmem [shape: f32[2,16,16,128], index: 5, kind: output, shape index: {0}]   ;;  %s7399_s6 = inlined_call_operand.vmem [shape: f32[2,8,8,128], index: 6, kind: output, shape index: {1}]  }
   0x1 LB: > { %s3393_s22 = sadd.s32 4294967295, %s4767_s21   ;;  %p3397_p0 = scmp.ge.s32.totalorder %s4767_s21, 1  ;;  %s4767_s21 = sphi %s4805_s21, %s17_s21  }
   0x2   : > { %p225_p1 = scmp.lt.s32.totalorder %s4767_s21, 3 }
   0x4   : > { %p226_p2 = pnand %p3397_p0, %p225_p1 }
   0x6   : > { %229 = sbr.rel (%p226_p2) target bundleno = 630 (0x276), region = 40 }
   0xb   : > { %v722_v0 = vld [vmem:[%s7396_s3 + $0x278] sm:$0xff]  ;;  %v721_v3 = vld [vmem:[%s7396_s3 + $0x270] sm:$0xff]  ;;  %v720_v6 = vld [vmem:[%s7396_s3 + $0x268] sm:$0xff]  ;;  %p4839_p3 = scmp.lt.s32.totalorder %s3393_s22, 1  ;;  %v318_v12 = vlaneseq }
   0xc   : > { %v738_v1 = vld [vmem:[%s7396_s3 + $0x2f8] sm:$0xff]  ;;  %3551 = vmatprep.subr.mxu0 %v722_v0  ;;  %v737_v4 = vld [vmem:[%s7396_s3 + $0x2f0] sm:$0xff]  ;;  %v736_v7 = vld [vmem:[%s7396_s3 + $0x2e8] sm:$0xff] }
   0xd   : > { %v706_v2 = vld [vmem:[%s7396_s3 + $0x1f8] sm:$0xff]  ;;  %4287 = vmatprep.subr.mxu1 %v738_v1  ;;  %v705_v5 = vld [vmem:[%s7396_s3 + $0x1f0] sm:$0xff]  ;;  %v704_v8 = vld [vmem:[%s7396_s3 + $0x1e8] sm:$0xff]  ;;  %s7539_s22 = smov (!%p4839_p3, %s3393_s22), 1  ;;  %v4879_v19 = vshrl.u32 %v318_v12, 7 }
   0xe   : > { %3552 = vmatpush3.msra.mxu0 %v706_v2  ;;  %4288 = vmatpush3.msra.mxu1 %v738_v1  ;;  %v719_v9 = vld [vmem:[%s7396_s3 + $0x260] sm:$0xff]  ;;  %v718_v13 = vld [vmem:[%s7396_s3 + $0x258] sm:$0xff]  ;;  %v717_v16 = vld [vmem:[%s7396_s3 + $0x250] sm:$0xff]  ;;  %s4888_s18 = sshll.u32 %s7539_s22, 8 }
   0xf   : > { %3553 = vmatprep.subr.mxu0 %v721_v3  ;;  %4289 = vmatprep.subr.mxu1 %v737_v4  ;;  %v735_v10 = vld [vmem:[%s7396_s3 + $0x2e0] sm:$0xff]  ;;  %v734_v14 = vld [vmem:[%s7396_s3 + $0x2d8] sm:$0xff]  ;;  %v733_v17 = vld [vmem:[%s7396_s3 + $0x2d0] sm:$0xff]  ;;  %s4906_s7 = scalar_lea.vmem %s7395_s2, %s4888_s18  ;;  %v320_v26 = vsub.s32 0, %v4879_v19  ;;  %v356_v27 = vsub.s32 1, %v4879_v19  ;;  %vm600_vm4 = vcmp.lt.s32.totalorder %v4879_v19, 7  ;;  %s5861_s12 = scalar_lea.vmem %s7394_s1, %s4888_s18 }
  0x10   : > { %3554 = vmatpush3.msra.mxu0 %v705_v5  ;;  %4290 = vmatpush3.msra.mxu1 %v737_v4  ;;  %v703_v11 = vld [vmem:[%s7396_s3 + $0x1e0] sm:$0xff]  ;;  %v702_v15 = vld [vmem:[%s7396_s3 + $0x1d8] sm:$0xff]  ;;  %v701_v18 = vld [vmem:[%s7396_s3 + $0x1d0] sm:$0xff]  ;;  %vm555_vm5 = vcmp.lt.s32.totalorder %v4879_v19, 1  ;;  %vm537_vm8 = vcmp.ge.s32.totalorder %v4879_v19, 1 }
  0x11   : > { %3555 = vmatprep.subr.mxu0 %v720_v6  ;;  %4291 = vmatprep.subr.mxu1 %v736_v7  ;;  %v716_v20 = vld [vmem:[%s7396_s3 + $0x248] sm:$0xff]  ;;  %v715_v23 = vld [vmem:[%s7396_s3 + $0x240] sm:$0xff]  ;;  %v714_v28 = vld [vmem:[%s7396_s3 + $0x238] sm:$0xff] }
  0x12   : > { %3556 = vmatpush3.msra.mxu0 %v704_v8  ;;  %4292 = vmatpush3.msra.mxu1 %v736_v7  ;;  %v732_v21 = vld [vmem:[%s7396_s3 + $0x2c8] sm:$0xff]  ;;  %v731_v24 = vld [vmem:[%s7396_s3 + $0x2c0] sm:$0xff]  ;;  %v730_v29 = vld [vmem:[%s7396_s3 + $0x2b8] sm:$0xff] }
  0x13   : > { %3557 = vmatprep.subr.mxu0 %v719_v9  ;;  %4293 = vmatprep.subr.mxu1 %v735_v10  ;;  %v700_v22 = vld [vmem:[%s7396_s3 + $0x1c8] sm:$0xff]  ;;  %v699_v25 = vld [vmem:[%s7396_s3 + $0x1c0] sm:$0xff]  ;;  %v698_v30 = vld [vmem:[%s7396_s3 + $0x1b8] sm:$0xff] }
  0x14   : > { %3558 = vmatpush3.msra.mxu0 %v703_v11  ;;  %4294 = vmatpush3.msra.mxu1 %v735_v10  ;;  %v713_v31 = vld [vmem:[%s7396_s3 + $0x230] sm:$0xff]  ;;  %v285_v33 = vld [vmem:[%s7393_s0] sm:$0x7]  ;;  %v287_v35 = vld [vmem:[%s4906_s7 + $0x8] sm:$0xff] }
  0x15   : > { %3559 = vmatprep.subr.mxu0 %v718_v13  ;;  %4295 = vmatprep.subr.mxu1 %v734_v14  ;;  %v729_v32 = vld [vmem:[%s7396_s3 + $0x2b0] sm:$0xff]  ;;  %v286_v34 = vld [vmem:[%s4906_s7] sm:$0xff]  ;;  %v712_v37 = vld [vmem:[%s7396_s3 + $0x228] sm:$0xff]  ;;  %v4936_v38 = vrot.slane %v285_v33, %v320_v26  ;;  %v4938_v39 = vrot.slane %v285_v33, %v356_v27  ;;  %v5003_v13 = vadd.s32 8, %v4879_v19 }
  0x16   : > { %3560 = vmatpush3.msra.mxu0 %v702_v15  ;;  %4296 = vmatpush3.msra.mxu1 %v734_v14  ;;  %v697_v36 = vld [vmem:[%s7396_s3 + $0x1b0] sm:$0xff]  ;;  %v728_v40 = vld [vmem:[%s7396_s3 + $0x2a8] sm:$0xff]  ;;  %v289_v42 = vld [vmem:[%s4906_s7 + $0x18] sm:$0xff] }
  0x17   : > { %3561 = vmatprep.subr.mxu0 %v717_v16  ;;  %4297 = vmatprep.subr.mxu1 %v733_v17  ;;  %v288_v41 = vld [vmem:[%s4906_s7 + $0x10] sm:$0xff]  ;;  %v696_v43 = vld [vmem:[%s7396_s3 + $0x1a8] sm:$0xff]  ;;  %v711_v44 = vld [vmem:[%s7396_s3 + $0x220] sm:$0xff]  ;;  %v322_v45 = vmul.f32 %v4936_v38, %v286_v34  ;;  %v323_v46 = vmul.f32 %v4936_v38, %v287_v35  ;;  %v325_v50 = vmul.f32 %v4936_v38, %v289_v42  ;;  %vm540_vm9 = vcmp.le.s32.totalorder %v5003_v13, 14 }
  0x18   : > { %3562 = vmatpush3.msra.mxu0 %v701_v18  ;;  %4298 = vmatpush3.msra.mxu1 %v733_v17  ;;  %v324_v47 = vmul.f32 %v4936_v38, %v288_v41  ;;  %v727_v48 = vld [vmem:[%s7396_s3 + $0x2a0] sm:$0xff]  ;;  %v710_v52 = vld [vmem:[%s7396_s3 + $0x218] sm:$0xff]  ;;  %v291_v57 = vld [vmem:[%s4906_s7 + $0x28] sm:$0xff] }
  0x19   : > { %3563 = vmatprep.subr.mxu0 %v716_v20  ;;  %4299 = vmatprep.subr.mxu1 %v732_v21  ;;  %v695_v49 = vld [vmem:[%s7396_s3 + $0x1a0] sm:$0xff]  ;;  %v726_v53 = vld [vmem:[%s7396_s3 + $0x298] sm:$0xff]  ;;  %v358_v54 = vadd.f32 %v4938_v39, %v322_v45  ;;  %v359_v55 = vadd.f32 %v4938_v39, %v323_v46  ;;  %v709_v59 = vld [vmem:[%s7396_s3 + $0x210] sm:$0xff]  ;;  %v361_v61 = vadd.f32 %v4938_v39, %v325_v50 }
  0x1a   : > { %3564 = vmatpush3.msra.mxu0 %v700_v22  ;;  %4300 = vmatpush3.msra.mxu1 %v732_v21  ;;  %v290_v51 = vld [vmem:[%s4906_s7 + $0x20] sm:$0xff]  ;;  %v360_v56 = vadd.f32 %v4938_v39, %v324_v47  ;;  %v694_v58 = vld [vmem:[%s7396_s3 + $0x198] sm:$0xff]  ;;  %v725_v60 = vld [vmem:[%s7396_s3 + $0x290] sm:$0xff]  ;;  %v327_v63 = vmul.f32 %v4936_v38, %v291_v57 }
  0x1b   : > { %3565 = vmatprep.subr.mxu0 %v715_v23  ;;  %4301 = vmatprep.subr.mxu1 %v731_v24  ;;  %v326_v62 = vmul.f32 %v4936_v38, %v290_v51  ;;  %vm390_vm0 = vcmp.ge.f32.partialorder %v358_v54, 0.0  ;;  %v422_v0 = vmul.f32 0.01, %v358_v54  ;;  %vm391_vm1 = vcmp.ge.f32.partialorder %v359_v55, 0.0  ;;  %v693_v4 = vld [vmem:[%s7396_s3 + $0x190] sm:$0xff]  ;;  %v708_v8 = vld [vmem:[%s7396_s3 + $0x208] sm:$0xff] }
  0x1c   : > { %3566 = vmatpush3.msra.mxu0 %v699_v25  ;;  %4302 = vmatpush3.msra.mxu1 %v731_v24  ;;  %v423_v1 = vmul.f32 0.01, %v359_v55  ;;  %vm392_vm2 = vcmp.ge.f32.partialorder %v360_v56, 0.0  ;;  %vm393_vm3 = vcmp.ge.f32.partialorder %v361_v61, 0.0  ;;  %v424_v2 = vmul.f32 0.01, %v360_v56 }
  0x1d   : > { %3567 = vmatprep.subr.mxu0 %v714_v28  ;;  %4303 = vmatprep.subr.mxu1 %v730_v29  ;;  %v425_v3 = vmul.f32 0.01, %v361_v61  ;;  %v4987_v5 = vsel %vm390_vm0, %v358_v54, %v422_v0  ;;  %v362_v7 = vadd.f32 %v4938_v39, %v326_v62  ;;  %v724_v9 = vld [vmem:[%s7396_s3 + $0x288] sm:$0xff]  ;;  %v363_v18 = vadd.f32 %v4938_v39, %v327_v63  ;;  %v292_v20 = vld [vmem:[%s4906_s7 + $0x30] sm:$0xff]  ;;  %v707_v21 = vld [vmem:[%s7396_s3 + $0x200] sm:$0xff] }
  0x1e   : > { %3568 = vmatpush3.msra.mxu0 %v698_v30  ;;  %4304 = vmatpush3.msra.mxu1 %v730_v29  ;;  %v4989_v6 = vsel %vm391_vm1, %v359_v55, %v423_v1  ;;  %v541_v10 = vrot.slane %v4987_v5, 7  ;;  %v586_v11 = vrot.slane %v4987_v5, 1  ;;  %v692_v14 = vld [vmem:[%s7396_s3 + $0x188] sm:$0xff]  ;;  %v5010_v16 = vsel %vm392_vm2, %v360_v56, %v424_v2  ;;  %v723_v22 = vld [vmem:[%s7396_s3 + $0x280] sm:$0xff]  ;;  %v293_v27 = vld [vmem:[%s4906_s7 + $0x38] sm:$0xff] }
  0x1f   : > { %3569 = vmatprep.subr.mxu0 %v713_v31  ;;  %4305 = vmatprep.subr.mxu1 %v729_v32  ;;  %v593_v12 = vrot.slane %v4989_v6, 1  ;;  %v548_v15 = vrot.slane %v4989_v6, 7  ;;  %v5013_v17 = vsel %vm393_vm3, %v361_v61, %v425_v3  ;;  %v691_v23 = vld [vmem:[%s7396_s3 + $0x180] sm:$0xff]  ;;  %vm394_vm6 = vcmp.ge.f32.partialorder %v362_v7, 0.0  ;;  %v295_v35 = vld [vmem:[%s4906_s7 + $0x48] sm:$0xff]  ;;  %v645_v54 = vld [vmem:[%s7396_s3 + $0x70] sm:$0xff] }
  0x20   : > { %3570 = vmatpush3.msra.mxu0 %v697_v36  ;;  %4306 = vmatpush3.msra.mxu1 %v729_v32  ;;  %v587_v24 = vrot.slane %v5010_v16, 1  ;;  %v594_v25 = vrot.slane %v5013_v17, 1  ;;  %vm395_vm7 = vcmp.ge.f32.partialorder %v363_v18, 0.0  ;;  %v426_v26 = vmul.f32 0.01, %v362_v7  ;;  %v294_v31 = vld [vmem:[%s4906_s7 + $0x40] sm:$0xff] }
  0x21   : > { %3571 = vmatprep.subr.mxu0 %v712_v37  ;;  %4307 = vmatprep.subr.mxu1 %v728_v40  ;;  %v5032_v28 = vsel %vm600_vm4, %v586_v11, %v593_v12  ;;  %v427_v29 = vmul.f32 0.01, %v363_v18  ;;  %v328_v30 = vmul.f32 %v4936_v38, %v292_v20  ;;  %v5039_v32 = vsel %vm555_vm5, %v548_v15, %v541_v10  ;;  %v662_v36 = vld [vmem:[%s7396_s3 + $0xf8] sm:$0xff]  ;;  %v660_v62 = vld [vmem:[%s7396_s3 + $0xe8] sm:$0xff]  ;;  %v677_v63 = vld [vmem:[%s7396_s3 + $0x170] sm:$0xff] }
  0x22   : > { %3572 = vmatpush3.msra.mxu0 %v696_v43  ;;  %4308 = vmatpush3.msra.mxu1 %v728_v40  ;;  %v5044_v33 = vsel %vm600_vm4, %v593_v12, %v586_v11  ;;  %v5048_v34 = vsel %vm555_vm5, %v541_v10, %v548_v15  ;;  %v678_v37 = vld [vmem:[%s7396_s3 + $0x178] sm:$0xff]  ;;  %v5059_v40 = vsel %vm394_vm6, %v362_v7, %v426_v26  ;;  %v542_v45 = vrot.slane %v5010_v16, 7  ;;  %v644_v2 = vld [vmem:[%s7396_s3 + $0x68] sm:$0xff]  ;;  %v298_v7 = vld [vmem:[%s4906_s7 + $0x60] sm:$0xff] }
  0x23   : > { %3573 = vmatprep.subr.mxu0 %v711_v44  ;;  %4309 = vmatprep.subr.mxu1 %v727_v48  ;;  %v5062_v41 = vsel %vm395_vm7, %v363_v18, %v427_v29  ;;  %v329_v42 = vmul.f32 %v4936_v38, %v293_v27  ;;  %v646_v43 = vld [vmem:[%s7396_s3 + $0x78] sm:$0xff]  ;;  %v5071_v44 = vsel %vm600_vm4, %v587_v24, %v594_v25  ;;  %v549_v50 = vrot.slane %v5013_v17, 7  ;;  %v676_v26 = vld [vmem:[%s7396_s3 + $0x168] sm:$0xff] }
  0x24   : > { %3574 = vmatpush3.msra.mxu0 %v695_v49  ;;  %4310 = vmatpush3.msra.mxu1 %v727_v48  ;;  %v364_v46 = vadd.f32 %v4938_v39, %v328_v30  ;;  %v330_v47 = vmul.f32 %v4936_v38, %v294_v31  ;;  %v661_v48 = vld [vmem:[%s7396_s3 + $0xf0] sm:$0xff]  ;;  %v5087_v49 = vsel %vm600_vm4, %v594_v25, %v587_v24  ;;  %v588_v55 = vrot.slane %v5059_v40, 1  ;;  %v297_v61 = vld [vmem:[%s4906_s7 + $0x58] sm:$0xff] }
  0x25   : > { %3575 = vmatprep.subr.mxu0 %v710_v52  ;;  %4311 = vmatprep.subr.mxu1 %v726_v53  ;;  %v365_v51 = vadd.f32 %v4938_v39, %v329_v42  ;;  %v331_v52 = vmul.f32 %v4936_v38, %v295_v35  ;;  %v595_v56 = vrot.slane %v5062_v41, 1  ;;  %v5119_v3 = vsel %vm555_vm5, %v549_v50, %v542_v45  ;;  %v658_v25 = vld [vmem:[%s7396_s3 + $0xd8] sm:$0xff]  ;;  %v657_v31 = vld [vmem:[%s7396_s3 + $0xd0] sm:$0xff] }
  0x26   : > { %3576 = vmatpush3.msra.mxu0 %v694_v58  ;;  %4312 = vmatpush3.msra.mxu1 %v726_v53  ;;  %v296_v53 = vld [vmem:[%s4906_s7 + $0x50] sm:$0xff]  ;;  %vm396_vm10 = vcmp.ge.f32.partialorder %v364_v46, 0.0  ;;  %v428_v57 = vmul.f32 0.01, %v364_v46  ;;  %v333_v11 = vmul.f32 %v4936_v38, %v297_v61  ;;  %v334_v24 = vmul.f32 %v4936_v38, %v298_v7  ;;  %v642_v30 = vld [vmem:[%s7396_s3 + $0x58] sm:$0xff] }
  0x27   : > { %3577 = vmatprep.subr.mxu0 %v709_v59  ;;  %4313 = vmatprep.subr.mxu1 %v725_v60  ;;  %vm397_vm11 = vcmp.ge.f32.partialorder %v365_v51, 0.0  ;;  %v429_v58 = vmul.f32 0.01, %v365_v51  ;;  %v366_v59 = vadd.f32 %v4938_v39, %v330_v47  ;;  %v332_v1 = vmul.f32 %v4936_v38, %v296_v53  ;;  %v301_v47 = vld [vmem:[%s4906_s7 + $0x78] sm:$0xff] }
  0x28   : > { %3578 = vmatpush3.msra.mxu0 %v693_v4  ;;  %4314 = vmatpush3.msra.mxu1 %v725_v60  ;;  %v367_v60 = vadd.f32 %v4938_v39, %v331_v52  ;;  %v5108_v0 = vsel %vm396_vm10, %v364_v46, %v428_v57  ;;  %v5134_v12 = vsel %vm600_vm4, %v588_v55, %v595_v56  ;;  %v543_v57 = vrot.slane %v5059_v40, 7 }
  0x29   : > { %3579 = vmatprep.subr.mxu0 %v708_v8  ;;  %4315 = vmatprep.subr.mxu1 %v724_v9  ;;  %v5121_v4 = vsel %vm397_vm11, %v365_v51, %v429_v58  ;;  %vm398_vm12 = vcmp.ge.f32.partialorder %v366_v59, 0.0  ;;  %v659_v8 = vld [vmem:[%s7396_s3 + $0xe0] sm:$0xff]  ;;  %v589_v15 = vrot.slane %v5108_v0, 1  ;;  %v368_v20 = vadd.f32 %v4938_v39, %v332_v1 }
  0x2a   : > { %3580 = vmatpush3.msra.mxu0 %v692_v14  ;;  %4316 = vmatpush3.msra.mxu1 %v724_v9  ;;  %vm399_vm13 = vcmp.ge.f32.partialorder %v367_v60, 0.0  ;;  %v430_v9 = vmul.f32 0.01, %v366_v59  ;;  %v431_v10 = vmul.f32 0.01, %v367_v60  ;;  %v643_v14 = vld [vmem:[%s7396_s3 + $0x60] sm:$0xff]  ;;  %v369_v29 = vadd.f32 %v4938_v39, %v333_v11 }
  0x2b   : > { %3581 = vmatprep.subr.mxu0 %v707_v21  ;;  %4317 = vmatprep.subr.mxu1 %v723_v22  ;;  %v596_v18 = vrot.slane %v5121_v4, 1  ;;  %v299_v21 = vld [vmem:[%s4906_s7 + $0x68] sm:$0xff]  ;;  %v5173_v35 = vsel %vm555_vm5, %v542_v45, %v549_v50  ;;  %v432_v46 = vmul.f32 0.01, %v368_v20  ;;  %vm400_vm14 = vcmp.ge.f32.partialorder %v368_v20, 0.0 }
  0x2c   : > { %3582 = vmatpush3.msra.mxu0 %v691_v23  ;;  %803 = vmatprep.mubr.f32.mxu0 %v4987_v5  ;;  %v5148_v23 = vsel %vm398_vm12, %v366_v59, %v430_v9  ;;  %v5159_v27 = vsel %vm399_vm13, %v367_v60, %v431_v10  ;;  %v433_v45 = vmul.f32 0.01, %v369_v29  ;;  %vm401_vm15 = vcmp.ge.f32.partialorder %v369_v29, 0.0  ;;  %v640_v60 = vld [vmem:[%s7396_s3 + $0x48] sm:$0xff] }
  0x2d   : > { %4318 = vmatpush3.msra.mxu1 %v723_v22  ;;  %4319 = vmatprep.mubr.f32.mxu1 %v5032_v28  ;;  %v5145_v22 = vsel %vm600_vm4, %v595_v56, %v588_v55  ;;  %v5185_v42 = vsel %vm600_vm4, %v589_v15, %v596_v18  ;;  %v597_v50 = vrot.slane %v5159_v27, 1  ;;  %v370_v51 = vadd.f32 %v4938_v39, %v334_v24  ;;  %v656_v55 = vld [vmem:[%s7396_s3 + $0xc8] sm:$0xff]  ;;  %v675_v56 = vld [vmem:[%s7396_s3 + $0x160] sm:$0xff]  ;;  %v638_v24 = vld [vmem:[%s7396_s3 + $0x38] sm:$0xff] }
  0x2e   : > { %3406 = vmatmul.mubr.msk.f32.vlgmr.msra.gmra.mxu0 %vm537_vm8, %v5039_v32  ;;  %4320 = vmatmul.mubr.msk.f32.vlgmr.msra.gmra.mxu1 %vm540_vm9, %v5044_v33  ;;  %v5196_v52 = vsel %vm600_vm4, %v596_v18, %v589_v15  ;;  %v550_v58 = vrot.slane %v5062_v41, 7  ;;  %v337_v59 = vmul.f32 %v4936_v38, %v301_v47  ;;  %v5215_v61 = vsel %vm400_vm14, %v368_v20, %v432_v46  ;;  %v654_v20 = vld [vmem:[%s7396_s3 + $0xb8] sm:$0xff] }
  0x2f   : > { %3663 = vmatprep.subr.mxu1 %v662_v36  ;;  %4343 = vmatprep.subr.mxu0 %v678_v37  ;;  %v335_v36 = vmul.f32 %v4936_v38, %v299_v21  ;;  %vm402_vm0 = vcmp.ge.f32.partialorder %v370_v51, 0.0  ;;  %v591_v15 = vrot.slane %v5215_v61, 1  ;;  %v674_v21 = vld [vmem:[%s7396_s3 + $0x158] sm:$0xff] }
  0x30   : > { %3664 = vmatpush3.msra.mxu1 %v646_v43  ;;  %4344 = vmatpush3.msra.mxu0 %v678_v37  ;;  %v300_v37 = vld [vmem:[%s4906_s7 + $0x70] sm:$0xff]  ;;  %v590_v43 = vrot.slane %v5148_v23, 1  ;;  %v373_v10 = vadd.f32 %v4938_v39, %v337_v59  ;;  %v5238_v11 = vsel %vm555_vm5, %v550_v58, %v543_v57  ;;  %v635_v59 = vld [vmem:[%s7396_s3 + $0x20] sm:$0xff] }
  0x31   : > { %3665 = vmatprep.subr.mxu1 %v661_v48  ;;  %808 = vmatprep.mubr.f32.mxu0 %v4989_v6  ;;  %v641_v48 = vld [vmem:[%s7396_s3 + $0x50] sm:$0xff]  ;;  %v371_v53 = vadd.f32 %v4938_v39, %v335_v36 }
  0x32   : > { %4322 = vmatprep.mubr.f32.mxu1 %v5071_v44  ;;  %3666 = vmatpush3.msra.mxu1 %v645_v54  ;;  %v336_v54 = vmul.f32 %v4936_v38, %v300_v37  ;;  %v5229_v1 = vsel %vm600_vm4, %v590_v43, %v597_v50  ;;  %v637_v37 = vld [vmem:[%s7396_s3 + $0x30] sm:$0xff]  ;;  %vm405_vm3 = vcmp.ge.f32.partialorder %v373_v10, 0.0 }
  0x33   : > { %809 = vmatmul.mubr.f32.gmra.mxu0 %v5048_v34  ;;  %4323 = vmatmul.mubr.msk.f32.gmra.mxu1 %vm540_vm9, %v5087_v49  ;;  %v435_v7 = vmul.f32 0.01, %v371_v53  ;;  %vm403_vm1 = vcmp.ge.f32.partialorder %v371_v53, 0.0 }
  0x34   : > { %3667 = vmatprep.subr.mxu1 %v660_v62  ;;  %4345 = vmatprep.subr.mxu0 %v677_v63  ;;  %v5218_v62 = vsel %vm401_vm15, %v369_v29, %v433_v45  ;;  %v372_v9 = vadd.f32 %v4938_v39, %v336_v54  ;;  %v653_v29 = vld [vmem:[%s7396_s3 + $0xb0] sm:$0xff]  ;;  %v636_v54 = vld [vmem:[%s7396_s3 + $0x28] sm:$0xff] }
  0x35   : > { %3668 = vmatpush3.msra.mxu1 %v644_v2  ;;  %4346 = vmatpush3.msra.mxu0 %v677_v63  ;;  %v655_v63 = vld [vmem:[%s7396_s3 + $0xc0] sm:$0xff]  ;;  %v434_v2 = vmul.f32 0.01, %v370_v51  ;;  %v598_v18 = vrot.slane %v5218_v62, 1 }
  0x36   : > { %3669 = vmatprep.subr.mxu1 %v659_v8  ;;  %813 = vmatprep.mubr.f32.mxu0 %v5010_v16  ;;  %v639_v8 = vld [vmem:[%s7396_s3 + $0x40] sm:$0xff]  ;;  %vm404_vm2 = vcmp.ge.f32.partialorder %v372_v9, 0.0 }
  0x37   : > { %4325 = vmatprep.mubr.f32.mxu1 %v5134_v12  ;;  %3670 = vmatpush3.msra.mxu1 %v643_v14  ;;  %v5242_v14 = vsel %vm600_vm4, %v597_v50, %v590_v43  ;;  %v5274_v36 = vsel %vm600_vm4, %v591_v15, %v598_v18  ;;  %v5281_v43 = vsel %vm555_vm5, %v543_v57, %v550_v58  ;;  %v673_v50 = vld [vmem:[%s7396_s3 + $0x150] sm:$0xff]  ;;  %v651_v57 = vld [vmem:[%s7396_s3 + $0xa0] sm:$0xff] }
  0x38   : > { %3407 = vmatmul.mubr.msk.f32.gmra.mxu0 %vm537_vm8, %v5119_v3  ;;  %4326 = vmatmul.mubr.msk.f32.gmra.mxu1 %vm540_vm9, %v5145_v22  ;;  %v5285_v46 = vsel %vm600_vm4, %v598_v18, %v591_v15  ;;  %v649_v15 = vld [vmem:[%s7396_s3 + $0x90] sm:$0xff] }
  0x39   : > { %3671 = vmatprep.subr.mxu1 %v658_v25  ;;  %4347 = vmatprep.subr.mxu0 %v676_v26  ;;  %v5258_v25 = vsel %vm402_vm0, %v370_v51, %v434_v2  ;;  %v544_v51 = vrot.slane %v5108_v0, 7 }
  0x3a   : > { %3672 = vmatpush3.msra.mxu1 %v642_v30  ;;  %4348 = vmatpush3.msra.mxu0 %v676_v26  ;;  %v5261_v26 = vsel %vm403_vm1, %v371_v53, %v435_v7  ;;  %v436_v30 = vmul.f32 0.01, %v372_v9  ;;  %v592_v45 = vrot.slane %v5258_v25, 1  ;;  %v551_v53 = vrot.slane %v5121_v4, 7 }
  0x3b   : > { %3673 = vmatprep.subr.mxu1 %v657_v31  ;;  %818 = vmatprep.mubr.f32.mxu0 %v5013_v17  ;;  %v437_v31 = vmul.f32 0.01, %v373_v10  ;;  %v599_v47 = vrot.slane %v5261_v26, 1 }
  0x3c   : > { %4328 = vmatprep.mubr.f32.mxu1 %v5185_v42  ;;  %3674 = vmatpush3.msra.mxu1 %v641_v48  ;;  %v652_v48 = vld [vmem:[%s7396_s3 + $0xa8] sm:$0xff] }
  0x3d   : > { %819 = vmatmul.mubr.f32.gmra.mxu0 %v5173_v35  ;;  %4329 = vmatmul.mubr.msk.f32.gmra.mxu1 %vm540_vm9, %v5196_v52  ;;  %v5317_v58 = vsel %vm600_vm4, %v592_v45, %v599_v47 }
  0x3e   : > { %3675 = vmatprep.subr.mxu1 %v656_v55  ;;  %4349 = vmatprep.subr.mxu0 %v675_v56  ;;  %v5303_v55 = vsel %vm404_vm2, %v372_v9, %v436_v30  ;;  %v672_v9 = vld [vmem:[%s7396_s3 + $0x148] sm:$0xff]  ;;  %v671_v30 = vld [vmem:[%s7396_s3 + $0x140] sm:$0xff] }
  0x3f   : > { %3676 = vmatpush3.msra.mxu1 %v640_v60  ;;  %4350 = vmatpush3.msra.mxu0 %v675_v56  ;;  %v5306_v56 = vsel %vm405_vm3, %v373_v10, %v437_v31  ;;  %v5324_v60 = vsel %vm555_vm5, %v551_v53, %v544_v51  ;;  %v685_v2 = vrot.slane %v5303_v55, 1  ;;  %v634_v10 = vld [vmem:[%s7396_s3 + $0x18] sm:$0xff]  ;;  %v545_v31 = vrot.slane %v5148_v23, 7 }
  0x40   : > { %3677 = vmatprep.subr.mxu1 %v655_v63  ;;  %823 = vmatprep.mubr.f32.mxu0 %v5059_v40  ;;  %v5328_v63 = vsel %vm600_vm4, %v599_v47, %v592_v45  ;;  %v686_v7 = vrot.slane %v5306_v56, 1  ;;  %v632_v45 = vld [vmem:[%s7396_s3 + $0x8] sm:$0xff]  ;;  %v647_v47 = vld [vmem:[%s7396_s3 + $0x80] sm:$0xff] }
  0x41   : > { %4331 = vmatprep.mubr.f32.mxu1 %v5229_v1  ;;  %3678 = vmatpush3.msra.mxu1 %v639_v8  ;;  %v650_v8 = vld [vmem:[%s7396_s3 + $0x98] sm:$0xff] }
  0x42   : > { %3408 = vmatmul.mubr.msk.f32.gmra.mxu0 %vm537_vm8, %v5238_v11  ;;  %4332 = vmatmul.mubr.msk.f32.gmra.mxu1 %vm540_vm9, %v5242_v14  ;;  %v5354_v18 = vsel %vm600_vm4, %v685_v2, %v686_v7 }
  0x43   : > { %3679 = vmatprep.subr.mxu1 %v654_v20  ;;  %4351 = vmatprep.subr.mxu0 %v674_v21  ;;  %v633_v20 = vld [vmem:[%s7396_s3 + $0x10] sm:$0xff] }
  0x44   : > { %3680 = vmatpush3.msra.mxu1 %v638_v24  ;;  %4352 = vmatpush3.msra.mxu0 %v674_v21  ;;  %v5361_v21 = vsel %vm555_vm5, %v544_v51, %v551_v53  ;;  %v5365_v24 = vsel %vm600_vm4, %v686_v7, %v685_v2  ;;  %v670_v51 = vld [vmem:[%s7396_s3 + $0x138] sm:$0xff]  ;;  %v7400_v53 = vmov 0.0   ;;  %v546_v2 = vrot.slane %v5215_v61, 7 }
  0x45   : > { %3681 = vmatprep.subr.mxu1 %v653_v29  ;;  %828 = vmatprep.mubr.f32.mxu0 %v5062_v41  ;;  %v648_v29 = vld [vmem:[%s7396_s3 + $0x88] sm:$0xff]  ;;  %v553_v7 = vrot.slane %v5218_v62, 7 }
  0x46   : > { %4334 = vmatprep.mubr.f32.mxu1 %v5274_v36  ;;  %3682 = vmatpush3.msra.mxu1 %v637_v37  ;;  %v552_v37 = vrot.slane %v5159_v27, 7 }
  0x47   : > { %829 = vmatmul.mubr.f32.gmra.mxu0 %v5281_v43  ;;  %4335 = vmatmul.mubr.msk.f32.gmra.mxu1 %vm540_vm9, %v5285_v46 }
  0x48   : > { %3683 = vmatprep.subr.mxu1 %v652_v48  ;;  %4353 = vmatprep.subr.mxu0 %v673_v50  ;;  %v631_v48 = vld [vmem:[%s7396_s3] sm:$0xff] }
  0x49   : > { %3684 = vmatpush3.msra.mxu1 %v636_v54  ;;  %4354 = vmatpush3.msra.mxu0 %v673_v50  ;;  %v5392_v50 = vsel %vm555_vm5, %v552_v37, %v545_v31  ;;  %v669_v54 = vld [vmem:[%s7396_s3 + $0x130] sm:$0xff] }
  0x4a   : > { %3685 = vmatprep.subr.mxu1 %v651_v57  ;;  %833 = vmatprep.mubr.f32.mxu0 %v5108_v0  ;;  %v1378_v57 = vld [vmem:[%s7396_s3 + $0x478] sm:$0xff] }
  0x4b   : > { %4337 = vmatprep.mubr.f32.mxu1 %v5317_v58  ;;  %3686 = vmatpush3.msra.mxu1 %v635_v59  ;;  %v5412_v59 = vsel %vm555_vm5, %v545_v31, %v552_v37  ;;  %v1375_v31 = vld [vmem:[%s7396_s3 + $0x460] sm:$0xff]  ;;  %v1374_v37 = vld [vmem:[%s7396_s3 + $0x458] sm:$0xff] }
  0x4c   : > { %3409 = vmatmul.mubr.msk.f32.gmra.mxu0 %vm537_vm8, %v5324_v60  ;;  %4338 = vmatmul.mubr.msk.f32.gmra.mxu1 %vm540_vm9, %v5328_v63 }
  0x4d   : > { %3687 = vmatprep.subr.mxu1 %v650_v8  ;;  %4355 = vmatprep.subr.mxu0 %v672_v9  ;;  %v668_v8 = vld [vmem:[%s7396_s3 + $0x128] sm:$0xff] }
  0x4e   : > { %3688 = vmatpush3.msra.mxu1 %v634_v10  ;;  %4356 = vmatpush3.msra.mxu0 %v672_v9  ;;  %v1377_v9 = vld [vmem:[%s7396_s3 + $0x470] sm:$0xff]  ;;  %v5428_v10 = vsel %vm555_vm5, %v553_v7, %v546_v2 }
  0x4f   : > { %3689 = vmatprep.subr.mxu1 %v649_v15  ;;  %838 = vmatprep.mubr.f32.mxu0 %v5121_v4  ;;  %v667_v15 = vld [vmem:[%s7396_s3 + $0x120] sm:$0xff] }
  0x50   : > { %4340 = vmatprep.mubr.f32.mxu1 %v5354_v18  ;;  %3690 = vmatpush3.msra.mxu1 %v633_v20  ;;  %v1376_v20 = vld [vmem:[%s7396_s3 + $0x468] sm:$0xff] }
  0x51   : > { %839 = vmatmul.mubr.f32.gmra.mxu0 %v5361_v21  ;;  %4341 = vmatmul.mubr.msk.f32.gmra.mxu1 %vm540_vm9, %v5365_v24 }
  0x52   : > { %3691 = vmatprep.subr.mxu1 %v648_v29  ;;  %4357 = vmatprep.subr.mxu0 %v671_v30  ;;  %v547_v29 = vrot.slane %v5258_v25, 7 }
  0x53   : > { %3692 = vmatpush3.msra.mxu1 %v632_v45  ;;  %4358 = vmatpush3.msra.mxu0 %v671_v30  ;;  %v554_v30 = vrot.slane %v5261_v26, 7 }
  0x54   : > { %3693 = vmatprep.subr.mxu1 %v647_v47  ;;  %843 = vmatprep.mubr.f32.mxu0 %v5148_v23  ;;  %v679_v47 = vrot.slane %v5303_v55, 7 }
  0x55   : > { %3694 = vmatpush3.msra.mxu1 %v631_v48  ;;  %1093 = vmatprep.mubr.f32.mxu1 %v7400_v53  ;;  %v5480_v45 = vsel %vm555_vm5, %v547_v29, %v554_v30  ;;  %v680_v48 = vrot.slane %v5306_v56, 7 }
  0x56   : > { %3410 = vmatmul.mubr.msk.f32.gmra.mxu0 %vm537_vm8, %v5392_v50  ;;  %1094 = vmatmul.mubr.f32.vlgmr.msra.gmra.mxu1 %v7400_v53 }
  0x57   : > { %4359 = vmatprep.subr.mxu0 %v670_v51  ;;  %848 = vmatprep.mubr.f32.mxu0 %v5159_v27 }
  0x58   : > { %4360 = vmatpush3.msra.mxu0 %v670_v51  ;;  %1098 = vmatprep.mubr.f32.mxu1 %v7400_v53  ;;  %v664_v51 = vld [vmem:[%s7396_s3 + $0x108] sm:$0xff] }
  0x59   : > { %4361 = vmatprep.subr.mxu0 %v669_v54  ;;  %4399 = vmatprep.subr.mxu1 %v1378_v57 }
  0x5a   : > { %849 = vmatmul.mubr.f32.gmra.mxu0 %v5412_v59  ;;  %1099 = vmatmul.mubr.f32.gmra.mxu1 %v7400_v53 }
  0x5b   : > { %4362 = vmatpush3.msra.mxu0 %v669_v54  ;;  %853 = vmatprep.mubr.f32.mxu0 %v5215_v61  ;;  %v1373_v54 = vld [vmem:[%s7396_s3 + $0x450] sm:$0xff] }
  0x5c   : > { %1103 = vmatprep.mubr.f32.mxu1 %v4987_v5  ;;  %4400 = vmatpush3.msra.mxu1 %v1378_v57  ;;  %v5446_v5 = vsel %vm555_vm5, %v546_v2, %v553_v7  ;;  %v5496_v57 = vsel %vm555_vm5, %v680_v48, %v679_v47  ;;  %v663_v2 = vld [vmem:[%s7396_s3 + $0x100] sm:$0xff]  ;;  %v1372_v7 = vld [vmem:[%s7396_s3 + $0x448] sm:$0xff] }
  0x5d   : > { %4363 = vmatprep.subr.mxu0 %v668_v8  ;;  %4401 = vmatprep.subr.mxu1 %v1377_v9 }
  0x5e   : > { %3411 = vmatmul.mubr.msk.f32.gmra.mxu0 %vm537_vm8, %v5428_v10  ;;  %3422 = vmatmul.mubr.msk.f32.gmra.mxu1 %vm537_vm8, %v5039_v32  ;;  %v666_v32 = vld [vmem:[%s7396_s3 + $0x118] sm:$0xff] }
  0x5f   : > { %4364 = vmatpush3.msra.mxu0 %v668_v8  ;;  %858 = vmatprep.mubr.f32.mxu0 %v5218_v62  ;;  %v5514_v8 = vsel %vm555_vm5, %v679_v47, %v680_v48  ;;  %v1369_v47 = vld [vmem:[%s7396_s3 + $0x430] sm:$0xff]  ;;  %v1342_v48 = vld [vmem:[%s7396_s3 + $0x358] sm:$0xff] }
  0x60   : > { %1108 = vmatprep.mubr.f32.mxu1 %v4989_v6  ;;  %4402 = vmatpush3.msra.mxu1 %v1377_v9  ;;  %v5462_v6 = vsel %vm555_vm5, %v554_v30, %v547_v29  ;;  %v1362_v9 = vld [vmem:[%s7396_s3 + $0x3f8] sm:$0xff]  ;;  %v1361_v29 = vld [vmem:[%s7396_s3 + $0x3f0] sm:$0xff] }
  0x61   : > { %4365 = vmatprep.subr.mxu0 %v667_v15  ;;  %4403 = vmatprep.subr.mxu1 %v1376_v20  ;;  %v1345_v30 = vld [vmem:[%s7396_s3 + $0x370] sm:$0xff] }
  0x62   : > { %859 = vmatmul.mubr.f32.gmra.mxu0 %v5446_v5  ;;  %1109 = vmatmul.mubr.f32.gmra.mxu1 %v5048_v34  ;;  %v665_v34 = vld [vmem:[%s7396_s3 + $0x110] sm:$0xff] }
  0x63   : > { %4366 = vmatpush3.msra.mxu0 %v667_v15  ;;  %863 = vmatprep.mubr.f32.mxu0 %v5258_v25  ;;  %v1371_v15 = vld [vmem:[%s7396_s3 + $0x440] sm:$0xff] }
  0x64   : > { %1113 = vmatprep.mubr.f32.mxu1 %v5010_v16  ;;  %4404 = vmatpush3.msra.mxu1 %v1376_v20  ;;  %v1346_v20 = vld [vmem:[%s7396_s3 + $0x378] sm:$0xff] }
  0x65   : > { %4367 = vmatprep.subr.mxu0 %v666_v32  ;;  %4405 = vmatprep.subr.mxu1 %v1375_v31 }
  0x66   : > { %3412 = vmatmul.mubr.msk.f32.gmra.mxu0 %vm537_vm8, %v5462_v6  ;;  %3423 = vmatmul.mubr.msk.f32.gmra.mxu1 %vm537_vm8, %v5119_v3 }
  0x67   : > { %4368 = vmatpush3.msra.mxu0 %v666_v32  ;;  %868 = vmatprep.mubr.f32.mxu0 %v5261_v26  ;;  %v1360_v32 = vld [vmem:[%s7396_s3 + $0x3e8] sm:$0xff] }
  0x68   : > { %1118 = vmatprep.mubr.f32.mxu1 %v5013_v17  ;;  %4406 = vmatpush3.msra.mxu1 %v1375_v31  ;;  %v1370_v31 = vld [vmem:[%s7396_s3 + $0x438] sm:$0xff] }
  0x69   : > { %4369 = vmatprep.subr.mxu0 %v665_v34  ;;  %4407 = vmatprep.subr.mxu1 %v1374_v37 }
  0x6a   : > { %869 = vmatmul.mubr.f32.gmra.mxu0 %v5480_v45  ;;  %1119 = vmatmul.mubr.f32.gmra.mxu1 %v5173_v35 }
  0x6b   : > { %4370 = vmatpush3.msra.mxu0 %v665_v34  ;;  %873 = vmatprep.mubr.f32.mxu0 %v5303_v55  ;;  %v1344_v34 = vld [vmem:[%s7396_s3 + $0x368] sm:$0xff] }
  0x6c   : > { %1123 = vmatprep.mubr.f32.mxu1 %v5059_v40  ;;  %4408 = vmatpush3.msra.mxu1 %v1374_v37  ;;  %v1343_v37 = vld [vmem:[%s7396_s3 + $0x360] sm:$0xff] }
  0x6d   : > { %4371 = vmatprep.subr.mxu0 %v664_v51  ;;  %4409 = vmatprep.subr.mxu1 %v1373_v54 }
  0x6e   : > { %3413 = vmatmul.mubr.msk.f32.gmra.mxu0 %vm537_vm8, %v5496_v57  ;;  %3424 = vmatmul.mubr.msk.f32.gmra.mxu1 %vm537_vm8, %v5238_v11 }
  0x6f   : > { %4372 = vmatpush3.msra.mxu0 %v664_v51  ;;  %878 = vmatprep.mubr.f32.mxu0 %v5306_v56  ;;  %v1357_v51 = vld [vmem:[%s7396_s3 + $0x3d0] sm:$0xff] }
  0x70   : > { %1128 = vmatprep.mubr.f32.mxu1 %v5062_v41  ;;  %4410 = vmatpush3.msra.mxu1 %v1373_v54  ;;  %v1341_v54 = vld [vmem:[%s7396_s3 + $0x350] sm:$0xff] }
  0x71   : > { %4373 = vmatprep.subr.mxu0 %v663_v2  ;;  %4411 = vmatprep.subr.mxu1 %v1372_v7 }
  0x72   : > { %879 = vmatmul.mubr.f32.gmra.mxu0 %v5514_v8  ;;  %1129 = vmatmul.mubr.f32.gmra.mxu1 %v5281_v43 }
  0x73   : > { %4374 = vmatpush3.msra.mxu0 %v663_v2  ;;  %1133 = vmatprep.mubr.f32.mxu1 %v5108_v0  ;;  %v1356_v2 = vld [vmem:[%s7396_s3 + $0x3c8] sm:$0xff] }
  0x74   : > { %4375 = vmatprep.mubr.f32.mxu0 %v7400_v53  ;;  %4412 = vmatpush3.msra.mxu1 %v1372_v7  ;;  %v1368_v7 = vld [vmem:[%s7396_s3 + $0x428] sm:$0xff] }
  0x75   : > { %3775 = vmatprep.subr.mxu0 %v1362_v9  ;;  %4413 = vmatprep.subr.mxu1 %v1371_v15  ;;  %v1340_v9 = vld [vmem:[%s7396_s3 + $0x348] sm:$0xff] }
  0x76   : > { %3425 = vmatmul.mubr.msk.f32.gmra.mxu1 %vm537_vm8, %v5324_v60  ;;  %4376 = vmatmul.mubr.f32.vlgmr.msra.gmra.mxu0 %v7400_v53 }
  0x77   : > { %3776 = vmatpush3.msra.mxu0 %v1346_v20  ;;  %1138 = vmatprep.mubr.f32.mxu1 %v5121_v4  ;;  %v1339_v20 = vld [vmem:[%s7396_s3 + $0x340] sm:$0xff] }
  0x78   : > { %3777 = vmatprep.subr.mxu0 %v1361_v29  ;;  %4378 = vmatprep.mubr.f32.mxu0 %v5032_v28  ;;  %v1359_v28 = vld [vmem:[%s7396_s3 + $0x3e0] sm:$0xff]  ;;  %v1354_v29 = vld [vmem:[%s7396_s3 + $0x3b8] sm:$0xff] }
  0x79   : > { %3778 = vmatpush3.msra.mxu0 %v1345_v30  ;;  %4414 = vmatpush3.msra.mxu1 %v1371_v15  ;;  %v1355_v15 = vld [vmem:[%s7396_s3 + $0x3c0] sm:$0xff] }
  0x7a   : > { %1139 = vmatmul.mubr.f32.gmra.mxu1 %v5361_v21  ;;  %4379 = vmatmul.mubr.msk.f32.gmra.mxu0 %vm540_vm9, %v5044_v33  ;;  %v1358_v33 = vld [vmem:[%s7396_s3 + $0x3d8] sm:$0xff]  ;;  %v1367_v30 = vld [vmem:[%s7396_s3 + $0x420] sm:$0xff] }
  0x7b   : > { %3779 = vmatprep.subr.mxu0 %v1360_v32  ;;  %4415 = vmatprep.subr.mxu1 %v1370_v31  ;;  %v1338_v32 = vld [vmem:[%s7396_s3 + $0x338] sm:$0xff] }
  0x7c   : > { %3780 = vmatpush3.msra.mxu0 %v1344_v34  ;;  %1143 = vmatprep.mubr.f32.mxu1 %v5148_v23  ;;  %v1337_v34 = vld [vmem:[%s7396_s3 + $0x330] sm:$0xff] }
  0x7d   : > { %3781 = vmatprep.subr.mxu0 %v1359_v28  ;;  %4381 = vmatprep.mubr.f32.mxu0 %v5071_v44  ;;  %v1352_v28 = vld [vmem:[%s7396_s3 + $0x3a8] sm:$0xff] }
  0x7e   : > { %3782 = vmatpush3.msra.mxu0 %v1343_v37  ;;  %4416 = vmatpush3.msra.mxu1 %v1370_v31  ;;  %v1353_v31 = vld [vmem:[%s7396_s3 + $0x3b0] sm:$0xff]  ;;  %v1366_v37 = vld [vmem:[%s7396_s3 + $0x418] sm:$0xff] }
  0x7f   : > { %3426 = vmatmul.mubr.msk.f32.gmra.mxu1 %vm537_vm8, %v5392_v50  ;;  %4382 = vmatmul.mubr.msk.f32.gmra.mxu0 %vm540_vm9, %v5087_v49 }
  0x80   : > { %3783 = vmatprep.subr.mxu0 %v1358_v33  ;;  %4417 = vmatprep.subr.mxu1 %v1369_v47  ;;  %v1336_v33 = vld [vmem:[%s7396_s3 + $0x328] sm:$0xff] }
  0x81   : > { %3784 = vmatpush3.msra.mxu0 %v1342_v48  ;;  %1148 = vmatprep.mubr.f32.mxu1 %v5159_v27  ;;  %v1335_v48 = vld [vmem:[%s7396_s3 + $0x320] sm:$0xff] }
  0x82   : > { %3785 = vmatprep.subr.mxu0 %v1357_v51  ;;  %4384 = vmatprep.mubr.f32.mxu0 %v5134_v12  ;;  %v1350_v51 = vld [vmem:[%s7396_s3 + $0x398] sm:$0xff] }
  0x83   : > { %3786 = vmatpush3.msra.mxu0 %v1341_v54  ;;  %4418 = vmatpush3.msra.mxu1 %v1369_v47  ;;  %v1351_v47 = vld [vmem:[%s7396_s3 + $0x3a0] sm:$0xff]  ;;  %v1365_v54 = vld [vmem:[%s7396_s3 + $0x410] sm:$0xff] }
  0x84   : > { %1149 = vmatmul.mubr.f32.gmra.mxu1 %v5412_v59  ;;  %4385 = vmatmul.mubr.msk.f32.gmra.mxu0 %vm540_vm9, %v5145_v22 }
  0x85   : > { %3787 = vmatprep.subr.mxu0 %v1356_v2  ;;  %4419 = vmatprep.subr.mxu1 %v1368_v7  ;;  %v1334_v2 = vld [vmem:[%s7396_s3 + $0x318] sm:$0xff] }
  0x86   : > { %3788 = vmatpush3.msra.mxu0 %v1340_v9  ;;  %1153 = vmatprep.mubr.f32.mxu1 %v5215_v61  ;;  %v1333_v9 = vld [vmem:[%s7396_s3 + $0x310] sm:$0xff] }
  0x87   : > { %3789 = vmatprep.subr.mxu0 %v1355_v15  ;;  %4387 = vmatprep.mubr.f32.mxu0 %v5185_v42  ;;  %v1348_v15 = vld [vmem:[%s7396_s3 + $0x388] sm:$0xff] }
  0x88   : > { %3790 = vmatpush3.msra.mxu0 %v1339_v20  ;;  %4420 = vmatpush3.msra.mxu1 %v1368_v7  ;;  %v1349_v7 = vld [vmem:[%s7396_s3 + $0x390] sm:$0xff]  ;;  %v1364_v20 = vld [vmem:[%s7396_s3 + $0x408] sm:$0xff] }
  0x89   : > { %3427 = vmatmul.mubr.msk.f32.gmra.mxu1 %vm537_vm8, %v5428_v10  ;;  %4388 = vmatmul.mubr.msk.f32.gmra.mxu0 %vm540_vm9, %v5196_v52 }
  0x8a   : > { %3791 = vmatprep.subr.mxu0 %v1354_v29  ;;  %4421 = vmatprep.subr.mxu1 %v1367_v30  ;;  %v1332_v29 = vld [vmem:[%s7396_s3 + $0x308] sm:$0xff] }
  0x8b   : > { %3792 = vmatpush3.msra.mxu0 %v1338_v32  ;;  %1158 = vmatprep.mubr.f32.mxu1 %v5218_v62  ;;  %v1363_v32 = vld [vmem:[%s7396_s3 + $0x400] sm:$0xff] }
  0x8c   : > { %3793 = vmatprep.subr.mxu0 %v1353_v31  ;;  %4390 = vmatprep.mubr.f32.mxu0 %v5229_v1  ;;  %v1331_v31 = vld [vmem:[%s7396_s3 + $0x300] sm:$0xff] }
  0x8d   : > { %3794 = vmatpush3.msra.mxu0 %v1337_v34  ;;  %4422 = vmatpush3.msra.mxu1 %v1367_v30  ;;  %v1347_v30 = vld [vmem:[%s7396_s3 + $0x380] sm:$0xff]  ;;  %v533_v34 = vld [vmem:[%s7397_s4 + $0x78] sm:$0xff] }
  0x8e   : > { %1159 = vmatmul.mubr.f32.gmra.mxu1 %v5446_v5  ;;  %4391 = vmatmul.mubr.msk.f32.gmra.mxu0 %vm540_vm9, %v5242_v14 }
  0x8f   : > { %3795 = vmatprep.subr.mxu0 %v1352_v28  ;;  %4423 = vmatprep.subr.mxu1 %v1366_v37  ;;  %v2045_v28 = vld [vmem:[%s7396_s3 + $0x278] sm:$0xff] }
  0x90   : > { %3796 = vmatpush3.msra.mxu0 %v1336_v33  ;;  %1163 = vmatprep.mubr.f32.mxu1 %v5258_v25  ;;  %v302_v33 = vld [vmem:[%s4906_s7 + $0x80] sm:$0xff] }
  0x91   : > { %3797 = vmatprep.subr.mxu0 %v1351_v47  ;;  %4393 = vmatprep.mubr.f32.mxu0 %v5274_v36  ;;  %v303_v47 = vld [vmem:[%s4906_s7 + $0x88] sm:$0xff] }
  0x92   : > { %3798 = vmatpush3.msra.mxu0 %v1335_v48  ;;  %4424 = vmatpush3.msra.mxu1 %v1366_v37  ;;  %v2029_v37 = vld [vmem:[%s7396_s3 + $0x1f8] sm:$0xff]  ;;  %v339_v48 = vmul.f32 %v4936_v38, %v303_v47 }
  0x93   : > { %3428 = vmatmul.mubr.msk.f32.gmra.mxu1 %vm537_vm8, %v5462_v6  ;;  %4394 = vmatmul.mubr.msk.f32.gmra.mxu0 %vm540_vm9, %v5285_v46  ;;  %v2057_v47 = vld [vmem:[%s7396_s3 + $0x2d8] sm:$0xff] }
  0x94   : > { %3799 = vmatprep.subr.mxu0 %v1350_v51  ;;  %4425 = vmatprep.subr.mxu1 %v1365_v54  ;;  %v2026_v51 = vld [vmem:[%s7396_s3 + $0x1e0] sm:$0xff] }
  0x95   : > { %3800 = vmatpush3.msra.mxu0 %v1334_v2  ;;  %1168 = vmatprep.mubr.f32.mxu1 %v5261_v26  ;;  %v2025_v2 = vld [vmem:[%s7396_s3 + $0x1d8] sm:$0xff] }
  0x96   : > { %3801 = vmatprep.subr.mxu0 %v1349_v7  ;;  %4396 = vmatprep.mubr.f32.mxu0 %v5317_v58 }
  0x97   : > { %3802 = vmatpush3.msra.mxu0 %v1333_v9  ;;  %4426 = vmatpush3.msra.mxu1 %v1365_v54 }
  0x98   : > { %1169 = vmatmul.mubr.f32.gmra.mxu1 %v5480_v45  ;;  %4397 = vmatmul.mubr.msk.f32.gmra.mxu0 %vm540_vm9, %v5328_v63 }
  0x99   : > { %3803 = vmatprep.subr.mxu0 %v1348_v15  ;;  %4427 = vmatprep.subr.mxu1 %v1364_v20 }
  0x9a   : > { %3804 = vmatpush3.msra.mxu0 %v1332_v29  ;;  %4428 = vmatpush3.msra.mxu1 %v1364_v20 }
  0x9b   : > { %3805 = vmatprep.subr.mxu0 %v1347_v30  ;;  %4429 = vmatprep.subr.mxu1 %v1363_v32  ;;  %v2023_v30 = vld [vmem:[%s7396_s3 + $0x1c8] sm:$0xff] }
  0x9c   : > { %3806 = vmatpush3.msra.mxu0 %v1331_v31  ;;  %1443 = vmatprep.mubr.f32.mxu0 %v5010_v16  ;;  %v532_v16 = vld [vmem:[%s7397_s4 + $0x70] sm:$0xff] }
  0x9d   : > { %4430 = vmatpush3.msra.mxu1 %v1363_v32  ;;  %4431 = vmatprep.mubr.f32.mxu1 %v5071_v44  ;;  %v531_v44 = vld [vmem:[%s7397_s4 + $0x68] sm:$0xff] }
  0x9e   : > { %3436 = vmatmul.mubr.msk.f32.vlgmr.msra.gmra.mxu0 %vm537_vm8, %v5119_v3  ;;  %4432 = vmatmul.mubr.msk.f32.vlgmr.msra.gmra.mxu1 %vm540_vm9, %v5087_v49  ;;  %v2044_v3 = vld [vmem:[%s7396_s3 + $0x270] sm:$0xff] }
  0x9f   : > { %4455 = vmatprep.subr.mxu1 %v533_v34  ;;  %3919 = vmatprep.subr.mxu0 %v2045_v28  ;;  %v2028_v49 = vld [vmem:[%s7396_s3 + $0x1f0] sm:$0xff]  ;;  %v518_v28 = vld [vmem:[%s7397_s4] sm:$0xff] }
  0xa0   : > { %4456 = vmatpush3.msra.mxu1 %v533_v34  ;;  %3920 = vmatpush3.msra.mxu0 %v2029_v37  ;;  %v2038_v34 = vld [vmem:[%s7396_s3 + $0x240] sm:$0xff] }
  0xa1   : > { %4457 = vmatprep.subr.mxu1 %v532_v16  ;;  %1448 = vmatprep.mubr.f32.mxu0 %v5013_v17  ;;  %v530_v17 = vld [vmem:[%s7397_s4 + $0x60] sm:$0xff] }
  0xa2   : > { %4434 = vmatprep.mubr.f32.mxu1 %v5134_v12  ;;  %4458 = vmatpush3.msra.mxu1 %v532_v16  ;;  %v529_v12 = vld [vmem:[%s7397_s4 + $0x58] sm:$0xff]  ;;  %v486_v37 = vld [vmem:[%s5861_s12] sm:$0xff]  ;;  %v487_v16 = vld [vmem:[%s5861_s12 + $0x8] sm:$0xff] }
  0xa3   : > { %1449 = vmatmul.mubr.f32.gmra.mxu0 %v5173_v35  ;;  %4435 = vmatmul.mubr.msk.f32.gmra.mxu1 %vm540_vm9, %v5145_v22  ;;  %v2043_v35 = vld [vmem:[%s7396_s3 + $0x268] sm:$0xff] }
  0xa4   : > { %4459 = vmatprep.subr.mxu1 %v531_v44  ;;  %3921 = vmatprep.subr.mxu0 %v2044_v3  ;;  %v2027_v22 = vld [vmem:[%s7396_s3 + $0x1e8] sm:$0xff]  ;;  %v2021_v3 = vld [vmem:[%s7396_s3 + $0x1b8] sm:$0xff] }
  0xa5   : > { %4460 = vmatpush3.msra.mxu1 %v531_v44  ;;  %3922 = vmatpush3.msra.mxu0 %v2028_v49  ;;  %v2061_v44 = vld [vmem:[%s7396_s3 + $0x2f8] sm:$0xff]  ;;  %v488_v49 = vld [vmem:[%s5861_s12 + $0x10] sm:$0xff] }
  0xa6   : > { %4461 = vmatprep.subr.mxu1 %v530_v17  ;;  %1453 = vmatprep.mubr.f32.mxu0 %v5059_v40  ;;  %v528_v40 = vld [vmem:[%s7397_s4 + $0x50] sm:$0xff] }
  0xa7   : > { %4437 = vmatprep.mubr.f32.mxu1 %v5185_v42  ;;  %4462 = vmatpush3.msra.mxu1 %v530_v17  ;;  %v338_v42 = vmul.f32 %v4936_v38, %v302_v33  ;;  %v489_v17 = vld [vmem:[%s5861_s12 + $0x18] sm:$0xff]  ;;  %v491_v33 = vld [vmem:[%s5861_s12 + $0x28] sm:$0xff] }
  0xa8   : > { %3437 = vmatmul.mubr.msk.f32.gmra.mxu0 %vm537_vm8, %v5238_v11  ;;  %4438 = vmatmul.mubr.msk.f32.gmra.mxu1 %vm540_vm9, %v5196_v52  ;;  %v527_v11 = vld [vmem:[%s7397_s4 + $0x48] sm:$0xff]  ;;  %v2042_v52 = vld [vmem:[%s7396_s3 + $0x260] sm:$0xff] }
  0xa9   : > { %4463 = vmatprep.subr.mxu1 %v529_v12  ;;  %3923 = vmatprep.subr.mxu0 %v2043_v35  ;;  %v374_v54 = vadd.f32 %v4938_v39, %v338_v42  ;;  %v2020_v35 = vld [vmem:[%s7396_s3 + $0x1b0] sm:$0xff] }
  0xaa   : > { %4464 = vmatpush3.msra.mxu1 %v529_v12  ;;  %3924 = vmatpush3.msra.mxu0 %v2027_v22  ;;  %v2059_v12 = vld [vmem:[%s7396_s3 + $0x2e8] sm:$0xff]  ;;  %v490_v22 = vld [vmem:[%s5861_s12 + $0x20] sm:$0xff]  ;;  %v492_v42 = vld [vmem:[%s5861_s12 + $0x30] sm:$0xff] }
  0xab   : > { %4465 = vmatprep.subr.mxu1 %v528_v40  ;;  %1458 = vmatprep.mubr.f32.mxu0 %v5062_v41  ;;  %v526_v41 = vld [vmem:[%s7397_s4 + $0x40] sm:$0xff]  ;;  %v438_v7 = vmul.f32 0.01, %v374_v54  ;;  %vm406_vm6 = vcmp.ge.f32.partialorder %v374_v54, 0.0 }
  0xac   : > { %4440 = vmatprep.mubr.f32.mxu1 %v5229_v1  ;;  %4466 = vmatpush3.msra.mxu1 %v528_v40  ;;  %v375_v1 = vadd.f32 %v4938_v39, %v339_v48  ;;  %v2019_v40 = vld [vmem:[%s7396_s3 + $0x1a8] sm:$0xff]  ;;  %v493_v48 = vld [vmem:[%s5861_s12 + $0x38] sm:$0xff] }
  0xad   : > { %1459 = vmatmul.mubr.f32.gmra.mxu0 %v5281_v43  ;;  %4441 = vmatmul.mubr.msk.f32.gmra.mxu1 %vm540_vm9, %v5242_v14  ;;  %v525_v43 = vld [vmem:[%s7397_s4 + $0x38] sm:$0xff]  ;;  %v5809_v15 = vsel %vm406_vm6, %v374_v54, %v438_v7  ;;  %v304_v54 = vld [vmem:[%s4906_s7 + $0x90] sm:$0xff] }
  0xae   : > { %4467 = vmatprep.subr.mxu1 %v527_v11  ;;  %3925 = vmatprep.subr.mxu0 %v2042_v52  ;;  %v2041_v14 = vld [vmem:[%s7396_s3 + $0x258] sm:$0xff]  ;;  %v439_v9 = vmul.f32 0.01, %v375_v1  ;;  %vm407_vm7 = vcmp.ge.f32.partialorder %v375_v1, 0.0  ;;  %v2018_v52 = vld [vmem:[%s7396_s3 + $0x1a0] sm:$0xff] }
  0xaf   : > { %4468 = vmatpush3.msra.mxu1 %v527_v11  ;;  %3926 = vmatpush3.msra.mxu0 %v2026_v51  ;;  %v2055_v11 = vld [vmem:[%s7396_s3 + $0x2c8] sm:$0xff]  ;;  %v494_v51 = vld [vmem:[%s5861_s12 + $0x40] sm:$0xff] }
  0xb0   : > { %4469 = vmatprep.subr.mxu1 %v526_v41  ;;  %1463 = vmatprep.mubr.f32.mxu0 %v5108_v0  ;;  %v524_v0 = vld [vmem:[%s7397_s4 + $0x30] sm:$0xff]  ;;  %v5811_v20 = vsel %vm407_vm7, %v375_v1, %v439_v9  ;;  %v305_v1 = vld [vmem:[%s4906_s7 + $0x98] sm:$0xff] }
  0xb1   : > { %4443 = vmatprep.mubr.f32.mxu1 %v5274_v36  ;;  %4470 = vmatpush3.msra.mxu1 %v526_v41  ;;  %v523_v36 = vld [vmem:[%s7397_s4 + $0x28] sm:$0xff]  ;;  %v1326_v29 = vrot.slane %v5811_v20, 1  ;;  %v341_v7 = vmul.f32 %v4936_v38, %v305_v1  ;;  %v496_v9 = vld [vmem:[%s5861_s12 + $0x50] sm:$0xff] }
  0xb2   : > { %3438 = vmatmul.mubr.msk.f32.gmra.mxu0 %vm537_vm8, %v5324_v60  ;;  %4444 = vmatmul.mubr.msk.f32.gmra.mxu1 %vm540_vm9, %v5285_v46  ;;  %v2040_v46 = vld [vmem:[%s7396_s3 + $0x250] sm:$0xff]  ;;  %v495_v41 = vld [vmem:[%s5861_s12 + $0x48] sm:$0xff] }
  0xb3   : > { %4471 = vmatprep.subr.mxu1 %v525_v43  ;;  %3927 = vmatprep.subr.mxu0 %v2041_v14  ;;  %v2024_v60 = vld [vmem:[%s7396_s3 + $0x1d0] sm:$0xff]  ;;  %v2017_v14 = vld [vmem:[%s7396_s3 + $0x198] sm:$0xff] }
  0xb4   : > { %4472 = vmatpush3.msra.mxu1 %v525_v43  ;;  %3928 = vmatpush3.msra.mxu0 %v2025_v2  ;;  %v2053_v43 = vld [vmem:[%s7396_s3 + $0x2b8] sm:$0xff]  ;;  %v2052_v2 = vld [vmem:[%s7396_s3 + $0x2b0] sm:$0xff] }
  0xb5   : > { %4473 = vmatprep.subr.mxu1 %v524_v0  ;;  %1468 = vmatprep.mubr.f32.mxu0 %v5121_v4  ;;  %v522_v4 = vld [vmem:[%s7397_s4 + $0x20] sm:$0xff] }
  0xb6   : > { %4446 = vmatprep.mubr.f32.mxu1 %v5317_v58  ;;  %4474 = vmatpush3.msra.mxu1 %v524_v0  ;;  %v1325_v58 = vrot.slane %v5809_v15, 1  ;;  %v340_v0 = vmul.f32 %v4936_v38, %v304_v54  ;;  %v2014_v54 = vld [vmem:[%s7396_s3 + $0x180] sm:$0xff] }
  0xb7   : > { %1469 = vmatmul.mubr.f32.gmra.mxu0 %v5361_v21  ;;  %4447 = vmatmul.mubr.msk.f32.gmra.mxu1 %vm540_vm9, %v5328_v63  ;;  %v521_v21 = vld [vmem:[%s7397_s4 + $0x18] sm:$0xff]  ;;  %v2039_v63 = vld [vmem:[%s7396_s3 + $0x248] sm:$0xff] }
  0xb8   : > { %4475 = vmatprep.subr.mxu1 %v523_v36  ;;  %3929 = vmatprep.subr.mxu0 %v2040_v46  ;;  %v5844_v32 = vsel %vm600_vm4, %v1325_v58, %v1326_v29  ;;  %v5848_v31 = vsel %vm600_vm4, %v1326_v29, %v1325_v58  ;;  %v306_v46 = vld [vmem:[%s4906_s7 + $0xa0] sm:$0xff]  ;;  %v2051_v58 = vld [vmem:[%s7396_s3 + $0x2a8] sm:$0xff]  ;;  %v1319_v29 = vrot.slane %v5809_v15, 7 }
  0xb9   : > { %4476 = vmatpush3.msra.mxu1 %v523_v36  ;;  %3930 = vmatpush3.msra.mxu0 %v2024_v60  ;;  %7437 = vst [vmem:[#allocation2_spill] sm:$0xff] %v5848_v31  ;;  %v497_v36 = vld [vmem:[%s5861_s12 + $0x58] sm:$0xff]  ;;  %v307_v60 = vld [vmem:[%s4906_s7 + $0xa8] sm:$0xff] }
  0xba   : > { %4477 = vmatprep.subr.mxu1 %v522_v4  ;;  %1473 = vmatprep.mubr.f32.mxu0 %v5148_v23  ;;  %v520_v23 = vld [vmem:[%s7397_s4 + $0x10] sm:$0xff] }
  0xbb   : > { %4449 = vmatprep.mubr.f32.mxu1 %v5354_v18  ;;  %4478 = vmatpush3.msra.mxu1 %v522_v4  ;;  %v2032_v4 = vld [vmem:[%s7396_s3 + $0x210] sm:$0xff] }
  0xbc   : > { %3439 = vmatmul.mubr.msk.f32.gmra.mxu0 %vm537_vm8, %v5392_v50  ;;  %4450 = vmatmul.mubr.msk.f32.gmra.mxu1 %vm540_vm9, %v5365_v24  ;;  %v519_v50 = vld [vmem:[%s7397_s4 + $0x8] sm:$0xff] }
  0xbd   : > { %4479 = vmatprep.subr.mxu1 %v521_v21  ;;  %3931 = vmatprep.subr.mxu0 %v2039_v63  ;;  %v2016_v63 = vld [vmem:[%s7396_s3 + $0x190] sm:$0xff] }
  0xbe   : > { %4480 = vmatpush3.msra.mxu1 %v521_v21  ;;  %3932 = vmatpush3.msra.mxu0 %v2023_v30  ;;  %v1320_v21 = vrot.slane %v5811_v20, 7  ;;  %v376_v30 = vadd.f32 %v4938_v39, %v340_v0 }
  0xbf   : > { %4481 = vmatprep.subr.mxu1 %v520_v23  ;;  %1478 = vmatprep.mubr.f32.mxu0 %v5159_v27  ;;  %v2022_v27 = vld [vmem:[%s7396_s3 + $0x1c0] sm:$0xff] }
  0xc0   : > { %4452 = vmatprep.mubr.f32.mxu1 %v5844_v32  ;;  %4482 = vmatpush3.msra.mxu1 %v520_v23  ;;  %v377_v23 = vadd.f32 %v4938_v39, %v341_v7  ;;  %vm408_vm10 = vcmp.ge.f32.partialorder %v376_v30, 0.0 }
  0xc1   : > { %1479 = vmatmul.mubr.f32.gmra.mxu0 %v5412_v59  ;;  %4453 = vmatmul.mubr.msk.f32.gmra.mxu1 %vm540_vm9, %v5848_v31  ;;  %v2037_v59 = vld [vmem:[%s7396_s3 + $0x238] sm:$0xff] }
  0xc2   : > { %4483 = vmatprep.subr.mxu1 %v519_v50  ;;  %3933 = vmatprep.subr.mxu0 %v2038_v34  ;;  %v342_v34 = vmul.f32 %v4936_v38, %v306_v46  ;;  %vm409_vm11 = vcmp.ge.f32.partialorder %v377_v23, 0.0  ;;  %v1985_v46 = vld [vmem:[%s7396_s3 + $0xf8] sm:$0xff] }
  0xc3   : > { %4484 = vmatpush3.msra.mxu1 %v519_v50  ;;  %3934 = vmatpush3.msra.mxu0 %v2022_v27  ;;  %v2050_v50 = vld [vmem:[%s7396_s3 + $0x2a0] sm:$0xff]  ;;  %v343_v27 = vmul.f32 %v4936_v38, %v307_v60  ;;  %v2001_v60 = vld [vmem:[%s7396_s3 + $0x178] sm:$0xff] }
  0xc4   : > { %4485 = vmatprep.subr.mxu1 %v518_v28  ;;  %1483 = vmatprep.mubr.f32.mxu0 %v5215_v61  ;;  %v2060_v61 = vld [vmem:[%s7396_s3 + $0x2f0] sm:$0xff] }
  0xc5   : > { %4486 = vmatpush3.msra.mxu1 %v518_v28  ;;  %4487 = vmatprep.mubr.f32.mxu1 %v486_v37  ;;  %v498_v28 = vld [vmem:[%s5861_s12 + $0x60] sm:$0xff]  ;;  %v308_v37 = vld [vmem:[%s4906_s7 + $0xb0] sm:$0xff] }
  0xc6   : > { %3440 = vmatmul.mubr.msk.f32.gmra.mxu0 %vm537_vm8, %v5428_v10  ;;  %4488 = vmatmul.mubr.f32.vlgmr.msra.gmra.mxu1 %v487_v16  ;;  %v2036_v10 = vld [vmem:[%s7396_s3 + $0x230] sm:$0xff]  ;;  %v5992_v16 = vsel %vm555_vm5, %v1320_v21, %v1319_v29 }
  0xc7   : > { %3935 = vmatprep.subr.mxu0 %v2037_v59  ;;  %4511 = vmatprep.subr.mxu1 %v2061_v44  ;;  %v499_v59 = vld [vmem:[%s5861_s12 + $0x68] sm:$0xff] }
  0xc8   : > { %3936 = vmatpush3.msra.mxu0 %v2021_v3  ;;  %4512 = vmatpush3.msra.mxu1 %v2061_v44  ;;  %v309_v44 = vld [vmem:[%s4906_s7 + $0xb8] sm:$0xff]  ;;  %v2031_v3 = vld [vmem:[%s7396_s3 + $0x208] sm:$0xff] }
  0xc9   : > { %4513 = vmatprep.subr.mxu1 %v2060_v61  ;;  %1488 = vmatprep.mubr.f32.mxu0 %v5218_v62  ;;  %v2058_v62 = vld [vmem:[%s7396_s3 + $0x2e0] sm:$0xff] }
  0xca   : > { %4490 = vmatprep.mubr.f32.mxu1 %v488_v49  ;;  %4514 = vmatpush3.msra.mxu1 %v2060_v61  ;;  %v2049_v61 = vld [vmem:[%s7396_s3 + $0x298] sm:$0xff]  ;;  %v440_v49 = vmul.f32 0.01, %v376_v30 }
  0xcb   : > { %1489 = vmatmul.mubr.f32.gmra.mxu0 %v5446_v5  ;;  %4491 = vmatmul.mubr.f32.gmra.mxu1 %v489_v17  ;;  %v2035_v5 = vld [vmem:[%s7396_s3 + $0x228] sm:$0xff]  ;;  %v441_v17 = vmul.f32 0.01, %v377_v23 }
  0xcc   : > { %3937 = vmatprep.subr.mxu0 %v2036_v10  ;;  %4515 = vmatprep.subr.mxu1 %v2059_v12  ;;  %v2015_v10 = vld [vmem:[%s7396_s3 + $0x188] sm:$0xff] }
  0xcd   : > { %3938 = vmatpush3.msra.mxu0 %v2020_v35  ;;  %4516 = vmatpush3.msra.mxu1 %v2059_v12  ;;  %v378_v12 = vadd.f32 %v4938_v39, %v342_v34  ;;  %v379_v35 = vadd.f32 %v4938_v39, %v343_v27 }
  0xce   : > { %4517 = vmatprep.subr.mxu1 %v2058_v62  ;;  %1493 = vmatprep.mubr.f32.mxu0 %v5258_v25  ;;  %v2056_v25 = vld [vmem:[%s7396_s3 + $0x2d0] sm:$0xff] }
  0xcf   : > { %4493 = vmatprep.mubr.f32.mxu1 %v490_v22  ;;  %4518 = vmatpush3.msra.mxu1 %v2058_v62  ;;  %v344_v62 = vmul.f32 %v4936_v38, %v308_v37  ;;  %v2048_v22 = vld [vmem:[%s7396_s3 + $0x290] sm:$0xff]  ;;  %vm410_vm12 = vcmp.ge.f32.partialorder %v378_v12, 0.0  ;;  %vm411_vm13 = vcmp.ge.f32.partialorder %v379_v35, 0.0 }
  0xd0   : > { %3441 = vmatmul.mubr.msk.f32.gmra.mxu0 %vm537_vm8, %v5462_v6  ;;  %4494 = vmatmul.mubr.f32.gmra.mxu1 %v491_v33  ;;  %v2034_v6 = vld [vmem:[%s7396_s3 + $0x220] sm:$0xff]  ;;  %v345_v33 = vmul.f32 %v4936_v38, %v309_v44 }
  0xd1   : > { %3939 = vmatprep.subr.mxu0 %v2035_v5  ;;  %4519 = vmatprep.subr.mxu1 %v2057_v47  ;;  %v500_v5 = vld [vmem:[%s5861_s12 + $0x70] sm:$0xff] }
  0xd2   : > { %3940 = vmatpush3.msra.mxu0 %v2019_v40  ;;  %4520 = vmatpush3.msra.mxu1 %v2057_v47  ;;  %v310_v47 = vld [vmem:[%s4906_s7 + $0xc0] sm:$0xff]  ;;  %v6020_v40 = vsel %vm555_vm5, %v1319_v29, %v1320_v21  ;;  %v381_v1 = vadd.f32 %v4938_v39, %v345_v33  ;;  %v1969_v29 = vld [vmem:[%s7396_s3 + $0x78] sm:$0xff]  ;;  %v1983_v33 = vld [vmem:[%s7396_s3 + $0xe8] sm:$0xff] }
  0xd3   : > { %4521 = vmatprep.subr.mxu1 %v2056_v25  ;;  %1498 = vmatprep.mubr.f32.mxu0 %v5261_v26  ;;  %v2054_v26 = vld [vmem:[%s7396_s3 + $0x2c0] sm:$0xff] }
  0xd4   : > { %4496 = vmatprep.mubr.f32.mxu1 %v492_v42  ;;  %4522 = vmatpush3.msra.mxu1 %v2056_v25  ;;  %v501_v25 = vld [vmem:[%s5861_s12 + $0x78] sm:$0xff]  ;;  %v6024_v42 = vsel %vm408_vm10, %v376_v30, %v440_v49  ;;  %vm413_vm15 = vcmp.ge.f32.partialorder %v381_v1, 0.0 }
  0xd5   : > { %1499 = vmatmul.mubr.f32.gmra.mxu0 %v5480_v45  ;;  %4497 = vmatmul.mubr.f32.gmra.mxu1 %v493_v48  ;;  %v2033_v45 = vld [vmem:[%s7396_s3 + $0x218] sm:$0xff]  ;;  %v311_v48 = vld [vmem:[%s4906_s7 + $0xc8] sm:$0xff] }
  0xd6   : > { %3941 = vmatprep.subr.mxu0 %v2034_v6  ;;  %4523 = vmatprep.subr.mxu1 %v2055_v11  ;;  %v2030_v6 = vld [vmem:[%s7396_s3 + $0x200] sm:$0xff]  ;;  %v313_v30 = vld [vmem:[%s4906_s7 + $0xd8] sm:$0xff] }
  0xd7   : > { %3942 = vmatpush3.msra.mxu0 %v2018_v52  ;;  %4524 = vmatpush3.msra.mxu1 %v2055_v11  ;;  %v2047_v11 = vld [vmem:[%s7396_s3 + $0x288] sm:$0xff]  ;;  %v6035_v52 = vsel %vm409_vm11, %v377_v23, %v441_v17  ;;  %v1984_v23 = vld [vmem:[%s7396_s3 + $0xf0] sm:$0xff] }
  0xd8   : > { %4525 = vmatprep.subr.mxu1 %v2054_v26  ;;  %1503 = vmatprep.mubr.f32.mxu0 %v5303_v55  ;;  %v1924_v0 = vrot.slane %v6035_v52, 1 }
  0xd9   : > { %4499 = vmatprep.mubr.f32.mxu1 %v494_v51  ;;  %4526 = vmatpush3.msra.mxu1 %v2054_v26  ;;  %v442_v26 = vmul.f32 0.01, %v378_v12  ;;  %v443_v51 = vmul.f32 0.01, %v379_v35 }
  0xda   : > { %3442 = vmatmul.mubr.msk.f32.gmra.mxu0 %vm537_vm8, %v5496_v57  ;;  %4500 = vmatmul.mubr.f32.gmra.mxu1 %v495_v41  ;;  %v380_v41 = vadd.f32 %v4938_v39, %v344_v62 }
  0xdb   : > { %3943 = vmatprep.subr.mxu0 %v2033_v45  ;;  %4527 = vmatprep.subr.mxu1 %v2053_v43  ;;  %v346_v45 = vmul.f32 %v4936_v38, %v310_v47  ;;  %v6050_v7 = vsel %vm410_vm12, %v378_v12, %v442_v26  ;;  %v1982_v26 = vld [vmem:[%s7396_s3 + $0xe0] sm:$0xff] }
  0xdc   : > { %3944 = vmatpush3.msra.mxu0 %v2017_v14  ;;  %4528 = vmatpush3.msra.mxu1 %v2053_v43  ;;  %v2046_v43 = vld [vmem:[%s7396_s3 + $0x280] sm:$0xff]  ;;  %v347_v14 = vmul.f32 %v4936_v38, %v311_v48  ;;  %vm412_vm14 = vcmp.ge.f32.partialorder %v380_v41, 0.0  ;;  %v1919_v34 = vrot.slane %v6050_v7, 1 }
  0xdd   : > { %4529 = vmatprep.subr.mxu1 %v2052_v2  ;;  %1508 = vmatprep.mubr.f32.mxu0 %v5306_v56 }
  0xde   : > { %4502 = vmatprep.mubr.f32.mxu1 %v496_v9  ;;  %4530 = vmatpush3.msra.mxu1 %v2052_v2  ;;  %v1918_v2 = vrot.slane %v6024_v42, 1  ;;  %v6052_v9 = vsel %vm411_vm13, %v379_v35, %v443_v51  ;;  %v383_v21 = vadd.f32 %v4938_v39, %v347_v14  ;;  %v349_v35 = vmul.f32 %v4936_v38, %v313_v30  ;;  %v1966_v14 = vld [vmem:[%s7396_s3 + $0x60] sm:$0xff] }
  0xdf   : > { %1509 = vmatmul.mubr.f32.gmra.mxu0 %v5514_v8  ;;  %4503 = vmatmul.mubr.f32.gmra.mxu1 %v497_v36  ;;  %v444_v36 = vmul.f32 0.01, %v380_v41  ;;  %v1925_v27 = vrot.slane %v6052_v9, 1 }
  0xe0   : > { %3945 = vmatprep.subr.mxu0 %v2032_v4  ;;  %4531 = vmatprep.subr.mxu1 %v2051_v58  ;;  %v445_v4 = vmul.f32 0.01, %v381_v1  ;;  %v6093_v44 = vsel %vm600_vm4, %v1924_v0, %v1918_v2  ;;  %v447_v47 = vmul.f32 0.01, %v383_v21  ;;  %vm415_vm1 = vcmp.ge.f32.partialorder %v383_v21, 0.0 }
  0xe1   : > { %3946 = vmatpush3.msra.mxu0 %v2016_v63  ;;  %4532 = vmatpush3.msra.mxu1 %v2051_v58  ;;  %v382_v58 = vadd.f32 %v4938_v39, %v346_v45  ;;  %v312_v63 = vld [vmem:[%s4906_s7 + $0xd0] sm:$0xff]  ;;  %7439 = vst [vmem:[#allocation4_spill] sm:$0xff] %v6093_v44  ;;  %v6098_v49 = vsel %vm412_vm14, %v380_v41, %v444_v36 }
  0xe2   : > { %4533 = vmatprep.subr.mxu1 %v2050_v50  ;;  %1513 = vmatprep.mubr.f32.mxu0 %v5809_v15  ;;  %v6101_v17 = vsel %vm413_vm15, %v381_v1, %v445_v4  ;;  %v348_v12 = vmul.f32 %v4936_v38, %v312_v63  ;;  %v6122_v48 = vsel %vm600_vm4, %v1919_v34, %v1925_v27 }
  0xe3   : > { %4505 = vmatprep.mubr.f32.mxu1 %v498_v28  ;;  %4534 = vmatpush3.msra.mxu1 %v2050_v50  ;;  %v6080_v50 = vsel %vm600_vm4, %v1918_v2, %v1924_v0  ;;  %vm414_vm0 = vcmp.ge.f32.partialorder %v382_v58, 0.0  ;;  %7440 = vst [vmem:[#allocation5_spill] sm:$0xff] %v6122_v48  ;;  %v6139_v41 = vsel %vm600_vm4, %v1925_v27, %v1919_v34  ;;  %v1926_v1 = vrot.slane %v6101_v17, 1 }
  0xe4   : > { %3443 = vmatmul.mubr.msk.f32.gmra.mxu0 %vm537_vm8, %v5992_v16  ;;  %4506 = vmatmul.mubr.f32.gmra.mxu1 %v499_v59  ;;  %7438 = vst [vmem:[#allocation3_spill] sm:$0xff] %v6080_v50  ;;  %v1968_v59 = vld [vmem:[%s7396_s3 + $0x70] sm:$0xff]  ;;  %7441 = vst [vmem:[#allocation6_spill] sm:$0xff] %v6139_v41  ;;  %v384_v0 = vadd.f32 %v4938_v39, %v348_v12  ;;  %v385_v36 = vadd.f32 %v4938_v39, %v349_v35  ;;  %v317_v12 = vld [vmem:[%s4906_s7 + $0xf8] sm:$0xff] }
  0xe5   : > { %3947 = vmatprep.subr.mxu0 %v2031_v3  ;;  %4535 = vmatprep.subr.mxu1 %v2049_v61  ;;  %v1882_v3 = vrot.slane %v6024_v42, 7  ;;  %v1980_v35 = vld [vmem:[%s7396_s3 + $0xd0] sm:$0xff] }
  0xe6   : > { %3948 = vmatpush3.msra.mxu0 %v2015_v10  ;;  %4536 = vmatpush3.msra.mxu1 %v2049_v61  ;;  %v1888_v61 = vrot.slane %v6035_v52, 7  ;;  %v446_v10 = vmul.f32 0.01, %v382_v58  ;;  %vm416_vm2 = vcmp.ge.f32.partialorder %v384_v0, 0.0  ;;  %vm417_vm3 = vcmp.ge.f32.partialorder %v385_v36, 0.0 }
  0xe7   : > { %4537 = vmatprep.subr.mxu1 %v2048_v22  ;;  %1518 = vmatprep.mubr.f32.mxu0 %v5811_v20 }
  0xe8   : > { %4508 = vmatprep.mubr.f32.mxu1 %v500_v5  ;;  %4538 = vmatpush3.msra.mxu1 %v2048_v22  ;;  %v2000_v5 = vld [vmem:[%s7396_s3 + $0x170] sm:$0xff]  ;;  %v6135_v51 = vsel %vm555_vm5, %v1888_v61, %v1882_v3  ;;  %v6149_v2 = vsel %vm414_vm0, %v382_v58, %v446_v10  ;;  %v1981_v58 = vld [vmem:[%s7396_s3 + $0xd8] sm:$0xff]  ;;  %v6177_v27 = vsel %vm555_vm5, %v1882_v3, %v1888_v61  ;;  %v448_v3 = vmul.f32 0.01, %v384_v0 }
  0xe9   : > { %1519 = vmatmul.mubr.f32.gmra.mxu0 %v6020_v40  ;;  %4509 = vmatmul.mubr.f32.gmra.mxu1 %v501_v25  ;;  %v1967_v25 = vld [vmem:[%s7396_s3 + $0x68] sm:$0xff]  ;;  %v316_v10 = vld [vmem:[%s4906_s7 + $0xf0] sm:$0xff]  ;;  %v449_v61 = vmul.f32 0.01, %v385_v36 }
  0xea   : > { %3949 = vmatprep.subr.mxu0 %v2030_v6  ;;  %4539 = vmatprep.subr.mxu1 %v2047_v11  ;;  %v314_v6 = vld [vmem:[%s4906_s7 + $0xe0] sm:$0xff] }
  0xeb   : > { %3950 = vmatpush3.msra.mxu0 %v2014_v54  ;;  %4540 = vmatpush3.msra.mxu1 %v2047_v11  ;;  %v315_v11 = vld [vmem:[%s4906_s7 + $0xe8] sm:$0xff]  ;;  %v1920_v54 = vrot.slane %v6098_v49, 1  ;;  %s7073_s7 = scalar_lea.vmem %s7398_s5, %s4888_s18  ;;  %s3550_s18 = sshll.u32 %s7539_s22, 6 }
  0xec   : > { %4541 = vmatprep.subr.mxu1 %v2046_v43  ;;  %2126 = vmatprep.mubr.f32.mxu0 %v5809_v15  ;;  %v351_v4 = vmul.f32 %v4936_v38, %v315_v11  ;;  %s7151_s14 = scalar_lea.vmem %s7399_s6, %s3550_s18 }
  0xed   : > { %4542 = vmatpush3.msra.mxu1 %v2046_v43  ;;  %4543 = vmatprep.mubr.f32.mxu1 %v5844_v32  ;;  %v6173_v34 = vsel %vm600_vm4, %v1920_v54, %v1926_v1 }
  0xee   : > { %3452 = vmatmul.mubr.msk.f32.vlgmr.msra.gmra.mxu0 %vm537_vm8, %v5992_v16  ;;  %4544 = vmatmul.mubr.msk.f32.vlgmr.msra.gmra.mxu1 %vm540_vm9, %v5848_v31  ;;  %v6084_v28 = vpop.f32.mrf.mxu0  ;;  %v6086_v37 = vpop.f32.mrf.mxu1  ;;  %7442 = vst [vmem:[#allocation7_spill] sm:$0xff] %v6173_v34 }
  0xef   : > { %4031 = vmatprep.subr.mxu1 %v1985_v46  ;;  %4567 = vmatprep.subr.mxu0 %v2001_v60  ;;  %v6154_v46 = vsel %vm415_vm1, %v383_v21, %v447_v47  ;;  %v1999_v21 = vld [vmem:[%s7396_s3 + $0x168] sm:$0xff] }
  0xf0   : > { %4032 = vmatpush3.msra.mxu1 %v1969_v29  ;;  %4568 = vmatpush3.msra.mxu0 %v2001_v60  ;;  %v6105_v62 = vpop.f32.mrf.mxu0  ;;  %v6107_v22 = vpop.f32.mrf.mxu1  ;;  %v350_v60 = vmul.f32 %v4936_v38, %v314_v6  ;;  %v1964_v6 = vld [vmem:[%s7396_s3 + $0x50] sm:$0xff] }
  0xf1   : > { %4033 = vmatprep.subr.mxu1 %v1984_v23  ;;  %2131 = vmatprep.mubr.f32.mxu0 %v5811_v20  ;;  %v1965_v23 = vld [vmem:[%s7396_s3 + $0x58] sm:$0xff] }
  0xf2   : > { %4546 = vmatprep.mubr.f32.mxu1 %v6080_v50  ;;  %4034 = vmatpush3.msra.mxu1 %v1968_v59  ;;  %v1921_v59 = vrot.slane %v6149_v2, 1  ;;  %v386_v11 = vadd.f32 %v4938_v39, %v350_v60  ;;  %v1979_v60 = vld [vmem:[%s7396_s3 + $0xc8] sm:$0xff] }
  0xf3   : > { %2132 = vmatmul.mubr.f32.gmra.mxu0 %v6020_v40  ;;  %4547 = vmatmul.mubr.msk.f32.gmra.mxu1 %vm540_vm9, %v6093_v44  ;;  %v3586_v45 = vpop.f32.mrf.mxu0  ;;  %v6143_v43 = vpop.f32.mrf.mxu1 }
  0xf4   : > { %4035 = vmatprep.subr.mxu1 %v1983_v33  ;;  %4569 = vmatprep.subr.mxu0 %v2000_v5  ;;  %v1927_v33 = vrot.slane %v6154_v46, 1  ;;  %vm418_vm6 = vcmp.ge.f32.partialorder %v386_v11, 0.0 }
  0xf5   : > { %4036 = vmatpush3.msra.mxu1 %v1967_v25  ;;  %4570 = vmatpush3.msra.mxu0 %v2000_v5  ;;  %v3587_v29 = vpop.f32.mrf.mxu0  ;;  %v6158_v63 = vpop.f32.mrf.mxu1 }
  0xf6   : > { %4037 = vmatprep.subr.mxu1 %v1982_v26  ;;  %2136 = vmatprep.mubr.f32.mxu0 %v6024_v42  ;;  %v3588_v30 = vadd.f32 %v3587_v29, %v3586_v45  ;;  %v387_v26 = vadd.f32 %v4938_v39, %v351_v4  ;;  %v352_v45 = vmul.f32 %v4936_v38, %v316_v10  ;;  %v1889_v4 = vrot.slane %v6052_v9, 7 }
  0xf7   : > { %4549 = vmatprep.mubr.f32.mxu1 %v6122_v48  ;;  %4038 = vmatpush3.msra.mxu1 %v1966_v14  ;;  %v353_v14 = vmul.f32 %v4936_v38, %v317_v12  ;;  %v1963_v38 = vld [vmem:[%s7396_s3 + $0x48] sm:$0xff]  ;;  %v6242_v10 = vsel %vm600_vm4, %v1921_v59, %v1927_v33  ;;  %v450_v12 = vmul.f32 0.01, %v386_v11 }
  0xf8   : > { %3453 = vmatmul.mubr.msk.f32.gmra.mxu0 %vm537_vm8, %v6135_v51  ;;  %4550 = vmatmul.mubr.msk.f32.gmra.mxu1 %vm540_vm9, %v6139_v41  ;;  %v6193_v5 = vadd.f32 %v6086_v37, %v3588_v30  ;;  %v6195_v47 = vpop.f32.mrf.mxu0  ;;  %v6197_v25 = vpop.f32.mrf.mxu1  ;;  %v6206_v37 = vsel %vm600_vm4, %v1926_v1, %v1920_v54  ;;  %v1998_v54 = vld [vmem:[%s7396_s3 + $0x160] sm:$0xff]  ;;  %v1883_v1 = vrot.slane %v6050_v7, 7  ;;  %v6231_v30 = vsel %vm417_vm3, %v385_v36, %v449_v61 }
  0xf9   : > { %4039 = vmatprep.subr.mxu1 %v1981_v58  ;;  %4571 = vmatprep.subr.mxu0 %v1999_v21  ;;  %7443 = vst [vmem:[#allocation8_spill] sm:$0xff] %v6206_v37  ;;  %7444 = vst [vmem:[#allocation9_spill] sm:$0xff] %v6242_v10  ;;  %v1962_v36 = vld [vmem:[%s7396_s3 + $0x40] sm:$0xff]  ;;  %vm419_vm7 = vcmp.ge.f32.partialorder %v387_v26, 0.0  ;;  %v388_v61 = vadd.f32 %v4938_v39, %v352_v45  ;;  %v1997_v45 = vld [vmem:[%s7396_s3 + $0x158] sm:$0xff] }
  0xfa   : > { %4040 = vmatpush3.msra.mxu1 %v1965_v23  ;;  %4572 = vmatpush3.msra.mxu0 %v1999_v21  ;;  %v6210_v29 = vpop.f32.mrf.mxu0  ;;  %v6212_v58 = vpop.f32.mrf.mxu1  ;;  %v6228_v21 = vsel %vm416_vm2, %v384_v0, %v448_v3  ;;  %v1978_v23 = vld [vmem:[%s7396_s3 + $0xc0] sm:$0xff]  ;;  %v451_v0 = vmul.f32 0.01, %v387_v26  ;;  %v6253_v53 = vsel %vm555_vm5, %v1889_v4, %v1883_v1 }
  0xfb   : > { %4041 = vmatprep.subr.mxu1 %v1980_v35  ;;  %2141 = vmatprep.mubr.f32.mxu0 %v6035_v52  ;;  %vm420_vm10 = vcmp.ge.f32.partialorder %v388_v61, 0.0 }
  0xfc   : > { %4552 = vmatprep.mubr.f32.mxu1 %v6173_v34  ;;  %4042 = vmatpush3.msra.mxu1 %v1964_v6  ;;  %v389_v6 = vadd.f32 %v4938_v39, %v353_v14  ;;  %v1928_v34 = vrot.slane %v6231_v30, 1  ;;  %v1977_v39 = vld [vmem:[%s7396_s3 + $0xb8] sm:$0xff]  ;;  %v6275_v14 = vsel %vm418_vm6, %v386_v11, %v450_v12 }
  0xfd   : > { %2142 = vmatmul.mubr.f32.gmra.mxu0 %v6177_v27  ;;  %4553 = vmatmul.mubr.msk.f32.gmra.mxu1 %vm540_vm9, %v6206_v37  ;;  %v3592_v35 = vpop.f32.mrf.mxu0  ;;  %v6244_v3 = vpop.f32.mrf.mxu1  ;;  %v1922_v37 = vrot.slane %v6228_v21, 1 }
  0xfe   : > { %4043 = vmatprep.subr.mxu1 %v1979_v60  ;;  %4573 = vmatprep.subr.mxu0 %v1998_v54  ;;  %v6257_v60 = vsel %vm600_vm4, %v1927_v33, %v1921_v59  ;;  %v1961_v33 = vld [vmem:[%s7396_s3 + $0x38] sm:$0xff]  ;;  %vm421_vm11 = vcmp.ge.f32.partialorder %v389_v6, 0.0 }
  0xff   : > { %4044 = vmatpush3.msra.mxu1 %v1963_v38  ;;  %4574 = vmatpush3.msra.mxu0 %v1998_v54  ;;  %7445 = vst [vmem:[#allocation10_spill] sm:$0xff] %v6257_v60  ;;  %v3593_v41 = vpop.f32.mrf.mxu0  ;;  %v6261_v48 = vpop.f32.mrf.mxu1  ;;  %v6278_v54 = vsel %vm419_vm7, %v387_v26, %v451_v0  ;;  %v452_v38 = vmul.f32 0.01, %v388_v61  ;;  %v6298_v0 = vsel %vm600_vm4, %v1922_v37, %v1928_v34 }
 0x100   : > { %4045 = vmatprep.subr.mxu1 %v1978_v23  ;;  %2146 = vmatprep.mubr.f32.mxu0 %v6050_v7  ;;  %v3594_v59 = vadd.f32 %v3593_v41, %v3592_v35  ;;  %v1976_v41 = vld [vmem:[%s7396_s3 + $0xb0] sm:$0xff]  ;;  %v453_v23 = vmul.f32 0.01, %v389_v6  ;;  %7446 = vst [vmem:[#allocation11_spill] sm:$0xff] %v6298_v0 }
 0x101   : > { %4555 = vmatprep.mubr.f32.mxu1 %v6242_v10  ;;  %4046 = vmatpush3.msra.mxu1 %v1962_v36  ;;  %v1960_v35 = vld [vmem:[%s7396_s3 + $0x30] sm:$0xff]  ;;  %v6309_v36 = vsel %vm600_vm4, %v1928_v34, %v1922_v37  ;;  %v1884_v37 = vrot.slane %v6098_v49, 7 }
 0x102   : > { %3454 = vmatmul.mubr.msk.f32.gmra.mxu0 %vm537_vm8, %v6253_v53  ;;  %4556 = vmatmul.mubr.msk.f32.gmra.mxu1 %vm540_vm9, %v6257_v60  ;;  %v6290_v11 = vadd.f32 %v6143_v43, %v3594_v59  ;;  %v6292_v12 = vpop.f32.mrf.mxu0  ;;  %v6294_v26 = vpop.f32.mrf.mxu1  ;;  %v6305_v43 = vsel %vm555_vm5, %v1883_v1, %v1889_v4  ;;  %7447 = vst [vmem:[#allocation12_spill] sm:$0xff] %v6309_v36  ;;  %v1929_v59 = vrot.slane %v6278_v54, 1  ;;  %v1975_v1 = vld [vmem:[%s7396_s3 + $0xa8] sm:$0xff]  ;;  %v1996_v34 = vld [vmem:[%s7396_s3 + $0x150] sm:$0xff]  ;;  %v1890_v4 = vrot.slane %v6101_v17, 7 }
 0x103   : > { %4047 = vmatprep.subr.mxu1 %v1977_v39  ;;  %4575 = vmatprep.subr.mxu0 %v1997_v45  ;;  %v1923_v39 = vrot.slane %v6275_v14, 1 }
 0x104   : > { %4048 = vmatpush3.msra.mxu1 %v1961_v33  ;;  %4576 = vmatpush3.msra.mxu0 %v1997_v45  ;;  %v6313_v60 = vpop.f32.mrf.mxu0  ;;  %v6315_v10 = vpop.f32.mrf.mxu1  ;;  %v1959_v45 = vld [vmem:[%s7396_s3 + $0x28] sm:$0xff]  ;;  %v6331_v33 = vsel %vm420_vm10, %v388_v61, %v452_v38  ;;  %v6354_v38 = vsel %vm555_vm5, %v1890_v4, %v1884_v37 }
 0x105   : > { %7448 = vst [vmem:[#allocation13_spill] sm:$0xff] %v6315_v10  ;;  %4049 = vmatprep.subr.mxu1 %v1976_v41  ;;  %2151 = vmatprep.mubr.f32.mxu0 %v6052_v9  ;;  %v6334_v41 = vsel %vm421_vm11, %v389_v6, %v453_v23  ;;  %v6347_v61 = vsel %vm600_vm4, %v1923_v39, %v1929_v59  ;;  %v1958_v6 = vld [vmem:[%s7396_s3 + $0x20] sm:$0xff] }
 0x106   : > { %4558 = vmatprep.mubr.f32.mxu1 %v6298_v0  ;;  %4050 = vmatpush3.msra.mxu1 %v1960_v35  ;;  %7449 = vst [vmem:[#allocation14_spill] sm:$0xff] %v6334_v41  ;;  %v1974_v35 = vld [vmem:[%s7396_s3 + $0xa0] sm:$0xff]  ;;  %7450 = vst [vmem:[#allocation15_spill] sm:$0xff] %v6347_v61  ;;  %v6358_v23 = vsel %vm600_vm4, %v1929_v59, %v1923_v39  ;;  %v1957_v59 = vld [vmem:[%s7396_s3 + $0x18] sm:$0xff] }
 0x107   : > { %2152 = vmatmul.mubr.f32.gmra.mxu0 %v6305_v43  ;;  %4559 = vmatmul.mubr.msk.f32.gmra.mxu1 %vm540_vm9, %v6309_v36  ;;  %v3598_v0 = vpop.f32.mrf.mxu0  ;;  %v6343_v44 = vpop.f32.mrf.mxu1  ;;  %7451 = vst [vmem:[#allocation16_spill] sm:$0xff] %v6358_v23  ;;  %v2009_v36 = vrot.slane %v6334_v41, 1 }
 0x108   : > { %4051 = vmatprep.subr.mxu1 %v1975_v1  ;;  %4577 = vmatprep.subr.mxu0 %v1996_v34  ;;  %v2008_v1 = vrot.slane %v6331_v33, 1 }
 0x109   : > { %4052 = vmatpush3.msra.mxu1 %v1959_v45  ;;  %4578 = vmatpush3.msra.mxu0 %v1996_v34  ;;  %v3599_v50 = vpop.f32.mrf.mxu0  ;;  %v6362_v31 = vpop.f32.mrf.mxu1  ;;  %v1973_v34 = vld [vmem:[%s7396_s3 + $0x98] sm:$0xff]  ;;  %v1995_v45 = vld [vmem:[%s7396_s3 + $0x148] sm:$0xff] }
 0x10a   : > { %7452 = vst [vmem:[#allocation17_spill] sm:$0xff] %v6362_v31  ;;  %4053 = vmatprep.subr.mxu1 %v1974_v35  ;;  %2156 = vmatprep.mubr.f32.mxu0 %v6098_v49  ;;  %v3600_v39 = vadd.f32 %v3599_v50, %v3598_v0  ;;  %v1972_v35 = vld [vmem:[%s7396_s3 + $0x90] sm:$0xff] }
 0x10b   : > { %4561 = vmatprep.mubr.f32.mxu1 %v6347_v61  ;;  %4054 = vmatpush3.msra.mxu1 %v1958_v6  ;;  %v6393_v61 = vsel %vm600_vm4, %v2008_v1, %v2009_v36 }
 0x10c   : > { %3455 = vmatmul.mubr.msk.f32.gmra.mxu0 %vm537_vm8, %v6354_v38  ;;  %4562 = vmatmul.mubr.msk.f32.gmra.mxu1 %vm540_vm9, %v6358_v23  ;;  %v6385_v50 = vadd.f32 %v6197_v25, %v3600_v39  ;;  %v6387_v0 = vpop.f32.mrf.mxu0  ;;  %v6389_v6 = vpop.f32.mrf.mxu1  ;;  %7453 = vst [vmem:[#allocation18_spill] sm:$0xff] %v6393_v61  ;;  %v1956_v23 = vld [vmem:[%s7396_s3 + $0x10] sm:$0xff]  ;;  %v6400_v25 = vsel %vm555_vm5, %v1884_v37, %v1890_v4  ;;  %v1994_v37 = vld [vmem:[%s7396_s3 + $0x140] sm:$0xff]  ;;  %v1885_v4 = vrot.slane %v6149_v2, 7 }
 0x10d   : > { %4055 = vmatprep.subr.mxu1 %v1973_v34  ;;  %4579 = vmatprep.subr.mxu0 %v1995_v45  ;;  %7454 = vst [vmem:[#allocation19_spill] sm:$0xff] %v6400_v25  ;;  %v6404_v39 = vsel %vm600_vm4, %v2009_v36, %v2008_v1  ;;  %v1891_v36 = vrot.slane %v6154_v46, 7  ;;  %v1955_v1 = vld [vmem:[%s7396_s3 + $0x8] sm:$0xff] }
 0x10e   : > { %4056 = vmatpush3.msra.mxu1 %v1957_v59  ;;  %4580 = vmatpush3.msra.mxu0 %v1995_v45  ;;  %7455 = vst [vmem:[#allocation20_spill] sm:$0xff] %v6404_v39  ;;  %v6406_v34 = vpop.f32.mrf.mxu0  ;;  %v6408_v31 = vpop.f32.mrf.mxu1  ;;  %v1971_v59 = vld [vmem:[%s7396_s3 + $0x88] sm:$0xff]  ;;  %v1970_v45 = vld [vmem:[%s7396_s3 + $0x80] sm:$0xff] }
 0x10f   : > { %7456 = vst [vmem:[#allocation21_spill] sm:$0xff] %v6408_v31  ;;  %4057 = vmatprep.subr.mxu1 %v1972_v35  ;;  %2161 = vmatprep.mubr.f32.mxu0 %v6101_v17 }
 0x110   : > { %4564 = vmatprep.mubr.f32.mxu1 %v6393_v61  ;;  %4058 = vmatpush3.msra.mxu1 %v1956_v23  ;;  %v1954_v23 = vld [vmem:[%s7396_s3] sm:$0xff]  ;;  %v6437_v61 = vsel %vm555_vm5, %v1891_v36, %v1885_v4 }
 0x111   : > { %2162 = vmatmul.mubr.f32.gmra.mxu0 %v6400_v25  ;;  %4565 = vmatmul.mubr.msk.f32.gmra.mxu1 %vm540_vm9, %v6404_v39  ;;  %v3604_v35 = vpop.f32.mrf.mxu0  ;;  %v6430_v31 = vpop.f32.mrf.mxu1 }
 0x112   : > { %4059 = vmatprep.subr.mxu1 %v1971_v59  ;;  %4581 = vmatprep.subr.mxu0 %v1994_v37  ;;  %v1993_v59 = vld [vmem:[%s7396_s3 + $0x138] sm:$0xff] }
 0x113   : > { %4060 = vmatpush3.msra.mxu1 %v1955_v1  ;;  %4582 = vmatpush3.msra.mxu0 %v1994_v37  ;;  %v3605_v39 = vpop.f32.mrf.mxu0  ;;  %v6439_v25 = vpop.f32.mrf.mxu1  ;;  %v3585_v37 = vadd.f32 %v6105_v62, %v6084_v28  ;;  %v1992_v1 = vld [vmem:[%s7396_s3 + $0x130] sm:$0xff] }
 0x114   : > { %7457 = vst [vmem:[#allocation22_spill] sm:$0xff] %v6439_v25  ;;  %4061 = vmatprep.subr.mxu1 %v1970_v45  ;;  %2166 = vmatprep.mubr.f32.mxu0 %v6149_v2  ;;  %v3606_v10 = vadd.f32 %v3605_v39, %v3604_v35  ;;  %v2689_v39 = vld [vmem:[%s7396_s3 + $0x478] sm:$0xff]  ;;  %v1886_v45 = vrot.slane %v6228_v21, 7  ;;  %v1892_v35 = vrot.slane %v6231_v30, 7 }
 0x115   : > { %4062 = vmatpush3.msra.mxu1 %v1954_v23  ;;  %2416 = vmatprep.mubr.f32.mxu1 %v5303_v55 }
 0x116   : > { %3456 = vmatmul.mubr.msk.f32.gmra.mxu0 %vm537_vm8, %v6437_v61  ;;  %3468 = vmatmul.mubr.msk.f32.vlgmr.msra.gmra.mxu1 %vm537_vm8, %v5496_v57  ;;  %v6461_v55 = vadd.f32 %v6244_v3, %v3606_v10  ;;  %v6463_v28 = vpop.f32.mrf.mxu0  ;;  %v3695_v62 = vpop.f32.mrf.mxu1  ;;  %v6468_v57 = vsel %vm555_vm5, %v1885_v4, %v1891_v36  ;;  %v951_v3 = vadd.f32 %v3585_v37, %v6107_v22  ;;  %v1991_v4 = vld [vmem:[%s7396_s3 + $0x128] sm:$0xff] }
 0x117   : > { %4583 = vmatprep.subr.mxu0 %v1993_v59  ;;  %2171 = vmatprep.mubr.f32.mxu0 %v6154_v46  ;;  %7458 = vst [vmem:[#allocation23_spill] sm:$0xff] %v6468_v57  ;;  %v6487_v22 = vsel %vm555_vm5, %v1892_v35, %v1886_v45 }
 0x118   : > { %4584 = vmatpush3.msra.mxu0 %v1993_v59  ;;  %2421 = vmatprep.mubr.f32.mxu1 %v5306_v56  ;;  %v6473_v23 = vpop.f32.mrf.mxu0  ;;  %v3696_v10 = vpop.f32.mrf.mxu1  ;;  %v2688_v56 = vld [vmem:[%s7396_s3 + $0x470] sm:$0xff] }
 0x119   : > { %4585 = vmatprep.subr.mxu0 %v1992_v1  ;;  %4623 = vmatprep.subr.mxu1 %v2689_v39  ;;  %v3697_v25 = vadd.f32 %v3696_v10, %v3695_v62  ;;  %v3591_v10 = vadd.f32 %v6210_v29, %v6195_v47  ;;  %v2687_v47 = vld [vmem:[%s7396_s3 + $0x468] sm:$0xff] }
 0x11a   : > { %2172 = vmatmul.mubr.f32.gmra.mxu0 %v6468_v57  ;;  %2422 = vmatmul.mubr.f32.gmra.mxu1 %v5514_v8  ;;  %v3610_v36 = vpop.f32.mrf.mxu0  ;;  %v3698_v59 = vpop.f32.mrf.mxu1 }
 0x11b   : > { %4586 = vmatpush3.msra.mxu0 %v1992_v1  ;;  %2176 = vmatprep.mubr.f32.mxu0 %v6228_v21  ;;  %v6489_v37 = vadd.f32 %v3697_v25, %v951_v3  ;;  %v1990_v25 = vld [vmem:[%s7396_s3 + $0x120] sm:$0xff]  ;;  %v1893_v3 = vrot.slane %v6278_v54, 7 }
 0x11c   : > { %2426 = vmatprep.mubr.f32.mxu1 %v5809_v15  ;;  %4624 = vmatpush3.msra.mxu1 %v2689_v39  ;;  %v3611_v8 = vpop.f32.mrf.mxu0  ;;  %v3699_v62 = vpop.f32.mrf.mxu1  ;;  %v6502_v15 = vsel %vm555_vm5, %v1886_v45, %v1892_v35 }
 0x11d   : > { %4587 = vmatprep.subr.mxu0 %v1991_v4  ;;  %4625 = vmatprep.subr.mxu1 %v2688_v56  ;;  %v3612_v57 = vadd.f32 %v3611_v8, %v3610_v36  ;;  %v3700_v1 = vadd.f32 %v3699_v62, %v3698_v59 }
 0x11e   : > { %3457 = vmatmul.mubr.msk.f32.gmra.mxu0 %vm537_vm8, %v6487_v22  ;;  %3469 = vmatmul.mubr.msk.f32.gmra.mxu1 %vm537_vm8, %v5992_v16  ;;  %v6510_v29 = vpop.f32.mrf.mxu0  ;;  %v3701_v39 = vpop.f32.mrf.mxu1  ;;  %v1887_v16 = vrot.slane %v6275_v14, 7 }
 0x11f   : > { %4588 = vmatpush3.msra.mxu0 %v1991_v4  ;;  %2181 = vmatprep.mubr.f32.mxu0 %v6231_v30  ;;  %v6516_v45 = vadd.f32 %v6294_v26, %v3612_v57  ;;  %v6519_v35 = vadd.f32 %v3700_v1, %v6193_v5  ;;  %v961_v4 = vadd.f32 %v3591_v10, %v6158_v63  ;;  %v1989_v5 = vld [vmem:[%s7396_s3 + $0x118] sm:$0xff] }
 0x120   : > { %2431 = vmatprep.mubr.f32.mxu1 %v5811_v20  ;;  %4626 = vmatpush3.msra.mxu1 %v2688_v56  ;;  %v6522_v36 = vpop.f32.mrf.mxu0  ;;  %v3702_v59 = vpop.f32.mrf.mxu1  ;;  %v2686_v20 = vld [vmem:[%s7396_s3 + $0x460] sm:$0xff]  ;;  %v6536_v63 = vsel %vm555_vm5, %v1893_v3, %v1887_v16  ;;  %v3597_v10 = vadd.f32 %v6313_v60, %v6292_v12  ;;  %v2685_v60 = vld [vmem:[%s7396_s3 + $0x458] sm:$0xff] }
 0x121   : > { %4589 = vmatprep.subr.mxu0 %v1990_v25  ;;  %4627 = vmatprep.subr.mxu1 %v2687_v47  ;;  %v3703_v8 = vadd.f32 %v3702_v59, %v3701_v39  ;;  %v1988_v39 = vld [vmem:[%s7396_s3 + $0x110] sm:$0xff] }
 0x122   : > { %2182 = vmatmul.mubr.f32.gmra.mxu0 %v6502_v15  ;;  %2432 = vmatmul.mubr.f32.gmra.mxu1 %v6020_v40  ;;  %v3616_v26 = vpop.f32.mrf.mxu0  ;;  %v3704_v57 = vpop.f32.mrf.mxu1 }
 0x123   : > { %4590 = vmatpush3.msra.mxu0 %v1990_v25  ;;  %2186 = vmatprep.mubr.f32.mxu0 %v6275_v14  ;;  %v6538_v56 = vadd.f32 %v3703_v8, %v961_v4  ;;  %v2002_v4 = vrot.slane %v6331_v33, 7  ;;  %v2003_v8 = vrot.slane %v6334_v41, 7 }
 0x124   : > { %2436 = vmatprep.mubr.f32.mxu1 %v6024_v42  ;;  %4628 = vmatpush3.msra.mxu1 %v2687_v47  ;;  %v3617_v40 = vpop.f32.mrf.mxu0  ;;  %v3705_v62 = vpop.f32.mrf.mxu1  ;;  %v6551_v47 = vsel %vm555_vm5, %v1887_v16, %v1893_v3 }
 0x125   : > { %4591 = vmatprep.subr.mxu0 %v1989_v5  ;;  %4629 = vmatprep.subr.mxu1 %v2686_v20  ;;  %v3618_v1 = vadd.f32 %v3617_v40, %v3616_v26  ;;  %v3706_v25 = vadd.f32 %v3705_v62, %v3704_v57 }
 0x126   : > { %3458 = vmatmul.mubr.msk.f32.gmra.mxu0 %vm537_vm8, %v6536_v63  ;;  %3470 = vmatmul.mubr.msk.f32.gmra.mxu1 %vm537_vm8, %v6135_v51  ;;  %v6559_v12 = vpop.f32.mrf.mxu0  ;;  %v3707_v59 = vpop.f32.mrf.mxu1 }
 0x127   : > { %4592 = vmatpush3.msra.mxu0 %v1989_v5  ;;  %2191 = vmatprep.mubr.f32.mxu0 %v6278_v54  ;;  %v6565_v16 = vadd.f32 %v6343_v44, %v3618_v1  ;;  %v6568_v3 = vadd.f32 %v3706_v25, %v6290_v11  ;;  %v971_v5 = vadd.f32 %v3597_v10, %v6212_v58  ;;  %v1987_v44 = vld [vmem:[%s7396_s3 + $0x108] sm:$0xff]  ;;  %v2684_v11 = vld [vmem:[%s7396_s3 + $0x450] sm:$0xff] }
 0x128   : > { %2441 = vmatprep.mubr.f32.mxu1 %v6035_v52  ;;  %4630 = vmatpush3.msra.mxu1 %v2686_v20  ;;  %v6571_v26 = vpop.f32.mrf.mxu0  ;;  %v3708_v57 = vpop.f32.mrf.mxu1  ;;  %v6585_v58 = vsel %vm555_vm5, %v2003_v8, %v2002_v4 }
 0x129   : > { %4593 = vmatprep.subr.mxu0 %v1988_v39  ;;  %4631 = vmatprep.subr.mxu1 %v2685_v60  ;;  %v3709_v40 = vadd.f32 %v3708_v57, %v3707_v59  ;;  %7459 = vst [vmem:[#allocation24_spill] sm:$0xff] %v6585_v58  ;;  %v3603_v59 = vadd.f32 %v6406_v34, %v6387_v0 }
 0x12a   : > { %2192 = vmatmul.mubr.f32.gmra.mxu0 %v6551_v47  ;;  %2442 = vmatmul.mubr.f32.gmra.mxu1 %v6177_v27  ;;  %v3622_v20 = vpop.f32.mrf.mxu0  ;;  %v3710_v62 = vpop.f32.mrf.mxu1 }
 0x12b   : > { %4594 = vmatpush3.msra.mxu0 %v1988_v39  ;;  %2196 = vmatprep.mubr.f32.mxu0 %v6331_v33  ;;  %v6587_v10 = vadd.f32 %v3709_v40, %v971_v5  ;;  %v2683_v5 = vld [vmem:[%s7396_s3 + $0x448] sm:$0xff]  ;;  %v6609_v40 = vsel %vm555_vm5, %v2002_v4, %v2003_v8 }
 0x12c   : > { %2446 = vmatprep.mubr.f32.mxu1 %v6050_v7  ;;  %4632 = vmatpush3.msra.mxu1 %v2685_v60  ;;  %v3623_v1 = vpop.f32.mrf.mxu0  ;;  %v3711_v25 = vpop.f32.mrf.mxu1  ;;  %v1986_v60 = vld [vmem:[%s7396_s3 + $0x100] sm:$0xff]  ;;  %7461 = vst [vmem:[#allocation26_spill] sm:$0xff] %v6609_v40 }
 0x12d   : > { %7460 = vst [vmem:[#allocation25_spill] sm:$0xff] %v6587_v10  ;;  %4595 = vmatprep.subr.mxu0 %v1987_v44  ;;  %4633 = vmatprep.subr.mxu1 %v2684_v11  ;;  %v3624_v57 = vadd.f32 %v3623_v1, %v3622_v20  ;;  %v3712_v39 = vadd.f32 %v3711_v25, %v3710_v62  ;;  %v7486_v10 = vld [vmem:[#allocation9_spill] sm:$0xff] }
 0x12e   : > { %3459 = vmatmul.mubr.msk.f32.gmra.mxu0 %vm537_vm8, %v6585_v58  ;;  %3471 = vmatmul.mubr.msk.f32.gmra.mxu1 %vm537_vm8, %v6253_v53  ;;  %v6604_v0 = vpop.f32.mrf.mxu0  ;;  %v3713_v34 = vpop.f32.mrf.mxu1 }
 0x12f   : > { %4596 = vmatpush3.msra.mxu0 %v1987_v44  ;;  %2201 = vmatprep.mubr.f32.mxu0 %v6334_v41  ;;  %v6612_v20 = vadd.f32 %v6389_v6, %v3624_v57  ;;  %v6615_v62 = vadd.f32 %v3712_v39, %v6385_v50  ;;  %v981_v44 = vadd.f32 %v3603_v59, %v6261_v48  ;;  %v2673_v50 = vld [vmem:[%s7396_s3 + $0x3f8] sm:$0xff]  ;;  %v2682_v6 = vld [vmem:[%s7396_s3 + $0x440] sm:$0xff] }
 0x130   : > { %2451 = vmatprep.mubr.f32.mxu1 %v6052_v9  ;;  %4634 = vmatpush3.msra.mxu1 %v2684_v11  ;;  %v6618_v1 = vpop.f32.mrf.mxu0  ;;  %v3714_v25 = vpop.f32.mrf.mxu1  ;;  %v2657_v11 = vld [vmem:[%s7396_s3 + $0x378] sm:$0xff]  ;;  %v3609_v39 = vadd.f32 %v6473_v23, %v6463_v28 }
 0x131   : > { %4597 = vmatprep.subr.mxu0 %v1986_v60  ;;  %4635 = vmatprep.subr.mxu1 %v2683_v5  ;;  %v3715_v41 = vadd.f32 %v3714_v25, %v3713_v34 }
 0x132   : > { %2202 = vmatmul.mubr.f32.gmra.mxu0 %v6609_v40  ;;  %2452 = vmatmul.mubr.f32.gmra.mxu1 %v6305_v43  ;;  %v3628_v4 = vpop.f32.mrf.mxu0  ;;  %v3716_v8 = vpop.f32.mrf.mxu1 }
 0x133   : > { %4598 = vmatpush3.msra.mxu0 %v1986_v60  ;;  %2456 = vmatprep.mubr.f32.mxu1 %v6098_v49  ;;  %v6630_v48 = vadd.f32 %v3715_v41, %v981_v44  ;;  %v2672_v60 = vld [vmem:[%s7396_s3 + $0x3f0] sm:$0xff]  ;;  %v2681_v44 = vld [vmem:[%s7396_s3 + $0x438] sm:$0xff] }
 0x134   : > { %4599 = vmatprep.mubr.f32.mxu0 %v5354_v18  ;;  %4636 = vmatpush3.msra.mxu1 %v2683_v5  ;;  %v3629_v59 = vpop.f32.mrf.mxu0  ;;  %v3717_v57 = vpop.f32.mrf.mxu1  ;;  %v2656_v18 = vld [vmem:[%s7396_s3 + $0x370] sm:$0xff] }
 0x135   : > { %7462 = vst [vmem:[#allocation27_spill] sm:$0xff] %v6630_v48  ;;  %4143 = vmatprep.subr.mxu0 %v2673_v50  ;;  %4637 = vmatprep.subr.mxu1 %v2682_v6  ;;  %v3630_v41 = vadd.f32 %v3629_v59, %v3628_v4  ;;  %v3718_v34 = vadd.f32 %v3717_v57, %v3716_v8  ;;  %v7464_v8 = vld [vmem:[#allocation13_spill] sm:$0xff]  ;;  %v7466_v59 = vld [vmem:[#allocation2_spill] sm:$0xff] }
 0x136   : > { %3472 = vmatmul.mubr.msk.f32.gmra.mxu1 %vm537_vm8, %v6354_v38  ;;  %4600 = vmatmul.mubr.msk.f32.vlgmr.msra.gmra.mxu0 %vm540_vm9, %v5365_v24  ;;  %v3719_v28 = vpop.f32.mrf.mxu1  ;;  %v6650_v23 = vpop.f32.mrf.mxu0  ;;  %v2671_v24 = vld [vmem:[%s7396_s3 + $0x3e8] sm:$0xff]  ;;  %v2670_v57 = vld [vmem:[%s7396_s3 + $0x3e0] sm:$0xff]  ;;  %v7474_v48 = vld [vmem:[#allocation5_spill] sm:$0xff] }
 0x137   : > { %4144 = vmatpush3.msra.mxu0 %v2657_v11  ;;  %2461 = vmatprep.mubr.f32.mxu1 %v6101_v17  ;;  %v6654_v5 = vadd.f32 %v6430_v31, %v3630_v41  ;;  %v6657_v25 = vadd.f32 %v3718_v34, %v6461_v55  ;;  %v991_v31 = vadd.f32 %v3609_v39, %v7464_v8  ;;  %v2655_v55 = vld [vmem:[%s7396_s3 + $0x368] sm:$0xff] }
 0x138   : > { %4145 = vmatprep.subr.mxu0 %v2672_v60  ;;  %4602 = vmatprep.mubr.f32.mxu0 %v5844_v32  ;;  %v3720_v50 = vpop.f32.mrf.mxu1  ;;  %v6666_v4 = vpop.f32.mrf.mxu0  ;;  %v7465_v11 = vld [vmem:[#allocation19_spill] sm:$0xff] }
 0x139   : > { %7463 = vst [vmem:[#allocation28_spill] sm:$0xff] %v6657_v25  ;;  %4146 = vmatpush3.msra.mxu0 %v2656_v18  ;;  %4638 = vmatpush3.msra.mxu1 %v2682_v6  ;;  %v3721_v32 = vadd.f32 %v3720_v50, %v3719_v28  ;;  %v2654_v6 = vld [vmem:[%s7396_s3 + $0x360] sm:$0xff]  ;;  %v7468_v28 = vld [vmem:[#allocation3_spill] sm:$0xff]  ;;  %v2680_v50 = vld [vmem:[%s7396_s3 + $0x430] sm:$0xff] }
 0x13a   : > { %2462 = vmatmul.mubr.f32.gmra.mxu1 %v7465_v11  ;;  %4603 = vmatmul.mubr.msk.f32.gmra.mxu0 %vm540_vm9, %v7466_v59  ;;  %v3722_v60 = vpop.f32.mrf.mxu1  ;;  %v6679_v41 = vpop.f32.mrf.mxu0  ;;  %v2668_v59 = vld [vmem:[%s7396_s3 + $0x3d0] sm:$0xff]  ;;  %v7480_v25 = vld [vmem:[#allocation7_spill] sm:$0xff] }
 0x13b   : > { %4147 = vmatprep.subr.mxu0 %v2671_v24  ;;  %4639 = vmatprep.subr.mxu1 %v2681_v44  ;;  %v6684_v39 = vadd.f32 %v3721_v32, %v991_v31  ;;  %v2669_v24 = vld [vmem:[%s7396_s3 + $0x3d8] sm:$0xff]  ;;  %v7469_v32 = vld [vmem:[#allocation4_spill] sm:$0xff] }
 0x13c   : > { %4148 = vmatpush3.msra.mxu0 %v2655_v55  ;;  %2466 = vmatprep.mubr.f32.mxu1 %v6149_v2  ;;  %v3723_v34 = vpop.f32.mrf.mxu1  ;;  %v6687_v18 = vpop.f32.mrf.mxu0  ;;  %v2653_v31 = vld [vmem:[%s7396_s3 + $0x358] sm:$0xff]  ;;  %v3615_v55 = vadd.f32 %v6522_v36, %v6510_v29  ;;  %v2652_v29 = vld [vmem:[%s7396_s3 + $0x350] sm:$0xff] }
 0x13d   : > { %7467 = vst [vmem:[#allocation13_spill] sm:$0xff] %v6684_v39  ;;  %4149 = vmatprep.subr.mxu0 %v2670_v57  ;;  %4605 = vmatprep.mubr.f32.mxu0 %v7468_v28  ;;  %v3724_v8 = vadd.f32 %v3723_v34, %v3722_v60  ;;  %v7473_v34 = vld [vmem:[#allocation17_spill] sm:$0xff] }
 0x13e   : > { %4150 = vmatpush3.msra.mxu0 %v2654_v6  ;;  %4640 = vmatpush3.msra.mxu1 %v2681_v44  ;;  %v1001_v39 = vadd.f32 %v3615_v55, %v7473_v34  ;;  %v7476_v55 = vld [vmem:[#allocation6_spill] sm:$0xff] }
 0x13f   : > { %3473 = vmatmul.mubr.msk.f32.gmra.mxu1 %vm537_vm8, %v6437_v61  ;;  %4606 = vmatmul.mubr.msk.f32.gmra.mxu0 %vm540_vm9, %v7469_v32  ;;  %v3725_v44 = vpop.f32.mrf.mxu1  ;;  %v6710_v57 = vpop.f32.mrf.mxu0  ;;  %v6713_v60 = vadd.f32 %v3724_v8, %v6516_v45  ;;  %v2667_v45 = vld [vmem:[%s7396_s3 + $0x3c8] sm:$0xff] }
 0x140   : > { %7470 = vst [vmem:[#allocation19_spill] sm:$0xff] %v6710_v57  ;;  %4151 = vmatprep.subr.mxu0 %v2669_v24  ;;  %4641 = vmatprep.subr.mxu1 %v2680_v50  ;;  %v2679_v24 = vld [vmem:[%s7396_s3 + $0x428] sm:$0xff] }
 0x141   : > { %7471 = vst [vmem:[#allocation2_spill] sm:$0xff] %v6713_v60  ;;  %4152 = vmatpush3.msra.mxu0 %v2653_v31  ;;  %2471 = vmatprep.mubr.f32.mxu1 %v6154_v46  ;;  %v3726_v36 = vpop.f32.mrf.mxu1  ;;  %v6719_v6 = vpop.f32.mrf.mxu0  ;;  %v2651_v31 = vld [vmem:[%s7396_s3 + $0x348] sm:$0xff] }
 0x142   : > { %7472 = vst [vmem:[#allocation3_spill] sm:$0xff] %v6719_v6  ;;  %4153 = vmatprep.subr.mxu0 %v2668_v59  ;;  %4608 = vmatprep.mubr.f32.mxu0 %v7474_v48  ;;  %v3727_v8 = vadd.f32 %v3726_v36, %v3725_v44  ;;  %v7475_v60 = vld [vmem:[#allocation23_spill] sm:$0xff]  ;;  %v2666_v59 = vld [vmem:[%s7396_s3 + $0x3c0] sm:$0xff] }
 0x143   : > { %4154 = vmatpush3.msra.mxu0 %v2652_v29  ;;  %4642 = vmatpush3.msra.mxu1 %v2680_v50  ;;  %v2650_v50 = vld [vmem:[%s7396_s3 + $0x340] sm:$0xff]  ;;  %v7495_v57 = vld [vmem:[#allocation15_spill] sm:$0xff] }
 0x144   : > { %2472 = vmatmul.mubr.f32.gmra.mxu1 %v7475_v60  ;;  %4609 = vmatmul.mubr.msk.f32.gmra.mxu0 %vm540_vm9, %v7476_v55  ;;  %v3728_v34 = vpop.f32.mrf.mxu1  ;;  %v6739_v40 = vpop.f32.mrf.mxu0  ;;  %v6741_v44 = vadd.f32 %v3727_v8, %v1001_v39  ;;  %v2665_v39 = vld [vmem:[%s7396_s3 + $0x3b8] sm:$0xff] }
 0x145   : > { %7477 = vst [vmem:[#allocation4_spill] sm:$0xff] %v6739_v40  ;;  %4155 = vmatprep.subr.mxu0 %v2667_v45  ;;  %4643 = vmatprep.subr.mxu1 %v2679_v24  ;;  %v2678_v45 = vld [vmem:[%s7396_s3 + $0x420] sm:$0xff]  ;;  %v7485_v40 = vld [vmem:[#allocation21_spill] sm:$0xff] }
 0x146   : > { %7478 = vst [vmem:[#allocation17_spill] sm:$0xff] %v6741_v44  ;;  %4156 = vmatpush3.msra.mxu0 %v2651_v31  ;;  %2476 = vmatprep.mubr.f32.mxu1 %v6228_v21  ;;  %v3729_v29 = vpop.f32.mrf.mxu1  ;;  %v6747_v36 = vpop.f32.mrf.mxu0  ;;  %v2649_v31 = vld [vmem:[%s7396_s3 + $0x338] sm:$0xff]  ;;  %v7481_v44 = vld [vmem:[#allocation8_spill] sm:$0xff] }
 0x147   : > { %7479 = vst [vmem:[#allocation5_spill] sm:$0xff] %v6747_v36  ;;  %4157 = vmatprep.subr.mxu0 %v2666_v59  ;;  %4611 = vmatprep.mubr.f32.mxu0 %v7480_v25  ;;  %v3730_v8 = vadd.f32 %v3729_v29, %v3728_v34  ;;  %v3621_v59 = vadd.f32 %v6571_v26, %v6559_v12  ;;  %v2664_v34 = vld [vmem:[%s7396_s3 + $0x3b0] sm:$0xff] }
 0x148   : > { %4158 = vmatpush3.msra.mxu0 %v2650_v50  ;;  %4644 = vmatpush3.msra.mxu1 %v2679_v24  ;;  %v2648_v12 = vld [vmem:[%s7396_s3 + $0x330] sm:$0xff] }
 0x149   : > { %3474 = vmatmul.mubr.msk.f32.gmra.mxu1 %vm537_vm8, %v6487_v22  ;;  %4612 = vmatmul.mubr.msk.f32.gmra.mxu0 %vm540_vm9, %v7481_v44  ;;  %v3731_v24 = vpop.f32.mrf.mxu1  ;;  %v6770_v50 = vpop.f32.mrf.mxu0  ;;  %v6773_v29 = vadd.f32 %v3730_v8, %v6565_v16  ;;  %v1011_v6 = vadd.f32 %v3621_v59, %v7485_v40  ;;  %v2663_v16 = vld [vmem:[%s7396_s3 + $0x3a8] sm:$0xff]  ;;  %v7487_v40 = vld [vmem:[#allocation10_spill] sm:$0xff] }
 0x14a   : > { %7482 = vst [vmem:[#allocation23_spill] sm:$0xff] %v6770_v50  ;;  %4159 = vmatprep.subr.mxu0 %v2665_v39  ;;  %4645 = vmatprep.subr.mxu1 %v2678_v45  ;;  %v2677_v39 = vld [vmem:[%s7396_s3 + $0x418] sm:$0xff]  ;;  %v2662_v59 = vld [vmem:[%s7396_s3 + $0x3a0] sm:$0xff] }
 0x14b   : > { %7483 = vst [vmem:[#allocation6_spill] sm:$0xff] %v6773_v29  ;;  %4160 = vmatpush3.msra.mxu0 %v2649_v31  ;;  %2481 = vmatprep.mubr.f32.mxu1 %v6231_v30  ;;  %v3732_v26 = vpop.f32.mrf.mxu1  ;;  %v6779_v36 = vpop.f32.mrf.mxu0  ;;  %v2647_v31 = vld [vmem:[%s7396_s3 + $0x328] sm:$0xff]  ;;  %v7494_v50 = vld [vmem:[#allocation22_spill] sm:$0xff] }
 0x14c   : > { %7484 = vst [vmem:[#allocation7_spill] sm:$0xff] %v6779_v36  ;;  %4161 = vmatprep.subr.mxu0 %v2664_v34  ;;  %4614 = vmatprep.mubr.f32.mxu0 %v7486_v10  ;;  %v3733_v8 = vadd.f32 %v3732_v26, %v3731_v24  ;;  %v7491_v36 = vld [vmem:[#allocation11_spill] sm:$0xff] }
 0x14d   : > { %4162 = vmatpush3.msra.mxu0 %v2648_v12  ;;  %4646 = vmatpush3.msra.mxu1 %v2678_v45  ;;  %v2646_v45 = vld [vmem:[%s7396_s3 + $0x320] sm:$0xff] }
 0x14e   : > { %2482 = vmatmul.mubr.f32.gmra.mxu1 %v6502_v15  ;;  %4615 = vmatmul.mubr.msk.f32.gmra.mxu0 %vm540_vm9, %v7487_v40  ;;  %v3734_v34 = vpop.f32.mrf.mxu1  ;;  %v6799_v29 = vpop.f32.mrf.mxu0  ;;  %v6801_v24 = vadd.f32 %v3733_v8, %v1011_v6  ;;  %v2661_v6 = vld [vmem:[%s7396_s3 + $0x398] sm:$0xff] }
 0x14f   : > { %7488 = vst [vmem:[#allocation8_spill] sm:$0xff] %v6799_v29  ;;  %4163 = vmatprep.subr.mxu0 %v2663_v16  ;;  %4647 = vmatprep.subr.mxu1 %v2677_v39  ;;  %v2676_v16 = vld [vmem:[%s7396_s3 + $0x410] sm:$0xff] }
 0x150   : > { %7489 = vst [vmem:[#allocation21_spill] sm:$0xff] %v6801_v24  ;;  %4164 = vmatpush3.msra.mxu0 %v2647_v31  ;;  %2486 = vmatprep.mubr.f32.mxu1 %v6275_v14  ;;  %v3735_v12 = vpop.f32.mrf.mxu1  ;;  %v6807_v26 = vpop.f32.mrf.mxu0  ;;  %v2645_v31 = vld [vmem:[%s7396_s3 + $0x318] sm:$0xff]  ;;  %v7492_v24 = vld [vmem:[#allocation12_spill] sm:$0xff] }
 0x151   : > { %7490 = vst [vmem:[#allocation9_spill] sm:$0xff] %v6807_v26  ;;  %4165 = vmatprep.subr.mxu0 %v2662_v59  ;;  %4617 = vmatprep.mubr.f32.mxu0 %v7491_v36  ;;  %v3736_v8 = vadd.f32 %v3735_v12, %v3734_v34  ;;  %v3627_v59 = vadd.f32 %v6618_v1, %v6604_v0  ;;  %v2660_v34 = vld [vmem:[%s7396_s3 + $0x390] sm:$0xff] }
 0x152   : > { %4166 = vmatpush3.msra.mxu0 %v2646_v45  ;;  %4648 = vmatpush3.msra.mxu1 %v2677_v39  ;;  %v2644_v0 = vld [vmem:[%s7396_s3 + $0x310] sm:$0xff] }
 0x153   : > { %3475 = vmatmul.mubr.msk.f32.gmra.mxu1 %vm537_vm8, %v6536_v63  ;;  %4618 = vmatmul.mubr.msk.f32.gmra.mxu0 %vm540_vm9, %v7492_v24  ;;  %v3737_v39 = vpop.f32.mrf.mxu1  ;;  %v1161_v45 = vadd.f32 %v3736_v8, %v6612_v20  ;;  %v4395_v12 = vpop.f32.mrf.mxu0  ;;  %v1021_v58 = vadd.f32 %v3627_v59, %v7494_v50  ;;  %v2659_v20 = vld [vmem:[%s7396_s3 + $0x388] sm:$0xff]  ;;  %v7496_v50 = vld [vmem:[#allocation16_spill] sm:$0xff]  ;;  %v2658_v59 = vld [vmem:[%s7396_s3 + $0x380] sm:$0xff] }
 0x154   : > { %4167 = vmatprep.subr.mxu0 %v2661_v6  ;;  %4649 = vmatprep.subr.mxu1 %v2676_v16  ;;  %v2675_v6 = vld [vmem:[%s7396_s3 + $0x408] sm:$0xff] }
 0x155   : > { %4168 = vmatpush3.msra.mxu0 %v2645_v31  ;;  %2491 = vmatprep.mubr.f32.mxu1 %v6278_v54  ;;  %v6835_v1 = vadd.f32 %v4395_v12, %v1161_v45  ;;  %v3738_v26 = vpop.f32.mrf.mxu1  ;;  %v6837_v29 = vpop.f32.mrf.mxu0  ;;  %v2643_v31 = vld [vmem:[%s7396_s3 + $0x308] sm:$0xff]  ;;  %v2642_v45 = vld [vmem:[%s7396_s3 + $0x300] sm:$0xff] }
 0x156   : > { %4169 = vmatprep.subr.mxu0 %v2660_v34  ;;  %4620 = vmatprep.mubr.f32.mxu0 %v7495_v57  ;;  %v3739_v8 = vadd.f32 %v3738_v26, %v3737_v39  ;;  %v2674_v26 = vld [vmem:[%s7396_s3 + $0x400] sm:$0xff] }
 0x157   : > { %7493 = vst [vmem:[#allocation10_spill] sm:$0xff] %v6835_v1  ;;  %4170 = vmatpush3.msra.mxu0 %v2644_v0  ;;  %4650 = vmatpush3.msra.mxu1 %v2676_v16 }
 0x158   : > { %2492 = vmatmul.mubr.f32.gmra.mxu1 %v6551_v47  ;;  %4621 = vmatmul.mubr.msk.f32.gmra.mxu0 %vm540_vm9, %v7496_v50  ;;  %v3740_v34 = vpop.f32.mrf.mxu1  ;;  %v4398_v16 = vpop.f32.mrf.mxu0  ;;  %v6860_v39 = vadd.f32 %v3739_v8, %v1021_v58 }
 0x159   : > { %4171 = vmatprep.subr.mxu0 %v2659_v20  ;;  %4651 = vmatprep.subr.mxu1 %v2675_v6 }
 0x15a   : > { %4172 = vmatpush3.msra.mxu0 %v2643_v31  ;;  %4652 = vmatpush3.msra.mxu1 %v2675_v6  ;;  %v3741_v12 = vpop.f32.mrf.mxu1  ;;  %v6865_v0 = vpop.f32.mrf.mxu0 }
 0x15b   : > { %4173 = vmatprep.subr.mxu0 %v2658_v59  ;;  %4653 = vmatprep.subr.mxu1 %v2674_v26  ;;  %v3742_v1 = vadd.f32 %v3741_v12, %v3740_v34 }
 0x15c   : > { %4174 = vmatpush3.msra.mxu0 %v2642_v45  ;;  %2754 = vmatprep.mubr.f32.mxu0 %v6024_v42  ;;  %v4744_v42 = vld [vmem:[%s7397_s4 + $0x78] sm:$0xff]  ;;  %v7497_v45 = vld [vmem:[#allocation18_spill] sm:$0xff] }
 0x15d   : > { %4654 = vmatpush3.msra.mxu1 %v2674_v26  ;;  %4655 = vmatprep.mubr.f32.mxu1 %v7468_v28  ;;  %v1171_v58 = vadd.f32 %v3742_v1, %v6654_v5 }
 0x15e   : > { %3484 = vmatmul.mubr.msk.f32.vlgmr.msra.gmra.mxu0 %vm537_vm8, %v6135_v51  ;;  %4656 = vmatmul.mubr.msk.f32.vlgmr.msra.gmra.mxu1 %vm540_vm9, %v7469_v32  ;;  %v6876_v20 = vpop.f32.mrf.mxu0  ;;  %v6878_v6 = vpop.f32.mrf.mxu1  ;;  %v4745_v32 = vld [vmem:[%s7397_s4 + $0x70] sm:$0xff] }
 0x15f   : > { %4679 = vmatprep.subr.mxu1 %v4744_v42  ;;  %2759 = vmatprep.mubr.f32.mxu0 %v6035_v52  ;;  %v6884_v5 = vadd.f32 %v4398_v16, %v1171_v58  ;;  %v4746_v52 = vld [vmem:[%s7397_s4 + $0x68] sm:$0xff] }
 0x160   : > { %4680 = vmatpush3.msra.mxu1 %v4744_v42  ;;  %4658 = vmatprep.mubr.f32.mxu1 %v7474_v48  ;;  %v6887_v51 = vpop.f32.mrf.mxu0  ;;  %v6889_v28 = vpop.f32.mrf.mxu1  ;;  %v7499_v42 = vmov 0.0  }
 0x161   : > { %4681 = vmatprep.subr.mxu1 %v4745_v32 }
 0x162   : > { %4682 = vmatpush3.msra.mxu1 %v4745_v32  ;;  %2760 = vmatmul.mubr.f32.gmra.mxu0 %v6177_v27  ;;  %v4747_v27 = vld [vmem:[%s7397_s4 + $0x60] sm:$0xff] }
 0x163   : > { %4659 = vmatmul.mubr.msk.f32.gmra.mxu1 %vm540_vm9, %v7476_v55  ;;  %4683 = vmatprep.subr.mxu1 %v4746_v52  ;;  %v6901_v48 = vpop.f32.mrf.mxu0  ;;  %v6903_v1 = vpop.f32.mrf.mxu1 }
 0x164   : > { %4684 = vmatpush3.msra.mxu1 %v4746_v52  ;;  %2764 = vmatprep.mubr.f32.mxu0 %v6050_v7  ;;  %v4748_v7 = vld [vmem:[%s7397_s4 + $0x58] sm:$0xff]  ;;  %v502_v52 = vld [vmem:[%s5861_s12 + $0x80] sm:$0xff] }
 0x165   : > { %4685 = vmatprep.subr.mxu1 %v4747_v27  ;;  %4661 = vmatprep.mubr.f32.mxu1 %v7480_v25  ;;  %v6910_v55 = vpop.f32.mrf.mxu0  ;;  %v6912_v8 = vpop.f32.mrf.mxu1 }
 0x166   : > { %4686 = vmatpush3.msra.mxu1 %v4747_v27  ;;  %3485 = vmatmul.mubr.msk.f32.gmra.mxu0 %vm537_vm8, %v6253_v53  ;;  %v4749_v53 = vld [vmem:[%s7397_s4 + $0x50] sm:$0xff]  ;;  %v503_v27 = vld [vmem:[%s5861_s12 + $0x88] sm:$0xff] }
 0x167   : > { %4662 = vmatmul.mubr.msk.f32.gmra.mxu1 %vm540_vm9, %v7481_v44  ;;  %4687 = vmatprep.subr.mxu1 %v4748_v7 }
 0x168   : > { %4688 = vmatpush3.msra.mxu1 %v4748_v7  ;;  %2769 = vmatprep.mubr.f32.mxu0 %v6052_v9  ;;  %v6924_v25 = vpop.f32.mrf.mxu0  ;;  %v6926_v31 = vpop.f32.mrf.mxu1  ;;  %v4750_v9 = vld [vmem:[%s7397_s4 + $0x48] sm:$0xff] }
 0x169   : > { %4689 = vmatprep.subr.mxu1 %v4749_v53  ;;  %4664 = vmatprep.mubr.f32.mxu1 %v7486_v10 }
 0x16a   : > { %4690 = vmatpush3.msra.mxu1 %v4749_v53  ;;  %2770 = vmatmul.mubr.f32.gmra.mxu0 %v6305_v43  ;;  %v6933_v44 = vpop.f32.mrf.mxu0  ;;  %v6935_v59 = vpop.f32.mrf.mxu1  ;;  %v4751_v43 = vld [vmem:[%s7397_s4 + $0x40] sm:$0xff] }
 0x16b   : > { %4665 = vmatmul.mubr.msk.f32.gmra.mxu1 %vm540_vm9, %v7487_v40  ;;  %4691 = vmatprep.subr.mxu1 %v4750_v9 }
 0x16c   : > { %4692 = vmatpush3.msra.mxu1 %v4750_v9  ;;  %2774 = vmatprep.mubr.f32.mxu0 %v6098_v49  ;;  %v4752_v49 = vld [vmem:[%s7397_s4 + $0x38] sm:$0xff]  ;;  %v504_v9 = vld [vmem:[%s5861_s12 + $0x90] sm:$0xff] }
 0x16d   : > { %4693 = vmatprep.subr.mxu1 %v4751_v43  ;;  %4667 = vmatprep.mubr.f32.mxu1 %v7491_v36  ;;  %v6948_v10 = vpop.f32.mrf.mxu0  ;;  %v6950_v26 = vpop.f32.mrf.mxu1 }
 0x16e   : > { %4694 = vmatpush3.msra.mxu1 %v4751_v43  ;;  %3486 = vmatmul.mubr.msk.f32.gmra.mxu0 %vm537_vm8, %v6354_v38  ;;  %v4753_v38 = vld [vmem:[%s7397_s4 + $0x30] sm:$0xff]  ;;  %v3812_v43 = vadd.f32 %v6910_v55, %v6901_v48  ;;  %v506_v55 = vld [vmem:[%s5861_s12 + $0xa0] sm:$0xff] }
 0x16f   : > { %4668 = vmatmul.mubr.msk.f32.gmra.mxu1 %vm540_vm9, %v7492_v24  ;;  %4695 = vmatprep.subr.mxu1 %v4752_v49  ;;  %v6961_v40 = vpop.f32.mrf.mxu0  ;;  %v6963_v36 = vpop.f32.mrf.mxu1 }
 0x170   : > { %4696 = vmatpush3.msra.mxu1 %v4752_v49  ;;  %2779 = vmatprep.mubr.f32.mxu0 %v6101_v17  ;;  %v4754_v17 = vld [vmem:[%s7397_s4 + $0x28] sm:$0xff]  ;;  %v1596_v48 = vadd.f32 %v6878_v6, %v3812_v43 }
 0x171   : > { %4697 = vmatprep.subr.mxu1 %v4753_v38  ;;  %4670 = vmatprep.mubr.f32.mxu1 %v7495_v57  ;;  %v511_v43 = vld [vmem:[%s5861_s12 + $0xc8] sm:$0xff] }
 0x172   : > { %4698 = vmatpush3.msra.mxu1 %v4753_v38  ;;  %2780 = vmatmul.mubr.f32.gmra.mxu0 %v7465_v11  ;;  %v6971_v24 = vpop.f32.mrf.mxu0  ;;  %v6973_v34 = vpop.f32.mrf.mxu1  ;;  %v4755_v11 = vld [vmem:[%s7397_s4 + $0x20] sm:$0xff]  ;;  %v3809_v38 = vadd.f32 %v6887_v51, %v6876_v20 }
 0x173   : > { %4671 = vmatmul.mubr.msk.f32.gmra.mxu1 %vm540_vm9, %v7496_v50  ;;  %4699 = vmatprep.subr.mxu1 %v4754_v17  ;;  %v7498_v50 = vld [vmem:[#allocation20_spill] sm:$0xff] }
 0x174   : > { %4700 = vmatpush3.msra.mxu1 %v4754_v17  ;;  %2784 = vmatprep.mubr.f32.mxu0 %v6149_v2  ;;  %v6982_v57 = vpop.f32.mrf.mxu0  ;;  %v6984_v16 = vpop.f32.mrf.mxu1  ;;  %v4756_v2 = vld [vmem:[%s7397_s4 + $0x18] sm:$0xff]  ;;  %v1591_v20 = vadd.f32 %v3809_v38, %v6889_v28 }
 0x175   : > { %4701 = vmatprep.subr.mxu1 %v4755_v11  ;;  %4673 = vmatprep.mubr.f32.mxu1 %v7497_v45  ;;  %v505_v17 = vld [vmem:[%s5861_s12 + $0x98] sm:$0xff] }
 0x176   : > { %4702 = vmatpush3.msra.mxu1 %v4755_v11  ;;  %3487 = vmatmul.mubr.msk.f32.gmra.mxu0 %vm537_vm8, %v6437_v61  ;;  %v4757_v61 = vld [vmem:[%s7397_s4 + $0x10] sm:$0xff] }
 0x177   : > { %4674 = vmatmul.mubr.msk.f32.gmra.mxu1 %vm540_vm9, %v7498_v50  ;;  %4703 = vmatprep.subr.mxu1 %v4756_v2  ;;  %v3822_v12 = vpop.f32.mrf.mxu0  ;;  %v6999_v58 = vpop.f32.mrf.mxu1  ;;  %v3818_v50 = vadd.f32 %v6961_v40, %v6948_v10  ;;  %v1241_v10 = vadd.f32 %v6666_v4, %v6489_v37  ;;  %v508_v40 = vld [vmem:[%s5861_s12 + $0xb0] sm:$0xff] }
 0x178   : > { %4704 = vmatpush3.msra.mxu1 %v4756_v2  ;;  %2789 = vmatprep.mubr.f32.mxu0 %v6154_v46  ;;  %v4758_v46 = vld [vmem:[%s7397_s4 + $0x8] sm:$0xff] }
 0x179   : > { %4705 = vmatprep.subr.mxu1 %v4757_v61  ;;  %4676 = vmatprep.mubr.f32.mxu1 %v7499_v42  ;;  %v3823_v13 = vpop.f32.mrf.mxu0  ;;  %v7006_v32 = vpop.f32.mrf.mxu1  ;;  %v507_v2 = vld [vmem:[%s5861_s12 + $0xa8] sm:$0xff] }
 0x17a   : > { %4706 = vmatpush3.msra.mxu1 %v4757_v61  ;;  %2790 = vmatmul.mubr.f32.gmra.mxu0 %v7475_v60  ;;  %v4759_v60 = vld [vmem:[%s7397_s4] sm:$0xff]  ;;  %v3824_v37 = vadd.f32 %v3823_v13, %v3822_v12  ;;  %v3821_v12 = vadd.f32 %v6982_v57, %v6971_v24 }
 0x17b   : > { %4677 = vmatmul.mubr.f32.gmra.mxu1 %v7499_v42  ;;  %4707 = vmatprep.subr.mxu1 %v4758_v46 }
 0x17c   : > { %4708 = vmatpush3.msra.mxu1 %v4758_v46  ;;  %2794 = vmatprep.mubr.f32.mxu0 %v6228_v21  ;;  %v7016_v7 = vpop.f32.mrf.mxu0  ;;  %v7018_v53 = vpop.f32.mrf.mxu1 }
 0x17d   : > { %4709 = vmatprep.subr.mxu1 %v4759_v60  ;;  %4711 = vmatprep.mubr.f32.mxu1 %v502_v52  ;;  %v509_v52 = vld [vmem:[%s5861_s12 + $0xb8] sm:$0xff] }
 0x17e   : > { %4710 = vmatpush3.msra.mxu1 %v4759_v60  ;;  %3488 = vmatmul.mubr.msk.f32.gmra.mxu0 %vm537_vm8, %v6487_v22  ;;  %v7029_v21 = vpop.f32.mrf.mxu0  ;;  %v7031_v49 = vpop.f32.mrf.mxu1  ;;  %v1848_v22 = vsub.s32 2, %v4879_v19 }
 0x17f   : > { %4712 = vmatmul.mubr.f32.vlgmr.msra.gmra.mxu1 %v503_v27  ;;  %2799 = vmatprep.mubr.f32.mxu0 %v6231_v30  ;;  %v1246_v30 = vadd.f32 %v6650_v23, %v6519_v35  ;;  %v4760_v35 = vld [vmem:[%s7393_s0] sm:$0x7]  ;;  %v1606_v23 = vadd.f32 %v6903_v1, %v3818_v50 }
 0x180   : > { %4714 = vmatprep.mubr.f32.mxu1 %v504_v9  ;;  %v1251_v9 = vadd.f32 %v6687_v18, %v6538_v56 }
 0x181   : > { %v3828_v11 = vpop.f32.mrf.mxu0  ;;  %v7039_v45 = vpop.f32.mrf.mxu1  ;;  %v1670_v61 = vadd.f32 %v1596_v48, %v1246_v30  ;;  %v1611_v48 = vadd.f32 %v3821_v12, %v6935_v59  ;;  %v7504_v59 = vld [vmem:[#allocation14_spill] sm:$0xff]  ;;  %v7508_v12 = vld [vmem:[#allocation27_spill] sm:$0xff] }
 0x182   : > { %2800 = vmatmul.mubr.f32.gmra.mxu0 %v6502_v15  ;;  %v3815_v15 = vadd.f32 %v6933_v44, %v6924_v25  ;;  %v1669_v44 = vadd.f32 %v1591_v20, %v1241_v10  ;;  %v7502_v20 = vld [vmem:[#allocation25_spill] sm:$0xff] }
 0x183   : > { %4715 = vmatmul.mubr.f32.gmra.mxu1 %v505_v17  ;;  %2804 = vmatprep.mubr.f32.mxu0 %v6275_v14  ;;  %v3829_v6 = vpop.f32.mrf.mxu0  ;;  %v7049_v51 = vpop.f32.mrf.mxu1  ;;  %v7060_v14 = vrot.slane %v4760_v35, %v1848_v22  ;;  %v7501_v22 = vld [vmem:[#allocation24_spill] sm:$0xff] }
 0x184   : > { %4717 = vmatprep.mubr.f32.mxu1 %v506_v55  ;;  %v1601_v1 = vadd.f32 %v3815_v15, %v6912_v8  ;;  %v3830_v38 = vadd.f32 %v3829_v6, %v3828_v11  ;;  %v3827_v11 = vadd.f32 %v7029_v21, %v7016_v7  ;;  %v513_v15 = vld [vmem:[%s5861_s12 + $0xd8] sm:$0xff]  ;;  %v514_v21 = vld [vmem:[%s5861_s12 + $0xe0] sm:$0xff] }
 0x186   : > { %3489 = vmatmul.mubr.msk.f32.gmra.mxu0 %vm537_vm8, %v6536_v63  ;;  %v7066_v28 = vpop.f32.mrf.mxu0  ;;  %v4489_v25 = vpop.f32.mrf.mxu1  ;;  %v1256_v63 = vadd.f32 %v6679_v41, %v6568_v3  ;;  %v1616_v41 = vadd.f32 %v6926_v31, %v3824_v37  ;;  %v1671_v56 = vadd.f32 %v1601_v1, %v1251_v9  ;;  %v1626_v19 = vadd.f32 %v6950_v26, %v3830_v38  ;;  %v7506_v37 = vld [vmem:[#allocation4_spill] sm:$0xff]  ;;  %v515_v9 = vld [vmem:[%s5861_s12 + $0xe8] sm:$0xff] }
 0x187   : > { %4718 = vmatmul.mubr.f32.gmra.mxu1 %v507_v2  ;;  %2809 = vmatprep.mubr.f32.mxu0 %v6278_v54  ;;  %v1831_v4 = vadd.f32 %v4489_v25, %v1670_v61  ;;  %v510_v54 = vld [vmem:[%s5861_s12 + $0xc0] sm:$0xff]  ;;  %v7505_v25 = vld [vmem:[#allocation28_spill] sm:$0xff]  ;;  %v7511_v38 = vld [vmem:[#allocation23_spill] sm:$0xff] }
 0x188   : > { %4720 = vmatprep.mubr.f32.mxu1 %v508_v40  ;;  %v3832_v46 = vpop.f32.mrf.mxu0  ;;  %v1751_v27 = vpop.f32.mrf.mxu1  ;;  %v1672_v3 = vadd.f32 %v1606_v23, %v1256_v63  ;;  %v1621_v63 = vadd.f32 %v3827_v11, %v6963_v36  ;;  %v516_v36 = vld [vmem:[%s5861_s12 + $0xf0] sm:$0xff] }
 0x189   : > { %v1851_v13 = vadd.f32 %v7060_v14, %v1831_v4  ;;  %v1830_v60 = vadd.f32 %v1751_v27, %v1669_v44  ;;  %v1276_v4 = vadd.f32 %v7506_v37, %v7505_v25  ;;  %v7507_v44 = vld [vmem:[#allocation26_spill] sm:$0xff] }
 0x18a   : > { %2810 = vmatmul.mubr.f32.gmra.mxu0 %v6551_v47  ;;  %v7500_v47 = vld [vmem:[#allocation19_spill] sm:$0xff] }
 0x18b   : > { %4721 = vmatmul.mubr.f32.gmra.mxu1 %v509_v52  ;;  %2814 = vmatprep.mubr.f32.mxu0 %v6331_v33  ;;  %1867 = vst [vmem:[%s7073_s7 + $0x8] sm:$0xff] %v1851_v13  ;;  %v1850_v8 = vadd.f32 %v7060_v14, %v1830_v60  ;;  %v3834_v24 = vpop.f32.mrf.mxu0  ;;  %v4492_v57 = vpop.f32.mrf.mxu1  ;;  %v1266_v18 = vadd.f32 %v7500_v47, %v6615_v62  ;;  %v512_v33 = vld [vmem:[%s5861_s12 + $0xd0] sm:$0xff]  ;;  %v7503_v62 = vld [vmem:[#allocation3_spill] sm:$0xff]  ;;  %v7509_v13 = vld [vmem:[#allocation5_spill] sm:$0xff] }
 0x18c   : > { %4723 = vmatprep.mubr.f32.mxu1 %v510_v54  ;;  %v1833_v17 = vadd.f32 %v4492_v57, %v1672_v3  ;;  %v1261_v6 = vadd.f32 %v7503_v62, %v7502_v20  ;;  %v3833_v52 = vadd.f32 %v3832_v46, %v7066_v28  ;;  %v1271_v60 = vadd.f32 %v7509_v13, %v7508_v12  ;;  %v7514_v62 = vld [vmem:[#allocation6_spill] sm:$0xff] }
 0x18d   : > { %1866 = vst [vmem:[%s7073_s7] sm:$0xff] %v1850_v8  ;;  %v3835_v31 = vpop.f32.mrf.mxu0  ;;  %v1761_v55 = vpop.f32.mrf.mxu1  ;;  %v1674_v2 = vadd.f32 %v1616_v41, %v1266_v18  ;;  %v1676_v3 = vadd.f32 %v1626_v19, %v1276_v4 }
 0x18e   : > { %3490 = vmatmul.mubr.msk.f32.gmra.mxu0 %vm537_vm8, %v7501_v22  ;;  %v1853_v50 = vadd.f32 %v7060_v14, %v1833_v17  ;;  %v1832_v30 = vadd.f32 %v1761_v55, %v1671_v56  ;;  %v3836_v61 = vadd.f32 %v3835_v31, %v3834_v24  ;;  %v1673_v23 = vadd.f32 %v1611_v48, %v1261_v6  ;;  %v7515_v6 = vld [vmem:[#allocation8_spill] sm:$0xff] }
 0x18f   : > { %4724 = vmatmul.mubr.f32.gmra.mxu1 %v511_v43  ;;  %2819 = vmatprep.mubr.f32.mxu0 %v7504_v59  ;;  %v1675_v57 = vadd.f32 %v1621_v63, %v1271_v60  ;;  %v7510_v43 = vld [vmem:[#allocation2_spill] sm:$0xff] }
 0x190   : > { %4726 = vmatprep.mubr.f32.mxu1 %v512_v33  ;;  %1869 = vst [vmem:[%s7073_s7 + $0x18] sm:$0xff] %v1853_v50  ;;  %v1852_v10 = vadd.f32 %v7060_v14, %v1832_v30  ;;  %v3837_v40 = vpop.f32.mrf.mxu0  ;;  %v4495_v7 = vpop.f32.mrf.mxu1  ;;  %v1636_v41 = vadd.f32 %v6973_v34, %v3836_v61  ;;  %v1286_v17 = vadd.f32 %v7511_v38, %v7510_v43  ;;  %v517_v33 = vld [vmem:[%s5861_s12 + $0xf8] sm:$0xff]  ;;  %v7513_v30 = vld [vmem:[#allocation7_spill] sm:$0xff] }
 0x191   : > { %v1835_v35 = vadd.f32 %v4495_v7, %v1674_v2  ;;  %v1631_v34 = vadd.f32 %v3833_v52, %v6984_v16  ;;  %v7512_v50 = vld [vmem:[#allocation13_spill] sm:$0xff]  ;;  %v1296_v16 = vadd.f32 %v7515_v6, %v7514_v62  ;;  %v1311_v6 = vadd.f32 %v6865_v0, %v6860_v39 }
 0x192   : > { %2820 = vmatmul.mubr.f32.gmra.mxu0 %v7507_v44  ;;  %1868 = vst [vmem:[%s7073_s7 + $0x10] sm:$0xff] %v1852_v10  ;;  %v3838_v26 = vpop.f32.mrf.mxu0  ;;  %v1771_v1 = vpop.f32.mrf.mxu1  ;;  %v1281_v20 = vadd.f32 %v7513_v30, %v7512_v50  ;;  %v7517_v52 = vld [vmem:[#allocation9_spill] sm:$0xff] }
 0x193   : > { %4727 = vmatmul.mubr.f32.gmra.mxu1 %v513_v15  ;;  %2824 = vmatprep.mubr.f32.mxu0 %v7499_v42  ;;  %v1855_v27 = vadd.f32 %v7060_v14, %v1835_v35  ;;  %v1834_v54 = vadd.f32 %v1771_v1, %v1673_v23  ;;  %v3839_v31 = vadd.f32 %v3838_v26, %v3837_v40  ;;  %v7516_v1 = vld [vmem:[#allocation17_spill] sm:$0xff] }
 0x194   : > { %4729 = vmatprep.mubr.f32.mxu1 %v514_v21  ;;  %v3190_v56 = vld [vmem:[%s7073_s7] ss:$2 sm:$0xff]  ;;  %v3529_v47 = vld [vmem:[%s7073_s7 + $0x1] ss:$2 sm:$0xff]  ;;  %v1678_v15 = vadd.f32 %v1636_v41, %v1286_v17  ;;  %v1677_v23 = vadd.f32 %v1631_v34, %v1281_v20  ;;  %v7518_v43 = vld [vmem:[#allocation21_spill] sm:$0xff] }
 0x195   : > { %1871 = vst [vmem:[%s7073_s7 + $0x28] sm:$0xff] %v1855_v27  ;;  %v1854_v8 = vadd.f32 %v7060_v14, %v1834_v54  ;;  %v3840_v28 = vpop.f32.mrf.mxu0  ;;  %v4498_v46 = vpop.f32.mrf.mxu1  ;;  %v3253_v19 = vadd.f32 %v3529_v47, %v3190_v56  ;;  %v1641_v37 = vadd.f32 %v3839_v31, %v7006_v32  ;;  %v1291_v32 = vadd.f32 %v7517_v52, %v7516_v1 }
 0x196   : > { %2825 = vmatmul.mubr.f32.gmra.mxu0 %v7499_v42  ;;  %v1837_v24 = vadd.f32 %v4498_v46, %v1676_v3  ;;  %v1301_v38 = vadd.f32 %v6837_v29, %v7518_v43 }
 0x197   : > { %4730 = vmatmul.mubr.f32.gmra.mxu1 %v515_v9  ;;  %2829 = vmatprep.mubr.f32.mxu0 %v7499_v42  ;;  %1870 = vst [vmem:[%s7073_s7 + $0x20] sm:$0xff] %v1854_v8  ;;  %v3841_v18 = vpop.f32.mrf.mxu0  ;;  %v1781_v48 = vpop.f32.mrf.mxu1  ;;  %v1679_v9 = vadd.f32 %v1641_v37, %v1291_v32 }
 0x198   : > { %4732 = vmatprep.mubr.f32.mxu1 %v516_v36  ;;  %v1857_v55 = vadd.f32 %v7060_v14, %v1837_v24  ;;  %v3842_v22 = vadd.f32 %v3841_v18, %v3840_v28  ;;  %v1836_v11 = vadd.f32 %v1781_v48, %v1675_v57 }
 0x199   : > { %v3514_v59 = vld [vmem:[%s7073_s7 + $0x10] ss:$2 sm:$0xff]  ;;  %v3530_v2 = vld [vmem:[%s7073_s7 + $0x11] ss:$2 sm:$0xff] }
 0x19a   : > { %2830 = vmatmul.mubr.f32.gmra.mxu0 %v7499_v42  ;;  %v3254_v10 = vadd.f32 %v3530_v2, %v3514_v59  ;;  %1873 = vst [vmem:[%s7073_s7 + $0x38] sm:$0xff] %v1857_v55  ;;  %v1646_v40 = vadd.f32 %v6999_v58, %v3842_v22  ;;  %v1856_v7 = vadd.f32 %v7060_v14, %v1836_v11  ;;  %v3843_v21 = vpop.f32.mrf.mxu0  ;;  %v4501_v61 = vpop.f32.mrf.mxu1  ;;  %v7519_v22 = vld [vmem:[#allocation10_spill] sm:$0xff] }
 0x19b   : > { %4733 = vmatmul.mubr.f32.gmra.mxu1 %v517_v33  ;;  %v1839_v35 = vadd.f32 %v4501_v61, %v1678_v15 }
 0x19c   : > { %v3269_v25 = vadd.f32 %v3254_v10, %v3253_v19  ;;  %1872 = vst [vmem:[%s7073_s7 + $0x30] sm:$0xff] %v1856_v7  ;;  %v3844_v4 = vpop.f32.mrf.mxu0  ;;  %v1791_v42 = vpop.f32.mrf.mxu1  ;;  %v1680_v44 = vadd.f32 %v1646_v40, %v1296_v16 }
 0x19d   : > { %v1859_v58 = vadd.f32 %v7060_v14, %v1839_v35  ;;  %v3845_v63 = vadd.f32 %v3844_v4, %v3843_v21  ;;  %v1838_v26 = vadd.f32 %v1791_v42, %v1677_v23 }
 0x19e   : > { %v3277_v27 = vmul.f32 0.25, %v3269_v25  ;;  %v3515_v3 = vld [vmem:[%s7073_s7 + $0x20] ss:$2 sm:$0xff]  ;;  %v3531_v36 = vld [vmem:[%s7073_s7 + $0x21] ss:$2 sm:$0xff] }
 0x19f   : > { %1875 = vst [vmem:[%s7073_s7 + $0x48] sm:$0xff] %v1859_v58  ;;  %v1858_v54 = vadd.f32 %v7060_v14, %v1838_v26  ;;  %v3846_v12 = vpop.f32.mrf.mxu0  ;;  %v4504_v13 = vpop.f32.mrf.mxu1  ;;  %v1651_v41 = vadd.f32 %v3845_v63, %v7031_v49  ;;  %v3255_v56 = vadd.f32 %v3531_v36, %v3515_v3 }
 0x1a0   : > { %3285 = vst [vmem:[%s7151_s14] sm:$0xff] %v3277_v27  ;;  %v1841_v60 = vadd.f32 %v4504_v13, %v1680_v44 }
 0x1a1   : > { %1874 = vst [vmem:[%s7073_s7 + $0x40] sm:$0xff] %v1858_v54  ;;  %v3847_v8 = vpop.f32.mrf.mxu0  ;;  %v1801_v28 = vpop.f32.mrf.mxu1  ;;  %v1681_v31 = vadd.f32 %v1651_v41, %v1301_v38 }
 0x1a2   : > { %v1861_v46 = vadd.f32 %v7060_v14, %v1841_v60  ;;  %v3848_v24 = vadd.f32 %v3847_v8, %v3846_v12  ;;  %v1840_v57 = vadd.f32 %v1801_v28, %v1679_v9 }
 0x1a3   : > { %v3516_v17 = vld [vmem:[%s7073_s7 + $0x30] ss:$2 sm:$0xff]  ;;  %v3532_v34 = vld [vmem:[%s7073_s7 + $0x31] ss:$2 sm:$0xff] }
 0x1a4   : > { %v3256_v47 = vadd.f32 %v3532_v34, %v3516_v17  ;;  %1877 = vst [vmem:[%s7073_s7 + $0x58] sm:$0xff] %v1861_v46  ;;  %v1656_v18 = vadd.f32 %v7018_v53, %v3848_v24  ;;  %v1860_v49 = vadd.f32 %v7060_v14, %v1840_v57  ;;  %v3849_v48 = vpop.f32.mrf.mxu0  ;;  %v4507_v33 = vpop.f32.mrf.mxu1 }
 0x1a6   : > { %v3270_v55 = vadd.f32 %v3256_v47, %v3255_v56  ;;  %1876 = vst [vmem:[%s7073_s7 + $0x50] sm:$0xff] %v1860_v49  ;;  %v1682_v11 = vadd.f32 %v1656_v18, %v7519_v22  ;;  %v3850_v29 = vpop.f32.mrf.mxu0  ;;  %v1811_v50 = vpop.f32.mrf.mxu1 }
 0x1a7   : > { %v3851_v30 = vadd.f32 %v3850_v29, %v3849_v48  ;;  %v1842_v20 = vadd.f32 %v1811_v50, %v1681_v31 }
 0x1a8   : > { %v3278_v62 = vmul.f32 0.25, %v3270_v55  ;;  %v1843_v53 = vadd.f32 %v4507_v33, %v1682_v11  ;;  %v3517_v10 = vld [vmem:[%s7073_s7 + $0x40] ss:$2 sm:$0xff]  ;;  %v3533_v40 = vld [vmem:[%s7073_s7 + $0x41] ss:$2 sm:$0xff] }
 0x1a9   : > { %v1661_v16 = vadd.f32 %v3851_v30, %v7049_v51  ;;  %v1862_v59 = vadd.f32 %v7060_v14, %v1842_v20  ;;  %v3852_v2 = vpop.f32.mrf.mxu0  ;;  %v4510_v15 = vpop.f32.mrf.mxu1  ;;  %v3257_v51 = vadd.f32 %v3533_v40, %v3517_v10 }
 0x1aa   : > { %3286 = vst [vmem:[%s7151_s14 + $0x8] sm:$0xff] %v3278_v62  ;;  %v1863_v19 = vadd.f32 %v7060_v14, %v1843_v53 }
 0x1ab   : > { %1878 = vst [vmem:[%s7073_s7 + $0x60] sm:$0xff] %v1862_v59  ;;  %v3853_v7 = vpop.f32.mrf.mxu0  ;;  %v1683_v21 = vadd.f32 %v1661_v16, %v1311_v6  ;;  %v1821_v61 = vpop.f32.mrf.mxu1 }
 0x1ac   : > { %1879 = vst [vmem:[%s7073_s7 + $0x68] sm:$0xff] %v1863_v19  ;;  %v3854_v35 = vadd.f32 %v3853_v7, %v3852_v2 }
 0x1ad   : > { %v3518_v39 = vld [vmem:[%s7073_s7 + $0x50] ss:$2 sm:$0xff]  ;;  %v3534_v0 = vld [vmem:[%s7073_s7 + $0x51] ss:$2 sm:$0xff]  ;;  %v1844_v23 = vadd.f32 %v1821_v61, %v1683_v21 }
 0x1ae   : > { %v3258_v25 = vadd.f32 %v3534_v0, %v3518_v39  ;;  %v1666_v37 = vadd.f32 %v7039_v45, %v3854_v35  ;;  %v3951_v4 = vpop.f32.mrf.mxu0  ;;  %v4545_v42 = vpop.f32.mrf.mxu1 }
 0x1af   : > { %v1864_v44 = vadd.f32 %v7060_v14, %v1844_v23 }
 0x1b0   : > { %v3271_v58 = vadd.f32 %v3258_v25, %v3257_v51  ;;  %v1684_v63 = vadd.f32 %v1666_v37, %v6884_v5  ;;  %v3952_v26 = vpop.f32.mrf.mxu0  ;;  %v2273_v1 = vpop.f32.mrf.mxu1 }
 0x1b1   : > { %1880 = vst [vmem:[%s7073_s7 + $0x70] sm:$0xff] %v1864_v44  ;;  %v3953_v52 = vadd.f32 %v3952_v26, %v3951_v4 }
 0x1b2   : > { %v3279_v32 = vmul.f32 0.25, %v3271_v58  ;;  %v1845_v27 = vadd.f32 %v4510_v15, %v1684_v63 }
 0x1b3   : > { %v7189_v54 = vadd.f32 %v3953_v52, %v2273_v1  ;;  %v3954_v12 = vpop.f32.mrf.mxu0  ;;  %v4548_v45 = vpop.f32.mrf.mxu1  ;;  %v3519_v46 = vld [vmem:[%s7073_s7 + $0x60] ss:$2 sm:$0xff]  ;;  %v3535_v24 = vld [vmem:[%s7073_s7 + $0x61] ss:$2 sm:$0xff] }
 0x1b4   : > { %3287 = vst [vmem:[%s7151_s14 + $0x10] sm:$0xff] %v3279_v32  ;;  %v1865_v13 = vadd.f32 %v7060_v14, %v1845_v27  ;;  %v3259_v47 = vadd.f32 %v3535_v24, %v3519_v46 }
 0x1b5   : > { %v3955_v60 = vpop.f32.mrf.mxu0  ;;  %v2283_v9 = vpop.f32.mrf.mxu1 }
 0x1b6   : > { %1881 = vst [vmem:[%s7073_s7 + $0x78] sm:$0xff] %v1865_v13  ;;  %v3956_v5 = vadd.f32 %v3955_v60, %v3954_v12 }
 0x1b8   : > { %v7194_v3 = vadd.f32 %v4545_v42, %v3956_v5  ;;  %v3957_v36 = vpop.f32.mrf.mxu0  ;;  %v4551_v41 = vpop.f32.mrf.mxu1 }
 0x1ba   : > { %v3958_v8 = vpop.f32.mrf.mxu0  ;;  %v2293_v28 = vpop.f32.mrf.mxu1 }
 0x1bb   : > { %v3959_v57 = vadd.f32 %v3958_v8, %v3957_v36 }
 0x1bd   : > { %v3520_v43 = vld [vmem:[%s7073_s7 + $0x70] ss:$2 sm:$0xff]  ;;  %v3536_v38 = vld [vmem:[%s7073_s7 + $0x71] ss:$2 sm:$0xff]  ;;  %v2284_v17 = vadd.f32 %v3959_v57, %v2283_v9  ;;  %v3960_v34 = vpop.f32.mrf.mxu0  ;;  %v4554_v56 = vpop.f32.mrf.mxu1 }
 0x1be   : > { %v3260_v18 = vadd.f32 %v3536_v38, %v3520_v43 }
 0x1bf   : > { %v3961_v49 = vpop.f32.mrf.mxu0  ;;  %v2303_v48 = vpop.f32.mrf.mxu1 }
 0x1c0   : > { %v3272_v33 = vadd.f32 %v3260_v18, %v3259_v47  ;;  %v3962_v31 = vadd.f32 %v3961_v49, %v3960_v34 }
 0x1c2   : > { %v3280_v55 = vmul.f32 0.25, %v3272_v33  ;;  %v2289_v22 = vadd.f32 %v4548_v45, %v3962_v31  ;;  %v3963_v11 = vpop.f32.mrf.mxu0  ;;  %v4557_v29 = vpop.f32.mrf.mxu1 }
 0x1c4   : > { %3288 = vst [vmem:[%s7151_s14 + $0x18] sm:$0xff] %v3280_v55  ;;  %v3964_v50 = vpop.f32.mrf.mxu0  ;;  %v2313_v30 = vpop.f32.mrf.mxu1 }
 0x1c5   : > { %v3965_v20 = vadd.f32 %v3964_v50, %v3963_v11 }
 0x1c7   : > { %v2294_v62 = vadd.f32 %v3965_v20, %v2293_v28  ;;  %v3966_v53 = vpop.f32.mrf.mxu0  ;;  %v4560_v6 = vpop.f32.mrf.mxu1 }
 0x1c9   : > { %v3967_v16 = vpop.f32.mrf.mxu0  ;;  %v2323_v59 = vpop.f32.mrf.mxu1 }
 0x1ca   : > { %v3968_v2 = vadd.f32 %v3967_v16, %v3966_v53 }
 0x1cc   : > { %v2299_v15 = vadd.f32 %v4551_v41, %v3968_v2  ;;  %v3969_v19 = vpop.f32.mrf.mxu0  ;;  %v4563_v10 = vpop.f32.mrf.mxu1 }
 0x1ce   : > { %v3970_v40 = vpop.f32.mrf.mxu0  ;;  %v2333_v7 = vpop.f32.mrf.mxu1 }
 0x1cf   : > { %v3971_v21 = vadd.f32 %v3970_v40, %v3969_v19 }
 0x1d1   : > { %v7201_v61 = vadd.f32 %v3971_v21, %v2303_v48  ;;  %v3972_v35 = vpop.f32.mrf.mxu0  ;;  %v7203_v39 = vpop.f32.mrf.mxu1 }
 0x1d3   : > { %v3973_v0 = vpop.f32.mrf.mxu0  ;;  %v2343_v23 = vpop.f32.mrf.mxu1 }
 0x1d4   : > { %v3974_v51 = vadd.f32 %v3973_v0, %v3972_v35 }
 0x1d6   : > { %v7205_v25 = vadd.f32 %v4554_v56, %v3974_v51  ;;  %v3975_v37 = vpop.f32.mrf.mxu0  ;;  %v4063_v4 = vpop.f32.mrf.mxu1 }
 0x1d8   : > { %v3976_v42 = vpop.f32.mrf.mxu0  ;;  %v4064_v44 = vpop.f32.mrf.mxu1 }
 0x1d9   : > { %v3977_v58 = vadd.f32 %v3976_v42, %v3975_v37  ;;  %v4065_v63 = vadd.f32 %v4064_v44, %v4063_v4 }
 0x1da   : > { %v3978_v26 = vpop.f32.mrf.mxu0  ;;  %v4066_v1 = vpop.f32.mrf.mxu1 }
 0x1db   : > { %v7207_v52 = vadd.f32 %v3977_v58, %v2313_v30  ;;  %v7210_v32 = vadd.f32 %v4065_v63, %v7189_v54 }
 0x1dc   : > { %v3979_v27 = vpop.f32.mrf.mxu0  ;;  %v4067_v12 = vpop.f32.mrf.mxu1 }
 0x1dd   : > { %v3980_v45 = vadd.f32 %v3979_v27, %v3978_v26  ;;  %v4068_v13 = vadd.f32 %v4067_v12, %v4066_v1 }
 0x1de   : > { %v3981_v60 = vpop.f32.mrf.mxu0  ;;  %v4069_v9 = vpop.f32.mrf.mxu1 }
 0x1df   : > { %v2319_v5 = vadd.f32 %v4557_v29, %v3980_v45  ;;  %v7213_v36 = vadd.f32 %v4068_v13, %v7194_v3 }
 0x1e0   : > { %v3982_v41 = vpop.f32.mrf.mxu0  ;;  %v4070_v8 = vpop.f32.mrf.mxu1 }
 0x1e1   : > { %v3983_v28 = vadd.f32 %v3982_v41, %v3981_v60  ;;  %v4071_v46 = vadd.f32 %v4070_v8, %v4069_v9 }
 0x1e2   : > { %v3984_v24 = vpop.f32.mrf.mxu0  ;;  %v4072_v57 = vpop.f32.mrf.mxu1 }
 0x1e3   : > { %v2324_v43 = vadd.f32 %v3983_v28, %v2323_v59  ;;  %v7215_v38 = vadd.f32 %v4071_v46, %v2284_v17 }
 0x1e4   : > { %v3985_v54 = vpop.f32.mrf.mxu0  ;;  %v4073_v34 = vpop.f32.mrf.mxu1 }
 0x1e5   : > { %v3986_v56 = vadd.f32 %v3985_v54, %v3984_v24  ;;  %v4074_v47 = vadd.f32 %v4073_v34, %v4072_v57 }
 0x1e6   : > { %v3987_v18 = vpop.f32.mrf.mxu0  ;;  %v4075_v49 = vpop.f32.mrf.mxu1 }
 0x1e7   : > { %v2329_v48 = vadd.f32 %v4560_v6, %v3986_v56  ;;  %v7217_v33 = vadd.f32 %v4074_v47, %v2289_v22 }
 0x1e8   : > { %v3988_v3 = vpop.f32.mrf.mxu0  ;;  %v4076_v31 = vpop.f32.mrf.mxu1 }
 0x1e9   : > { %v3989_v55 = vadd.f32 %v3988_v3, %v3987_v18  ;;  %v4077_v11 = vadd.f32 %v4076_v31, %v4075_v49 }
 0x1ea   : > { %v3990_v29 = vpop.f32.mrf.mxu0  ;;  %v4078_v50 = vpop.f32.mrf.mxu1 }
 0x1eb   : > { %v2334_v30 = vadd.f32 %v3989_v55, %v2333_v7  ;;  %v7219_v20 = vadd.f32 %v4077_v11, %v2294_v62 }
 0x1ec   : > { %v3991_v17 = vpop.f32.mrf.mxu0  ;;  %v4079_v53 = vpop.f32.mrf.mxu1 }
 0x1ed   : > { %v3992_v16 = vadd.f32 %v3991_v17, %v3990_v29  ;;  %v4080_v59 = vadd.f32 %v4079_v53, %v4078_v50 }
 0x1ee   : > { %v3993_v2 = vpop.f32.mrf.mxu0  ;;  %v4081_v19 = vpop.f32.mrf.mxu1 }
 0x1ef   : > { %v2339_v40 = vadd.f32 %v4563_v10, %v3992_v16  ;;  %v7221_v21 = vadd.f32 %v4080_v59, %v2299_v15 }
 0x1f0   : > { %v3994_v22 = vpop.f32.mrf.mxu0  ;;  %v4082_v6 = vpop.f32.mrf.mxu1 }
 0x1f1   : > { %v3995_v35 = vadd.f32 %v3994_v22, %v3993_v2  ;;  %v4083_v0 = vadd.f32 %v4082_v6, %v4081_v19 }
 0x1f2   : > { %v3996_v51 = vpop.f32.mrf.mxu0  ;;  %v4084_v37 = vpop.f32.mrf.mxu1 }
 0x1f3   : > { %v7223_v4 = vadd.f32 %v3995_v35, %v2343_v23  ;;  %v7226_v62 = vadd.f32 %v4083_v0, %v7201_v61 }
 0x1f4   : > { %v3997_v7 = vpop.f32.mrf.mxu0  ;;  %v4085_v42 = vpop.f32.mrf.mxu1 }
 0x1f5   : > { %7520 = vst [vmem:[#allocation11_spill] sm:$0xff] %v7223_v4  ;;  %v3998_v44 = vadd.f32 %v3997_v7, %v3996_v51  ;;  %v4086_v58 = vadd.f32 %v4085_v42, %v4084_v37 }
 0x1f6   : > { %v4087_v63 = vpop.f32.mrf.mxu1  ;;  %v7228_v26 = vpop.f32.mrf.mxu0 }
 0x1f7   : > { %v2349_v15 = vadd.f32 %v7203_v39, %v3998_v44  ;;  %v7232_v10 = vadd.f32 %v4086_v58, %v7205_v25  ;;  %v2569_v4 = vadd.f32 %v7228_v26, %v7213_v36 }
 0x1f8   : > { %v4088_v1 = vpop.f32.mrf.mxu1  ;;  %v7234_v27 = vpop.f32.mrf.mxu0 }
 0x1f9   : > { %v4089_v23 = vadd.f32 %v4088_v1, %v4087_v63 }
 0x1fa   : > { %v4090_v12 = vpop.f32.mrf.mxu1  ;;  %v7236_v45 = vpop.f32.mrf.mxu0 }
 0x1fb   : > { %v7239_v61 = vadd.f32 %v4089_v23, %v7207_v52 }
 0x1fc   : > { %v4091_v13 = vpop.f32.mrf.mxu1  ;;  %v7241_v60 = vpop.f32.mrf.mxu0 }
 0x1fd   : > { %v4092_v9 = vadd.f32 %v4091_v13, %v4090_v12 }
 0x1ff   : > { %v4093_v41 = vpop.f32.mrf.mxu1  ;;  %v7243_v8 = vpop.f32.mrf.mxu0  ;;  %v7245_v39 = vadd.f32 %v4092_v9, %v2319_v5 }
 0x201   : > { %v4094_v25 = vpop.f32.mrf.mxu1  ;;  %v7247_v28 = vpop.f32.mrf.mxu0 }
 0x202   : > { %v4095_v46 = vadd.f32 %v4094_v25, %v4093_v41 }
 0x204   : > { %v4096_v24 = vpop.f32.mrf.mxu1  ;;  %v7249_v57 = vpop.f32.mrf.mxu0  ;;  %v7251_v54 = vadd.f32 %v4095_v46, %v2324_v43 }
 0x206   : > { %v4097_v52 = vpop.f32.mrf.mxu1  ;;  %v7253_v34 = vpop.f32.mrf.mxu0 }
 0x207   : > { %v4098_v56 = vadd.f32 %v4097_v52, %v4096_v24 }
 0x209   : > { %v4099_v47 = vpop.f32.mrf.mxu1  ;;  %v7255_v18 = vpop.f32.mrf.mxu0  ;;  %v7257_v49 = vadd.f32 %v4098_v56, %v2329_v48 }
 0x20b   : > { %v4100_v5 = vpop.f32.mrf.mxu1  ;;  %v7259_v3 = vpop.f32.mrf.mxu0 }
 0x20c   : > { %v4101_v31 = vadd.f32 %v4100_v5, %v4099_v47 }
 0x20e   : > { %v4102_v55 = vpop.f32.mrf.mxu1  ;;  %v7261_v11 = vpop.f32.mrf.mxu0  ;;  %v7263_v29 = vadd.f32 %v4101_v31, %v2334_v30 }
 0x210   : > { %7521 = vst [vmem:[#allocation12_spill] sm:$0xff] %v7263_v29  ;;  %v4103_v43 = vpop.f32.mrf.mxu1  ;;  %v7265_v50 = vpop.f32.mrf.mxu0 }
 0x211   : > { %v4104_v17 = vadd.f32 %v4103_v43, %v4102_v55 }
 0x213   : > { %v7267_v53 = vpop.f32.mrf.mxu1  ;;  %v2484_v16 = vadd.f32 %v4104_v17, %v2339_v40  ;;  %v4619_v59 = vpop.f32.mrf.mxu0 }
 0x214   : > { %7522 = vst [vmem:[#allocation22_spill] sm:$0xff] %v7267_v53 }
 0x215   : > { %v7269_v2 = vadd.f32 %v4619_v59, %v2484_v16  ;;  %v7271_v48 = vpop.f32.mrf.mxu1  ;;  %v7273_v19 = vpop.f32.mrf.mxu0 }
 0x216   : > { %7524 = vst [vmem:[#allocation16_spill] sm:$0xff] %v7271_v48  ;;  %7525 = vst [vmem:[#allocation18_spill] sm:$0xff] %v7273_v19 }
 0x217   : > { %7523 = vst [vmem:[#allocation15_spill] sm:$0xff] %v7269_v2 }
 0x218   : > { %v4108_v22 = vpop.f32.mrf.mxu1  ;;  %v4622_v6 = vpop.f32.mrf.mxu0 }
 0x21a   : > { %v4109_v35 = vpop.f32.mrf.mxu1  ;;  %v7275_v0 = vpop.f32.mrf.mxu0 }
 0x21b   : > { %7526 = vst [vmem:[#allocation20_spill] sm:$0xff] %v7275_v0  ;;  %v4110_v30 = vadd.f32 %v4109_v35, %v4108_v22 }
 0x21d   : > { %v2494_v51 = vadd.f32 %v4110_v30, %v2349_v15 }
 0x21e   : > { %v4175_v37 = vpop.f32.mrf.mxu0  ;;  %v4657_v7 = vpop.f32.mrf.mxu1 }
 0x21f   : > { %v7277_v42 = vadd.f32 %v4622_v6, %v2494_v51 }
 0x220   : > { %v4176_v44 = vpop.f32.mrf.mxu0  ;;  %v2901_v40 = vpop.f32.mrf.mxu1 }
 0x221   : > { %7527 = vst [vmem:[#allocation19_spill] sm:$0xff] %v7277_v42  ;;  %v4177_v6 = vadd.f32 %v4176_v44, %v4175_v37  ;;  %v2564_v37 = vadd.f32 %v7234_v27, %v7210_v32 }
 0x222   : > { %v4178_v58 = vpop.f32.mrf.mxu0 }
 0x223   : > { %v4660_v63 = vpop.f32.mrf.mxu1  ;;  %v2902_v19 = vadd.f32 %v4177_v6, %v2901_v40 }
 0x224   : > { %v4179_v1 = vpop.f32.mrf.mxu0 }
 0x225   : > { %v2911_v23 = vpop.f32.mrf.mxu1  ;;  %v4180_v16 = vadd.f32 %v4179_v1, %v4178_v58  ;;  %v2980_v40 = vadd.f32 %v2902_v19, %v2564_v37 }
 0x226   : > { %v4181_v12 = vpop.f32.mrf.mxu0 }
 0x227   : > { %v4663_v13 = vpop.f32.mrf.mxu1  ;;  %v2907_v51 = vadd.f32 %v4657_v7, %v4180_v16 }
 0x228   : > { %v4182_v9 = vpop.f32.mrf.mxu0 }
 0x229   : > { %v2921_v41 = vpop.f32.mrf.mxu1  ;;  %v4183_v29 = vadd.f32 %v4182_v9, %v4181_v12  ;;  %v2574_v12 = vadd.f32 %v7241_v60, %v7215_v38 }
 0x22a   : > { %v4184_v25 = vpop.f32.mrf.mxu0 }
 0x22b   : > { %v4666_v46 = vpop.f32.mrf.mxu1  ;;  %v2912_v16 = vadd.f32 %v4183_v29, %v2911_v23 }
 0x22c   : > { %v4185_v24 = vpop.f32.mrf.mxu0 }
 0x22d   : > { %v7279_v52 = vpop.f32.mrf.mxu1  ;;  %v4186_v42 = vadd.f32 %v4185_v24, %v4184_v25  ;;  %v2579_v24 = vadd.f32 %v7236_v45, %v7217_v33  ;;  %v2589_v33 = vadd.f32 %v7243_v8, %v7221_v21  ;;  %v2982_v60 = vadd.f32 %v2912_v16, %v2574_v12 }
 0x22e   : > { %v4187_v15 = vpop.f32.mrf.mxu0  ;;  %v2604_v12 = vadd.f32 %v7259_v3, %v7239_v61 }
 0x22f   : > { %v7281_v56 = vpop.f32.mrf.mxu1  ;;  %v2917_v44 = vadd.f32 %v4660_v63, %v4186_v42 }
 0x230   : > { %v4188_v47 = vpop.f32.mrf.mxu0 }
 0x231   : > { %v7283_v5 = vpop.f32.mrf.mxu1  ;;  %v4189_v7 = vadd.f32 %v4188_v47, %v4187_v15  ;;  %v2983_v42 = vadd.f32 %v2917_v44, %v2579_v24  ;;  %v2599_v47 = vadd.f32 %v7249_v57, %v7232_v10 }
 0x232   : > { %v4190_v31 = vpop.f32.mrf.mxu0 }
 0x233   : > { %v7285_v55 = vpop.f32.mrf.mxu1  ;;  %v2922_v45 = vadd.f32 %v4189_v7, %v2921_v41 }
 0x234   : > { %v4191_v43 = vpop.f32.mrf.mxu0 }
 0x235   : > { %v7287_v17 = vpop.f32.mrf.mxu1  ;;  %v4192_v53 = vadd.f32 %v4191_v43, %v4190_v31 }
 0x236   : > { %v4193_v59 = vpop.f32.mrf.mxu0 }
 0x237   : > { %v7289_v22 = vpop.f32.mrf.mxu1  ;;  %v2927_v9 = vadd.f32 %v4663_v13, %v4192_v53  ;;  %v2584_v53 = vadd.f32 %v7247_v28, %v7219_v20 }
 0x238   : > { %7528 = vst [vmem:[#allocation24_spill] sm:$0xff] %v7289_v22  ;;  %v4194_v35 = vpop.f32.mrf.mxu0  ;;  %v2981_v22 = vadd.f32 %v2907_v51, %v2569_v4  ;;  %v2594_v51 = vadd.f32 %v7253_v34, %v7226_v62 }
 0x239   : > { %v7291_v30 = vpop.f32.mrf.mxu1  ;;  %v4195_v63 = vadd.f32 %v4194_v35, %v4193_v59 }
 0x23a   : > { %v4196_v0 = vpop.f32.mrf.mxu0 }
 0x23b   : > { %v7293_v2 = vpop.f32.mrf.mxu1  ;;  %v2932_v6 = vadd.f32 %v4195_v63, %v7279_v52 }
 0x23c   : > { %v4197_v48 = vpop.f32.mrf.mxu0 }
 0x23d   : > { %v7297_v58 = vpop.f32.mrf.mxu1  ;;  %v4198_v43 = vadd.f32 %v4197_v48, %v4196_v0  ;;  %v2985_v0 = vadd.f32 %v2927_v9, %v2589_v33 }
 0x23e   : > { %v4199_v1 = vpop.f32.mrf.mxu0 }
 0x23f   : > { %v4713_v25 = vpop.f32.mrf.mxu1  ;;  %v2937_v13 = vadd.f32 %v4666_v46, %v4198_v43 }
 0x240   : > { %v3142_v36 = vadd.f32 %v4713_v25, %v2981_v22  ;;  %v4200_v26 = vpop.f32.mrf.mxu0  ;;  %v2984_v22 = vadd.f32 %v2922_v45, %v2584_v53 }
 0x241   : > { %v3062_v31 = vpop.f32.mrf.mxu1  ;;  %v4201_v35 = vadd.f32 %v4200_v26, %v4199_v1  ;;  %v2987_v52 = vadd.f32 %v2937_v13, %v2599_v47  ;;  %v2609_v1 = vadd.f32 %v7255_v18, %v7245_v39 }
 0x242   : > { %v3158_v32 = vadd.f32 %v3142_v36, %v7060_v14  ;;  %v3141_v27 = vadd.f32 %v3062_v31, %v2980_v40  ;;  %v4202_v4 = vpop.f32.mrf.mxu0  ;;  %v2986_v36 = vadd.f32 %v2932_v6, %v2594_v51  ;;  %v2619_v31 = vadd.f32 %v7261_v11, %v7257_v49  ;;  %v7531_v6 = vld [vmem:[#allocation12_spill] sm:$0xff] }
 0x243   : > { %v4716_v29 = vpop.f32.mrf.mxu1  ;;  %v2942_v16 = vadd.f32 %v4201_v35, %v7283_v5  ;;  %v7532_v35 = vld [vmem:[#allocation18_spill] sm:$0xff] }
 0x244   : > { %3499 = vst [vmem:[%s7073_s7 + $0x88] sm:$0xff] %v3158_v32  ;;  %v3157_v19 = vadd.f32 %v3141_v27, %v7060_v14  ;;  %v3144_v23 = vadd.f32 %v4716_v29, %v2983_v42  ;;  %v4203_v38 = vpop.f32.mrf.mxu0  ;;  %v2614_v29 = vadd.f32 %v7265_v50, %v7251_v54 }
 0x245   : > { %v3072_v48 = vpop.f32.mrf.mxu1  ;;  %v4204_v21 = vadd.f32 %v4203_v38, %v4202_v4  ;;  %v2988_v45 = vadd.f32 %v2942_v16, %v2604_v12 }
 0x246   : > { %3498 = vst [vmem:[%s7073_s7 + $0x80] sm:$0xff] %v3157_v19  ;;  %v3160_v15 = vadd.f32 %v3144_v23, %v7060_v14  ;;  %v3143_v8 = vadd.f32 %v3072_v48, %v2982_v60  ;;  %v4205_v41 = vpop.f32.mrf.mxu0  ;;  %v7529_v48 = vld [vmem:[#allocation22_spill] sm:$0xff] }
 0x247   : > { %v4719_v59 = vpop.f32.mrf.mxu1  ;;  %v2947_v44 = vadd.f32 %v7281_v56, %v4204_v21 }
 0x248   : > { %3501 = vst [vmem:[%s7073_s7 + $0x98] sm:$0xff] %v3160_v15  ;;  %v3159_v20 = vadd.f32 %v3143_v8, %v7060_v14  ;;  %v3146_v28 = vadd.f32 %v4719_v59, %v2985_v0  ;;  %v4206_v46 = vpop.f32.mrf.mxu0  ;;  %v7530_v0 = vld [vmem:[#allocation16_spill] sm:$0xff] }
 0x249   : > { %v3082_v37 = vpop.f32.mrf.mxu1  ;;  %v4207_v25 = vadd.f32 %v4206_v46, %v4205_v41  ;;  %v2989_v9 = vadd.f32 %v2947_v44, %v2609_v1  ;;  %v4107_v13 = vadd.f32 %v7530_v0, %v7529_v48 }
 0x24a   : > { %3500 = vst [vmem:[%s7073_s7 + $0x90] sm:$0xff] %v3159_v20  ;;  %v3162_v10 = vadd.f32 %v3146_v28, %v7060_v14  ;;  %v3145_v57 = vadd.f32 %v3082_v37, %v2984_v22  ;;  %v4208_v7 = vpop.f32.mrf.mxu0  ;;  %v2624_v20 = vadd.f32 %v7532_v35, %v7531_v6 }
 0x24b   : > { %v4722_v24 = vpop.f32.mrf.mxu1  ;;  %v2952_v27 = vadd.f32 %v4207_v25, %v7287_v17 }
 0x24c   : > { %3503 = vst [vmem:[%s7073_s7 + $0xa8] sm:$0xff] %v3162_v10  ;;  %v3161_v62 = vadd.f32 %v3145_v57, %v7060_v14  ;;  %v3148_v34 = vadd.f32 %v4722_v24, %v2987_v52  ;;  %v4209_v56 = vpop.f32.mrf.mxu0 }
 0x24d   : > { %v4210_v26 = vadd.f32 %v4209_v56, %v4208_v7  ;;  %v3092_v40 = vpop.f32.mrf.mxu1  ;;  %v3521_v43 = vld [vmem:[%s7073_s7 + $0x80] ss:$2 sm:$0xff]  ;;  %v3537_v32 = vld [vmem:[%s7073_s7 + $0x81] ss:$2 sm:$0xff]  ;;  %v2990_v21 = vadd.f32 %v2952_v27, %v2614_v29  ;;  %v7534_v7 = vld [vmem:[#allocation24_spill] sm:$0xff] }
 0x24e   : > { %3502 = vst [vmem:[%s7073_s7 + $0xa0] sm:$0xff] %v3161_v62  ;;  %v3164_v39 = vadd.f32 %v3148_v34, %v7060_v14  ;;  %v3147_v18 = vadd.f32 %v3092_v40, %v2986_v36  ;;  %v4211_v5 = vpop.f32.mrf.mxu0  ;;  %v3261_v17 = vadd.f32 %v3537_v32, %v3521_v43  ;;  %v7535_v56 = vld [vmem:[#allocation15_spill] sm:$0xff] }
 0x24f   : > { %v2957_v4 = vadd.f32 %v7285_v55, %v4210_v26  ;;  %v4725_v42 = vpop.f32.mrf.mxu1 }
 0x250   : > { %3505 = vst [vmem:[%s7073_s7 + $0xb8] sm:$0xff] %v3164_v39  ;;  %v3163_v61 = vadd.f32 %v3147_v18, %v7060_v14  ;;  %v3150_v3 = vadd.f32 %v4725_v42, %v2989_v9  ;;  %v4212_v33 = vpop.f32.mrf.mxu0  ;;  %v7536_v9 = vld [vmem:[#allocation20_spill] sm:$0xff] }
 0x251   : > { %v3522_v63 = vld [vmem:[%s7073_s7 + $0x90] ss:$2 sm:$0xff]  ;;  %v3538_v49 = vld [vmem:[%s7073_s7 + $0x91] ss:$2 sm:$0xff]  ;;  %v4213_v11 = vadd.f32 %v4212_v33, %v4211_v5  ;;  %v3102_v19 = vpop.f32.mrf.mxu1  ;;  %v2991_v23 = vadd.f32 %v2957_v4, %v2619_v31 }
 0x252   : > { %v3262_v38 = vadd.f32 %v3538_v49, %v3522_v63  ;;  %3504 = vst [vmem:[%s7073_s7 + $0xb0] sm:$0xff] %v3163_v61  ;;  %v3166_v55 = vadd.f32 %v3150_v3, %v7060_v14  ;;  %v3149_v60 = vadd.f32 %v3102_v19, %v2988_v45  ;;  %v4214_v53 = vpop.f32.mrf.mxu0 }
 0x253   : > { %v4728_v15 = vpop.f32.mrf.mxu1  ;;  %v2962_v50 = vadd.f32 %v4213_v11, %v7291_v30  ;;  %v7533_v30 = vld [vmem:[#allocation11_spill] sm:$0xff] }
 0x254   : > { %v3273_v54 = vadd.f32 %v3262_v38, %v3261_v17  ;;  %3507 = vst [vmem:[%s7073_s7 + $0xc8] sm:$0xff] %v3166_v55  ;;  %v3165_v8 = vadd.f32 %v3149_v60, %v7060_v14  ;;  %v3152_v41 = vadd.f32 %v4728_v15, %v2991_v23  ;;  %v4215_v47 = vpop.f32.mrf.mxu0  ;;  %v2489_v44 = vadd.f32 %v4107_v13, %v7533_v30  ;;  %v7537_v38 = vld [vmem:[#allocation19_spill] sm:$0xff] }
 0x255   : > { %v4216_v59 = vadd.f32 %v4215_v47, %v4214_v53  ;;  %v3112_v22 = vpop.f32.mrf.mxu1  ;;  %v3523_v10 = vld [vmem:[%s7073_s7 + $0xa0] ss:$2 sm:$0xff]  ;;  %v3539_v57 = vld [vmem:[%s7073_s7 + $0xa1] ss:$2 sm:$0xff]  ;;  %v2992_v16 = vadd.f32 %v2962_v50, %v2624_v20 }
 0x256   : > { %v3281_v28 = vmul.f32 0.25, %v3273_v54  ;;  %3506 = vst [vmem:[%s7073_s7 + $0xc0] sm:$0xff] %v3165_v8  ;;  %v3168_v46 = vadd.f32 %v3152_v41, %v7060_v14  ;;  %v3151_v51 = vadd.f32 %v3112_v22, %v2990_v21  ;;  %v4217_v37 = vpop.f32.mrf.mxu0  ;;  %v3263_v12 = vadd.f32 %v3539_v57, %v3523_v10 }
 0x257   : > { %v2967_v52 = vadd.f32 %v7534_v7, %v4216_v59  ;;  %v4731_v1 = vpop.f32.mrf.mxu1  ;;  %v2634_v31 = vadd.f32 %v7536_v9, %v2489_v44 }
 0x258   : > { %3289 = vst [vmem:[%s7151_s14 + $0x20] sm:$0xff] %v3281_v28  ;;  %3509 = vst [vmem:[%s7073_s7 + $0xd8] sm:$0xff] %v3168_v46  ;;  %v3167_v25 = vadd.f32 %v3151_v51, %v7060_v14  ;;  %v4218_v24 = vpop.f32.mrf.mxu0 }
 0x259   : > { %v3524_v62 = vld [vmem:[%s7073_s7 + $0xb0] ss:$2 sm:$0xff]  ;;  %v3540_v34 = vld [vmem:[%s7073_s7 + $0xb1] ss:$2 sm:$0xff]  ;;  %v2993_v36 = vadd.f32 %v2967_v52, %v7535_v56  ;;  %v4219_v26 = vadd.f32 %v4218_v24, %v4217_v37  ;;  %v3122_v40 = vpop.f32.mrf.mxu1 }
 0x25a   : > { %v3264_v39 = vadd.f32 %v3540_v34, %v3524_v62  ;;  %3508 = vst [vmem:[%s7073_s7 + $0xd0] sm:$0xff] %v3167_v25  ;;  %v3153_v18 = vadd.f32 %v3122_v40, %v2992_v16  ;;  %v4220_v5 = vpop.f32.mrf.mxu0 }
 0x25b   : > { %v3154_v43 = vadd.f32 %v4731_v1, %v2993_v36  ;;  %v2972_v32 = vadd.f32 %v4219_v26, %v7297_v58  ;;  %v4734_v27 = vpop.f32.mrf.mxu1 }
 0x25c   : > { %v3274_v4 = vadd.f32 %v3264_v39, %v3263_v12  ;;  %v3169_v42 = vadd.f32 %v3153_v18, %v7060_v14  ;;  %v4221_v61 = vpop.f32.mrf.mxu0 }
 0x25d   : > { %v3170_v3 = vadd.f32 %v3154_v43, %v7060_v14  ;;  %v4222_v33 = vadd.f32 %v4221_v61, %v4220_v5  ;;  %v2994_v45 = vadd.f32 %v2972_v32, %v2634_v31  ;;  %v3132_v29 = vpop.f32.mrf.mxu1  ;;  %v3525_v49 = vld [vmem:[%s7073_s7 + $0xc0] ss:$2 sm:$0xff]  ;;  %v3541_v11 = vld [vmem:[%s7073_s7 + $0xc1] ss:$2 sm:$0xff] }
 0x25e   : > { %v3282_v63 = vmul.f32 0.25, %v3274_v4  ;;  %3510 = vst [vmem:[%s7073_s7 + $0xe0] sm:$0xff] %v3169_v42  ;;  %v3265_v53 = vadd.f32 %v3541_v11, %v3525_v49 }
 0x25f   : > { %3511 = vst [vmem:[%s7073_s7 + $0xe8] sm:$0xff] %v3170_v3  ;;  %v2977_v58 = vadd.f32 %v7293_v2, %v4222_v33  ;;  %v3155_v19 = vadd.f32 %v3132_v29, %v2994_v45 }
 0x260   : > { %3290 = vst [vmem:[%s7151_s14 + $0x28] sm:$0xff] %v3282_v63 }
 0x261   : > { %v3526_v23 = vld [vmem:[%s7073_s7 + $0xd0] ss:$2 sm:$0xff]  ;;  %v3542_v17 = vld [vmem:[%s7073_s7 + $0xd1] ss:$2 sm:$0xff]  ;;  %v2995_v55 = vadd.f32 %v2977_v58, %v7537_v38  ;;  %v3171_v60 = vadd.f32 %v3155_v19, %v7060_v14 }
 0x262   : > { %v3266_v48 = vadd.f32 %v3542_v17, %v3526_v23 }
 0x263   : > { %v3156_v0 = vadd.f32 %v4734_v27, %v2995_v55  ;;  %3512 = vst [vmem:[%s7073_s7 + $0xf0] sm:$0xff] %v3171_v60 }
 0x264   : > { %v3275_v13 = vadd.f32 %v3266_v48, %v3265_v53 }
 0x265   : > { %v3172_v2 = vadd.f32 %v3156_v0, %v7060_v14 }
 0x266   : > { %v3283_v15 = vmul.f32 0.25, %v3275_v13  ;;  %v3527_v21 = vld [vmem:[%s7073_s7 + $0xe0] ss:$2 sm:$0xff]  ;;  %v3543_v54 = vld [vmem:[%s7073_s7 + $0xe1] ss:$2 sm:$0xff] }
 0x267   : > { %3513 = vst [vmem:[%s7073_s7 + $0xf8] sm:$0xff] %v3172_v2  ;;  %v3267_v41 = vadd.f32 %v3543_v54, %v3527_v21 }
 0x268   : > { %3291 = vst [vmem:[%s7151_s14 + $0x30] sm:$0xff] %v3283_v15 }
 0x26e   : > { %v3528_v50 = vld [vmem:[%s7073_s7 + $0xf0] ss:$2 sm:$0xff]  ;;  %v3544_v8 = vld [vmem:[%s7073_s7 + $0xf1] ss:$2 sm:$0xff] }
 0x26f   : > { %v3268_v47 = vadd.f32 %v3544_v8, %v3528_v50 }
 0x271   : > { %v3276_v59 = vadd.f32 %v3268_v47, %v3267_v41 }
 0x273   : > { %v3284_v22 = vmul.f32 0.25, %v3276_v59 }
 0x275   : > { %3292 = vst [vmem:[%s7151_s14 + $0x38] sm:$0xff] %v3284_v22 }
 0x276 PF: > { %s17_s21 = sadd.s32 1, %s4767_s21  }
 0x277   : > { %p14_p4 = scmp.ge.s32.totalorder %s17_s21, 4  }
 0x279   :  { %16 = sbr.rel (!%p14_p4) target bundleno = 1 (0x1), region = 117 }

</bundles_post_ra>
